<compile_context>
chip_gen: v5e
topology: v5e:2x2
jax: 0.10.0
libtpu: 0.0.40
codegen_flags: <defaults>
</compile_context>

<pallas_src>
import jax
import jax.numpy as jnp
from jax.experimental import pallas as pl

SPLIT_INDEX = 8          # number of transformer layers (first half of model)
V = 128                  # vocab size
D = 128                  # hidden size
H = 4                    # attention heads
KV = 2                   # key/value heads (GQA)
HD = D // H              # head dim = 32
REP = H // KV            # query heads per kv head = 2
KVD = KV * HD            # total kv width = 64
F = 256                  # MLP intermediate size
B = 2                    # batch
S = 8                    # sequence length
BS = B * S               # folded batch*seq rows = 16
EPS = 1e-5               # rms_norm_eps
ROPE_THETA = 10000.0
NEG_INF = -1e30


# ---------------------------------------------------------------------------
# Fused kernel: all 8 decoder layers in one invocation; activation stays in
# registers/VMEM the whole time, weights are whole resident VMEM blocks.
# ---------------------------------------------------------------------------
def _rmsnorm(x, w):
    var = jnp.mean(x * x, axis=-1, keepdims=True)
    return x * jax.lax.rsqrt(var + EPS) * w


def fused_kernel(x_ref, cos_ref, sin_ref, bias_ref,
                 ln1_ref, wqkv_ref, wo_ref, ln2_ref, wgu_ref, wd_ref,
                 o_ref):
    x = x_ref[...]                       # (BS, D) f32 token embeddings
    cos_q = cos_ref[...]                 # (BS, D)   tiled over batch & heads
    sin_q = sin_ref[...]
    cos_k = cos_q[:, :KVD]               # (BS, KVD) same table, kv heads only
    sin_k = sin_q[:, :KVD]
    bias = bias_ref[...]                 # (REP*BS, BS) additive causal mask

    for l in range(SPLIT_INDEX):         # static unroll; static ref indices
        # ---------------- attention block ----------------
        h = _rmsnorm(x, ln1_ref[l])
        # Fused projection: [Wq | Wq_rot | Wk | Wk_rot | Wv] -> (BS, 2D+3*KVD)
        proj = jnp.dot(h.astype(jnp.bfloat16), wqkv_ref[l],
                       preferred_element_type=jnp.float32)
        q, q_rot = proj[:, 0:D], proj[:, D:2 * D]
        k = proj[:, 2 * D:2 * D + KVD]
        k_rot = proj[:, 2 * D + KVD:2 * D + 2 * KVD]
        v = proj[:, 2 * D + 2 * KVD:2 * D + 3 * KVD]

        # RoPE: rotate_half folded into *_rot columns, 1/sqrt(HD) folded into
        # Wq at init -> pure fused-multiply-adds here.
        q_r = q * cos_q + q_rot * sin_q                        # (BS, D)
        k_r = k * cos_k + k_rot * sin_k                        # (BS, KVD)

        attn_out = jnp.zeros((BS, D), jnp.float32)
        for kvi in range(KV):
            # Stack REP query heads of this kv head along rows -> (REP*BS, HD)
            q_stack = jnp.concatenate(
                [q_r[:, (kvi * REP + r) * HD:(kvi * REP + r + 1) * HD]
                 for r in range(REP)], axis=0)
            k_h = k_r[:, kvi * HD:(kvi + 1) * HD]              # (BS, HD)
            v_h = v[:, kvi * HD:(kvi + 1) * HD]                # (BS, HD)

            s = jax.lax.dot_general(
                q_stack.astype(jnp.bfloat16), k_h.astype(jnp.bfloat16),
                (((1,), (1,)), ((), ())),
                preferred_element_type=jnp.float32) + bias     # (REP*BS, BS)
            m = jnp.max(s, axis=-1, keepdims=True)
            p = jnp.exp(s - m)
            p = p * pl.reciprocal(jnp.sum(p, axis=-1, keepdims=True),
                                  approx=True)
            cs = jnp.dot(p.astype(jnp.bfloat16), v_h.astype(jnp.bfloat16),
                         preferred_element_type=jnp.float32)   # (REP*BS, HD)
            # Accumulate the output projection per head using row slices only
            # (no lane-axis concat of the 32-wide head contexts).
            for r in range(REP):
                hidx = kvi * REP + r
                attn_out = attn_out + jnp.dot(
                    cs[r * BS:(r + 1) * BS, :].astype(jnp.bfloat16),
                    wo_ref[l, hidx * HD:(hidx + 1) * HD, :],
                    preferred_element_type=jnp.float32)        # (BS, D)
        x = x + attn_out

        # ---------------- SwiGLU MLP block ----------------
        h2 = _rmsnorm(x, ln2_ref[l])
        gu = jnp.dot(h2.astype(jnp.bfloat16), wgu_ref[l],
                     preferred_element_type=jnp.float32)       # (BS, 2F)
        gate, up = gu[:, :F], gu[:, F:]
        mlp = jnp.dot((jax.nn.silu(gate) * up).astype(jnp.bfloat16), wd_ref[l],
                      preferred_element_type=jnp.float32)      # (BS, D)
        x = x + mlp

    o_ref[...] = x                                             # lane-dense (BS, D)


@jax.jit
def first_half_forward(input_ids, table, params, cos_full, sin_full, attn_bias):
    # Embedding gather in plain XLA (outside the kernel); the result buffer is
    # aliased to the kernel output.
    x0 = table[input_ids.reshape(-1)]                          # (BS, D) f32
    out = pl.pallas_call(
        fused_kernel,
        out_shape=jax.ShapeDtypeStruct((BS, D), jnp.float32),
        input_output_aliases={0: 0},      # x0 buffer reused for the output
        # No grid: single invocation, whole arrays as VMEM blocks (~2.8 MB).
        # NOTE: deliberately NOT splitting across the second TensorCore (v7x)
        # at this toy size - sync cost would exceed the sub-microsecond work.
    )(x0, cos_full, sin_full, attn_bias,
      params["ln1"], params["w_qkv"], params["w_o"],
      params["ln2"], params["w_gu"], params["w_d"])
    return out.reshape(B, S, D)


# ---------------------------------------------------------------------------
# Parameter init (deterministic, synthetic) + RoPE/bias tables (plain JAX).
# ---------------------------------------------------------------------------
def _fold_rotate_half(w):
    """Signed column permutation so that x @ w_rot == rotate_half(x @ w)."""
    nin, ncol = w.shape
    assert ncol % HD == 0, "rotate_half fold requires whole heads"
    w3 = w.reshape(nin, ncol // HD, HD)
    w_rot = jnp.concatenate([-w3[:, :, HD // 2:], w3[:, :, :HD // 2]], axis=-1)
    return w_rot.reshape(nin, ncol)


def init_params(key):
    keys = jax.random.split(key, 1 + SPLIT_INDEX)
    table = jax.random.normal(keys[0], (V, D), jnp.float32) * 0.02
    scale = 1.0 / (HD ** 0.5)
    w_qkv, w_o, w_gu, w_d, ln1, ln2 = [], [], [], [], [], []
    for li in range(SPLIT_INDEX):
        lk = jax.random.split(keys[1 + li], 7)
        wq = jax.random.normal(lk[0], (D, H * HD), jnp.float32) * 0.02
        wk = jax.random.normal(lk[1], (D, KVD), jnp.float32) * 0.02
        wv = jax.random.normal(lk[2], (D, KVD), jnp.float32) * 0.02
        wo = jax.random.normal(lk[3], (H * HD, D), jnp.float32) * 0.02
        wg = jax.random.normal(lk[4], (D, F), jnp.float32) * 0.02
        wu = jax.random.normal(lk[5], (D, F), jnp.float32) * 0.02
        wd = jax.random.normal(lk[6], (F, D), jnp.float32) * 0.02
        wq_s = wq * scale                      # fold 1/sqrt(HD) into Wq once
        fused = jnp.concatenate(
            [wq_s, _fold_rotate_half(wq_s),    # q | q_rot        (2*D cols)
             wk, _fold_rotate_half(wk),        # k | k_rot        (2*KVD cols)
             wv], axis=1)                      # v                (KVD cols)
        assert fused.shape == (D, 2 * D + 3 * KVD)
        w_qkv.append(fused)
        w_o.append(wo)
        w_gu.append(jnp.concatenate([wg, wu], axis=1))      # (D, 2F)
        w_d.append(wd)
        ln1.append(jnp.ones((1, D), jnp.float32))
        ln2.append(jnp.ones((1, D), jnp.float32))
    params = dict(
        ln1=jnp.stack(ln1), ln2=jnp.stack(ln2),             # norms stay f32
        w_qkv=jnp.stack(w_qkv).astype(jnp.bfloat16),
        w_o=jnp.stack(w_o).astype(jnp.bfloat16),
        w_gu=jnp.stack(w_gu).astype(jnp.bfloat16),
        w_d=jnp.stack(w_d).astype(jnp.bfloat16),
    )
    return table, params


def rope_tables():
    # position_ids = arange(S) for every batch row, as in FirstHalf.forward.
    # TODO(synk): HF applies llama3 rope scaling for Llama-3.2; synthetic
    # version uses plain RoPE (theta=10000) since weights are random anyway.
    pos = jnp.arange(S, dtype=jnp.float32)
    inv_freq = 1.0 / (ROPE_THETA ** (jnp.arange(0, HD, 2, dtype=jnp.float32) / HD))
    freqs = pos[:, None] * inv_freq[None, :]                # (S, HD/2)
    emb = jnp.concatenate([freqs, freqs], axis=-1)          # (S, HD)
    cos, sin = jnp.cos(emb), jnp.sin(emb)
    # Tile over batch (rows) and heads (lanes): row b*S+s carries cos[s].
    return jnp.tile(cos, (B, H)), jnp.tile(sin, (B, H))     # (B*S, H*HD)


def attn_bias_table():
    r = jnp.arange(BS)
    c = jnp.arange(BS)
    same_batch = (r[:, None] // S) == (c[None, :] // S)
    causal = (c[None, :] % S) <= (r[:, None] % S)
    bias = jnp.where(same_batch & causal, 0.0, NEG_INF).astype(jnp.float32)
    return jnp.tile(bias, (REP, 1))                         # (REP*BS, BS)


if __name__ == "__main__":
    key = jax.random.PRNGKey(0)
    pkey, ikey = jax.random.split(key)
    table, params = init_params(pkey)
    cos_full, sin_full = rope_tables()
    bias = attn_bias_table()

    input_ids = jax.random.randint(ikey, (B, S), 0, V, dtype=jnp.int32)
    out = first_half_forward(input_ids, table, params, cos_full, sin_full, bias)
    out = jax.block_until_ready(out)
    assert out.shape == (B, S, D) and out.dtype == jnp.float32
    assert bool(jnp.all(jnp.isfinite(out)))
    print("KERNEL_OK")
</pallas_src>

<mosaic_0001>
module attributes {stable_mosaic.version = 11 : i64} {
  func.func @fused_kernel(%arg0: memref<16x128xf32, #tpu.memory_space<vmem>>, %arg1: memref<16x128xf32, #tpu.memory_space<vmem>>, %arg2: memref<16x128xf32, #tpu.memory_space<vmem>>, %arg3: memref<32x16xf32, #tpu.memory_space<vmem>>, %arg4: memref<8x1x128xf32, #tpu.memory_space<vmem>>, %arg5: memref<8x128x448xbf16, #tpu.memory_space<vmem>>, %arg6: memref<8x128x128xbf16, #tpu.memory_space<vmem>>, %arg7: memref<8x1x128xf32, #tpu.memory_space<vmem>>, %arg8: memref<8x128x512xbf16, #tpu.memory_space<vmem>>, %arg9: memref<8x256x128xbf16, #tpu.memory_space<vmem>>, %arg10: memref<16x128xf32, #tpu.memory_space<vmem>>) attributes {dimension_semantics = [], scalar_prefetch = 0 : i64, scratch_operands = 0 : i64, tpu.core_type = #tpu.core_type<tc>} {
    %c0 = arith.constant 0 : index
    %c0_0 = arith.constant 0 : index
    %0 = vector.load %arg0[%c0, %c0_0] : memref<16x128xf32, #tpu.memory_space<vmem>>, vector<16x128xf32>
    %c0_1 = arith.constant 0 : index
    %c0_2 = arith.constant 0 : index
    %1 = vector.load %arg1[%c0_1, %c0_2] : memref<16x128xf32, #tpu.memory_space<vmem>>, vector<16x128xf32>
    %c0_3 = arith.constant 0 : index
    %c0_4 = arith.constant 0 : index
    %2 = vector.load %arg2[%c0_3, %c0_4] : memref<16x128xf32, #tpu.memory_space<vmem>>, vector<16x128xf32>
    %3 = vector.extract_strided_slice %1 {offsets = [0, 0], sizes = [16, 64], strides = [1, 1]} : vector<16x128xf32> to vector<16x64xf32>
    %4 = vector.extract_strided_slice %2 {offsets = [0, 0], sizes = [16, 64], strides = [1, 1]} : vector<16x128xf32> to vector<16x64xf32>
    %c0_5 = arith.constant 0 : index
    %c0_6 = arith.constant 0 : index
    %5 = vector.load %arg3[%c0_5, %c0_6] : memref<32x16xf32, #tpu.memory_space<vmem>>, vector<32x16xf32>
    %c0_7 = arith.constant 0 : index
    %c0_8 = arith.constant 0 : index
    %c0_9 = arith.constant 0 : index
    %6 = vector.load %arg4[%c0_7, %c0_8, %c0_9] : memref<8x1x128xf32, #tpu.memory_space<vmem>>, vector<1x1x128xf32>
    %7 = vector.shape_cast %6 : vector<1x1x128xf32> to vector<1x128xf32>
    %8 = arith.mulf %0, %0 : vector<16x128xf32>
    %cst = arith.constant dense<0.000000e+00> : vector<16xf32>
    %9 = vector.multi_reduction <add>, %8, %cst [1] : vector<16x128xf32> to vector<16xf32>
    %10 = vector.shape_cast %9 : vector<16xf32> to vector<16x1xf32>
    %cst_10 = arith.constant 1.280000e+02 : f32
    %11 = vector.broadcast %cst_10 : f32 to vector<16x1xf32>
    %12 = arith.divf %10, %11 : vector<16x1xf32>
    %cst_11 = arith.constant 9.99999974E-6 : f32
    %13 = vector.broadcast %cst_11 : f32 to vector<16x1xf32>
    %14 = arith.addf %12, %13 : vector<16x1xf32>
    %15 = math.rsqrt %14 : vector<16x1xf32>
    %16 = vector.broadcast %15 : vector<16x1xf32> to vector<16x128xf32>
    %17 = arith.mulf %0, %16 : vector<16x128xf32>
    %18 = vector.broadcast %7 : vector<1x128xf32> to vector<16x128xf32>
    %19 = arith.mulf %17, %18 : vector<16x128xf32>
    %20 = arith.truncf %19 : vector<16x128xf32> to vector<16x128xbf16>
    %c0_12 = arith.constant 0 : index
    %c0_13 = arith.constant 0 : index
    %c0_14 = arith.constant 0 : index
    %21 = vector.load %arg5[%c0_12, %c0_13, %c0_14] : memref<8x128x448xbf16, #tpu.memory_space<vmem>>, vector<1x128x448xbf16>
    %22 = vector.shape_cast %21 : vector<1x128x448xbf16> to vector<128x448xbf16>
    %cst_15 = arith.constant dense<0.000000e+00> : vector<16x448xf32>
    %23 = tpu.matmul %20, %22, %cst_15 {dimension_numbers = #tpu.dot_dimension_numbers<[1], [0], [0], [1], [0, 0, 1, 1], [], []>} : vector<16x128xbf16>, vector<128x448xbf16>, vector<16x448xf32> -> vector<16x448xf32>
    %24 = vector.extract_strided_slice %23 {offsets = [0, 0], sizes = [16, 128], strides = [1, 1]} : vector<16x448xf32> to vector<16x128xf32>
    %25 = vector.extract_strided_slice %23 {offsets = [0, 128], sizes = [16, 128], strides = [1, 1]} : vector<16x448xf32> to vector<16x128xf32>
    %26 = vector.extract_strided_slice %23 {offsets = [0, 256], sizes = [16, 64], strides = [1, 1]} : vector<16x448xf32> to vector<16x64xf32>
    %27 = vector.extract_strided_slice %23 {offsets = [0, 320], sizes = [16, 64], strides = [1, 1]} : vector<16x448xf32> to vector<16x64xf32>
    %28 = vector.extract_strided_slice %23 {offsets = [0, 384], sizes = [16, 64], strides = [1, 1]} : vector<16x448xf32> to vector<16x64xf32>
    %29 = arith.mulf %24, %1 : vector<16x128xf32>
    %30 = arith.mulf %25, %2 : vector<16x128xf32>
    %31 = arith.addf %29, %30 : vector<16x128xf32>
    %32 = arith.mulf %26, %3 : vector<16x64xf32>
    %33 = arith.mulf %27, %4 : vector<16x64xf32>
    %34 = arith.addf %32, %33 : vector<16x64xf32>
    %cst_16 = arith.constant 0.000000e+00 : f32
    %35 = vector.broadcast %cst_16 : f32 to vector<16x128xf32>
    %36 = vector.extract_strided_slice %31 {offsets = [0, 0], sizes = [16, 32], strides = [1, 1]} : vector<16x128xf32> to vector<16x32xf32>
    %37 = vector.extract_strided_slice %31 {offsets = [0, 32], sizes = [16, 32], strides = [1, 1]} : vector<16x128xf32> to vector<16x32xf32>
    %38 = tpu.concatenate %36, %37 in 0 : vector<16x32xf32>, vector<16x32xf32> -> vector<32x32xf32>
    %39 = vector.extract_strided_slice %34 {offsets = [0, 0], sizes = [16, 32], strides = [1, 1]} : vector<16x64xf32> to vector<16x32xf32>
    %40 = vector.extract_strided_slice %28 {offsets = [0, 0], sizes = [16, 32], strides = [1, 1]} : vector<16x64xf32> to vector<16x32xf32>
    %41 = arith.truncf %38 : vector<32x32xf32> to vector<32x32xbf16>
    %42 = arith.truncf %39 : vector<16x32xf32> to vector<16x32xbf16>
    %cst_17 = arith.constant dense<0.000000e+00> : vector<32x16xf32>
    %43 = tpu.matmul %41, %42, %cst_17 {dimension_numbers = #tpu.dot_dimension_numbers<[1], [1], [0], [0], [0, 0, 1, 0], [], []>} : vector<32x32xbf16>, vector<16x32xbf16>, vector<32x16xf32> -> vector<32x16xf32>
    %44 = arith.addf %43, %5 : vector<32x16xf32>
    %cst_18 = arith.constant dense<0xFF800000> : vector<32xf32>
    %45 = vector.multi_reduction <maximumf>, %44, %cst_18 [1] : vector<32x16xf32> to vector<32xf32>
    %46 = vector.shape_cast %45 : vector<32xf32> to vector<32x1xf32>
    %47 = vector.broadcast %46 : vector<32x1xf32> to vector<32x16xf32>
    %48 = arith.subf %44, %47 : vector<32x16xf32>
    %49 = math.exp %48 : vector<32x16xf32>
    %cst_19 = arith.constant dense<0.000000e+00> : vector<32xf32>
    %50 = vector.multi_reduction <add>, %49, %cst_19 [1] : vector<32x16xf32> to vector<32xf32>
    %51 = vector.shape_cast %50 : vector<32xf32> to vector<32x1xf32>
    %52 = tpu.reciprocal %51 {approx = true} : vector<32x1xf32> -> vector<32x1xf32>
    %53 = vector.broadcast %52 : vector<32x1xf32> to vector<32x16xf32>
    %54 = arith.mulf %49, %53 : vector<32x16xf32>
    %55 = arith.truncf %54 : vector<32x16xf32> to vector<32x16xbf16>
    %56 = arith.truncf %40 : vector<16x32xf32> to vector<16x32xbf16>
    %cst_20 = arith.constant dense<0.000000e+00> : vector<32x32xf32>
    %57 = tpu.matmul %55, %56, %cst_20 {dimension_numbers = #tpu.dot_dimension_numbers<[1], [0], [0], [1], [0, 0, 1, 1], [], []>} : vector<32x16xbf16>, vector<16x32xbf16>, vector<32x32xf32> -> vector<32x32xf32>
    %58 = vector.extract_strided_slice %57 {offsets = [0, 0], sizes = [16, 32], strides = [1, 1]} : vector<32x32xf32> to vector<16x32xf32>
    %59 = arith.truncf %58 : vector<16x32xf32> to vector<16x32xbf16>
    %c0_21 = arith.constant 0 : index
    %c0_22 = arith.constant 0 : index
    %c0_23 = arith.constant 0 : index
    %60 = vector.load %arg6[%c0_21, %c0_22, %c0_23] : memref<8x128x128xbf16, #tpu.memory_space<vmem>>, vector<1x32x128xbf16>
    %61 = vector.shape_cast %60 : vector<1x32x128xbf16> to vector<32x128xbf16>
    %cst_24 = arith.constant dense<0.000000e+00> : vector<16x128xf32>
    %62 = tpu.matmul %59, %61, %cst_24 {dimension_numbers = #tpu.dot_dimension_numbers<[1], [0], [0], [1], [0, 0, 1, 1], [], []>} : vector<16x32xbf16>, vector<32x128xbf16>, vector<16x128xf32> -> vector<16x128xf32>
    %63 = arith.addf %35, %62 : vector<16x128xf32>
    %64 = vector.extract_strided_slice %57 {offsets = [16, 0], sizes = [16, 32], strides = [1, 1]} : vector<32x32xf32> to vector<16x32xf32>
    %65 = arith.truncf %64 : vector<16x32xf32> to vector<16x32xbf16>
    %c0_25 = arith.constant 0 : index
    %c32 = arith.constant 32 : index
    %c0_26 = arith.constant 0 : index
    %66 = vector.load %arg6[%c0_25, %c32, %c0_26] : memref<8x128x128xbf16, #tpu.memory_space<vmem>>, vector<1x32x128xbf16>
    %67 = vector.shape_cast %66 : vector<1x32x128xbf16> to vector<32x128xbf16>
    %cst_27 = arith.constant dense<0.000000e+00> : vector<16x128xf32>
    %68 = tpu.matmul %65, %67, %cst_27 {dimension_numbers = #tpu.dot_dimension_numbers<[1], [0], [0], [1], [0, 0, 1, 1], [], []>} : vector<16x32xbf16>, vector<32x128xbf16>, vector<16x128xf32> -> vector<16x128xf32>
    %69 = arith.addf %63, %68 : vector<16x128xf32>
    %70 = vector.extract_strided_slice %31 {offsets = [0, 64], sizes = [16, 32], strides = [1, 1]} : vector<16x128xf32> to vector<16x32xf32>
    %71 = vector.extract_strided_slice %31 {offsets = [0, 96], sizes = [16, 32], strides = [1, 1]} : vector<16x128xf32> to vector<16x32xf32>
    %72 = tpu.concatenate %70, %71 in 0 : vector<16x32xf32>, vector<16x32xf32> -> vector<32x32xf32>
    %73 = vector.extract_strided_slice %34 {offsets = [0, 32], sizes = [16, 32], strides = [1, 1]} : vector<16x64xf32> to vector<16x32xf32>
    %74 = vector.extract_strided_slice %28 {offsets = [0, 32], sizes = [16, 32], strides = [1, 1]} : vector<16x64xf32> to vector<16x32xf32>
    %75 = arith.truncf %72 : vector<32x32xf32> to vector<32x32xbf16>
    %76 = arith.truncf %73 : vector<16x32xf32> to vector<16x32xbf16>
    %cst_28 = arith.constant dense<0.000000e+00> : vector<32x16xf32>
    %77 = tpu.matmul %75, %76, %cst_28 {dimension_numbers = #tpu.dot_dimension_numbers<[1], [1], [0], [0], [0, 0, 1, 0], [], []>} : vector<32x32xbf16>, vector<16x32xbf16>, vector<32x16xf32> -> vector<32x16xf32>
    %78 = arith.addf %77, %5 : vector<32x16xf32>
    %cst_29 = arith.constant dense<0xFF800000> : vector<32xf32>
    %79 = vector.multi_reduction <maximumf>, %78, %cst_29 [1] : vector<32x16xf32> to vector<32xf32>
    %80 = vector.shape_cast %79 : vector<32xf32> to vector<32x1xf32>
    %81 = vector.broadcast %80 : vector<32x1xf32> to vector<32x16xf32>
    %82 = arith.subf %78, %81 : vector<32x16xf32>
    %83 = math.exp %82 : vector<32x16xf32>
    %cst_30 = arith.constant dense<0.000000e+00> : vector<32xf32>
    %84 = vector.multi_reduction <add>, %83, %cst_30 [1] : vector<32x16xf32> to vector<32xf32>
    %85 = vector.shape_cast %84 : vector<32xf32> to vector<32x1xf32>
    %86 = tpu.reciprocal %85 {approx = true} : vector<32x1xf32> -> vector<32x1xf32>
    %87 = vector.broadcast %86 : vector<32x1xf32> to vector<32x16xf32>
    %88 = arith.mulf %83, %87 : vector<32x16xf32>
    %89 = arith.truncf %88 : vector<32x16xf32> to vector<32x16xbf16>
    %90 = arith.truncf %74 : vector<16x32xf32> to vector<16x32xbf16>
    %cst_31 = arith.constant dense<0.000000e+00> : vector<32x32xf32>
    %91 = tpu.matmul %89, %90, %cst_31 {dimension_numbers = #tpu.dot_dimension_numbers<[1], [0], [0], [1], [0, 0, 1, 1], [], []>} : vector<32x16xbf16>, vector<16x32xbf16>, vector<32x32xf32> -> vector<32x32xf32>
    %92 = vector.extract_strided_slice %91 {offsets = [0, 0], sizes = [16, 32], strides = [1, 1]} : vector<32x32xf32> to vector<16x32xf32>
    %93 = arith.truncf %92 : vector<16x32xf32> to vector<16x32xbf16>
    %c0_32 = arith.constant 0 : index
    %c64 = arith.constant 64 : index
    %c0_33 = arith.constant 0 : index
    %94 = vector.load %arg6[%c0_32, %c64, %c0_33] : memref<8x128x128xbf16, #tpu.memory_space<vmem>>, vector<1x32x128xbf16>
    %95 = vector.shape_cast %94 : vector<1x32x128xbf16> to vector<32x128xbf16>
    %cst_34 = arith.constant dense<0.000000e+00> : vector<16x128xf32>
    %96 = tpu.matmul %93, %95, %cst_34 {dimension_numbers = #tpu.dot_dimension_numbers<[1], [0], [0], [1], [0, 0, 1, 1], [], []>} : vector<16x32xbf16>, vector<32x128xbf16>, vector<16x128xf32> -> vector<16x128xf32>
    %97 = arith.addf %69, %96 : vector<16x128xf32>
    %98 = vector.extract_strided_slice %91 {offsets = [16, 0], sizes = [16, 32], strides = [1, 1]} : vector<32x32xf32> to vector<16x32xf32>
    %99 = arith.truncf %98 : vector<16x32xf32> to vector<16x32xbf16>
    %c0_35 = arith.constant 0 : index
    %c96 = arith.constant 96 : index
    %c0_36 = arith.constant 0 : index
    %100 = vector.load %arg6[%c0_35, %c96, %c0_36] : memref<8x128x128xbf16, #tpu.memory_space<vmem>>, vector<1x32x128xbf16>
    %101 = vector.shape_cast %100 : vector<1x32x128xbf16> to vector<32x128xbf16>
    %cst_37 = arith.constant dense<0.000000e+00> : vector<16x128xf32>
    %102 = tpu.matmul %99, %101, %cst_37 {dimension_numbers = #tpu.dot_dimension_numbers<[1], [0], [0], [1], [0, 0, 1, 1], [], []>} : vector<16x32xbf16>, vector<32x128xbf16>, vector<16x128xf32> -> vector<16x128xf32>
    %103 = arith.addf %97, %102 : vector<16x128xf32>
    %104 = arith.addf %0, %103 : vector<16x128xf32>
    %c0_38 = arith.constant 0 : index
    %c0_39 = arith.constant 0 : index
    %c0_40 = arith.constant 0 : index
    %105 = vector.load %arg7[%c0_38, %c0_39, %c0_40] : memref<8x1x128xf32, #tpu.memory_space<vmem>>, vector<1x1x128xf32>
    %106 = vector.shape_cast %105 : vector<1x1x128xf32> to vector<1x128xf32>
    %107 = arith.mulf %104, %104 : vector<16x128xf32>
    %cst_41 = arith.constant dense<0.000000e+00> : vector<16xf32>
    %108 = vector.multi_reduction <add>, %107, %cst_41 [1] : vector<16x128xf32> to vector<16xf32>
    %109 = vector.shape_cast %108 : vector<16xf32> to vector<16x1xf32>
    %cst_42 = arith.constant 1.280000e+02 : f32
    %110 = vector.broadcast %cst_42 : f32 to vector<16x1xf32>
    %111 = arith.divf %109, %110 : vector<16x1xf32>
    %cst_43 = arith.constant 9.99999974E-6 : f32
    %112 = vector.broadcast %cst_43 : f32 to vector<16x1xf32>
    %113 = arith.addf %111, %112 : vector<16x1xf32>
    %114 = math.rsqrt %113 : vector<16x1xf32>
    %115 = vector.broadcast %114 : vector<16x1xf32> to vector<16x128xf32>
    %116 = arith.mulf %104, %115 : vector<16x128xf32>
    %117 = vector.broadcast %106 : vector<1x128xf32> to vector<16x128xf32>
    %118 = arith.mulf %116, %117 : vector<16x128xf32>
    %119 = arith.truncf %118 : vector<16x128xf32> to vector<16x128xbf16>
    %c0_44 = arith.constant 0 : index
    %c0_45 = arith.constant 0 : index
    %c0_46 = arith.constant 0 : index
    %120 = vector.load %arg8[%c0_44, %c0_45, %c0_46] : memref<8x128x512xbf16, #tpu.memory_space<vmem>>, vector<1x128x512xbf16>
    %121 = vector.shape_cast %120 : vector<1x128x512xbf16> to vector<128x512xbf16>
    %cst_47 = arith.constant dense<0.000000e+00> : vector<16x512xf32>
    %122 = tpu.matmul %119, %121, %cst_47 {dimension_numbers = #tpu.dot_dimension_numbers<[1], [0], [0], [1], [0, 0, 1, 1], [], []>} : vector<16x128xbf16>, vector<128x512xbf16>, vector<16x512xf32> -> vector<16x512xf32>
    %123 = vector.extract_strided_slice %122 {offsets = [0, 0], sizes = [16, 256], strides = [1, 1]} : vector<16x512xf32> to vector<16x256xf32>
    %124 = vector.extract_strided_slice %122 {offsets = [0, 256], sizes = [16, 256], strides = [1, 1]} : vector<16x512xf32> to vector<16x256xf32>
    %125 = arith.negf %123 : vector<16x256xf32>
    %126 = math.exp %125 : vector<16x256xf32>
    %cst_48 = arith.constant 1.000000e+00 : f32
    %127 = vector.broadcast %cst_48 : f32 to vector<16x256xf32>
    %128 = arith.addf %127, %126 : vector<16x256xf32>
    %129 = arith.divf %127, %128 : vector<16x256xf32>
    %130 = arith.mulf %123, %129 : vector<16x256xf32>
    %131 = arith.mulf %130, %124 : vector<16x256xf32>
    %132 = arith.truncf %131 : vector<16x256xf32> to vector<16x256xbf16>
    %c0_49 = arith.constant 0 : index
    %c0_50 = arith.constant 0 : index
    %c0_51 = arith.constant 0 : index
    %133 = vector.load %arg9[%c0_49, %c0_50, %c0_51] : memref<8x256x128xbf16, #tpu.memory_space<vmem>>, vector<1x256x128xbf16>
    %134 = vector.shape_cast %133 : vector<1x256x128xbf16> to vector<256x128xbf16>
    %cst_52 = arith.constant dense<0.000000e+00> : vector<16x128xf32>
    %135 = tpu.matmul %132, %134, %cst_52 {dimension_numbers = #tpu.dot_dimension_numbers<[1], [0], [0], [1], [0, 0, 1, 1], [], []>} : vector<16x256xbf16>, vector<256x128xbf16>, vector<16x128xf32> -> vector<16x128xf32>
    %136 = arith.addf %104, %135 : vector<16x128xf32>
    %c1 = arith.constant 1 : index
    %c0_53 = arith.constant 0 : index
    %c0_54 = arith.constant 0 : index
    %137 = vector.load %arg4[%c1, %c0_53, %c0_54] : memref<8x1x128xf32, #tpu.memory_space<vmem>>, vector<1x1x128xf32>
    %138 = vector.shape_cast %137 : vector<1x1x128xf32> to vector<1x128xf32>
    %139 = arith.mulf %136, %136 : vector<16x128xf32>
    %cst_55 = arith.constant dense<0.000000e+00> : vector<16xf32>
    %140 = vector.multi_reduction <add>, %139, %cst_55 [1] : vector<16x128xf32> to vector<16xf32>
    %141 = vector.shape_cast %140 : vector<16xf32> to vector<16x1xf32>
    %cst_56 = arith.constant 1.280000e+02 : f32
    %142 = vector.broadcast %cst_56 : f32 to vector<16x1xf32>
    %143 = arith.divf %141, %142 : vector<16x1xf32>
    %cst_57 = arith.constant 9.99999974E-6 : f32
    %144 = vector.broadcast %cst_57 : f32 to vector<16x1xf32>
    %145 = arith.addf %143, %144 : vector<16x1xf32>
    %146 = math.rsqrt %145 : vector<16x1xf32>
    %147 = vector.broadcast %146 : vector<16x1xf32> to vector<16x128xf32>
    %148 = arith.mulf %136, %147 : vector<16x128xf32>
    %149 = vector.broadcast %138 : vector<1x128xf32> to vector<16x128xf32>
    %150 = arith.mulf %148, %149 : vector<16x128xf32>
    %151 = arith.truncf %150 : vector<16x128xf32> to vector<16x128xbf16>
    %c1_58 = arith.constant 1 : index
    %c0_59 = arith.constant 0 : index
    %c0_60 = arith.constant 0 : index
    %152 = vector.load %arg5[%c1_58, %c0_59, %c0_60] : memref<8x128x448xbf16, #tpu.memory_space<vmem>>, vector<1x128x448xbf16>
    %153 = vector.shape_cast %152 : vector<1x128x448xbf16> to vector<128x448xbf16>
    %cst_61 = arith.constant dense<0.000000e+00> : vector<16x448xf32>
    %154 = tpu.matmul %151, %153, %cst_61 {dimension_numbers = #tpu.dot_dimension_numbers<[1], [0], [0], [1], [0, 0, 1, 1], [], []>} : vector<16x128xbf16>, vector<128x448xbf16>, vector<16x448xf32> -> vector<16x448xf32>
    %155 = vector.extract_strided_slice %154 {offsets = [0, 0], sizes = [16, 128], strides = [1, 1]} : vector<16x448xf32> to vector<16x128xf32>
    %156 = vector.extract_strided_slice %154 {offsets = [0, 128], sizes = [16, 128], strides = [1, 1]} : vector<16x448xf32> to vector<16x128xf32>
    %157 = vector.extract_strided_slice %154 {offsets = [0, 256], sizes = [16, 64], strides = [1, 1]} : vector<16x448xf32> to vector<16x64xf32>
    %158 = vector.extract_strided_slice %154 {offsets = [0, 320], sizes = [16, 64], strides = [1, 1]} : vector<16x448xf32> to vector<16x64xf32>
    %159 = vector.extract_strided_slice %154 {offsets = [0, 384], sizes = [16, 64], strides = [1, 1]} : vector<16x448xf32> to vector<16x64xf32>
    %160 = arith.mulf %155, %1 : vector<16x128xf32>
    %161 = arith.mulf %156, %2 : vector<16x128xf32>
    %162 = arith.addf %160, %161 : vector<16x128xf32>
    %163 = arith.mulf %157, %3 : vector<16x64xf32>
    %164 = arith.mulf %158, %4 : vector<16x64xf32>
    %165 = arith.addf %163, %164 : vector<16x64xf32>
    %cst_62 = arith.constant 0.000000e+00 : f32
    %166 = vector.broadcast %cst_62 : f32 to vector<16x128xf32>
    %167 = vector.extract_strided_slice %162 {offsets = [0, 0], sizes = [16, 32], strides = [1, 1]} : vector<16x128xf32> to vector<16x32xf32>
    %168 = vector.extract_strided_slice %162 {offsets = [0, 32], sizes = [16, 32], strides = [1, 1]} : vector<16x128xf32> to vector<16x32xf32>
    %169 = tpu.concatenate %167, %168 in 0 : vector<16x32xf32>, vector<16x32xf32> -> vector<32x32xf32>
    %170 = vector.extract_strided_slice %165 {offsets = [0, 0], sizes = [16, 32], strides = [1, 1]} : vector<16x64xf32> to vector<16x32xf32>
    %171 = vector.extract_strided_slice %159 {offsets = [0, 0], sizes = [16, 32], strides = [1, 1]} : vector<16x64xf32> to vector<16x32xf32>
    %172 = arith.truncf %169 : vector<32x32xf32> to vector<32x32xbf16>
    %173 = arith.truncf %170 : vector<16x32xf32> to vector<16x32xbf16>
    %cst_63 = arith.constant dense<0.000000e+00> : vector<32x16xf32>
    %174 = tpu.matmul %172, %173, %cst_63 {dimension_numbers = #tpu.dot_dimension_numbers<[1], [1], [0], [0], [0, 0, 1, 0], [], []>} : vector<32x32xbf16>, vector<16x32xbf16>, vector<32x16xf32> -> vector<32x16xf32>
    %175 = arith.addf %174, %5 : vector<32x16xf32>
    %cst_64 = arith.constant dense<0xFF800000> : vector<32xf32>
    %176 = vector.multi_reduction <maximumf>, %175, %cst_64 [1] : vector<32x16xf32> to vector<32xf32>
    %177 = vector.shape_cast %176 : vector<32xf32> to vector<32x1xf32>
    %178 = vector.broadcast %177 : vector<32x1xf32> to vector<32x16xf32>
    %179 = arith.subf %175, %178 : vector<32x16xf32>
    %180 = math.exp %179 : vector<32x16xf32>
    %cst_65 = arith.constant dense<0.000000e+00> : vector<32xf32>
    %181 = vector.multi_reduction <add>, %180, %cst_65 [1] : vector<32x16xf32> to vector<32xf32>
    %182 = vector.shape_cast %181 : vector<32xf32> to vector<32x1xf32>
    %183 = tpu.reciprocal %182 {approx = true} : vector<32x1xf32> -> vector<32x1xf32>
    %184 = vector.broadcast %183 : vector<32x1xf32> to vector<32x16xf32>
    %185 = arith.mulf %180, %184 : vector<32x16xf32>
    %186 = arith.truncf %185 : vector<32x16xf32> to vector<32x16xbf16>
    %187 = arith.truncf %171 : vector<16x32xf32> to vector<16x32xbf16>
    %cst_66 = arith.constant dense<0.000000e+00> : vector<32x32xf32>
    %188 = tpu.matmul %186, %187, %cst_66 {dimension_numbers = #tpu.dot_dimension_numbers<[1], [0], [0], [1], [0, 0, 1, 1], [], []>} : vector<32x16xbf16>, vector<16x32xbf16>, vector<32x32xf32> -> vector<32x32xf32>
    %189 = vector.extract_strided_slice %188 {offsets = [0, 0], sizes = [16, 32], strides = [1, 1]} : vector<32x32xf32> to vector<16x32xf32>
    %190 = arith.truncf %189 : vector<16x32xf32> to vector<16x32xbf16>
    %c1_67 = arith.constant 1 : index
    %c0_68 = arith.constant 0 : index
    %c0_69 = arith.constant 0 : index
    %191 = vector.load %arg6[%c1_67, %c0_68, %c0_69] : memref<8x128x128xbf16, #tpu.memory_space<vmem>>, vector<1x32x128xbf16>
    %192 = vector.shape_cast %191 : vector<1x32x128xbf16> to vector<32x128xbf16>
    %cst_70 = arith.constant dense<0.000000e+00> : vector<16x128xf32>
    %193 = tpu.matmul %190, %192, %cst_70 {dimension_numbers = #tpu.dot_dimension_numbers<[1], [0], [0], [1], [0, 0, 1, 1], [], []>} : vector<16x32xbf16>, vector<32x128xbf16>, vector<16x128xf32> -> vector<16x128xf32>
    %194 = arith.addf %166, %193 : vector<16x128xf32>
    %195 = vector.extract_strided_slice %188 {offsets = [16, 0], sizes = [16, 32], strides = [1, 1]} : vector<32x32xf32> to vector<16x32xf32>
    %196 = arith.truncf %195 : vector<16x32xf32> to vector<16x32xbf16>
    %c1_71 = arith.constant 1 : index
    %c32_72 = arith.constant 32 : index
    %c0_73 = arith.constant 0 : index
    %197 = vector.load %arg6[%c1_71, %c32_72, %c0_73] : memref<8x128x128xbf16, #tpu.memory_space<vmem>>, vector<1x32x128xbf16>
    %198 = vector.shape_cast %197 : vector<1x32x128xbf16> to vector<32x128xbf16>
    %cst_74 = arith.constant dense<0.000000e+00> : vector<16x128xf32>
    %199 = tpu.matmul %196, %198, %cst_74 {dimension_numbers = #tpu.dot_dimension_numbers<[1], [0], [0], [1], [0, 0, 1, 1], [], []>} : vector<16x32xbf16>, vector<32x128xbf16>, vector<16x128xf32> -> vector<16x128xf32>
    %200 = arith.addf %194, %199 : vector<16x128xf32>
    %201 = vector.extract_strided_slice %162 {offsets = [0, 64], sizes = [16, 32], strides = [1, 1]} : vector<16x128xf32> to vector<16x32xf32>
    %202 = vector.extract_strided_slice %162 {offsets = [0, 96], sizes = [16, 32], strides = [1, 1]} : vector<16x128xf32> to vector<16x32xf32>
    %203 = tpu.concatenate %201, %202 in 0 : vector<16x32xf32>, vector<16x32xf32> -> vector<32x32xf32>
    %204 = vector.extract_strided_slice %165 {offsets = [0, 32], sizes = [16, 32], strides = [1, 1]} : vector<16x64xf32> to vector<16x32xf32>
    %205 = vector.extract_strided_slice %159 {offsets = [0, 32], sizes = [16, 32], strides = [1, 1]} : vector<16x64xf32> to vector<16x32xf32>
    %206 = arith.truncf %203 : vector<32x32xf32> to vector<32x32xbf16>
    %207 = arith.truncf %204 : vector<16x32xf32> to vector<16x32xbf16>
    %cst_75 = arith.constant dense<0.000000e+00> : vector<32x16xf32>
    %208 = tpu.matmul %206, %207, %cst_75 {dimension_numbers = #tpu.dot_dimension_numbers<[1], [1], [0], [0], [0, 0, 1, 0], [], []>} : vector<32x32xbf16>, vector<16x32xbf16>, vector<32x16xf32> -> vector<32x16xf32>
    %209 = arith.addf %208, %5 : vector<32x16xf32>
    %cst_76 = arith.constant dense<0xFF800000> : vector<32xf32>
    %210 = vector.multi_reduction <maximumf>, %209, %cst_76 [1] : vector<32x16xf32> to vector<32xf32>
    %211 = vector.shape_cast %210 : vector<32xf32> to vector<32x1xf32>
    %212 = vector.broadcast %211 : vector<32x1xf32> to vector<32x16xf32>
    %213 = arith.subf %209, %212 : vector<32x16xf32>
    %214 = math.exp %213 : vector<32x16xf32>
    %cst_77 = arith.constant dense<0.000000e+00> : vector<32xf32>
    %215 = vector.multi_reduction <add>, %214, %cst_77 [1] : vector<32x16xf32> to vector<32xf32>
    %216 = vector.shape_cast %215 : vector<32xf32> to vector<32x1xf32>
    %217 = tpu.reciprocal %216 {approx = true} : vector<32x1xf32> -> vector<32x1xf32>
    %218 = vector.broadcast %217 : vector<32x1xf32> to vector<32x16xf32>
    %219 = arith.mulf %214, %218 : vector<32x16xf32>
    %220 = arith.truncf %219 : vector<32x16xf32> to vector<32x16xbf16>
    %221 = arith.truncf %205 : vector<16x32xf32> to vector<16x32xbf16>
    %cst_78 = arith.constant dense<0.000000e+00> : vector<32x32xf32>
    %222 = tpu.matmul %220, %221, %cst_78 {dimension_numbers = #tpu.dot_dimension_numbers<[1], [0], [0], [1], [0, 0, 1, 1], [], []>} : vector<32x16xbf16>, vector<16x32xbf16>, vector<32x32xf32> -> vector<32x32xf32>
    %223 = vector.extract_strided_slice %222 {offsets = [0, 0], sizes = [16, 32], strides = [1, 1]} : vector<32x32xf32> to vector<16x32xf32>
    %224 = arith.truncf %223 : vector<16x32xf32> to vector<16x32xbf16>
    %c1_79 = arith.constant 1 : index
    %c64_80 = arith.constant 64 : index
    %c0_81 = arith.constant 0 : index
    %225 = vector.load %arg6[%c1_79, %c64_80, %c0_81] : memref<8x128x128xbf16, #tpu.memory_space<vmem>>, vector<1x32x128xbf16>
    %226 = vector.shape_cast %225 : vector<1x32x128xbf16> to vector<32x128xbf16>
    %cst_82 = arith.constant dense<0.000000e+00> : vector<16x128xf32>
    %227 = tpu.matmul %224, %226, %cst_82 {dimension_numbers = #tpu.dot_dimension_numbers<[1], [0], [0], [1], [0, 0, 1, 1], [], []>} : vector<16x32xbf16>, vector<32x128xbf16>, vector<16x128xf32> -> vector<16x128xf32>
    %228 = arith.addf %200, %227 : vector<16x128xf32>
    %229 = vector.extract_strided_slice %222 {offsets = [16, 0], sizes = [16, 32], strides = [1, 1]} : vector<32x32xf32> to vector<16x32xf32>
    %230 = arith.truncf %229 : vector<16x32xf32> to vector<16x32xbf16>
    %c1_83 = arith.constant 1 : index
    %c96_84 = arith.constant 96 : index
    %c0_85 = arith.constant 0 : index
    %231 = vector.load %arg6[%c1_83, %c96_84, %c0_85] : memref<8x128x128xbf16, #tpu.memory_space<vmem>>, vector<1x32x128xbf16>
    %232 = vector.shape_cast %231 : vector<1x32x128xbf16> to vector<32x128xbf16>
    %cst_86 = arith.constant dense<0.000000e+00> : vector<16x128xf32>
    %233 = tpu.matmul %230, %232, %cst_86 {dimension_numbers = #tpu.dot_dimension_numbers<[1], [0], [0], [1], [0, 0, 1, 1], [], []>} : vector<16x32xbf16>, vector<32x128xbf16>, vector<16x128xf32> -> vector<16x128xf32>
    %234 = arith.addf %228, %233 : vector<16x128xf32>
    %235 = arith.addf %136, %234 : vector<16x128xf32>
    %c1_87 = arith.constant 1 : index
    %c0_88 = arith.constant 0 : index
    %c0_89 = arith.constant 0 : index
    %236 = vector.load %arg7[%c1_87, %c0_88, %c0_89] : memref<8x1x128xf32, #tpu.memory_space<vmem>>, vector<1x1x128xf32>
    %237 = vector.shape_cast %236 : vector<1x1x128xf32> to vector<1x128xf32>
    %238 = arith.mulf %235, %235 : vector<16x128xf32>
    %cst_90 = arith.constant dense<0.000000e+00> : vector<16xf32>
    %239 = vector.multi_reduction <add>, %238, %cst_90 [1] : vector<16x128xf32> to vector<16xf32>
    %240 = vector.shape_cast %239 : vector<16xf32> to vector<16x1xf32>
    %cst_91 = arith.constant 1.280000e+02 : f32
    %241 = vector.broadcast %cst_91 : f32 to vector<16x1xf32>
    %242 = arith.divf %240, %241 : vector<16x1xf32>
    %cst_92 = arith.constant 9.99999974E-6 : f32
    %243 = vector.broadcast %cst_92 : f32 to vector<16x1xf32>
    %244 = arith.addf %242, %243 : vector<16x1xf32>
    %245 = math.rsqrt %244 : vector<16x1xf32>
    %246 = vector.broadcast %245 : vector<16x1xf32> to vector<16x128xf32>
    %247 = arith.mulf %235, %246 : vector<16x128xf32>
    %248 = vector.broadcast %237 : vector<1x128xf32> to vector<16x128xf32>
    %249 = arith.mulf %247, %248 : vector<16x128xf32>
    %250 = arith.truncf %249 : vector<16x128xf32> to vector<16x128xbf16>
    %c1_93 = arith.constant 1 : index
    %c0_94 = arith.constant 0 : index
    %c0_95 = arith.constant 0 : index
    %251 = vector.load %arg8[%c1_93, %c0_94, %c0_95] : memref<8x128x512xbf16, #tpu.memory_space<vmem>>, vector<1x128x512xbf16>
    %252 = vector.shape_cast %251 : vector<1x128x512xbf16> to vector<128x512xbf16>
    %cst_96 = arith.constant dense<0.000000e+00> : vector<16x512xf32>
    %253 = tpu.matmul %250, %252, %cst_96 {dimension_numbers = #tpu.dot_dimension_numbers<[1], [0], [0], [1], [0, 0, 1, 1], [], []>} : vector<16x128xbf16>, vector<128x512xbf16>, vector<16x512xf32> -> vector<16x512xf32>
    %254 = vector.extract_strided_slice %253 {offsets = [0, 0], sizes = [16, 256], strides = [1, 1]} : vector<16x512xf32> to vector<16x256xf32>
    %255 = vector.extract_strided_slice %253 {offsets = [0, 256], sizes = [16, 256], strides = [1, 1]} : vector<16x512xf32> to vector<16x256xf32>
    %256 = arith.negf %254 : vector<16x256xf32>
    %257 = math.exp %256 : vector<16x256xf32>
    %cst_97 = arith.constant 1.000000e+00 : f32
    %258 = vector.broadcast %cst_97 : f32 to vector<16x256xf32>
    %259 = arith.addf %258, %257 : vector<16x256xf32>
    %260 = arith.divf %258, %259 : vector<16x256xf32>
    %261 = arith.mulf %254, %260 : vector<16x256xf32>
    %262 = arith.mulf %261, %255 : vector<16x256xf32>
    %263 = arith.truncf %262 : vector<16x256xf32> to vector<16x256xbf16>
    %c1_98 = arith.constant 1 : index
    %c0_99 = arith.constant 0 : index
    %c0_100 = arith.constant 0 : index
    %264 = vector.load %arg9[%c1_98, %c0_99, %c0_100] : memref<8x256x128xbf16, #tpu.memory_space<vmem>>, vector<1x256x128xbf16>
    %265 = vector.shape_cast %264 : vector<1x256x128xbf16> to vector<256x128xbf16>
    %cst_101 = arith.constant dense<0.000000e+00> : vector<16x128xf32>
    %266 = tpu.matmul %263, %265, %cst_101 {dimension_numbers = #tpu.dot_dimension_numbers<[1], [0], [0], [1], [0, 0, 1, 1], [], []>} : vector<16x256xbf16>, vector<256x128xbf16>, vector<16x128xf32> -> vector<16x128xf32>
    %267 = arith.addf %235, %266 : vector<16x128xf32>
    %c2 = arith.constant 2 : index
    %c0_102 = arith.constant 0 : index
    %c0_103 = arith.constant 0 : index
    %268 = vector.load %arg4[%c2, %c0_102, %c0_103] : memref<8x1x128xf32, #tpu.memory_space<vmem>>, vector<1x1x128xf32>
    %269 = vector.shape_cast %268 : vector<1x1x128xf32> to vector<1x128xf32>
    %270 = arith.mulf %267, %267 : vector<16x128xf32>
    %cst_104 = arith.constant dense<0.000000e+00> : vector<16xf32>
    %271 = vector.multi_reduction <add>, %270, %cst_104 [1] : vector<16x128xf32> to vector<16xf32>
    %272 = vector.shape_cast %271 : vector<16xf32> to vector<16x1xf32>
    %cst_105 = arith.constant 1.280000e+02 : f32
    %273 = vector.broadcast %cst_105 : f32 to vector<16x1xf32>
    %274 = arith.divf %272, %273 : vector<16x1xf32>
    %cst_106 = arith.constant 9.99999974E-6 : f32
    %275 = vector.broadcast %cst_106 : f32 to vector<16x1xf32>
    %276 = arith.addf %274, %275 : vector<16x1xf32>
    %277 = math.rsqrt %276 : vector<16x1xf32>
    %278 = vector.broadcast %277 : vector<16x1xf32> to vector<16x128xf32>
    %279 = arith.mulf %267, %278 : vector<16x128xf32>
    %280 = vector.broadcast %269 : vector<1x128xf32> to vector<16x128xf32>
    %281 = arith.mulf %279, %280 : vector<16x128xf32>
    %282 = arith.truncf %281 : vector<16x128xf32> to vector<16x128xbf16>
    %c2_107 = arith.constant 2 : index
    %c0_108 = arith.constant 0 : index
    %c0_109 = arith.constant 0 : index
    %283 = vector.load %arg5[%c2_107, %c0_108, %c0_109] : memref<8x128x448xbf16, #tpu.memory_space<vmem>>, vector<1x128x448xbf16>
    %284 = vector.shape_cast %283 : vector<1x128x448xbf16> to vector<128x448xbf16>
    %cst_110 = arith.constant dense<0.000000e+00> : vector<16x448xf32>
    %285 = tpu.matmul %282, %284, %cst_110 {dimension_numbers = #tpu.dot_dimension_numbers<[1], [0], [0], [1], [0, 0, 1, 1], [], []>} : vector<16x128xbf16>, vector<128x448xbf16>, vector<16x448xf32> -> vector<16x448xf32>
    %286 = vector.extract_strided_slice %285 {offsets = [0, 0], sizes = [16, 128], strides = [1, 1]} : vector<16x448xf32> to vector<16x128xf32>
    %287 = vector.extract_strided_slice %285 {offsets = [0, 128], sizes = [16, 128], strides = [1, 1]} : vector<16x448xf32> to vector<16x128xf32>
    %288 = vector.extract_strided_slice %285 {offsets = [0, 256], sizes = [16, 64], strides = [1, 1]} : vector<16x448xf32> to vector<16x64xf32>
    %289 = vector.extract_strided_slice %285 {offsets = [0, 320], sizes = [16, 64], strides = [1, 1]} : vector<16x448xf32> to vector<16x64xf32>
    %290 = vector.extract_strided_slice %285 {offsets = [0, 384], sizes = [16, 64], strides = [1, 1]} : vector<16x448xf32> to vector<16x64xf32>
    %291 = arith.mulf %286, %1 : vector<16x128xf32>
    %292 = arith.mulf %287, %2 : vector<16x128xf32>
    %293 = arith.addf %291, %292 : vector<16x128xf32>
    %294 = arith.mulf %288, %3 : vector<16x64xf32>
    %295 = arith.mulf %289, %4 : vector<16x64xf32>
    %296 = arith.addf %294, %295 : vector<16x64xf32>
    %cst_111 = arith.constant 0.000000e+00 : f32
    %297 = vector.broadcast %cst_111 : f32 to vector<16x128xf32>
    %298 = vector.extract_strided_slice %293 {offsets = [0, 0], sizes = [16, 32], strides = [1, 1]} : vector<16x128xf32> to vector<16x32xf32>
    %299 = vector.extract_strided_slice %293 {offsets = [0, 32], sizes = [16, 32], strides = [1, 1]} : vector<16x128xf32> to vector<16x32xf32>
    %300 = tpu.concatenate %298, %299 in 0 : vector<16x32xf32>, vector<16x32xf32> -> vector<32x32xf32>
    %301 = vector.extract_strided_slice %296 {offsets = [0, 0], sizes = [16, 32], strides = [1, 1]} : vector<16x64xf32> to vector<16x32xf32>
    %302 = vector.extract_strided_slice %290 {offsets = [0, 0], sizes = [16, 32], strides = [1, 1]} : vector<16x64xf32> to vector<16x32xf32>
    %303 = arith.truncf %300 : vector<32x32xf32> to vector<32x32xbf16>
    %304 = arith.truncf %301 : vector<16x32xf32> to vector<16x32xbf16>
    %cst_112 = arith.constant dense<0.000000e+00> : vector<32x16xf32>
    %305 = tpu.matmul %303, %304, %cst_112 {dimension_numbers = #tpu.dot_dimension_numbers<[1], [1], [0], [0], [0, 0, 1, 0], [], []>} : vector<32x32xbf16>, vector<16x32xbf16>, vector<32x16xf32> -> vector<32x16xf32>
    %306 = arith.addf %305, %5 : vector<32x16xf32>
    %cst_113 = arith.constant dense<0xFF800000> : vector<32xf32>
    %307 = vector.multi_reduction <maximumf>, %306, %cst_113 [1] : vector<32x16xf32> to vector<32xf32>
    %308 = vector.shape_cast %307 : vector<32xf32> to vector<32x1xf32>
    %309 = vector.broadcast %308 : vector<32x1xf32> to vector<32x16xf32>
    %310 = arith.subf %306, %309 : vector<32x16xf32>
    %311 = math.exp %310 : vector<32x16xf32>
    %cst_114 = arith.constant dense<0.000000e+00> : vector<32xf32>
    %312 = vector.multi_reduction <add>, %311, %cst_114 [1] : vector<32x16xf32> to vector<32xf32>
    %313 = vector.shape_cast %312 : vector<32xf32> to vector<32x1xf32>
    %314 = tpu.reciprocal %313 {approx = true} : vector<32x1xf32> -> vector<32x1xf32>
    %315 = vector.broadcast %314 : vector<32x1xf32> to vector<32x16xf32>
    %316 = arith.mulf %311, %315 : vector<32x16xf32>
    %317 = arith.truncf %316 : vector<32x16xf32> to vector<32x16xbf16>
    %318 = arith.truncf %302 : vector<16x32xf32> to vector<16x32xbf16>
    %cst_115 = arith.constant dense<0.000000e+00> : vector<32x32xf32>
    %319 = tpu.matmul %317, %318, %cst_115 {dimension_numbers = #tpu.dot_dimension_numbers<[1], [0], [0], [1], [0, 0, 1, 1], [], []>} : vector<32x16xbf16>, vector<16x32xbf16>, vector<32x32xf32> -> vector<32x32xf32>
    %320 = vector.extract_strided_slice %319 {offsets = [0, 0], sizes = [16, 32], strides = [1, 1]} : vector<32x32xf32> to vector<16x32xf32>
    %321 = arith.truncf %320 : vector<16x32xf32> to vector<16x32xbf16>
    %c2_116 = arith.constant 2 : index
    %c0_117 = arith.constant 0 : index
    %c0_118 = arith.constant 0 : index
    %322 = vector.load %arg6[%c2_116, %c0_117, %c0_118] : memref<8x128x128xbf16, #tpu.memory_space<vmem>>, vector<1x32x128xbf16>
    %323 = vector.shape_cast %322 : vector<1x32x128xbf16> to vector<32x128xbf16>
    %cst_119 = arith.constant dense<0.000000e+00> : vector<16x128xf32>
    %324 = tpu.matmul %321, %323, %cst_119 {dimension_numbers = #tpu.dot_dimension_numbers<[1], [0], [0], [1], [0, 0, 1, 1], [], []>} : vector<16x32xbf16>, vector<32x128xbf16>, vector<16x128xf32> -> vector<16x128xf32>
    %325 = arith.addf %297, %324 : vector<16x128xf32>
    %326 = vector.extract_strided_slice %319 {offsets = [16, 0], sizes = [16, 32], strides = [1, 1]} : vector<32x32xf32> to vector<16x32xf32>
    %327 = arith.truncf %326 : vector<16x32xf32> to vector<16x32xbf16>
    %c2_120 = arith.constant 2 : index
    %c32_121 = arith.constant 32 : index
    %c0_122 = arith.constant 0 : index
    %328 = vector.load %arg6[%c2_120, %c32_121, %c0_122] : memref<8x128x128xbf16, #tpu.memory_space<vmem>>, vector<1x32x128xbf16>
    %329 = vector.shape_cast %328 : vector<1x32x128xbf16> to vector<32x128xbf16>
    %cst_123 = arith.constant dense<0.000000e+00> : vector<16x128xf32>
    %330 = tpu.matmul %327, %329, %cst_123 {dimension_numbers = #tpu.dot_dimension_numbers<[1], [0], [0], [1], [0, 0, 1, 1], [], []>} : vector<16x32xbf16>, vector<32x128xbf16>, vector<16x128xf32> -> vector<16x128xf32>
    %331 = arith.addf %325, %330 : vector<16x128xf32>
    %332 = vector.extract_strided_slice %293 {offsets = [0, 64], sizes = [16, 32], strides = [1, 1]} : vector<16x128xf32> to vector<16x32xf32>
    %333 = vector.extract_strided_slice %293 {offsets = [0, 96], sizes = [16, 32], strides = [1, 1]} : vector<16x128xf32> to vector<16x32xf32>
    %334 = tpu.concatenate %332, %333 in 0 : vector<16x32xf32>, vector<16x32xf32> -> vector<32x32xf32>
    %335 = vector.extract_strided_slice %296 {offsets = [0, 32], sizes = [16, 32], strides = [1, 1]} : vector<16x64xf32> to vector<16x32xf32>
    %336 = vector.extract_strided_slice %290 {offsets = [0, 32], sizes = [16, 32], strides = [1, 1]} : vector<16x64xf32> to vector<16x32xf32>
    %337 = arith.truncf %334 : vector<32x32xf32> to vector<32x32xbf16>
    %338 = arith.truncf %335 : vector<16x32xf32> to vector<16x32xbf16>
    %cst_124 = arith.constant dense<0.000000e+00> : vector<32x16xf32>
    %339 = tpu.matmul %337, %338, %cst_124 {dimension_numbers = #tpu.dot_dimension_numbers<[1], [1], [0], [0], [0, 0, 1, 0], [], []>} : vector<32x32xbf16>, vector<16x32xbf16>, vector<32x16xf32> -> vector<32x16xf32>
    %340 = arith.addf %339, %5 : vector<32x16xf32>
    %cst_125 = arith.constant dense<0xFF800000> : vector<32xf32>
    %341 = vector.multi_reduction <maximumf>, %340, %cst_125 [1] : vector<32x16xf32> to vector<32xf32>
    %342 = vector.shape_cast %341 : vector<32xf32> to vector<32x1xf32>
    %343 = vector.broadcast %342 : vector<32x1xf32> to vector<32x16xf32>
    %344 = arith.subf %340, %343 : vector<32x16xf32>
    %345 = math.exp %344 : vector<32x16xf32>
    %cst_126 = arith.constant dense<0.000000e+00> : vector<32xf32>
    %346 = vector.multi_reduction <add>, %345, %cst_126 [1] : vector<32x16xf32> to vector<32xf32>
    %347 = vector.shape_cast %346 : vector<32xf32> to vector<32x1xf32>
    %348 = tpu.reciprocal %347 {approx = true} : vector<32x1xf32> -> vector<32x1xf32>
    %349 = vector.broadcast %348 : vector<32x1xf32> to vector<32x16xf32>
    %350 = arith.mulf %345, %349 : vector<32x16xf32>
    %351 = arith.truncf %350 : vector<32x16xf32> to vector<32x16xbf16>
    %352 = arith.truncf %336 : vector<16x32xf32> to vector<16x32xbf16>
    %cst_127 = arith.constant dense<0.000000e+00> : vector<32x32xf32>
    %353 = tpu.matmul %351, %352, %cst_127 {dimension_numbers = #tpu.dot_dimension_numbers<[1], [0], [0], [1], [0, 0, 1, 1], [], []>} : vector<32x16xbf16>, vector<16x32xbf16>, vector<32x32xf32> -> vector<32x32xf32>
    %354 = vector.extract_strided_slice %353 {offsets = [0, 0], sizes = [16, 32], strides = [1, 1]} : vector<32x32xf32> to vector<16x32xf32>
    %355 = arith.truncf %354 : vector<16x32xf32> to vector<16x32xbf16>
    %c2_128 = arith.constant 2 : index
    %c64_129 = arith.constant 64 : index
    %c0_130 = arith.constant 0 : index
    %356 = vector.load %arg6[%c2_128, %c64_129, %c0_130] : memref<8x128x128xbf16, #tpu.memory_space<vmem>>, vector<1x32x128xbf16>
    %357 = vector.shape_cast %356 : vector<1x32x128xbf16> to vector<32x128xbf16>
    %cst_131 = arith.constant dense<0.000000e+00> : vector<16x128xf32>
    %358 = tpu.matmul %355, %357, %cst_131 {dimension_numbers = #tpu.dot_dimension_numbers<[1], [0], [0], [1], [0, 0, 1, 1], [], []>} : vector<16x32xbf16>, vector<32x128xbf16>, vector<16x128xf32> -> vector<16x128xf32>
    %359 = arith.addf %331, %358 : vector<16x128xf32>
    %360 = vector.extract_strided_slice %353 {offsets = [16, 0], sizes = [16, 32], strides = [1, 1]} : vector<32x32xf32> to vector<16x32xf32>
    %361 = arith.truncf %360 : vector<16x32xf32> to vector<16x32xbf16>
    %c2_132 = arith.constant 2 : index
    %c96_133 = arith.constant 96 : index
    %c0_134 = arith.constant 0 : index
    %362 = vector.load %arg6[%c2_132, %c96_133, %c0_134] : memref<8x128x128xbf16, #tpu.memory_space<vmem>>, vector<1x32x128xbf16>
    %363 = vector.shape_cast %362 : vector<1x32x128xbf16> to vector<32x128xbf16>
    %cst_135 = arith.constant dense<0.000000e+00> : vector<16x128xf32>
    %364 = tpu.matmul %361, %363, %cst_135 {dimension_numbers = #tpu.dot_dimension_numbers<[1], [0], [0], [1], [0, 0, 1, 1], [], []>} : vector<16x32xbf16>, vector<32x128xbf16>, vector<16x128xf32> -> vector<16x128xf32>
    %365 = arith.addf %359, %364 : vector<16x128xf32>
    %366 = arith.addf %267, %365 : vector<16x128xf32>
    %c2_136 = arith.constant 2 : index
    %c0_137 = arith.constant 0 : index
    %c0_138 = arith.constant 0 : index
    %367 = vector.load %arg7[%c2_136, %c0_137, %c0_138] : memref<8x1x128xf32, #tpu.memory_space<vmem>>, vector<1x1x128xf32>
    %368 = vector.shape_cast %367 : vector<1x1x128xf32> to vector<1x128xf32>
    %369 = arith.mulf %366, %366 : vector<16x128xf32>
    %cst_139 = arith.constant dense<0.000000e+00> : vector<16xf32>
    %370 = vector.multi_reduction <add>, %369, %cst_139 [1] : vector<16x128xf32> to vector<16xf32>
    %371 = vector.shape_cast %370 : vector<16xf32> to vector<16x1xf32>
    %cst_140 = arith.constant 1.280000e+02 : f32
    %372 = vector.broadcast %cst_140 : f32 to vector<16x1xf32>
    %373 = arith.divf %371, %372 : vector<16x1xf32>
    %cst_141 = arith.constant 9.99999974E-6 : f32
    %374 = vector.broadcast %cst_141 : f32 to vector<16x1xf32>
    %375 = arith.addf %373, %374 : vector<16x1xf32>
    %376 = math.rsqrt %375 : vector<16x1xf32>
    %377 = vector.broadcast %376 : vector<16x1xf32> to vector<16x128xf32>
    %378 = arith.mulf %366, %377 : vector<16x128xf32>
    %379 = vector.broadcast %368 : vector<1x128xf32> to vector<16x128xf32>
    %380 = arith.mulf %378, %379 : vector<16x128xf32>
    %381 = arith.truncf %380 : vector<16x128xf32> to vector<16x128xbf16>
    %c2_142 = arith.constant 2 : index
    %c0_143 = arith.constant 0 : index
    %c0_144 = arith.constant 0 : index
    %382 = vector.load %arg8[%c2_142, %c0_143, %c0_144] : memref<8x128x512xbf16, #tpu.memory_space<vmem>>, vector<1x128x512xbf16>
    %383 = vector.shape_cast %382 : vector<1x128x512xbf16> to vector<128x512xbf16>
    %cst_145 = arith.constant dense<0.000000e+00> : vector<16x512xf32>
    %384 = tpu.matmul %381, %383, %cst_145 {dimension_numbers = #tpu.dot_dimension_numbers<[1], [0], [0], [1], [0, 0, 1, 1], [], []>} : vector<16x128xbf16>, vector<128x512xbf16>, vector<16x512xf32> -> vector<16x512xf32>
    %385 = vector.extract_strided_slice %384 {offsets = [0, 0], sizes = [16, 256], strides = [1, 1]} : vector<16x512xf32> to vector<16x256xf32>
    %386 = vector.extract_strided_slice %384 {offsets = [0, 256], sizes = [16, 256], strides = [1, 1]} : vector<16x512xf32> to vector<16x256xf32>
    %387 = arith.negf %385 : vector<16x256xf32>
    %388 = math.exp %387 : vector<16x256xf32>
    %cst_146 = arith.constant 1.000000e+00 : f32
    %389 = vector.broadcast %cst_146 : f32 to vector<16x256xf32>
    %390 = arith.addf %389, %388 : vector<16x256xf32>
    %391 = arith.divf %389, %390 : vector<16x256xf32>
    %392 = arith.mulf %385, %391 : vector<16x256xf32>
    %393 = arith.mulf %392, %386 : vector<16x256xf32>
    %394 = arith.truncf %393 : vector<16x256xf32> to vector<16x256xbf16>
    %c2_147 = arith.constant 2 : index
    %c0_148 = arith.constant 0 : index
    %c0_149 = arith.constant 0 : index
    %395 = vector.load %arg9[%c2_147, %c0_148, %c0_149] : memref<8x256x128xbf16, #tpu.memory_space<vmem>>, vector<1x256x128xbf16>
    %396 = vector.shape_cast %395 : vector<1x256x128xbf16> to vector<256x128xbf16>
    %cst_150 = arith.constant dense<0.000000e+00> : vector<16x128xf32>
    %397 = tpu.matmul %394, %396, %cst_150 {dimension_numbers = #tpu.dot_dimension_numbers<[1], [0], [0], [1], [0, 0, 1, 1], [], []>} : vector<16x256xbf16>, vector<256x128xbf16>, vector<16x128xf32> -> vector<16x128xf32>
    %398 = arith.addf %366, %397 : vector<16x128xf32>
    %c3 = arith.constant 3 : index
    %c0_151 = arith.constant 0 : index
    %c0_152 = arith.constant 0 : index
    %399 = vector.load %arg4[%c3, %c0_151, %c0_152] : memref<8x1x128xf32, #tpu.memory_space<vmem>>, vector<1x1x128xf32>
    %400 = vector.shape_cast %399 : vector<1x1x128xf32> to vector<1x128xf32>
    %401 = arith.mulf %398, %398 : vector<16x128xf32>
    %cst_153 = arith.constant dense<0.000000e+00> : vector<16xf32>
    %402 = vector.multi_reduction <add>, %401, %cst_153 [1] : vector<16x128xf32> to vector<16xf32>
    %403 = vector.shape_cast %402 : vector<16xf32> to vector<16x1xf32>
    %cst_154 = arith.constant 1.280000e+02 : f32
    %404 = vector.broadcast %cst_154 : f32 to vector<16x1xf32>
    %405 = arith.divf %403, %404 : vector<16x1xf32>
    %cst_155 = arith.constant 9.99999974E-6 : f32
    %406 = vector.broadcast %cst_155 : f32 to vector<16x1xf32>
    %407 = arith.addf %405, %406 : vector<16x1xf32>
    %408 = math.rsqrt %407 : vector<16x1xf32>
    %409 = vector.broadcast %408 : vector<16x1xf32> to vector<16x128xf32>
    %410 = arith.mulf %398, %409 : vector<16x128xf32>
    %411 = vector.broadcast %400 : vector<1x128xf32> to vector<16x128xf32>
    %412 = arith.mulf %410, %411 : vector<16x128xf32>
    %413 = arith.truncf %412 : vector<16x128xf32> to vector<16x128xbf16>
    %c3_156 = arith.constant 3 : index
    %c0_157 = arith.constant 0 : index
    %c0_158 = arith.constant 0 : index
    %414 = vector.load %arg5[%c3_156, %c0_157, %c0_158] : memref<8x128x448xbf16, #tpu.memory_space<vmem>>, vector<1x128x448xbf16>
    %415 = vector.shape_cast %414 : vector<1x128x448xbf16> to vector<128x448xbf16>
    %cst_159 = arith.constant dense<0.000000e+00> : vector<16x448xf32>
    %416 = tpu.matmul %413, %415, %cst_159 {dimension_numbers = #tpu.dot_dimension_numbers<[1], [0], [0], [1], [0, 0, 1, 1], [], []>} : vector<16x128xbf16>, vector<128x448xbf16>, vector<16x448xf32> -> vector<16x448xf32>
    %417 = vector.extract_strided_slice %416 {offsets = [0, 0], sizes = [16, 128], strides = [1, 1]} : vector<16x448xf32> to vector<16x128xf32>
    %418 = vector.extract_strided_slice %416 {offsets = [0, 128], sizes = [16, 128], strides = [1, 1]} : vector<16x448xf32> to vector<16x128xf32>
    %419 = vector.extract_strided_slice %416 {offsets = [0, 256], sizes = [16, 64], strides = [1, 1]} : vector<16x448xf32> to vector<16x64xf32>
    %420 = vector.extract_strided_slice %416 {offsets = [0, 320], sizes = [16, 64], strides = [1, 1]} : vector<16x448xf32> to vector<16x64xf32>
    %421 = vector.extract_strided_slice %416 {offsets = [0, 384], sizes = [16, 64], strides = [1, 1]} : vector<16x448xf32> to vector<16x64xf32>
    %422 = arith.mulf %417, %1 : vector<16x128xf32>
    %423 = arith.mulf %418, %2 : vector<16x128xf32>
    %424 = arith.addf %422, %423 : vector<16x128xf32>
    %425 = arith.mulf %419, %3 : vector<16x64xf32>
    %426 = arith.mulf %420, %4 : vector<16x64xf32>
    %427 = arith.addf %425, %426 : vector<16x64xf32>
    %cst_160 = arith.constant 0.000000e+00 : f32
    %428 = vector.broadcast %cst_160 : f32 to vector<16x128xf32>
    %429 = vector.extract_strided_slice %424 {offsets = [0, 0], sizes = [16, 32], strides = [1, 1]} : vector<16x128xf32> to vector<16x32xf32>
    %430 = vector.extract_strided_slice %424 {offsets = [0, 32], sizes = [16, 32], strides = [1, 1]} : vector<16x128xf32> to vector<16x32xf32>
    %431 = tpu.concatenate %429, %430 in 0 : vector<16x32xf32>, vector<16x32xf32> -> vector<32x32xf32>
    %432 = vector.extract_strided_slice %427 {offsets = [0, 0], sizes = [16, 32], strides = [1, 1]} : vector<16x64xf32> to vector<16x32xf32>
    %433 = vector.extract_strided_slice %421 {offsets = [0, 0], sizes = [16, 32], strides = [1, 1]} : vector<16x64xf32> to vector<16x32xf32>
    %434 = arith.truncf %431 : vector<32x32xf32> to vector<32x32xbf16>
    %435 = arith.truncf %432 : vector<16x32xf32> to vector<16x32xbf16>
    %cst_161 = arith.constant dense<0.000000e+00> : vector<32x16xf32>
    %436 = tpu.matmul %434, %435, %cst_161 {dimension_numbers = #tpu.dot_dimension_numbers<[1], [1], [0], [0], [0, 0, 1, 0], [], []>} : vector<32x32xbf16>, vector<16x32xbf16>, vector<32x16xf32> -> vector<32x16xf32>
    %437 = arith.addf %436, %5 : vector<32x16xf32>
    %cst_162 = arith.constant dense<0xFF800000> : vector<32xf32>
    %438 = vector.multi_reduction <maximumf>, %437, %cst_162 [1] : vector<32x16xf32> to vector<32xf32>
    %439 = vector.shape_cast %438 : vector<32xf32> to vector<32x1xf32>
    %440 = vector.broadcast %439 : vector<32x1xf32> to vector<32x16xf32>
    %441 = arith.subf %437, %440 : vector<32x16xf32>
    %442 = math.exp %441 : vector<32x16xf32>
    %cst_163 = arith.constant dense<0.000000e+00> : vector<32xf32>
    %443 = vector.multi_reduction <add>, %442, %cst_163 [1] : vector<32x16xf32> to vector<32xf32>
    %444 = vector.shape_cast %443 : vector<32xf32> to vector<32x1xf32>
    %445 = tpu.reciprocal %444 {approx = true} : vector<32x1xf32> -> vector<32x1xf32>
    %446 = vector.broadcast %445 : vector<32x1xf32> to vector<32x16xf32>
    %447 = arith.mulf %442, %446 : vector<32x16xf32>
    %448 = arith.truncf %447 : vector<32x16xf32> to vector<32x16xbf16>
    %449 = arith.truncf %433 : vector<16x32xf32> to vector<16x32xbf16>
    %cst_164 = arith.constant dense<0.000000e+00> : vector<32x32xf32>
    %450 = tpu.matmul %448, %449, %cst_164 {dimension_numbers = #tpu.dot_dimension_numbers<[1], [0], [0], [1], [0, 0, 1, 1], [], []>} : vector<32x16xbf16>, vector<16x32xbf16>, vector<32x32xf32> -> vector<32x32xf32>
    %451 = vector.extract_strided_slice %450 {offsets = [0, 0], sizes = [16, 32], strides = [1, 1]} : vector<32x32xf32> to vector<16x32xf32>
    %452 = arith.truncf %451 : vector<16x32xf32> to vector<16x32xbf16>
    %c3_165 = arith.constant 3 : index
    %c0_166 = arith.constant 0 : index
    %c0_167 = arith.constant 0 : index
    %453 = vector.load %arg6[%c3_165, %c0_166, %c0_167] : memref<8x128x128xbf16, #tpu.memory_space<vmem>>, vector<1x32x128xbf16>
    %454 = vector.shape_cast %453 : vector<1x32x128xbf16> to vector<32x128xbf16>
    %cst_168 = arith.constant dense<0.000000e+00> : vector<16x128xf32>
    %455 = tpu.matmul %452, %454, %cst_168 {dimension_numbers = #tpu.dot_dimension_numbers<[1], [0], [0], [1], [0, 0, 1, 1], [], []>} : vector<16x32xbf16>, vector<32x128xbf16>, vector<16x128xf32> -> vector<16x128xf32>
    %456 = arith.addf %428, %455 : vector<16x128xf32>
    %457 = vector.extract_strided_slice %450 {offsets = [16, 0], sizes = [16, 32], strides = [1, 1]} : vector<32x32xf32> to vector<16x32xf32>
    %458 = arith.truncf %457 : vector<16x32xf32> to vector<16x32xbf16>
    %c3_169 = arith.constant 3 : index
    %c32_170 = arith.constant 32 : index
    %c0_171 = arith.constant 0 : index
    %459 = vector.load %arg6[%c3_169, %c32_170, %c0_171] : memref<8x128x128xbf16, #tpu.memory_space<vmem>>, vector<1x32x128xbf16>
    %460 = vector.shape_cast %459 : vector<1x32x128xbf16> to vector<32x128xbf16>
    %cst_172 = arith.constant dense<0.000000e+00> : vector<16x128xf32>
    %461 = tpu.matmul %458, %460, %cst_172 {dimension_numbers = #tpu.dot_dimension_numbers<[1], [0], [0], [1], [0, 0, 1, 1], [], []>} : vector<16x32xbf16>, vector<32x128xbf16>, vector<16x128xf32> -> vector<16x128xf32>
    %462 = arith.addf %456, %461 : vector<16x128xf32>
    %463 = vector.extract_strided_slice %424 {offsets = [0, 64], sizes = [16, 32], strides = [1, 1]} : vector<16x128xf32> to vector<16x32xf32>
    %464 = vector.extract_strided_slice %424 {offsets = [0, 96], sizes = [16, 32], strides = [1, 1]} : vector<16x128xf32> to vector<16x32xf32>
    %465 = tpu.concatenate %463, %464 in 0 : vector<16x32xf32>, vector<16x32xf32> -> vector<32x32xf32>
    %466 = vector.extract_strided_slice %427 {offsets = [0, 32], sizes = [16, 32], strides = [1, 1]} : vector<16x64xf32> to vector<16x32xf32>
    %467 = vector.extract_strided_slice %421 {offsets = [0, 32], sizes = [16, 32], strides = [1, 1]} : vector<16x64xf32> to vector<16x32xf32>
    %468 = arith.truncf %465 : vector<32x32xf32> to vector<32x32xbf16>
    %469 = arith.truncf %466 : vector<16x32xf32> to vector<16x32xbf16>
    %cst_173 = arith.constant dense<0.000000e+00> : vector<32x16xf32>
    %470 = tpu.matmul %468, %469, %cst_173 {dimension_numbers = #tpu.dot_dimension_numbers<[1], [1], [0], [0], [0, 0, 1, 0], [], []>} : vector<32x32xbf16>, vector<16x32xbf16>, vector<32x16xf32> -> vector<32x16xf32>
    %471 = arith.addf %470, %5 : vector<32x16xf32>
    %cst_174 = arith.constant dense<0xFF800000> : vector<32xf32>
    %472 = vector.multi_reduction <maximumf>, %471, %cst_174 [1] : vector<32x16xf32> to vector<32xf32>
    %473 = vector.shape_cast %472 : vector<32xf32> to vector<32x1xf32>
    %474 = vector.broadcast %473 : vector<32x1xf32> to vector<32x16xf32>
    %475 = arith.subf %471, %474 : vector<32x16xf32>
    %476 = math.exp %475 : vector<32x16xf32>
    %cst_175 = arith.constant dense<0.000000e+00> : vector<32xf32>
    %477 = vector.multi_reduction <add>, %476, %cst_175 [1] : vector<32x16xf32> to vector<32xf32>
    %478 = vector.shape_cast %477 : vector<32xf32> to vector<32x1xf32>
    %479 = tpu.reciprocal %478 {approx = true} : vector<32x1xf32> -> vector<32x1xf32>
    %480 = vector.broadcast %479 : vector<32x1xf32> to vector<32x16xf32>
    %481 = arith.mulf %476, %480 : vector<32x16xf32>
    %482 = arith.truncf %481 : vector<32x16xf32> to vector<32x16xbf16>
    %483 = arith.truncf %467 : vector<16x32xf32> to vector<16x32xbf16>
    %cst_176 = arith.constant dense<0.000000e+00> : vector<32x32xf32>
    %484 = tpu.matmul %482, %483, %cst_176 {dimension_numbers = #tpu.dot_dimension_numbers<[1], [0], [0], [1], [0, 0, 1, 1], [], []>} : vector<32x16xbf16>, vector<16x32xbf16>, vector<32x32xf32> -> vector<32x32xf32>
    %485 = vector.extract_strided_slice %484 {offsets = [0, 0], sizes = [16, 32], strides = [1, 1]} : vector<32x32xf32> to vector<16x32xf32>
    %486 = arith.truncf %485 : vector<16x32xf32> to vector<16x32xbf16>
    %c3_177 = arith.constant 3 : index
    %c64_178 = arith.constant 64 : index
    %c0_179 = arith.constant 0 : index
    %487 = vector.load %arg6[%c3_177, %c64_178, %c0_179] : memref<8x128x128xbf16, #tpu.memory_space<vmem>>, vector<1x32x128xbf16>
    %488 = vector.shape_cast %487 : vector<1x32x128xbf16> to vector<32x128xbf16>
    %cst_180 = arith.constant dense<0.000000e+00> : vector<16x128xf32>
    %489 = tpu.matmul %486, %488, %cst_180 {dimension_numbers = #tpu.dot_dimension_numbers<[1], [0], [0], [1], [0, 0, 1, 1], [], []>} : vector<16x32xbf16>, vector<32x128xbf16>, vector<16x128xf32> -> vector<16x128xf32>
    %490 = arith.addf %462, %489 : vector<16x128xf32>
    %491 = vector.extract_strided_slice %484 {offsets = [16, 0], sizes = [16, 32], strides = [1, 1]} : vector<32x32xf32> to vector<16x32xf32>
    %492 = arith.truncf %491 : vector<16x32xf32> to vector<16x32xbf16>
    %c3_181 = arith.constant 3 : index
    %c96_182 = arith.constant 96 : index
    %c0_183 = arith.constant 0 : index
    %493 = vector.load %arg6[%c3_181, %c96_182, %c0_183] : memref<8x128x128xbf16, #tpu.memory_space<vmem>>, vector<1x32x128xbf16>
    %494 = vector.shape_cast %493 : vector<1x32x128xbf16> to vector<32x128xbf16>
    %cst_184 = arith.constant dense<0.000000e+00> : vector<16x128xf32>
    %495 = tpu.matmul %492, %494, %cst_184 {dimension_numbers = #tpu.dot_dimension_numbers<[1], [0], [0], [1], [0, 0, 1, 1], [], []>} : vector<16x32xbf16>, vector<32x128xbf16>, vector<16x128xf32> -> vector<16x128xf32>
    %496 = arith.addf %490, %495 : vector<16x128xf32>
    %497 = arith.addf %398, %496 : vector<16x128xf32>
    %c3_185 = arith.constant 3 : index
    %c0_186 = arith.constant 0 : index
    %c0_187 = arith.constant 0 : index
    %498 = vector.load %arg7[%c3_185, %c0_186, %c0_187] : memref<8x1x128xf32, #tpu.memory_space<vmem>>, vector<1x1x128xf32>
    %499 = vector.shape_cast %498 : vector<1x1x128xf32> to vector<1x128xf32>
    %500 = arith.mulf %497, %497 : vector<16x128xf32>
    %cst_188 = arith.constant dense<0.000000e+00> : vector<16xf32>
    %501 = vector.multi_reduction <add>, %500, %cst_188 [1] : vector<16x128xf32> to vector<16xf32>
    %502 = vector.shape_cast %501 : vector<16xf32> to vector<16x1xf32>
    %cst_189 = arith.constant 1.280000e+02 : f32
    %503 = vector.broadcast %cst_189 : f32 to vector<16x1xf32>
    %504 = arith.divf %502, %503 : vector<16x1xf32>
    %cst_190 = arith.constant 9.99999974E-6 : f32
    %505 = vector.broadcast %cst_190 : f32 to vector<16x1xf32>
    %506 = arith.addf %504, %505 : vector<16x1xf32>
    %507 = math.rsqrt %506 : vector<16x1xf32>
    %508 = vector.broadcast %507 : vector<16x1xf32> to vector<16x128xf32>
    %509 = arith.mulf %497, %508 : vector<16x128xf32>
    %510 = vector.broadcast %499 : vector<1x128xf32> to vector<16x128xf32>
    %511 = arith.mulf %509, %510 : vector<16x128xf32>
    %512 = arith.truncf %511 : vector<16x128xf32> to vector<16x128xbf16>
    %c3_191 = arith.constant 3 : index
    %c0_192 = arith.constant 0 : index
    %c0_193 = arith.constant 0 : index
    %513 = vector.load %arg8[%c3_191, %c0_192, %c0_193] : memref<8x128x512xbf16, #tpu.memory_space<vmem>>, vector<1x128x512xbf16>
    %514 = vector.shape_cast %513 : vector<1x128x512xbf16> to vector<128x512xbf16>
    %cst_194 = arith.constant dense<0.000000e+00> : vector<16x512xf32>
    %515 = tpu.matmul %512, %514, %cst_194 {dimension_numbers = #tpu.dot_dimension_numbers<[1], [0], [0], [1], [0, 0, 1, 1], [], []>} : vector<16x128xbf16>, vector<128x512xbf16>, vector<16x512xf32> -> vector<16x512xf32>
    %516 = vector.extract_strided_slice %515 {offsets = [0, 0], sizes = [16, 256], strides = [1, 1]} : vector<16x512xf32> to vector<16x256xf32>
    %517 = vector.extract_strided_slice %515 {offsets = [0, 256], sizes = [16, 256], strides = [1, 1]} : vector<16x512xf32> to vector<16x256xf32>
    %518 = arith.negf %516 : vector<16x256xf32>
    %519 = math.exp %518 : vector<16x256xf32>
    %cst_195 = arith.constant 1.000000e+00 : f32
    %520 = vector.broadcast %cst_195 : f32 to vector<16x256xf32>
    %521 = arith.addf %520, %519 : vector<16x256xf32>
    %522 = arith.divf %520, %521 : vector<16x256xf32>
    %523 = arith.mulf %516, %522 : vector<16x256xf32>
    %524 = arith.mulf %523, %517 : vector<16x256xf32>
    %525 = arith.truncf %524 : vector<16x256xf32> to vector<16x256xbf16>
    %c3_196 = arith.constant 3 : index
    %c0_197 = arith.constant 0 : index
    %c0_198 = arith.constant 0 : index
    %526 = vector.load %arg9[%c3_196, %c0_197, %c0_198] : memref<8x256x128xbf16, #tpu.memory_space<vmem>>, vector<1x256x128xbf16>
    %527 = vector.shape_cast %526 : vector<1x256x128xbf16> to vector<256x128xbf16>
    %cst_199 = arith.constant dense<0.000000e+00> : vector<16x128xf32>
    %528 = tpu.matmul %525, %527, %cst_199 {dimension_numbers = #tpu.dot_dimension_numbers<[1], [0], [0], [1], [0, 0, 1, 1], [], []>} : vector<16x256xbf16>, vector<256x128xbf16>, vector<16x128xf32> -> vector<16x128xf32>
    %529 = arith.addf %497, %528 : vector<16x128xf32>
    %c4 = arith.constant 4 : index
    %c0_200 = arith.constant 0 : index
    %c0_201 = arith.constant 0 : index
    %530 = vector.load %arg4[%c4, %c0_200, %c0_201] : memref<8x1x128xf32, #tpu.memory_space<vmem>>, vector<1x1x128xf32>
    %531 = vector.shape_cast %530 : vector<1x1x128xf32> to vector<1x128xf32>
    %532 = arith.mulf %529, %529 : vector<16x128xf32>
    %cst_202 = arith.constant dense<0.000000e+00> : vector<16xf32>
    %533 = vector.multi_reduction <add>, %532, %cst_202 [1] : vector<16x128xf32> to vector<16xf32>
    %534 = vector.shape_cast %533 : vector<16xf32> to vector<16x1xf32>
    %cst_203 = arith.constant 1.280000e+02 : f32
    %535 = vector.broadcast %cst_203 : f32 to vector<16x1xf32>
    %536 = arith.divf %534, %535 : vector<16x1xf32>
    %cst_204 = arith.constant 9.99999974E-6 : f32
    %537 = vector.broadcast %cst_204 : f32 to vector<16x1xf32>
    %538 = arith.addf %536, %537 : vector<16x1xf32>
    %539 = math.rsqrt %538 : vector<16x1xf32>
    %540 = vector.broadcast %539 : vector<16x1xf32> to vector<16x128xf32>
    %541 = arith.mulf %529, %540 : vector<16x128xf32>
    %542 = vector.broadcast %531 : vector<1x128xf32> to vector<16x128xf32>
    %543 = arith.mulf %541, %542 : vector<16x128xf32>
    %544 = arith.truncf %543 : vector<16x128xf32> to vector<16x128xbf16>
    %c4_205 = arith.constant 4 : index
    %c0_206 = arith.constant 0 : index
    %c0_207 = arith.constant 0 : index
    %545 = vector.load %arg5[%c4_205, %c0_206, %c0_207] : memref<8x128x448xbf16, #tpu.memory_space<vmem>>, vector<1x128x448xbf16>
    %546 = vector.shape_cast %545 : vector<1x128x448xbf16> to vector<128x448xbf16>
    %cst_208 = arith.constant dense<0.000000e+00> : vector<16x448xf32>
    %547 = tpu.matmul %544, %546, %cst_208 {dimension_numbers = #tpu.dot_dimension_numbers<[1], [0], [0], [1], [0, 0, 1, 1], [], []>} : vector<16x128xbf16>, vector<128x448xbf16>, vector<16x448xf32> -> vector<16x448xf32>
    %548 = vector.extract_strided_slice %547 {offsets = [0, 0], sizes = [16, 128], strides = [1, 1]} : vector<16x448xf32> to vector<16x128xf32>
    %549 = vector.extract_strided_slice %547 {offsets = [0, 128], sizes = [16, 128], strides = [1, 1]} : vector<16x448xf32> to vector<16x128xf32>
    %550 = vector.extract_strided_slice %547 {offsets = [0, 256], sizes = [16, 64], strides = [1, 1]} : vector<16x448xf32> to vector<16x64xf32>
    %551 = vector.extract_strided_slice %547 {offsets = [0, 320], sizes = [16, 64], strides = [1, 1]} : vector<16x448xf32> to vector<16x64xf32>
    %552 = vector.extract_strided_slice %547 {offsets = [0, 384], sizes = [16, 64], strides = [1, 1]} : vector<16x448xf32> to vector<16x64xf32>
    %553 = arith.mulf %548, %1 : vector<16x128xf32>
    %554 = arith.mulf %549, %2 : vector<16x128xf32>
    %555 = arith.addf %553, %554 : vector<16x128xf32>
    %556 = arith.mulf %550, %3 : vector<16x64xf32>
    %557 = arith.mulf %551, %4 : vector<16x64xf32>
    %558 = arith.addf %556, %557 : vector<16x64xf32>
    %cst_209 = arith.constant 0.000000e+00 : f32
    %559 = vector.broadcast %cst_209 : f32 to vector<16x128xf32>
    %560 = vector.extract_strided_slice %555 {offsets = [0, 0], sizes = [16, 32], strides = [1, 1]} : vector<16x128xf32> to vector<16x32xf32>
    %561 = vector.extract_strided_slice %555 {offsets = [0, 32], sizes = [16, 32], strides = [1, 1]} : vector<16x128xf32> to vector<16x32xf32>
    %562 = tpu.concatenate %560, %561 in 0 : vector<16x32xf32>, vector<16x32xf32> -> vector<32x32xf32>
    %563 = vector.extract_strided_slice %558 {offsets = [0, 0], sizes = [16, 32], strides = [1, 1]} : vector<16x64xf32> to vector<16x32xf32>
    %564 = vector.extract_strided_slice %552 {offsets = [0, 0], sizes = [16, 32], strides = [1, 1]} : vector<16x64xf32> to vector<16x32xf32>
    %565 = arith.truncf %562 : vector<32x32xf32> to vector<32x32xbf16>
    %566 = arith.truncf %563 : vector<16x32xf32> to vector<16x32xbf16>
    %cst_210 = arith.constant dense<0.000000e+00> : vector<32x16xf32>
    %567 = tpu.matmul %565, %566, %cst_210 {dimension_numbers = #tpu.dot_dimension_numbers<[1], [1], [0], [0], [0, 0, 1, 0], [], []>} : vector<32x32xbf16>, vector<16x32xbf16>, vector<32x16xf32> -> vector<32x16xf32>
    %568 = arith.addf %567, %5 : vector<32x16xf32>
    %cst_211 = arith.constant dense<0xFF800000> : vector<32xf32>
    %569 = vector.multi_reduction <maximumf>, %568, %cst_211 [1] : vector<32x16xf32> to vector<32xf32>
    %570 = vector.shape_cast %569 : vector<32xf32> to vector<32x1xf32>
    %571 = vector.broadcast %570 : vector<32x1xf32> to vector<32x16xf32>
    %572 = arith.subf %568, %571 : vector<32x16xf32>
    %573 = math.exp %572 : vector<32x16xf32>
    %cst_212 = arith.constant dense<0.000000e+00> : vector<32xf32>
    %574 = vector.multi_reduction <add>, %573, %cst_212 [1] : vector<32x16xf32> to vector<32xf32>
    %575 = vector.shape_cast %574 : vector<32xf32> to vector<32x1xf32>
    %576 = tpu.reciprocal %575 {approx = true} : vector<32x1xf32> -> vector<32x1xf32>
    %577 = vector.broadcast %576 : vector<32x1xf32> to vector<32x16xf32>
    %578 = arith.mulf %573, %577 : vector<32x16xf32>
    %579 = arith.truncf %578 : vector<32x16xf32> to vector<32x16xbf16>
    %580 = arith.truncf %564 : vector<16x32xf32> to vector<16x32xbf16>
    %cst_213 = arith.constant dense<0.000000e+00> : vector<32x32xf32>
    %581 = tpu.matmul %579, %580, %cst_213 {dimension_numbers = #tpu.dot_dimension_numbers<[1], [0], [0], [1], [0, 0, 1, 1], [], []>} : vector<32x16xbf16>, vector<16x32xbf16>, vector<32x32xf32> -> vector<32x32xf32>
    %582 = vector.extract_strided_slice %581 {offsets = [0, 0], sizes = [16, 32], strides = [1, 1]} : vector<32x32xf32> to vector<16x32xf32>
    %583 = arith.truncf %582 : vector<16x32xf32> to vector<16x32xbf16>
    %c4_214 = arith.constant 4 : index
    %c0_215 = arith.constant 0 : index
    %c0_216 = arith.constant 0 : index
    %584 = vector.load %arg6[%c4_214, %c0_215, %c0_216] : memref<8x128x128xbf16, #tpu.memory_space<vmem>>, vector<1x32x128xbf16>
    %585 = vector.shape_cast %584 : vector<1x32x128xbf16> to vector<32x128xbf16>
    %cst_217 = arith.constant dense<0.000000e+00> : vector<16x128xf32>
    %586 = tpu.matmul %583, %585, %cst_217 {dimension_numbers = #tpu.dot_dimension_numbers<[1], [0], [0], [1], [0, 0, 1, 1], [], []>} : vector<16x32xbf16>, vector<32x128xbf16>, vector<16x128xf32> -> vector<16x128xf32>
    %587 = arith.addf %559, %586 : vector<16x128xf32>
    %588 = vector.extract_strided_slice %581 {offsets = [16, 0], sizes = [16, 32], strides = [1, 1]} : vector<32x32xf32> to vector<16x32xf32>
    %589 = arith.truncf %588 : vector<16x32xf32> to vector<16x32xbf16>
    %c4_218 = arith.constant 4 : index
    %c32_219 = arith.constant 32 : index
    %c0_220 = arith.constant 0 : index
    %590 = vector.load %arg6[%c4_218, %c32_219, %c0_220] : memref<8x128x128xbf16, #tpu.memory_space<vmem>>, vector<1x32x128xbf16>
    %591 = vector.shape_cast %590 : vector<1x32x128xbf16> to vector<32x128xbf16>
    %cst_221 = arith.constant dense<0.000000e+00> : vector<16x128xf32>
    %592 = tpu.matmul %589, %591, %cst_221 {dimension_numbers = #tpu.dot_dimension_numbers<[1], [0], [0], [1], [0, 0, 1, 1], [], []>} : vector<16x32xbf16>, vector<32x128xbf16>, vector<16x128xf32> -> vector<16x128xf32>
    %593 = arith.addf %587, %592 : vector<16x128xf32>
    %594 = vector.extract_strided_slice %555 {offsets = [0, 64], sizes = [16, 32], strides = [1, 1]} : vector<16x128xf32> to vector<16x32xf32>
    %595 = vector.extract_strided_slice %555 {offsets = [0, 96], sizes = [16, 32], strides = [1, 1]} : vector<16x128xf32> to vector<16x32xf32>
    %596 = tpu.concatenate %594, %595 in 0 : vector<16x32xf32>, vector<16x32xf32> -> vector<32x32xf32>
    %597 = vector.extract_strided_slice %558 {offsets = [0, 32], sizes = [16, 32], strides = [1, 1]} : vector<16x64xf32> to vector<16x32xf32>
    %598 = vector.extract_strided_slice %552 {offsets = [0, 32], sizes = [16, 32], strides = [1, 1]} : vector<16x64xf32> to vector<16x32xf32>
    %599 = arith.truncf %596 : vector<32x32xf32> to vector<32x32xbf16>
    %600 = arith.truncf %597 : vector<16x32xf32> to vector<16x32xbf16>
    %cst_222 = arith.constant dense<0.000000e+00> : vector<32x16xf32>
    %601 = tpu.matmul %599, %600, %cst_222 {dimension_numbers = #tpu.dot_dimension_numbers<[1], [1], [0], [0], [0, 0, 1, 0], [], []>} : vector<32x32xbf16>, vector<16x32xbf16>, vector<32x16xf32> -> vector<32x16xf32>
    %602 = arith.addf %601, %5 : vector<32x16xf32>
    %cst_223 = arith.constant dense<0xFF800000> : vector<32xf32>
    %603 = vector.multi_reduction <maximumf>, %602, %cst_223 [1] : vector<32x16xf32> to vector<32xf32>
    %604 = vector.shape_cast %603 : vector<32xf32> to vector<32x1xf32>
    %605 = vector.broadcast %604 : vector<32x1xf32> to vector<32x16xf32>
    %606 = arith.subf %602, %605 : vector<32x16xf32>
    %607 = math.exp %606 : vector<32x16xf32>
    %cst_224 = arith.constant dense<0.000000e+00> : vector<32xf32>
    %608 = vector.multi_reduction <add>, %607, %cst_224 [1] : vector<32x16xf32> to vector<32xf32>
    %609 = vector.shape_cast %608 : vector<32xf32> to vector<32x1xf32>
    %610 = tpu.reciprocal %609 {approx = true} : vector<32x1xf32> -> vector<32x1xf32>
    %611 = vector.broadcast %610 : vector<32x1xf32> to vector<32x16xf32>
    %612 = arith.mulf %607, %611 : vector<32x16xf32>
    %613 = arith.truncf %612 : vector<32x16xf32> to vector<32x16xbf16>
    %614 = arith.truncf %598 : vector<16x32xf32> to vector<16x32xbf16>
    %cst_225 = arith.constant dense<0.000000e+00> : vector<32x32xf32>
    %615 = tpu.matmul %613, %614, %cst_225 {dimension_numbers = #tpu.dot_dimension_numbers<[1], [0], [0], [1], [0, 0, 1, 1], [], []>} : vector<32x16xbf16>, vector<16x32xbf16>, vector<32x32xf32> -> vector<32x32xf32>
    %616 = vector.extract_strided_slice %615 {offsets = [0, 0], sizes = [16, 32], strides = [1, 1]} : vector<32x32xf32> to vector<16x32xf32>
    %617 = arith.truncf %616 : vector<16x32xf32> to vector<16x32xbf16>
    %c4_226 = arith.constant 4 : index
    %c64_227 = arith.constant 64 : index
    %c0_228 = arith.constant 0 : index
    %618 = vector.load %arg6[%c4_226, %c64_227, %c0_228] : memref<8x128x128xbf16, #tpu.memory_space<vmem>>, vector<1x32x128xbf16>
    %619 = vector.shape_cast %618 : vector<1x32x128xbf16> to vector<32x128xbf16>
    %cst_229 = arith.constant dense<0.000000e+00> : vector<16x128xf32>
    %620 = tpu.matmul %617, %619, %cst_229 {dimension_numbers = #tpu.dot_dimension_numbers<[1], [0], [0], [1], [0, 0, 1, 1], [], []>} : vector<16x32xbf16>, vector<32x128xbf16>, vector<16x128xf32> -> vector<16x128xf32>
    %621 = arith.addf %593, %620 : vector<16x128xf32>
    %622 = vector.extract_strided_slice %615 {offsets = [16, 0], sizes = [16, 32], strides = [1, 1]} : vector<32x32xf32> to vector<16x32xf32>
    %623 = arith.truncf %622 : vector<16x32xf32> to vector<16x32xbf16>
    %c4_230 = arith.constant 4 : index
    %c96_231 = arith.constant 96 : index
    %c0_232 = arith.constant 0 : index
    %624 = vector.load %arg6[%c4_230, %c96_231, %c0_232] : memref<8x128x128xbf16, #tpu.memory_space<vmem>>, vector<1x32x128xbf16>
    %625 = vector.shape_cast %624 : vector<1x32x128xbf16> to vector<32x128xbf16>
    %cst_233 = arith.constant dense<0.000000e+00> : vector<16x128xf32>
    %626 = tpu.matmul %623, %625, %cst_233 {dimension_numbers = #tpu.dot_dimension_numbers<[1], [0], [0], [1], [0, 0, 1, 1], [], []>} : vector<16x32xbf16>, vector<32x128xbf16>, vector<16x128xf32> -> vector<16x128xf32>
    %627 = arith.addf %621, %626 : vector<16x128xf32>
    %628 = arith.addf %529, %627 : vector<16x128xf32>
    %c4_234 = arith.constant 4 : index
    %c0_235 = arith.constant 0 : index
    %c0_236 = arith.constant 0 : index
    %629 = vector.load %arg7[%c4_234, %c0_235, %c0_236] : memref<8x1x128xf32, #tpu.memory_space<vmem>>, vector<1x1x128xf32>
    %630 = vector.shape_cast %629 : vector<1x1x128xf32> to vector<1x128xf32>
    %631 = arith.mulf %628, %628 : vector<16x128xf32>
    %cst_237 = arith.constant dense<0.000000e+00> : vector<16xf32>
    %632 = vector.multi_reduction <add>, %631, %cst_237 [1] : vector<16x128xf32> to vector<16xf32>
    %633 = vector.shape_cast %632 : vector<16xf32> to vector<16x1xf32>
    %cst_238 = arith.constant 1.280000e+02 : f32
    %634 = vector.broadcast %cst_238 : f32 to vector<16x1xf32>
    %635 = arith.divf %633, %634 : vector<16x1xf32>
    %cst_239 = arith.constant 9.99999974E-6 : f32
    %636 = vector.broadcast %cst_239 : f32 to vector<16x1xf32>
    %637 = arith.addf %635, %636 : vector<16x1xf32>
    %638 = math.rsqrt %637 : vector<16x1xf32>
    %639 = vector.broadcast %638 : vector<16x1xf32> to vector<16x128xf32>
    %640 = arith.mulf %628, %639 : vector<16x128xf32>
    %641 = vector.broadcast %630 : vector<1x128xf32> to vector<16x128xf32>
    %642 = arith.mulf %640, %641 : vector<16x128xf32>
    %643 = arith.truncf %642 : vector<16x128xf32> to vector<16x128xbf16>
    %c4_240 = arith.constant 4 : index
    %c0_241 = arith.constant 0 : index
    %c0_242 = arith.constant 0 : index
    %644 = vector.load %arg8[%c4_240, %c0_241, %c0_242] : memref<8x128x512xbf16, #tpu.memory_space<vmem>>, vector<1x128x512xbf16>
    %645 = vector.shape_cast %644 : vector<1x128x512xbf16> to vector<128x512xbf16>
    %cst_243 = arith.constant dense<0.000000e+00> : vector<16x512xf32>
    %646 = tpu.matmul %643, %645, %cst_243 {dimension_numbers = #tpu.dot_dimension_numbers<[1], [0], [0], [1], [0, 0, 1, 1], [], []>} : vector<16x128xbf16>, vector<128x512xbf16>, vector<16x512xf32> -> vector<16x512xf32>
    %647 = vector.extract_strided_slice %646 {offsets = [0, 0], sizes = [16, 256], strides = [1, 1]} : vector<16x512xf32> to vector<16x256xf32>
    %648 = vector.extract_strided_slice %646 {offsets = [0, 256], sizes = [16, 256], strides = [1, 1]} : vector<16x512xf32> to vector<16x256xf32>
    %649 = arith.negf %647 : vector<16x256xf32>
    %650 = math.exp %649 : vector<16x256xf32>
    %cst_244 = arith.constant 1.000000e+00 : f32
    %651 = vector.broadcast %cst_244 : f32 to vector<16x256xf32>
    %652 = arith.addf %651, %650 : vector<16x256xf32>
    %653 = arith.divf %651, %652 : vector<16x256xf32>
    %654 = arith.mulf %647, %653 : vector<16x256xf32>
    %655 = arith.mulf %654, %648 : vector<16x256xf32>
    %656 = arith.truncf %655 : vector<16x256xf32> to vector<16x256xbf16>
    %c4_245 = arith.constant 4 : index
    %c0_246 = arith.constant 0 : index
    %c0_247 = arith.constant 0 : index
    %657 = vector.load %arg9[%c4_245, %c0_246, %c0_247] : memref<8x256x128xbf16, #tpu.memory_space<vmem>>, vector<1x256x128xbf16>
    %658 = vector.shape_cast %657 : vector<1x256x128xbf16> to vector<256x128xbf16>
    %cst_248 = arith.constant dense<0.000000e+00> : vector<16x128xf32>
    %659 = tpu.matmul %656, %658, %cst_248 {dimension_numbers = #tpu.dot_dimension_numbers<[1], [0], [0], [1], [0, 0, 1, 1], [], []>} : vector<16x256xbf16>, vector<256x128xbf16>, vector<16x128xf32> -> vector<16x128xf32>
    %660 = arith.addf %628, %659 : vector<16x128xf32>
    %c5 = arith.constant 5 : index
    %c0_249 = arith.constant 0 : index
    %c0_250 = arith.constant 0 : index
    %661 = vector.load %arg4[%c5, %c0_249, %c0_250] : memref<8x1x128xf32, #tpu.memory_space<vmem>>, vector<1x1x128xf32>
    %662 = vector.shape_cast %661 : vector<1x1x128xf32> to vector<1x128xf32>
    %663 = arith.mulf %660, %660 : vector<16x128xf32>
    %cst_251 = arith.constant dense<0.000000e+00> : vector<16xf32>
    %664 = vector.multi_reduction <add>, %663, %cst_251 [1] : vector<16x128xf32> to vector<16xf32>
    %665 = vector.shape_cast %664 : vector<16xf32> to vector<16x1xf32>
    %cst_252 = arith.constant 1.280000e+02 : f32
    %666 = vector.broadcast %cst_252 : f32 to vector<16x1xf32>
    %667 = arith.divf %665, %666 : vector<16x1xf32>
    %cst_253 = arith.constant 9.99999974E-6 : f32
    %668 = vector.broadcast %cst_253 : f32 to vector<16x1xf32>
    %669 = arith.addf %667, %668 : vector<16x1xf32>
    %670 = math.rsqrt %669 : vector<16x1xf32>
    %671 = vector.broadcast %670 : vector<16x1xf32> to vector<16x128xf32>
    %672 = arith.mulf %660, %671 : vector<16x128xf32>
    %673 = vector.broadcast %662 : vector<1x128xf32> to vector<16x128xf32>
    %674 = arith.mulf %672, %673 : vector<16x128xf32>
    %675 = arith.truncf %674 : vector<16x128xf32> to vector<16x128xbf16>
    %c5_254 = arith.constant 5 : index
    %c0_255 = arith.constant 0 : index
    %c0_256 = arith.constant 0 : index
    %676 = vector.load %arg5[%c5_254, %c0_255, %c0_256] : memref<8x128x448xbf16, #tpu.memory_space<vmem>>, vector<1x128x448xbf16>
    %677 = vector.shape_cast %676 : vector<1x128x448xbf16> to vector<128x448xbf16>
    %cst_257 = arith.constant dense<0.000000e+00> : vector<16x448xf32>
    %678 = tpu.matmul %675, %677, %cst_257 {dimension_numbers = #tpu.dot_dimension_numbers<[1], [0], [0], [1], [0, 0, 1, 1], [], []>} : vector<16x128xbf16>, vector<128x448xbf16>, vector<16x448xf32> -> vector<16x448xf32>
    %679 = vector.extract_strided_slice %678 {offsets = [0, 0], sizes = [16, 128], strides = [1, 1]} : vector<16x448xf32> to vector<16x128xf32>
    %680 = vector.extract_strided_slice %678 {offsets = [0, 128], sizes = [16, 128], strides = [1, 1]} : vector<16x448xf32> to vector<16x128xf32>
    %681 = vector.extract_strided_slice %678 {offsets = [0, 256], sizes = [16, 64], strides = [1, 1]} : vector<16x448xf32> to vector<16x64xf32>
    %682 = vector.extract_strided_slice %678 {offsets = [0, 320], sizes = [16, 64], strides = [1, 1]} : vector<16x448xf32> to vector<16x64xf32>
    %683 = vector.extract_strided_slice %678 {offsets = [0, 384], sizes = [16, 64], strides = [1, 1]} : vector<16x448xf32> to vector<16x64xf32>
    %684 = arith.mulf %679, %1 : vector<16x128xf32>
    %685 = arith.mulf %680, %2 : vector<16x128xf32>
    %686 = arith.addf %684, %685 : vector<16x128xf32>
    %687 = arith.mulf %681, %3 : vector<16x64xf32>
    %688 = arith.mulf %682, %4 : vector<16x64xf32>
    %689 = arith.addf %687, %688 : vector<16x64xf32>
    %cst_258 = arith.constant 0.000000e+00 : f32
    %690 = vector.broadcast %cst_258 : f32 to vector<16x128xf32>
    %691 = vector.extract_strided_slice %686 {offsets = [0, 0], sizes = [16, 32], strides = [1, 1]} : vector<16x128xf32> to vector<16x32xf32>
    %692 = vector.extract_strided_slice %686 {offsets = [0, 32], sizes = [16, 32], strides = [1, 1]} : vector<16x128xf32> to vector<16x32xf32>
    %693 = tpu.concatenate %691, %692 in 0 : vector<16x32xf32>, vector<16x32xf32> -> vector<32x32xf32>
    %694 = vector.extract_strided_slice %689 {offsets = [0, 0], sizes = [16, 32], strides = [1, 1]} : vector<16x64xf32> to vector<16x32xf32>
    %695 = vector.extract_strided_slice %683 {offsets = [0, 0], sizes = [16, 32], strides = [1, 1]} : vector<16x64xf32> to vector<16x32xf32>
    %696 = arith.truncf %693 : vector<32x32xf32> to vector<32x32xbf16>
    %697 = arith.truncf %694 : vector<16x32xf32> to vector<16x32xbf16>
    %cst_259 = arith.constant dense<0.000000e+00> : vector<32x16xf32>
    %698 = tpu.matmul %696, %697, %cst_259 {dimension_numbers = #tpu.dot_dimension_numbers<[1], [1], [0], [0], [0, 0, 1, 0], [], []>} : vector<32x32xbf16>, vector<16x32xbf16>, vector<32x16xf32> -> vector<32x16xf32>
    %699 = arith.addf %698, %5 : vector<32x16xf32>
    %cst_260 = arith.constant dense<0xFF800000> : vector<32xf32>
    %700 = vector.multi_reduction <maximumf>, %699, %cst_260 [1] : vector<32x16xf32> to vector<32xf32>
    %701 = vector.shape_cast %700 : vector<32xf32> to vector<32x1xf32>
    %702 = vector.broadcast %701 : vector<32x1xf32> to vector<32x16xf32>
    %703 = arith.subf %699, %702 : vector<32x16xf32>
    %704 = math.exp %703 : vector<32x16xf32>
    %cst_261 = arith.constant dense<0.000000e+00> : vector<32xf32>
    %705 = vector.multi_reduction <add>, %704, %cst_261 [1] : vector<32x16xf32> to vector<32xf32>
    %706 = vector.shape_cast %705 : vector<32xf32> to vector<32x1xf32>
    %707 = tpu.reciprocal %706 {approx = true} : vector<32x1xf32> -> vector<32x1xf32>
    %708 = vector.broadcast %707 : vector<32x1xf32> to vector<32x16xf32>
    %709 = arith.mulf %704, %708 : vector<32x16xf32>
    %710 = arith.truncf %709 : vector<32x16xf32> to vector<32x16xbf16>
    %711 = arith.truncf %695 : vector<16x32xf32> to vector<16x32xbf16>
    %cst_262 = arith.constant dense<0.000000e+00> : vector<32x32xf32>
    %712 = tpu.matmul %710, %711, %cst_262 {dimension_numbers = #tpu.dot_dimension_numbers<[1], [0], [0], [1], [0, 0, 1, 1], [], []>} : vector<32x16xbf16>, vector<16x32xbf16>, vector<32x32xf32> -> vector<32x32xf32>
    %713 = vector.extract_strided_slice %712 {offsets = [0, 0], sizes = [16, 32], strides = [1, 1]} : vector<32x32xf32> to vector<16x32xf32>
    %714 = arith.truncf %713 : vector<16x32xf32> to vector<16x32xbf16>
    %c5_263 = arith.constant 5 : index
    %c0_264 = arith.constant 0 : index
    %c0_265 = arith.constant 0 : index
    %715 = vector.load %arg6[%c5_263, %c0_264, %c0_265] : memref<8x128x128xbf16, #tpu.memory_space<vmem>>, vector<1x32x128xbf16>
    %716 = vector.shape_cast %715 : vector<1x32x128xbf16> to vector<32x128xbf16>
    %cst_266 = arith.constant dense<0.000000e+00> : vector<16x128xf32>
    %717 = tpu.matmul %714, %716, %cst_266 {dimension_numbers = #tpu.dot_dimension_numbers<[1], [0], [0], [1], [0, 0, 1, 1], [], []>} : vector<16x32xbf16>, vector<32x128xbf16>, vector<16x128xf32> -> vector<16x128xf32>
    %718 = arith.addf %690, %717 : vector<16x128xf32>
    %719 = vector.extract_strided_slice %712 {offsets = [16, 0], sizes = [16, 32], strides = [1, 1]} : vector<32x32xf32> to vector<16x32xf32>
    %720 = arith.truncf %719 : vector<16x32xf32> to vector<16x32xbf16>
    %c5_267 = arith.constant 5 : index
    %c32_268 = arith.constant 32 : index
    %c0_269 = arith.constant 0 : index
    %721 = vector.load %arg6[%c5_267, %c32_268, %c0_269] : memref<8x128x128xbf16, #tpu.memory_space<vmem>>, vector<1x32x128xbf16>
    %722 = vector.shape_cast %721 : vector<1x32x128xbf16> to vector<32x128xbf16>
    %cst_270 = arith.constant dense<0.000000e+00> : vector<16x128xf32>
    %723 = tpu.matmul %720, %722, %cst_270 {dimension_numbers = #tpu.dot_dimension_numbers<[1], [0], [0], [1], [0, 0, 1, 1], [], []>} : vector<16x32xbf16>, vector<32x128xbf16>, vector<16x128xf32> -> vector<16x128xf32>
    %724 = arith.addf %718, %723 : vector<16x128xf32>
    %725 = vector.extract_strided_slice %686 {offsets = [0, 64], sizes = [16, 32], strides = [1, 1]} : vector<16x128xf32> to vector<16x32xf32>
    %726 = vector.extract_strided_slice %686 {offsets = [0, 96], sizes = [16, 32], strides = [1, 1]} : vector<16x128xf32> to vector<16x32xf32>
    %727 = tpu.concatenate %725, %726 in 0 : vector<16x32xf32>, vector<16x32xf32> -> vector<32x32xf32>
    %728 = vector.extract_strided_slice %689 {offsets = [0, 32], sizes = [16, 32], strides = [1, 1]} : vector<16x64xf32> to vector<16x32xf32>
    %729 = vector.extract_strided_slice %683 {offsets = [0, 32], sizes = [16, 32], strides = [1, 1]} : vector<16x64xf32> to vector<16x32xf32>
    %730 = arith.truncf %727 : vector<32x32xf32> to vector<32x32xbf16>
    %731 = arith.truncf %728 : vector<16x32xf32> to vector<16x32xbf16>
    %cst_271 = arith.constant dense<0.000000e+00> : vector<32x16xf32>
    %732 = tpu.matmul %730, %731, %cst_271 {dimension_numbers = #tpu.dot_dimension_numbers<[1], [1], [0], [0], [0, 0, 1, 0], [], []>} : vector<32x32xbf16>, vector<16x32xbf16>, vector<32x16xf32> -> vector<32x16xf32>
    %733 = arith.addf %732, %5 : vector<32x16xf32>
    %cst_272 = arith.constant dense<0xFF800000> : vector<32xf32>
    %734 = vector.multi_reduction <maximumf>, %733, %cst_272 [1] : vector<32x16xf32> to vector<32xf32>
    %735 = vector.shape_cast %734 : vector<32xf32> to vector<32x1xf32>
    %736 = vector.broadcast %735 : vector<32x1xf32> to vector<32x16xf32>
    %737 = arith.subf %733, %736 : vector<32x16xf32>
    %738 = math.exp %737 : vector<32x16xf32>
    %cst_273 = arith.constant dense<0.000000e+00> : vector<32xf32>
    %739 = vector.multi_reduction <add>, %738, %cst_273 [1] : vector<32x16xf32> to vector<32xf32>
    %740 = vector.shape_cast %739 : vector<32xf32> to vector<32x1xf32>
    %741 = tpu.reciprocal %740 {approx = true} : vector<32x1xf32> -> vector<32x1xf32>
    %742 = vector.broadcast %741 : vector<32x1xf32> to vector<32x16xf32>
    %743 = arith.mulf %738, %742 : vector<32x16xf32>
    %744 = arith.truncf %743 : vector<32x16xf32> to vector<32x16xbf16>
    %745 = arith.truncf %729 : vector<16x32xf32> to vector<16x32xbf16>
    %cst_274 = arith.constant dense<0.000000e+00> : vector<32x32xf32>
    %746 = tpu.matmul %744, %745, %cst_274 {dimension_numbers = #tpu.dot_dimension_numbers<[1], [0], [0], [1], [0, 0, 1, 1], [], []>} : vector<32x16xbf16>, vector<16x32xbf16>, vector<32x32xf32> -> vector<32x32xf32>
    %747 = vector.extract_strided_slice %746 {offsets = [0, 0], sizes = [16, 32], strides = [1, 1]} : vector<32x32xf32> to vector<16x32xf32>
    %748 = arith.truncf %747 : vector<16x32xf32> to vector<16x32xbf16>
    %c5_275 = arith.constant 5 : index
    %c64_276 = arith.constant 64 : index
    %c0_277 = arith.constant 0 : index
    %749 = vector.load %arg6[%c5_275, %c64_276, %c0_277] : memref<8x128x128xbf16, #tpu.memory_space<vmem>>, vector<1x32x128xbf16>
    %750 = vector.shape_cast %749 : vector<1x32x128xbf16> to vector<32x128xbf16>
    %cst_278 = arith.constant dense<0.000000e+00> : vector<16x128xf32>
    %751 = tpu.matmul %748, %750, %cst_278 {dimension_numbers = #tpu.dot_dimension_numbers<[1], [0], [0], [1], [0, 0, 1, 1], [], []>} : vector<16x32xbf16>, vector<32x128xbf16>, vector<16x128xf32> -> vector<16x128xf32>
    %752 = arith.addf %724, %751 : vector<16x128xf32>
    %753 = vector.extract_strided_slice %746 {offsets = [16, 0], sizes = [16, 32], strides = [1, 1]} : vector<32x32xf32> to vector<16x32xf32>
    %754 = arith.truncf %753 : vector<16x32xf32> to vector<16x32xbf16>
    %c5_279 = arith.constant 5 : index
    %c96_280 = arith.constant 96 : index
    %c0_281 = arith.constant 0 : index
    %755 = vector.load %arg6[%c5_279, %c96_280, %c0_281] : memref<8x128x128xbf16, #tpu.memory_space<vmem>>, vector<1x32x128xbf16>
    %756 = vector.shape_cast %755 : vector<1x32x128xbf16> to vector<32x128xbf16>
    %cst_282 = arith.constant dense<0.000000e+00> : vector<16x128xf32>
    %757 = tpu.matmul %754, %756, %cst_282 {dimension_numbers = #tpu.dot_dimension_numbers<[1], [0], [0], [1], [0, 0, 1, 1], [], []>} : vector<16x32xbf16>, vector<32x128xbf16>, vector<16x128xf32> -> vector<16x128xf32>
    %758 = arith.addf %752, %757 : vector<16x128xf32>
    %759 = arith.addf %660, %758 : vector<16x128xf32>
    %c5_283 = arith.constant 5 : index
    %c0_284 = arith.constant 0 : index
    %c0_285 = arith.constant 0 : index
    %760 = vector.load %arg7[%c5_283, %c0_284, %c0_285] : memref<8x1x128xf32, #tpu.memory_space<vmem>>, vector<1x1x128xf32>
    %761 = vector.shape_cast %760 : vector<1x1x128xf32> to vector<1x128xf32>
    %762 = arith.mulf %759, %759 : vector<16x128xf32>
    %cst_286 = arith.constant dense<0.000000e+00> : vector<16xf32>
    %763 = vector.multi_reduction <add>, %762, %cst_286 [1] : vector<16x128xf32> to vector<16xf32>
    %764 = vector.shape_cast %763 : vector<16xf32> to vector<16x1xf32>
    %cst_287 = arith.constant 1.280000e+02 : f32
    %765 = vector.broadcast %cst_287 : f32 to vector<16x1xf32>
    %766 = arith.divf %764, %765 : vector<16x1xf32>
    %cst_288 = arith.constant 9.99999974E-6 : f32
    %767 = vector.broadcast %cst_288 : f32 to vector<16x1xf32>
    %768 = arith.addf %766, %767 : vector<16x1xf32>
    %769 = math.rsqrt %768 : vector<16x1xf32>
    %770 = vector.broadcast %769 : vector<16x1xf32> to vector<16x128xf32>
    %771 = arith.mulf %759, %770 : vector<16x128xf32>
    %772 = vector.broadcast %761 : vector<1x128xf32> to vector<16x128xf32>
    %773 = arith.mulf %771, %772 : vector<16x128xf32>
    %774 = arith.truncf %773 : vector<16x128xf32> to vector<16x128xbf16>
    %c5_289 = arith.constant 5 : index
    %c0_290 = arith.constant 0 : index
    %c0_291 = arith.constant 0 : index
    %775 = vector.load %arg8[%c5_289, %c0_290, %c0_291] : memref<8x128x512xbf16, #tpu.memory_space<vmem>>, vector<1x128x512xbf16>
    %776 = vector.shape_cast %775 : vector<1x128x512xbf16> to vector<128x512xbf16>
    %cst_292 = arith.constant dense<0.000000e+00> : vector<16x512xf32>
    %777 = tpu.matmul %774, %776, %cst_292 {dimension_numbers = #tpu.dot_dimension_numbers<[1], [0], [0], [1], [0, 0, 1, 1], [], []>} : vector<16x128xbf16>, vector<128x512xbf16>, vector<16x512xf32> -> vector<16x512xf32>
    %778 = vector.extract_strided_slice %777 {offsets = [0, 0], sizes = [16, 256], strides = [1, 1]} : vector<16x512xf32> to vector<16x256xf32>
    %779 = vector.extract_strided_slice %777 {offsets = [0, 256], sizes = [16, 256], strides = [1, 1]} : vector<16x512xf32> to vector<16x256xf32>
    %780 = arith.negf %778 : vector<16x256xf32>
    %781 = math.exp %780 : vector<16x256xf32>
    %cst_293 = arith.constant 1.000000e+00 : f32
    %782 = vector.broadcast %cst_293 : f32 to vector<16x256xf32>
    %783 = arith.addf %782, %781 : vector<16x256xf32>
    %784 = arith.divf %782, %783 : vector<16x256xf32>
    %785 = arith.mulf %778, %784 : vector<16x256xf32>
    %786 = arith.mulf %785, %779 : vector<16x256xf32>
    %787 = arith.truncf %786 : vector<16x256xf32> to vector<16x256xbf16>
    %c5_294 = arith.constant 5 : index
    %c0_295 = arith.constant 0 : index
    %c0_296 = arith.constant 0 : index
    %788 = vector.load %arg9[%c5_294, %c0_295, %c0_296] : memref<8x256x128xbf16, #tpu.memory_space<vmem>>, vector<1x256x128xbf16>
    %789 = vector.shape_cast %788 : vector<1x256x128xbf16> to vector<256x128xbf16>
    %cst_297 = arith.constant dense<0.000000e+00> : vector<16x128xf32>
    %790 = tpu.matmul %787, %789, %cst_297 {dimension_numbers = #tpu.dot_dimension_numbers<[1], [0], [0], [1], [0, 0, 1, 1], [], []>} : vector<16x256xbf16>, vector<256x128xbf16>, vector<16x128xf32> -> vector<16x128xf32>
    %791 = arith.addf %759, %790 : vector<16x128xf32>
    %c6 = arith.constant 6 : index
    %c0_298 = arith.constant 0 : index
    %c0_299 = arith.constant 0 : index
    %792 = vector.load %arg4[%c6, %c0_298, %c0_299] : memref<8x1x128xf32, #tpu.memory_space<vmem>>, vector<1x1x128xf32>
    %793 = vector.shape_cast %792 : vector<1x1x128xf32> to vector<1x128xf32>
    %794 = arith.mulf %791, %791 : vector<16x128xf32>
    %cst_300 = arith.constant dense<0.000000e+00> : vector<16xf32>
    %795 = vector.multi_reduction <add>, %794, %cst_300 [1] : vector<16x128xf32> to vector<16xf32>
    %796 = vector.shape_cast %795 : vector<16xf32> to vector<16x1xf32>
    %cst_301 = arith.constant 1.280000e+02 : f32
    %797 = vector.broadcast %cst_301 : f32 to vector<16x1xf32>
    %798 = arith.divf %796, %797 : vector<16x1xf32>
    %cst_302 = arith.constant 9.99999974E-6 : f32
    %799 = vector.broadcast %cst_302 : f32 to vector<16x1xf32>
    %800 = arith.addf %798, %799 : vector<16x1xf32>
    %801 = math.rsqrt %800 : vector<16x1xf32>
    %802 = vector.broadcast %801 : vector<16x1xf32> to vector<16x128xf32>
    %803 = arith.mulf %791, %802 : vector<16x128xf32>
    %804 = vector.broadcast %793 : vector<1x128xf32> to vector<16x128xf32>
    %805 = arith.mulf %803, %804 : vector<16x128xf32>
    %806 = arith.truncf %805 : vector<16x128xf32> to vector<16x128xbf16>
    %c6_303 = arith.constant 6 : index
    %c0_304 = arith.constant 0 : index
    %c0_305 = arith.constant 0 : index
    %807 = vector.load %arg5[%c6_303, %c0_304, %c0_305] : memref<8x128x448xbf16, #tpu.memory_space<vmem>>, vector<1x128x448xbf16>
    %808 = vector.shape_cast %807 : vector<1x128x448xbf16> to vector<128x448xbf16>
    %cst_306 = arith.constant dense<0.000000e+00> : vector<16x448xf32>
    %809 = tpu.matmul %806, %808, %cst_306 {dimension_numbers = #tpu.dot_dimension_numbers<[1], [0], [0], [1], [0, 0, 1, 1], [], []>} : vector<16x128xbf16>, vector<128x448xbf16>, vector<16x448xf32> -> vector<16x448xf32>
    %810 = vector.extract_strided_slice %809 {offsets = [0, 0], sizes = [16, 128], strides = [1, 1]} : vector<16x448xf32> to vector<16x128xf32>
    %811 = vector.extract_strided_slice %809 {offsets = [0, 128], sizes = [16, 128], strides = [1, 1]} : vector<16x448xf32> to vector<16x128xf32>
    %812 = vector.extract_strided_slice %809 {offsets = [0, 256], sizes = [16, 64], strides = [1, 1]} : vector<16x448xf32> to vector<16x64xf32>
    %813 = vector.extract_strided_slice %809 {offsets = [0, 320], sizes = [16, 64], strides = [1, 1]} : vector<16x448xf32> to vector<16x64xf32>
    %814 = vector.extract_strided_slice %809 {offsets = [0, 384], sizes = [16, 64], strides = [1, 1]} : vector<16x448xf32> to vector<16x64xf32>
    %815 = arith.mulf %810, %1 : vector<16x128xf32>
    %816 = arith.mulf %811, %2 : vector<16x128xf32>
    %817 = arith.addf %815, %816 : vector<16x128xf32>
    %818 = arith.mulf %812, %3 : vector<16x64xf32>
    %819 = arith.mulf %813, %4 : vector<16x64xf32>
    %820 = arith.addf %818, %819 : vector<16x64xf32>
    %cst_307 = arith.constant 0.000000e+00 : f32
    %821 = vector.broadcast %cst_307 : f32 to vector<16x128xf32>
    %822 = vector.extract_strided_slice %817 {offsets = [0, 0], sizes = [16, 32], strides = [1, 1]} : vector<16x128xf32> to vector<16x32xf32>
    %823 = vector.extract_strided_slice %817 {offsets = [0, 32], sizes = [16, 32], strides = [1, 1]} : vector<16x128xf32> to vector<16x32xf32>
    %824 = tpu.concatenate %822, %823 in 0 : vector<16x32xf32>, vector<16x32xf32> -> vector<32x32xf32>
    %825 = vector.extract_strided_slice %820 {offsets = [0, 0], sizes = [16, 32], strides = [1, 1]} : vector<16x64xf32> to vector<16x32xf32>
    %826 = vector.extract_strided_slice %814 {offsets = [0, 0], sizes = [16, 32], strides = [1, 1]} : vector<16x64xf32> to vector<16x32xf32>
    %827 = arith.truncf %824 : vector<32x32xf32> to vector<32x32xbf16>
    %828 = arith.truncf %825 : vector<16x32xf32> to vector<16x32xbf16>
    %cst_308 = arith.constant dense<0.000000e+00> : vector<32x16xf32>
    %829 = tpu.matmul %827, %828, %cst_308 {dimension_numbers = #tpu.dot_dimension_numbers<[1], [1], [0], [0], [0, 0, 1, 0], [], []>} : vector<32x32xbf16>, vector<16x32xbf16>, vector<32x16xf32> -> vector<32x16xf32>
    %830 = arith.addf %829, %5 : vector<32x16xf32>
    %cst_309 = arith.constant dense<0xFF800000> : vector<32xf32>
    %831 = vector.multi_reduction <maximumf>, %830, %cst_309 [1] : vector<32x16xf32> to vector<32xf32>
    %832 = vector.shape_cast %831 : vector<32xf32> to vector<32x1xf32>
    %833 = vector.broadcast %832 : vector<32x1xf32> to vector<32x16xf32>
    %834 = arith.subf %830, %833 : vector<32x16xf32>
    %835 = math.exp %834 : vector<32x16xf32>
    %cst_310 = arith.constant dense<0.000000e+00> : vector<32xf32>
    %836 = vector.multi_reduction <add>, %835, %cst_310 [1] : vector<32x16xf32> to vector<32xf32>
    %837 = vector.shape_cast %836 : vector<32xf32> to vector<32x1xf32>
    %838 = tpu.reciprocal %837 {approx = true} : vector<32x1xf32> -> vector<32x1xf32>
    %839 = vector.broadcast %838 : vector<32x1xf32> to vector<32x16xf32>
    %840 = arith.mulf %835, %839 : vector<32x16xf32>
    %841 = arith.truncf %840 : vector<32x16xf32> to vector<32x16xbf16>
    %842 = arith.truncf %826 : vector<16x32xf32> to vector<16x32xbf16>
    %cst_311 = arith.constant dense<0.000000e+00> : vector<32x32xf32>
    %843 = tpu.matmul %841, %842, %cst_311 {dimension_numbers = #tpu.dot_dimension_numbers<[1], [0], [0], [1], [0, 0, 1, 1], [], []>} : vector<32x16xbf16>, vector<16x32xbf16>, vector<32x32xf32> -> vector<32x32xf32>
    %844 = vector.extract_strided_slice %843 {offsets = [0, 0], sizes = [16, 32], strides = [1, 1]} : vector<32x32xf32> to vector<16x32xf32>
    %845 = arith.truncf %844 : vector<16x32xf32> to vector<16x32xbf16>
    %c6_312 = arith.constant 6 : index
    %c0_313 = arith.constant 0 : index
    %c0_314 = arith.constant 0 : index
    %846 = vector.load %arg6[%c6_312, %c0_313, %c0_314] : memref<8x128x128xbf16, #tpu.memory_space<vmem>>, vector<1x32x128xbf16>
    %847 = vector.shape_cast %846 : vector<1x32x128xbf16> to vector<32x128xbf16>
    %cst_315 = arith.constant dense<0.000000e+00> : vector<16x128xf32>
    %848 = tpu.matmul %845, %847, %cst_315 {dimension_numbers = #tpu.dot_dimension_numbers<[1], [0], [0], [1], [0, 0, 1, 1], [], []>} : vector<16x32xbf16>, vector<32x128xbf16>, vector<16x128xf32> -> vector<16x128xf32>
    %849 = arith.addf %821, %848 : vector<16x128xf32>
    %850 = vector.extract_strided_slice %843 {offsets = [16, 0], sizes = [16, 32], strides = [1, 1]} : vector<32x32xf32> to vector<16x32xf32>
    %851 = arith.truncf %850 : vector<16x32xf32> to vector<16x32xbf16>
    %c6_316 = arith.constant 6 : index
    %c32_317 = arith.constant 32 : index
    %c0_318 = arith.constant 0 : index
    %852 = vector.load %arg6[%c6_316, %c32_317, %c0_318] : memref<8x128x128xbf16, #tpu.memory_space<vmem>>, vector<1x32x128xbf16>
    %853 = vector.shape_cast %852 : vector<1x32x128xbf16> to vector<32x128xbf16>
    %cst_319 = arith.constant dense<0.000000e+00> : vector<16x128xf32>
    %854 = tpu.matmul %851, %853, %cst_319 {dimension_numbers = #tpu.dot_dimension_numbers<[1], [0], [0], [1], [0, 0, 1, 1], [], []>} : vector<16x32xbf16>, vector<32x128xbf16>, vector<16x128xf32> -> vector<16x128xf32>
    %855 = arith.addf %849, %854 : vector<16x128xf32>
    %856 = vector.extract_strided_slice %817 {offsets = [0, 64], sizes = [16, 32], strides = [1, 1]} : vector<16x128xf32> to vector<16x32xf32>
    %857 = vector.extract_strided_slice %817 {offsets = [0, 96], sizes = [16, 32], strides = [1, 1]} : vector<16x128xf32> to vector<16x32xf32>
    %858 = tpu.concatenate %856, %857 in 0 : vector<16x32xf32>, vector<16x32xf32> -> vector<32x32xf32>
    %859 = vector.extract_strided_slice %820 {offsets = [0, 32], sizes = [16, 32], strides = [1, 1]} : vector<16x64xf32> to vector<16x32xf32>
    %860 = vector.extract_strided_slice %814 {offsets = [0, 32], sizes = [16, 32], strides = [1, 1]} : vector<16x64xf32> to vector<16x32xf32>
    %861 = arith.truncf %858 : vector<32x32xf32> to vector<32x32xbf16>
    %862 = arith.truncf %859 : vector<16x32xf32> to vector<16x32xbf16>
    %cst_320 = arith.constant dense<0.000000e+00> : vector<32x16xf32>
    %863 = tpu.matmul %861, %862, %cst_320 {dimension_numbers = #tpu.dot_dimension_numbers<[1], [1], [0], [0], [0, 0, 1, 0], [], []>} : vector<32x32xbf16>, vector<16x32xbf16>, vector<32x16xf32> -> vector<32x16xf32>
    %864 = arith.addf %863, %5 : vector<32x16xf32>
    %cst_321 = arith.constant dense<0xFF800000> : vector<32xf32>
    %865 = vector.multi_reduction <maximumf>, %864, %cst_321 [1] : vector<32x16xf32> to vector<32xf32>
    %866 = vector.shape_cast %865 : vector<32xf32> to vector<32x1xf32>
    %867 = vector.broadcast %866 : vector<32x1xf32> to vector<32x16xf32>
    %868 = arith.subf %864, %867 : vector<32x16xf32>
    %869 = math.exp %868 : vector<32x16xf32>
    %cst_322 = arith.constant dense<0.000000e+00> : vector<32xf32>
    %870 = vector.multi_reduction <add>, %869, %cst_322 [1] : vector<32x16xf32> to vector<32xf32>
    %871 = vector.shape_cast %870 : vector<32xf32> to vector<32x1xf32>
    %872 = tpu.reciprocal %871 {approx = true} : vector<32x1xf32> -> vector<32x1xf32>
    %873 = vector.broadcast %872 : vector<32x1xf32> to vector<32x16xf32>
    %874 = arith.mulf %869, %873 : vector<32x16xf32>
    %875 = arith.truncf %874 : vector<32x16xf32> to vector<32x16xbf16>
    %876 = arith.truncf %860 : vector<16x32xf32> to vector<16x32xbf16>
    %cst_323 = arith.constant dense<0.000000e+00> : vector<32x32xf32>
    %877 = tpu.matmul %875, %876, %cst_323 {dimension_numbers = #tpu.dot_dimension_numbers<[1], [0], [0], [1], [0, 0, 1, 1], [], []>} : vector<32x16xbf16>, vector<16x32xbf16>, vector<32x32xf32> -> vector<32x32xf32>
    %878 = vector.extract_strided_slice %877 {offsets = [0, 0], sizes = [16, 32], strides = [1, 1]} : vector<32x32xf32> to vector<16x32xf32>
    %879 = arith.truncf %878 : vector<16x32xf32> to vector<16x32xbf16>
    %c6_324 = arith.constant 6 : index
    %c64_325 = arith.constant 64 : index
    %c0_326 = arith.constant 0 : index
    %880 = vector.load %arg6[%c6_324, %c64_325, %c0_326] : memref<8x128x128xbf16, #tpu.memory_space<vmem>>, vector<1x32x128xbf16>
    %881 = vector.shape_cast %880 : vector<1x32x128xbf16> to vector<32x128xbf16>
    %cst_327 = arith.constant dense<0.000000e+00> : vector<16x128xf32>
    %882 = tpu.matmul %879, %881, %cst_327 {dimension_numbers = #tpu.dot_dimension_numbers<[1], [0], [0], [1], [0, 0, 1, 1], [], []>} : vector<16x32xbf16>, vector<32x128xbf16>, vector<16x128xf32> -> vector<16x128xf32>
    %883 = arith.addf %855, %882 : vector<16x128xf32>
    %884 = vector.extract_strided_slice %877 {offsets = [16, 0], sizes = [16, 32], strides = [1, 1]} : vector<32x32xf32> to vector<16x32xf32>
    %885 = arith.truncf %884 : vector<16x32xf32> to vector<16x32xbf16>
    %c6_328 = arith.constant 6 : index
    %c96_329 = arith.constant 96 : index
    %c0_330 = arith.constant 0 : index
    %886 = vector.load %arg6[%c6_328, %c96_329, %c0_330] : memref<8x128x128xbf16, #tpu.memory_space<vmem>>, vector<1x32x128xbf16>
    %887 = vector.shape_cast %886 : vector<1x32x128xbf16> to vector<32x128xbf16>
    %cst_331 = arith.constant dense<0.000000e+00> : vector<16x128xf32>
    %888 = tpu.matmul %885, %887, %cst_331 {dimension_numbers = #tpu.dot_dimension_numbers<[1], [0], [0], [1], [0, 0, 1, 1], [], []>} : vector<16x32xbf16>, vector<32x128xbf16>, vector<16x128xf32> -> vector<16x128xf32>
    %889 = arith.addf %883, %888 : vector<16x128xf32>
    %890 = arith.addf %791, %889 : vector<16x128xf32>
    %c6_332 = arith.constant 6 : index
    %c0_333 = arith.constant 0 : index
    %c0_334 = arith.constant 0 : index
    %891 = vector.load %arg7[%c6_332, %c0_333, %c0_334] : memref<8x1x128xf32, #tpu.memory_space<vmem>>, vector<1x1x128xf32>
    %892 = vector.shape_cast %891 : vector<1x1x128xf32> to vector<1x128xf32>
    %893 = arith.mulf %890, %890 : vector<16x128xf32>
    %cst_335 = arith.constant dense<0.000000e+00> : vector<16xf32>
    %894 = vector.multi_reduction <add>, %893, %cst_335 [1] : vector<16x128xf32> to vector<16xf32>
    %895 = vector.shape_cast %894 : vector<16xf32> to vector<16x1xf32>
    %cst_336 = arith.constant 1.280000e+02 : f32
    %896 = vector.broadcast %cst_336 : f32 to vector<16x1xf32>
    %897 = arith.divf %895, %896 : vector<16x1xf32>
    %cst_337 = arith.constant 9.99999974E-6 : f32
    %898 = vector.broadcast %cst_337 : f32 to vector<16x1xf32>
    %899 = arith.addf %897, %898 : vector<16x1xf32>
    %900 = math.rsqrt %899 : vector<16x1xf32>
    %901 = vector.broadcast %900 : vector<16x1xf32> to vector<16x128xf32>
    %902 = arith.mulf %890, %901 : vector<16x128xf32>
    %903 = vector.broadcast %892 : vector<1x128xf32> to vector<16x128xf32>
    %904 = arith.mulf %902, %903 : vector<16x128xf32>
    %905 = arith.truncf %904 : vector<16x128xf32> to vector<16x128xbf16>
    %c6_338 = arith.constant 6 : index
    %c0_339 = arith.constant 0 : index
    %c0_340 = arith.constant 0 : index
    %906 = vector.load %arg8[%c6_338, %c0_339, %c0_340] : memref<8x128x512xbf16, #tpu.memory_space<vmem>>, vector<1x128x512xbf16>
    %907 = vector.shape_cast %906 : vector<1x128x512xbf16> to vector<128x512xbf16>
    %cst_341 = arith.constant dense<0.000000e+00> : vector<16x512xf32>
    %908 = tpu.matmul %905, %907, %cst_341 {dimension_numbers = #tpu.dot_dimension_numbers<[1], [0], [0], [1], [0, 0, 1, 1], [], []>} : vector<16x128xbf16>, vector<128x512xbf16>, vector<16x512xf32> -> vector<16x512xf32>
    %909 = vector.extract_strided_slice %908 {offsets = [0, 0], sizes = [16, 256], strides = [1, 1]} : vector<16x512xf32> to vector<16x256xf32>
    %910 = vector.extract_strided_slice %908 {offsets = [0, 256], sizes = [16, 256], strides = [1, 1]} : vector<16x512xf32> to vector<16x256xf32>
    %911 = arith.negf %909 : vector<16x256xf32>
    %912 = math.exp %911 : vector<16x256xf32>
    %cst_342 = arith.constant 1.000000e+00 : f32
    %913 = vector.broadcast %cst_342 : f32 to vector<16x256xf32>
    %914 = arith.addf %913, %912 : vector<16x256xf32>
    %915 = arith.divf %913, %914 : vector<16x256xf32>
    %916 = arith.mulf %909, %915 : vector<16x256xf32>
    %917 = arith.mulf %916, %910 : vector<16x256xf32>
    %918 = arith.truncf %917 : vector<16x256xf32> to vector<16x256xbf16>
    %c6_343 = arith.constant 6 : index
    %c0_344 = arith.constant 0 : index
    %c0_345 = arith.constant 0 : index
    %919 = vector.load %arg9[%c6_343, %c0_344, %c0_345] : memref<8x256x128xbf16, #tpu.memory_space<vmem>>, vector<1x256x128xbf16>
    %920 = vector.shape_cast %919 : vector<1x256x128xbf16> to vector<256x128xbf16>
    %cst_346 = arith.constant dense<0.000000e+00> : vector<16x128xf32>
    %921 = tpu.matmul %918, %920, %cst_346 {dimension_numbers = #tpu.dot_dimension_numbers<[1], [0], [0], [1], [0, 0, 1, 1], [], []>} : vector<16x256xbf16>, vector<256x128xbf16>, vector<16x128xf32> -> vector<16x128xf32>
    %922 = arith.addf %890, %921 : vector<16x128xf32>
    %c7 = arith.constant 7 : index
    %c0_347 = arith.constant 0 : index
    %c0_348 = arith.constant 0 : index
    %923 = vector.load %arg4[%c7, %c0_347, %c0_348] : memref<8x1x128xf32, #tpu.memory_space<vmem>>, vector<1x1x128xf32>
    %924 = vector.shape_cast %923 : vector<1x1x128xf32> to vector<1x128xf32>
    %925 = arith.mulf %922, %922 : vector<16x128xf32>
    %cst_349 = arith.constant dense<0.000000e+00> : vector<16xf32>
    %926 = vector.multi_reduction <add>, %925, %cst_349 [1] : vector<16x128xf32> to vector<16xf32>
    %927 = vector.shape_cast %926 : vector<16xf32> to vector<16x1xf32>
    %cst_350 = arith.constant 1.280000e+02 : f32
    %928 = vector.broadcast %cst_350 : f32 to vector<16x1xf32>
    %929 = arith.divf %927, %928 : vector<16x1xf32>
    %cst_351 = arith.constant 9.99999974E-6 : f32
    %930 = vector.broadcast %cst_351 : f32 to vector<16x1xf32>
    %931 = arith.addf %929, %930 : vector<16x1xf32>
    %932 = math.rsqrt %931 : vector<16x1xf32>
    %933 = vector.broadcast %932 : vector<16x1xf32> to vector<16x128xf32>
    %934 = arith.mulf %922, %933 : vector<16x128xf32>
    %935 = vector.broadcast %924 : vector<1x128xf32> to vector<16x128xf32>
    %936 = arith.mulf %934, %935 : vector<16x128xf32>
    %937 = arith.truncf %936 : vector<16x128xf32> to vector<16x128xbf16>
    %c7_352 = arith.constant 7 : index
    %c0_353 = arith.constant 0 : index
    %c0_354 = arith.constant 0 : index
    %938 = vector.load %arg5[%c7_352, %c0_353, %c0_354] : memref<8x128x448xbf16, #tpu.memory_space<vmem>>, vector<1x128x448xbf16>
    %939 = vector.shape_cast %938 : vector<1x128x448xbf16> to vector<128x448xbf16>
    %cst_355 = arith.constant dense<0.000000e+00> : vector<16x448xf32>
    %940 = tpu.matmul %937, %939, %cst_355 {dimension_numbers = #tpu.dot_dimension_numbers<[1], [0], [0], [1], [0, 0, 1, 1], [], []>} : vector<16x128xbf16>, vector<128x448xbf16>, vector<16x448xf32> -> vector<16x448xf32>
    %941 = vector.extract_strided_slice %940 {offsets = [0, 0], sizes = [16, 128], strides = [1, 1]} : vector<16x448xf32> to vector<16x128xf32>
    %942 = vector.extract_strided_slice %940 {offsets = [0, 128], sizes = [16, 128], strides = [1, 1]} : vector<16x448xf32> to vector<16x128xf32>
    %943 = vector.extract_strided_slice %940 {offsets = [0, 256], sizes = [16, 64], strides = [1, 1]} : vector<16x448xf32> to vector<16x64xf32>
    %944 = vector.extract_strided_slice %940 {offsets = [0, 320], sizes = [16, 64], strides = [1, 1]} : vector<16x448xf32> to vector<16x64xf32>
    %945 = vector.extract_strided_slice %940 {offsets = [0, 384], sizes = [16, 64], strides = [1, 1]} : vector<16x448xf32> to vector<16x64xf32>
    %946 = arith.mulf %941, %1 : vector<16x128xf32>
    %947 = arith.mulf %942, %2 : vector<16x128xf32>
    %948 = arith.addf %946, %947 : vector<16x128xf32>
    %949 = arith.mulf %943, %3 : vector<16x64xf32>
    %950 = arith.mulf %944, %4 : vector<16x64xf32>
    %951 = arith.addf %949, %950 : vector<16x64xf32>
    %cst_356 = arith.constant 0.000000e+00 : f32
    %952 = vector.broadcast %cst_356 : f32 to vector<16x128xf32>
    %953 = vector.extract_strided_slice %948 {offsets = [0, 0], sizes = [16, 32], strides = [1, 1]} : vector<16x128xf32> to vector<16x32xf32>
    %954 = vector.extract_strided_slice %948 {offsets = [0, 32], sizes = [16, 32], strides = [1, 1]} : vector<16x128xf32> to vector<16x32xf32>
    %955 = tpu.concatenate %953, %954 in 0 : vector<16x32xf32>, vector<16x32xf32> -> vector<32x32xf32>
    %956 = vector.extract_strided_slice %951 {offsets = [0, 0], sizes = [16, 32], strides = [1, 1]} : vector<16x64xf32> to vector<16x32xf32>
    %957 = vector.extract_strided_slice %945 {offsets = [0, 0], sizes = [16, 32], strides = [1, 1]} : vector<16x64xf32> to vector<16x32xf32>
    %958 = arith.truncf %955 : vector<32x32xf32> to vector<32x32xbf16>
    %959 = arith.truncf %956 : vector<16x32xf32> to vector<16x32xbf16>
    %cst_357 = arith.constant dense<0.000000e+00> : vector<32x16xf32>
    %960 = tpu.matmul %958, %959, %cst_357 {dimension_numbers = #tpu.dot_dimension_numbers<[1], [1], [0], [0], [0, 0, 1, 0], [], []>} : vector<32x32xbf16>, vector<16x32xbf16>, vector<32x16xf32> -> vector<32x16xf32>
    %961 = arith.addf %960, %5 : vector<32x16xf32>
    %cst_358 = arith.constant dense<0xFF800000> : vector<32xf32>
    %962 = vector.multi_reduction <maximumf>, %961, %cst_358 [1] : vector<32x16xf32> to vector<32xf32>
    %963 = vector.shape_cast %962 : vector<32xf32> to vector<32x1xf32>
    %964 = vector.broadcast %963 : vector<32x1xf32> to vector<32x16xf32>
    %965 = arith.subf %961, %964 : vector<32x16xf32>
    %966 = math.exp %965 : vector<32x16xf32>
    %cst_359 = arith.constant dense<0.000000e+00> : vector<32xf32>
    %967 = vector.multi_reduction <add>, %966, %cst_359 [1] : vector<32x16xf32> to vector<32xf32>
    %968 = vector.shape_cast %967 : vector<32xf32> to vector<32x1xf32>
    %969 = tpu.reciprocal %968 {approx = true} : vector<32x1xf32> -> vector<32x1xf32>
    %970 = vector.broadcast %969 : vector<32x1xf32> to vector<32x16xf32>
    %971 = arith.mulf %966, %970 : vector<32x16xf32>
    %972 = arith.truncf %971 : vector<32x16xf32> to vector<32x16xbf16>
    %973 = arith.truncf %957 : vector<16x32xf32> to vector<16x32xbf16>
    %cst_360 = arith.constant dense<0.000000e+00> : vector<32x32xf32>
    %974 = tpu.matmul %972, %973, %cst_360 {dimension_numbers = #tpu.dot_dimension_numbers<[1], [0], [0], [1], [0, 0, 1, 1], [], []>} : vector<32x16xbf16>, vector<16x32xbf16>, vector<32x32xf32> -> vector<32x32xf32>
    %975 = vector.extract_strided_slice %974 {offsets = [0, 0], sizes = [16, 32], strides = [1, 1]} : vector<32x32xf32> to vector<16x32xf32>
    %976 = arith.truncf %975 : vector<16x32xf32> to vector<16x32xbf16>
    %c7_361 = arith.constant 7 : index
    %c0_362 = arith.constant 0 : index
    %c0_363 = arith.constant 0 : index
    %977 = vector.load %arg6[%c7_361, %c0_362, %c0_363] : memref<8x128x128xbf16, #tpu.memory_space<vmem>>, vector<1x32x128xbf16>
    %978 = vector.shape_cast %977 : vector<1x32x128xbf16> to vector<32x128xbf16>
    %cst_364 = arith.constant dense<0.000000e+00> : vector<16x128xf32>
    %979 = tpu.matmul %976, %978, %cst_364 {dimension_numbers = #tpu.dot_dimension_numbers<[1], [0], [0], [1], [0, 0, 1, 1], [], []>} : vector<16x32xbf16>, vector<32x128xbf16>, vector<16x128xf32> -> vector<16x128xf32>
    %980 = arith.addf %952, %979 : vector<16x128xf32>
    %981 = vector.extract_strided_slice %974 {offsets = [16, 0], sizes = [16, 32], strides = [1, 1]} : vector<32x32xf32> to vector<16x32xf32>
    %982 = arith.truncf %981 : vector<16x32xf32> to vector<16x32xbf16>
    %c7_365 = arith.constant 7 : index
    %c32_366 = arith.constant 32 : index
    %c0_367 = arith.constant 0 : index
    %983 = vector.load %arg6[%c7_365, %c32_366, %c0_367] : memref<8x128x128xbf16, #tpu.memory_space<vmem>>, vector<1x32x128xbf16>
    %984 = vector.shape_cast %983 : vector<1x32x128xbf16> to vector<32x128xbf16>
    %cst_368 = arith.constant dense<0.000000e+00> : vector<16x128xf32>
    %985 = tpu.matmul %982, %984, %cst_368 {dimension_numbers = #tpu.dot_dimension_numbers<[1], [0], [0], [1], [0, 0, 1, 1], [], []>} : vector<16x32xbf16>, vector<32x128xbf16>, vector<16x128xf32> -> vector<16x128xf32>
    %986 = arith.addf %980, %985 : vector<16x128xf32>
    %987 = vector.extract_strided_slice %948 {offsets = [0, 64], sizes = [16, 32], strides = [1, 1]} : vector<16x128xf32> to vector<16x32xf32>
    %988 = vector.extract_strided_slice %948 {offsets = [0, 96], sizes = [16, 32], strides = [1, 1]} : vector<16x128xf32> to vector<16x32xf32>
    %989 = tpu.concatenate %987, %988 in 0 : vector<16x32xf32>, vector<16x32xf32> -> vector<32x32xf32>
    %990 = vector.extract_strided_slice %951 {offsets = [0, 32], sizes = [16, 32], strides = [1, 1]} : vector<16x64xf32> to vector<16x32xf32>
    %991 = vector.extract_strided_slice %945 {offsets = [0, 32], sizes = [16, 32], strides = [1, 1]} : vector<16x64xf32> to vector<16x32xf32>
    %992 = arith.truncf %989 : vector<32x32xf32> to vector<32x32xbf16>
    %993 = arith.truncf %990 : vector<16x32xf32> to vector<16x32xbf16>
    %cst_369 = arith.constant dense<0.000000e+00> : vector<32x16xf32>
    %994 = tpu.matmul %992, %993, %cst_369 {dimension_numbers = #tpu.dot_dimension_numbers<[1], [1], [0], [0], [0, 0, 1, 0], [], []>} : vector<32x32xbf16>, vector<16x32xbf16>, vector<32x16xf32> -> vector<32x16xf32>
    %995 = arith.addf %994, %5 : vector<32x16xf32>
    %cst_370 = arith.constant dense<0xFF800000> : vector<32xf32>
    %996 = vector.multi_reduction <maximumf>, %995, %cst_370 [1] : vector<32x16xf32> to vector<32xf32>
    %997 = vector.shape_cast %996 : vector<32xf32> to vector<32x1xf32>
    %998 = vector.broadcast %997 : vector<32x1xf32> to vector<32x16xf32>
    %999 = arith.subf %995, %998 : vector<32x16xf32>
    %1000 = math.exp %999 : vector<32x16xf32>
    %cst_371 = arith.constant dense<0.000000e+00> : vector<32xf32>
    %1001 = vector.multi_reduction <add>, %1000, %cst_371 [1] : vector<32x16xf32> to vector<32xf32>
    %1002 = vector.shape_cast %1001 : vector<32xf32> to vector<32x1xf32>
    %1003 = tpu.reciprocal %1002 {approx = true} : vector<32x1xf32> -> vector<32x1xf32>
    %1004 = vector.broadcast %1003 : vector<32x1xf32> to vector<32x16xf32>
    %1005 = arith.mulf %1000, %1004 : vector<32x16xf32>
    %1006 = arith.truncf %1005 : vector<32x16xf32> to vector<32x16xbf16>
    %1007 = arith.truncf %991 : vector<16x32xf32> to vector<16x32xbf16>
    %cst_372 = arith.constant dense<0.000000e+00> : vector<32x32xf32>
    %1008 = tpu.matmul %1006, %1007, %cst_372 {dimension_numbers = #tpu.dot_dimension_numbers<[1], [0], [0], [1], [0, 0, 1, 1], [], []>} : vector<32x16xbf16>, vector<16x32xbf16>, vector<32x32xf32> -> vector<32x32xf32>
    %1009 = vector.extract_strided_slice %1008 {offsets = [0, 0], sizes = [16, 32], strides = [1, 1]} : vector<32x32xf32> to vector<16x32xf32>
    %1010 = arith.truncf %1009 : vector<16x32xf32> to vector<16x32xbf16>
    %c7_373 = arith.constant 7 : index
    %c64_374 = arith.constant 64 : index
    %c0_375 = arith.constant 0 : index
    %1011 = vector.load %arg6[%c7_373, %c64_374, %c0_375] : memref<8x128x128xbf16, #tpu.memory_space<vmem>>, vector<1x32x128xbf16>
    %1012 = vector.shape_cast %1011 : vector<1x32x128xbf16> to vector<32x128xbf16>
    %cst_376 = arith.constant dense<0.000000e+00> : vector<16x128xf32>
    %1013 = tpu.matmul %1010, %1012, %cst_376 {dimension_numbers = #tpu.dot_dimension_numbers<[1], [0], [0], [1], [0, 0, 1, 1], [], []>} : vector<16x32xbf16>, vector<32x128xbf16>, vector<16x128xf32> -> vector<16x128xf32>
    %1014 = arith.addf %986, %1013 : vector<16x128xf32>
    %1015 = vector.extract_strided_slice %1008 {offsets = [16, 0], sizes = [16, 32], strides = [1, 1]} : vector<32x32xf32> to vector<16x32xf32>
    %1016 = arith.truncf %1015 : vector<16x32xf32> to vector<16x32xbf16>
    %c7_377 = arith.constant 7 : index
    %c96_378 = arith.constant 96 : index
    %c0_379 = arith.constant 0 : index
    %1017 = vector.load %arg6[%c7_377, %c96_378, %c0_379] : memref<8x128x128xbf16, #tpu.memory_space<vmem>>, vector<1x32x128xbf16>
    %1018 = vector.shape_cast %1017 : vector<1x32x128xbf16> to vector<32x128xbf16>
    %cst_380 = arith.constant dense<0.000000e+00> : vector<16x128xf32>
    %1019 = tpu.matmul %1016, %1018, %cst_380 {dimension_numbers = #tpu.dot_dimension_numbers<[1], [0], [0], [1], [0, 0, 1, 1], [], []>} : vector<16x32xbf16>, vector<32x128xbf16>, vector<16x128xf32> -> vector<16x128xf32>
    %1020 = arith.addf %1014, %1019 : vector<16x128xf32>
    %1021 = arith.addf %922, %1020 : vector<16x128xf32>
    %c7_381 = arith.constant 7 : index
    %c0_382 = arith.constant 0 : index
    %c0_383 = arith.constant 0 : index
    %1022 = vector.load %arg7[%c7_381, %c0_382, %c0_383] : memref<8x1x128xf32, #tpu.memory_space<vmem>>, vector<1x1x128xf32>
    %1023 = vector.shape_cast %1022 : vector<1x1x128xf32> to vector<1x128xf32>
    %1024 = arith.mulf %1021, %1021 : vector<16x128xf32>
    %cst_384 = arith.constant dense<0.000000e+00> : vector<16xf32>
    %1025 = vector.multi_reduction <add>, %1024, %cst_384 [1] : vector<16x128xf32> to vector<16xf32>
    %1026 = vector.shape_cast %1025 : vector<16xf32> to vector<16x1xf32>
    %cst_385 = arith.constant 1.280000e+02 : f32
    %1027 = vector.broadcast %cst_385 : f32 to vector<16x1xf32>
    %1028 = arith.divf %1026, %1027 : vector<16x1xf32>
    %cst_386 = arith.constant 9.99999974E-6 : f32
    %1029 = vector.broadcast %cst_386 : f32 to vector<16x1xf32>
    %1030 = arith.addf %1028, %1029 : vector<16x1xf32>
    %1031 = math.rsqrt %1030 : vector<16x1xf32>
    %1032 = vector.broadcast %1031 : vector<16x1xf32> to vector<16x128xf32>
    %1033 = arith.mulf %1021, %1032 : vector<16x128xf32>
    %1034 = vector.broadcast %1023 : vector<1x128xf32> to vector<16x128xf32>
    %1035 = arith.mulf %1033, %1034 : vector<16x128xf32>
    %1036 = arith.truncf %1035 : vector<16x128xf32> to vector<16x128xbf16>
    %c7_387 = arith.constant 7 : index
    %c0_388 = arith.constant 0 : index
    %c0_389 = arith.constant 0 : index
    %1037 = vector.load %arg8[%c7_387, %c0_388, %c0_389] : memref<8x128x512xbf16, #tpu.memory_space<vmem>>, vector<1x128x512xbf16>
    %1038 = vector.shape_cast %1037 : vector<1x128x512xbf16> to vector<128x512xbf16>
    %cst_390 = arith.constant dense<0.000000e+00> : vector<16x512xf32>
    %1039 = tpu.matmul %1036, %1038, %cst_390 {dimension_numbers = #tpu.dot_dimension_numbers<[1], [0], [0], [1], [0, 0, 1, 1], [], []>} : vector<16x128xbf16>, vector<128x512xbf16>, vector<16x512xf32> -> vector<16x512xf32>
    %1040 = vector.extract_strided_slice %1039 {offsets = [0, 0], sizes = [16, 256], strides = [1, 1]} : vector<16x512xf32> to vector<16x256xf32>
    %1041 = vector.extract_strided_slice %1039 {offsets = [0, 256], sizes = [16, 256], strides = [1, 1]} : vector<16x512xf32> to vector<16x256xf32>
    %1042 = arith.negf %1040 : vector<16x256xf32>
    %1043 = math.exp %1042 : vector<16x256xf32>
    %cst_391 = arith.constant 1.000000e+00 : f32
    %1044 = vector.broadcast %cst_391 : f32 to vector<16x256xf32>
    %1045 = arith.addf %1044, %1043 : vector<16x256xf32>
    %1046 = arith.divf %1044, %1045 : vector<16x256xf32>
    %1047 = arith.mulf %1040, %1046 : vector<16x256xf32>
    %1048 = arith.mulf %1047, %1041 : vector<16x256xf32>
    %1049 = arith.truncf %1048 : vector<16x256xf32> to vector<16x256xbf16>
    %c7_392 = arith.constant 7 : index
    %c0_393 = arith.constant 0 : index
    %c0_394 = arith.constant 0 : index
    %1050 = vector.load %arg9[%c7_392, %c0_393, %c0_394] : memref<8x256x128xbf16, #tpu.memory_space<vmem>>, vector<1x256x128xbf16>
    %1051 = vector.shape_cast %1050 : vector<1x256x128xbf16> to vector<256x128xbf16>
    %cst_395 = arith.constant dense<0.000000e+00> : vector<16x128xf32>
    %1052 = tpu.matmul %1049, %1051, %cst_395 {dimension_numbers = #tpu.dot_dimension_numbers<[1], [0], [0], [1], [0, 0, 1, 1], [], []>} : vector<16x256xbf16>, vector<256x128xbf16>, vector<16x128xf32> -> vector<16x128xf32>
    %1053 = arith.addf %1021, %1052 : vector<16x128xf32>
    %c0_396 = arith.constant 0 : index
    %c0_397 = arith.constant 0 : index
    %1054 = vector.load %arg10[%c0_396, %c0_397] : memref<16x128xf32, #tpu.memory_space<vmem>>, vector<16x128xf32>
    tpu.vector_store %arg10[%c0_396, %c0_397], %1053 {strides = array<i32>} : memref<16x128xf32, #tpu.memory_space<vmem>>, vector<16x128xf32>,
    return
  }
}

</mosaic_0001>

<bundles_post_ra>
// kernel: first_half_forward.1
= control target key start
LH: loop header
LB: loop body
LE: loop exit
PB: predicated region body
PF: predicated region fallthrough
CT: control target
= control target key end

     0   :  { %v14748_v11 = vmov 128.0   ;;  %s14749_s21 = smov 64   ;;  %s14750_s29 = smov 96   ;;  %vm379_vm7 = vcmask 261120   ;;  %vm408_vm8 = vcmask 130048   ;;  %s19536_s0 = inlined_call_operand.vmem [shape: f32[16,128], index: 0, kind: input, shape index: {}, may-alias: {0,10}]   ;;  %s19537_s4 = inlined_call_operand.vmem [shape: f32[8,1,128], index: 4, kind: input, shape index: {}]   ;;  %s19538_s5 = inlined_call_operand.vmem [shape: bf16[8,128,448], index: 5, kind: input, shape index: {}]   ;;  %s19539_s2 = inlined_call_operand.vmem [shape: f32[16,128], index: 2, kind: input, shape index: {}]   ;;  %s19540_s1 = inlined_call_operand.vmem [shape: f32[16,128], index: 1, kind: input, shape index: {}]   ;;  %s19541_s3 = inlined_call_operand.vmem [shape: f32[32,16], index: 3, kind: input, shape index: {}]   ;;  %s19542_s6 = inlined_call_operand.vmem [shape: bf16[8,128,128], index: 6, kind: input, shape index: {}]   ;;  %s19543_s7 = inlined_call_operand.vmem [shape: f32[8,1,128], index: 7, kind: input, shape index: {}]   ;;  %s19544_s8 = inlined_call_operand.vmem [shape: bf16[8,128,512], index: 8, kind: input, shape index: {}]   ;;  %s19545_s9 = inlined_call_operand.vmem [shape: bf16[8,256,128], index: 9, kind: input, shape index: {}]   ;;  %s19546_s10 = inlined_call_operand.vmem [shape: f32[16,128], index: 10, kind: output, shape index: {}, may-alias: {0,10}]  }
   0x1   :  { %v14809_v0 = vld [vmem:[%s19536_s0] sm:$0xff]  ;;  %v14816_v2 = vld [vmem:[%s19536_s0 + $0x8] sm:$0xff]  ;;  %v13507_v5 = vld [vmem:[%s19538_s5 + $0xec] sm:$0xf0]  ;;  %14242 = vrcp.f32 %v14748_v11 }
   0x2   :  { %v47_v1 = vmul.f32 %v14809_v0, %v14809_v0  ;;  %v48_v3 = vmul.f32 %v14816_v2, %v14816_v2  ;;  %v9849_v4 = vld [vmem:[%s19538_s5 + $0xe0] sm:$0xf]  ;;  %v13505_v6 = vld [vmem:[%s19538_s5 + $0xe4] sm:$0xf]  ;;  %v9851_v8 = vld [vmem:[%s19538_s5 + $0xf0] sm:$0xf0] }
   0x3   :  { %v9850_v7 = vor.u32 %v13507_v5, %v9849_v4  ;;  %v9857_v9 = vld [vmem:[%s19538_s5 + $0xe8] sm:$0xf]  ;;  %v13508_v10 = vld [vmem:[%s19538_s5 + $0xf4] sm:$0xf0]  ;;  %v9854_v12 = vor.u32 %v13505_v6, %v9851_v8  ;;  %v13506_v14 = vld [vmem:[%s19538_s5 + $0xec] sm:$0xf] }
   0x4   :  { %49 = vadd.xlane.f32.xlu0 %v47_v1  ;;  %v9858_v13 = vor.u32 %v13508_v10, %v9857_v9  ;;  %v9859_v15 = vld [vmem:[%s19538_s5 + $0xf8] sm:$0xf0]  ;;  %v9833_v17 = vld [vmem:[%s19538_s5 + $0xc0] sm:$0xf]  ;;  %v13503_v18 = vld [vmem:[%s19538_s5 + $0xcc] sm:$0xf0] }
   0x5   :  { %284 = vmatpush.bf16.msra.mxu0 %v9850_v7  ;;  %v9862_v16 = vor.u32 %v13506_v14, %v9859_v15  ;;  %298 = vmatpush.bf16.msra.mxu1 %v9854_v12  ;;  %v13501_v19 = vld [vmem:[%s19538_s5 + $0xc4] sm:$0xf]  ;;  %v9834_v20 = vor.u32 %v13503_v18, %v9833_v17  ;;  %v9835_v21 = vld [vmem:[%s19538_s5 + $0xd0] sm:$0xf0]  ;;  %v9841_v22 = vld [vmem:[%s19538_s5 + $0xc8] sm:$0xf] }
   0x6   :  { %312 = vmatpush.bf16.msra.mxu2 %v9858_v13  ;;  %v13504_v23 = vld [vmem:[%s19538_s5 + $0xd4] sm:$0xf0]  ;;  %v9838_v24 = vor.u32 %v13501_v19, %v9835_v21  ;;  %v13502_v26 = vld [vmem:[%s19538_s5 + $0xcc] sm:$0xf]  ;;  %v9843_v27 = vld [vmem:[%s19538_s5 + $0xd8] sm:$0xf0] }
   0x7   :  { %326 = vmatpush.bf16.msra.mxu3 %v9862_v16  ;;  %v9842_v25 = vor.u32 %v13504_v23, %v9841_v22  ;;  %v9846_v28 = vor.u32 %v13502_v26, %v9843_v27  ;;  %v14868_v29 = vpop.eup %14242  ;;  %v9817_v30 = vld [vmem:[%s19538_s5 + $0xa0] sm:$0xf]  ;;  %v13499_v31 = vld [vmem:[%s19538_s5 + $0xac] sm:$0xf0]  ;;  %v13497_v32 = vld [vmem:[%s19538_s5 + $0xa4] sm:$0xf] }
   0x8   :  { %v9818_v33 = vor.u32 %v13499_v31, %v9817_v30  ;;  %v9819_v34 = vld [vmem:[%s19538_s5 + $0xb0] sm:$0xf0]  ;;  %v9825_v35 = vld [vmem:[%s19538_s5 + $0xa8] sm:$0xf]  ;;  %v13500_v36 = vld [vmem:[%s19538_s5 + $0xb4] sm:$0xf0]  ;;  %vm58_vm0 = vweird.f32 %v14868_v29 }
   0x9   :  { %285 = vmatpush.bf16.msra.mxu0 %v9834_v20  ;;  %299 = vmatpush.bf16.msra.mxu1 %v9838_v24  ;;  %v9822_v37 = vor.u32 %v13497_v32, %v9819_v34  ;;  %v9826_v38 = vor.u32 %v13500_v36, %v9825_v35  ;;  %v13498_v39 = vld [vmem:[%s19538_s5 + $0xac] sm:$0xf]  ;;  %v9827_v40 = vld [vmem:[%s19538_s5 + $0xb8] sm:$0xf0]  ;;  %v54_v41 = vmul.f32 128.0, %v14868_v29 }
   0xa   :  { %313 = vmatpush.bf16.msra.mxu2 %v9842_v25  ;;  %v9830_v42 = vor.u32 %v13498_v39, %v9827_v40  ;;  %v9801_v43 = vld [vmem:[%s19538_s5 + $0x80] sm:$0xf]  ;;  %v13495_v44 = vld [vmem:[%s19538_s5 + $0x8c] sm:$0xf0]  ;;  %v13493_v45 = vld [vmem:[%s19538_s5 + $0x84] sm:$0xf] }
   0xb   :  { %327 = vmatpush.bf16.msra.mxu3 %v9846_v28  ;;  %v9802_v46 = vor.u32 %v13495_v44, %v9801_v43  ;;  %v9803_v47 = vld [vmem:[%s19538_s5 + $0x90] sm:$0xf0]  ;;  %v9809_v48 = vld [vmem:[%s19538_s5 + $0x88] sm:$0xf]  ;;  %v13496_v49 = vld [vmem:[%s19538_s5 + $0x94] sm:$0xf0] }
   0xc   :  { %51 = vadd.xlane.f32.xlu0 %v48_v3  ;;  %v9806_v50 = vor.u32 %v13493_v45, %v9803_v47  ;;  %v9810_v51 = vor.u32 %v13496_v49, %v9809_v48  ;;  %v13494_v52 = vld [vmem:[%s19538_s5 + $0x8c] sm:$0xf]  ;;  %v9811_v53 = vld [vmem:[%s19538_s5 + $0x98] sm:$0xf0]  ;;  %v55_v54 = vsub.f32 1.0, %v54_v41  ;;  %v40_v48 = vld [vmem:[%s19539_s2] sm:$0xff] }
   0xd   :  { %286 = vmatpush.bf16.msra.mxu0 %v9818_v33  ;;  %300 = vmatpush.bf16.msra.mxu1 %v9822_v37  ;;  %v9814_v55 = vor.u32 %v13494_v52, %v9811_v53  ;;  %v9785_v56 = vld [vmem:[%s19538_s5 + $0x60] sm:$0xf]  ;;  %v13491_v57 = vld [vmem:[%s19538_s5 + $0x6c] sm:$0xf0]  ;;  %v13489_v58 = vld [vmem:[%s19538_s5 + $0x64] sm:$0xf] }
   0xe   :  { %314 = vmatpush.bf16.msra.mxu2 %v9826_v38  ;;  %v9786_v59 = vor.u32 %v13491_v57, %v9785_v56  ;;  %v9787_v60 = vld [vmem:[%s19538_s5 + $0x70] sm:$0xf0]  ;;  %v9793_v61 = vld [vmem:[%s19538_s5 + $0x68] sm:$0xf]  ;;  %v13492_v62 = vld [vmem:[%s19538_s5 + $0x74] sm:$0xf0]  ;;  %v56_v5 = vmul.f32 %v14868_v29, %v55_v54  ;;  %350 = vrot.lane.b32.xlu1 %v40_v48, %s14749_s21 }
   0xf   :  { %328 = vmatpush.bf16.msra.mxu3 %v9830_v42  ;;  %v9790_v63 = vor.u32 %v13489_v58, %v9787_v60  ;;  %v9794_v1 = vor.u32 %v13492_v62, %v9793_v61  ;;  %v13490_v3 = vld [vmem:[%s19538_s5 + $0x6c] sm:$0xf]  ;;  %v9795_v4 = vld [vmem:[%s19538_s5 + $0x78] sm:$0xf0]  ;;  %v9769_v7 = vld [vmem:[%s19538_s5 + $0x40] sm:$0xf] }
  0x10   :  { %v9798_v6 = vor.u32 %v13490_v3, %v9795_v4  ;;  %v13487_v8 = vld [vmem:[%s19538_s5 + $0x4c] sm:$0xf0]  ;;  %v13485_v9 = vld [vmem:[%s19538_s5 + $0x44] sm:$0xf]  ;;  %v9771_v11 = vld [vmem:[%s19538_s5 + $0x50] sm:$0xf0]  ;;  %v57_v18 = vadd.f32 %v14868_v29, %v56_v5 }
  0x11   :  { %287 = vmatpush.bf16.msra.mxu0 %v9802_v46  ;;  %301 = vmatpush.bf16.msra.mxu1 %v9806_v50  ;;  %v9770_v10 = vor.u32 %v13487_v8, %v9769_v7  ;;  %v9777_v12 = vld [vmem:[%s19538_s5 + $0x48] sm:$0xf]  ;;  %v13488_v13 = vld [vmem:[%s19538_s5 + $0x54] sm:$0xf0]  ;;  %v9774_v14 = vor.u32 %v13485_v9, %v9771_v11  ;;  %v13486_v16 = vld [vmem:[%s19538_s5 + $0x4c] sm:$0xf] }
  0x12   :  { %315 = vmatpush.bf16.msra.mxu2 %v9810_v51  ;;  %v9778_v15 = vor.u32 %v13488_v13, %v9777_v12  ;;  %v9779_v17 = vld [vmem:[%s19538_s5 + $0x58] sm:$0xf0]  ;;  %v9753_v20 = vld [vmem:[%s19538_s5 + $0x20] sm:$0xf]  ;;  %v13483_v21 = vld [vmem:[%s19538_s5 + $0x2c] sm:$0xf0]  ;;  %v14995_v32 = vsel %vm58_vm0, %v14868_v29, %v57_v18 }
  0x13   :  { %329 = vmatpush.bf16.msra.mxu3 %v9814_v55  ;;  %v9782_v19 = vor.u32 %v13486_v16, %v9779_v17  ;;  %v13481_v22 = vld [vmem:[%s19538_s5 + $0x24] sm:$0xf]  ;;  %v9754_v23 = vor.u32 %v13483_v21, %v9753_v20  ;;  %v9755_v24 = vld [vmem:[%s19538_s5 + $0x30] sm:$0xf0]  ;;  %v9761_v25 = vld [vmem:[%s19538_s5 + $0x28] sm:$0xf] }
  0x14   :  { %v13484_v26 = vld [vmem:[%s19538_s5 + $0x34] sm:$0xf0]  ;;  %v9758_v27 = vor.u32 %v13481_v22, %v9755_v24  ;;  %v13482_v30 = vld [vmem:[%s19538_s5 + $0x2c] sm:$0xf]  ;;  %v9763_v31 = vld [vmem:[%s19538_s5 + $0x38] sm:$0xf0] }
  0x15   :  { %288 = vmatpush.bf16.msra.mxu0 %v9786_v59  ;;  %302 = vmatpush.bf16.msra.mxu1 %v9790_v63  ;;  %v9762_v28 = vor.u32 %v13484_v26, %v9761_v25  ;;  %v9766_v33 = vor.u32 %v13482_v30, %v9763_v31  ;;  %v9737_v34 = vld [vmem:[%s19538_s5] sm:$0xf]  ;;  %v13479_v35 = vld [vmem:[%s19538_s5 + $0xc] sm:$0xf0]  ;;  %v13477_v36 = vld [vmem:[%s19538_s5 + $0x4] sm:$0xf] }
  0x16   :  { %316 = vmatpush.bf16.msra.mxu2 %v9794_v1  ;;  %v9738_v29 = vor.u32 %v13479_v35, %v9737_v34  ;;  %v9739_v38 = vld [vmem:[%s19538_s5 + $0x10] sm:$0xf0]  ;;  %v9745_v39 = vld [vmem:[%s19538_s5 + $0x8] sm:$0xf]  ;;  %v13480_v40 = vld [vmem:[%s19538_s5 + $0x14] sm:$0xf0] }
  0x17   :  { %330 = vmatpush.bf16.msra.mxu3 %v9798_v6  ;;  %v9742_v42 = vor.u32 %v13477_v36, %v9739_v38  ;;  %v9746_v43 = vor.u32 %v13480_v40, %v9745_v39  ;;  %v13478_v44 = vld [vmem:[%s19538_s5 + $0xc] sm:$0xf]  ;;  %v9747_v45 = vld [vmem:[%s19538_s5 + $0x18] sm:$0xf0]  ;;  %v14226_v5 = vld [vmem:[%s19537_s4] ss:$0 sm:$0xff] }
  0x18   :  { %v9750_v46 = vor.u32 %v13478_v44, %v9747_v45  ;;  %v41_v54 = vld [vmem:[%s19539_s2 + $0x8] sm:$0xff] }
  0x19   :  { %289 = vmatpush.bf16.msra.mxu0 %v9770_v10  ;;  %303 = vmatpush.bf16.msra.mxu1 %v9774_v14  ;;  %v38_v14 = vld [vmem:[%s19540_s1] sm:$0xff] }
  0x1a   :  { %317 = vmatpush.bf16.msra.mxu2 %v9778_v15  ;;  %352 = vrot.lane.b32.xlu1 %v41_v54, %s14749_s21  ;;  %v39_v15 = vld [vmem:[%s19540_s1 + $0x8] sm:$0xff] }
  0x1b   :  { %331 = vmatpush.bf16.msra.mxu3 %v9782_v19 }
  0x1d   :  { %290 = vmatpush.bf16.msra.mxu0 %v9754_v23  ;;  %304 = vmatpush.bf16.msra.mxu1 %v9758_v27 }
  0x1e   :  { %318 = vmatpush.bf16.msra.mxu2 %v9762_v28 }
  0x1f   :  { %332 = vmatpush.bf16.msra.mxu3 %v9766_v33 }
  0x21   :  { %291 = vmatpush.bf16.msra.mxu0 %v9738_v29  ;;  %305 = vmatpush.bf16.msra.mxu1 %v9742_v42 }
  0x22   :  { %319 = vmatpush.bf16.msra.mxu2 %v9746_v43 }
  0x23   :  { %333 = vmatpush.bf16.msra.mxu3 %v9750_v46 }
  0x77   :  { %v50_v37 = vpop.xlane.xlu0 %49 }
  0x78   :  { %v60_v41 = vmul.f32 %v14995_v32, %v50_v37 }
  0x7a   :  { %v62_v47 = vadd.f32 1e-05, %v60_v41 }
  0x7c   :  { %14244 = vrsqrt.f32 %v62_v47  ;;  %vm70_vm2 = vweird.f32 %v62_v47 }
  0x7f   :  { %v52_v49 = vpop.xlane.xlu0 %51 }
  0x80   :  { %v61_v50 = vmul.f32 %v14995_v32, %v52_v49  ;;  %v15036_v13 = vpop.permute.xlu1 %350 }
  0x82   :  { %v14245_v51 = vpop.eup %14244  ;;  %v63_v52 = vadd.f32 1e-05, %v61_v50 }
  0x83   :  { %v65_v53 = vmul.f32 %v14245_v51, %v62_v47  ;;  %vm71_vm1 = vweird.f32 %v14245_v51  ;;  %v15064_v47 = vld [vmem:[%s19541_s3 + $0x10] sm:$0xff] }
  0x84   :  { %14246 = vrsqrt.f32 %v63_v52  ;;  %vm72_vm3 = vmor %vm70_vm2, %vm71_vm1  ;;  %vm80_vm5 = vweird.f32 %v63_v52 }
  0x85   :  { %v66_v55 = vmul.f32 %v14245_v51, %v65_v53 }
  0x87   :  { %v67_v56 = vmul.f32 0.5, %v66_v55  ;;  %v15079_v55 = vld [vmem:[%s19541_s3] sm:$0xff] }
  0x89   :  { %v68_v57 = vsub.f32 1.5, %v67_v56 }
  0x8a   :  { %v14247_v58 = vpop.eup %14246 }
  0x8b   :  { %v75_v59 = vmul.f32 %v14247_v58, %v63_v52  ;;  %v69_v60 = vmul.f32 %v14245_v51, %v68_v57  ;;  %vm81_vm4 = vweird.f32 %v14247_v58 }
  0x8c   :  { %vm82_vm6 = vmor %vm80_vm5, %vm81_vm4  ;;  %v15048_v28 = vpop.permute.xlu1 %352 }
  0x8d   :  { %v76_v61 = vmul.f32 %v14247_v58, %v75_v59  ;;  %v73_v63 = vsel %vm72_vm3, %v14245_v51, %v69_v60  ;;  %v15071_v51 = vld [vmem:[%s19541_s3 + $0x18] sm:$0xff]  ;;  %v13511_v60 = vld [vmem:[%s19542_s6 + $0x10] sm:$0xff] }
  0x8e   :  { %v84_v4 = vmul.f32 %v73_v63, %v14809_v0  ;;  %v13512_v59 = vld [vmem:[%s19542_s6 + $0x18] sm:$0xff] }
  0x8f   :  { %v77_v62 = vmul.f32 0.5, %v76_v61 }
  0x90   :  { %v89_v8 = vmul.f32 %v14226_v5, %v84_v4 }
  0x91   :  { %v78_v1 = vsub.f32 1.5, %v77_v62 }
  0x93   :  { %v79_v3 = vmul.f32 %v14247_v58, %v78_v1 }
  0x95   :  { %v83_v6 = vsel %vm82_vm6, %v14247_v58, %v79_v3 }
  0x96   :  { %v85_v7 = vmul.f32 %v83_v6, %v14816_v2 }
  0x98   :  { %v90_v9 = vmul.f32 %v14226_v5, %v85_v7 }
  0x9a   :  { %v91_v10 = vpack.c.bf16 %v90_v9, %v89_v8 }
  0x9c   :  { %292 = vmatmul.bf16.vlgmr.msra.gmra.mxu0 %v91_v10  ;;  %306 = vmatmul.bf16.vlgmr.msra.gmra.mxu1 %v91_v10 }
  0x9d   :  { %320 = vmatmul.bf16.vlgmr.msra.gmra.mxu2 %v91_v10  ;;  %334 = vmatmul.bf16.vlgmr.msra.gmra.mxu3 %v91_v10 }
 0x119   :  { %v293_v11 = vpop.f32.mrf.mxu0  ;;  %v307_v12 = vpop.f32.mrf.mxu1 }
 0x11a   :  { %v340_v16 = vmul.f32 %v293_v11, %v38_v14  ;;  %v342_v17 = vmul.f32 %v307_v12, %v40_v48 }
 0x11c   :  { %v344_v25 = vadd.f32 %v342_v17, %v340_v16  ;;  %v43_v16 = vld [vmem:[%s19541_s3 + $0x8] sm:$0xff] }
 0x120   :  { %v321_v18 = vpop.f32.mrf.mxu2  ;;  %v335_v19 = vpop.f32.mrf.mxu3 }
 0x121   :  { %v295_v20 = vpop.f32.mrf.mxu0  ;;  %v309_v21 = vpop.f32.mrf.mxu1  ;;  %v356_v22 = vmul.f32 %v15036_v13, %v321_v18  ;;  %v346_v37 = vmul.f32 %v321_v18, %v38_v14 }
 0x122   :  { %v341_v23 = vmul.f32 %v295_v20, %v39_v15  ;;  %v343_v24 = vmul.f32 %v309_v21, %v41_v54 }
 0x123   :  { %360 = vrot.lane.b32.xlu2 %v356_v22, %s14749_s21 }
 0x124   :  { %v345_v26 = vadd.f32 %v343_v24, %v341_v23 }
 0x126   :  { %v15046_v27 = vpack.c.bf16 %v345_v26, %v344_v25  ;;  %v14186_v30 = vpack.i.bf16 %v345_v26, %v344_v25 }
 0x128   :  { %v323_v31 = vpop.f32.mrf.mxu2  ;;  %v337_v33 = vpop.f32.mrf.mxu3  ;;  %14187 = vrot.lane.b32.xlu0 %v14186_v30, %s14750_s29 }
 0x129   :  { %v357_v34 = vmul.f32 %v15048_v28, %v323_v31  ;;  %v15052_v35 = vpack.c.bf16 %v337_v33, %v335_v19  ;;  %v347_v29 = vmul.f32 %v323_v31, %v39_v15 }
 0x12b   :  { %469 = vmatpush.bf16.msrb.mxu1 %v15052_v35  ;;  %14182 = vmatpush.bf16.msrb.mxu3 %v15052_v35 }
 0x12c   :  { %362 = vrot.lane.b32.xlu2 %v357_v34, %s14749_s21 }
 0x17d   :  { %v361_v36 = vpop.permute.xlu2 %360 }
 0x17e   :  { %v366_v39 = vadd.f32 %v361_v36, %v346_v37 }
 0x186   :  { %v363_v38 = vpop.permute.xlu2 %362 }
 0x187   :  { %v367_v40 = vadd.f32 %v363_v38, %v347_v29 }
 0x189   :  { %v378_v41 = vpack.c.bf16 %v367_v40, %v366_v39 }
 0x18b   :  { %v387_v42 = vsel %vm379_vm7, %v378_v41, 0 }
 0x18c   :  { %396 = vmatpush.bf16.xpose.msrb.mxu0 %v387_v42  ;;  %14181 = vmatpush.bf16.xpose.msrb.mxu2 %v387_v42 }
 0x193   :  { %9863 = vmatmul.msk.bf16.vlgmr.msrb.gmra.mxu0 %vm379_vm7, %v15046_v27 }
 0x194   :  { %512 = vmatpush.bf16.msra.mxu2 %v13512_v59 }
 0x198   :  { %513 = vmatpush.bf16.msra.mxu2 %v13511_v60 }
 0x19a   :  { %v14188_v43 = vpop.permute.xlu0 %14187 }
 0x19b   :  { %v14190_v44 = vunpack.i.h.bf16 %v14188_v43  ;;  %v14189_v45 = vunpack.i.l.bf16 %v14188_v43 }
 0x19d   :  { %v377_v46 = vpack.c.bf16 %v14190_v44, %v14189_v45 }
 0x19f   :  { %9864 = vmatmul.msk.bf16.vlgmr.msrb.gmra.mxu2 %vm379_vm7, %v377_v46 }
 0x210   :  { %v398_v56 = vpop.f32.mrf.mxu0 }
 0x211   :  { %v399_v57 = vadd.f32 %v398_v56, %v15079_v55 }
 0x213   :  { %v409_v58 = vsel %vm408_vm8, %v399_v57, -inf }
 0x218   :  { %v400_v17 = vpop.f32.mrf.mxu0 }
 0x219   :  { %v401_v19 = vadd.f32 %v400_v17, %v43_v16 }
 0x21b   :  { %v412_v20 = vsel %vm408_vm8, %v401_v19, -inf }
 0x222   :  { %v403_v48 = vpop.f32.mrf.mxu2 }
 0x223   :  { %v404_v49 = vadd.f32 %v403_v48, %v15064_v47 }
 0x225   :  { %v415_v50 = vsel %vm408_vm8, %v404_v49, -inf }
 0x226   :  { %416 = vmax.xlane.f32.xlu1 %v415_v50 }
 0x22a   :  { %v405_v52 = vpop.f32.mrf.mxu2 }
 0x22b   :  { %v406_v53 = vadd.f32 %v405_v52, %v15071_v51  ;;  %v13510_v52 = vld [vmem:[%s19542_s6 + $0x8] sm:$0xff] }
 0x22c   :  { %541 = vmatpush.bf16.msra.mxu3 %v13510_v52  ;;  %v13515_v52 = vld [vmem:[%s19542_s6 + $0x30] sm:$0xff] }
 0x22d   :  { %v418_v54 = vsel %vm408_vm8, %v406_v53, -inf }
 0x22e   :  { %419 = vmax.xlane.f32.xlu2 %v418_v54 }
 0x23f   :  { %556 = vrot.lane.b32.xlu1 %v378_v41, %s14750_s29 }
 0x269   :  { %410 = vmax.xlane.f32.xlu1 %v409_v58 }
 0x299   :  { %v417_v61 = vpop.xlane.xlu1 %416 }
 0x29a   :  { %v423_v62 = vsub.f32 %v404_v49, %v417_v61 }
 0x29c   :  { %v429_v63 = vmul.f32 1.442695, %v423_v62 }
 0x29e   :  { %14248 = vpow2.f32 %v429_v63 }
 0x2a1   :  { %v420_v1 = vpop.xlane.xlu2 %419 }
 0x2a2   :  { %v424_v3 = vsub.f32 %v406_v53, %v420_v1 }
 0x2a4   :  { %v14249_v4 = vpop.eup %14248  ;;  %v431_v5 = vmul.f32 1.442695, %v424_v3 }
 0x2a5   :  { %v439_v6 = vsel %vm408_vm8, %v14249_v4, 0.0 }
 0x2a6   :  { %14250 = vpow2.f32 %v431_v5  ;;  %440 = vadd.xlane.f32.xlu0 %v439_v6 }
 0x2ac   :  { %v14251_v7 = vpop.eup %14250 }
 0x2ad   :  { %v442_v8 = vsel %vm408_vm8, %v14251_v7, 0.0 }
 0x2ae   :  { %443 = vadd.xlane.f32.xlu2 %v442_v8 }
 0x2b1   :  { %v557_v9 = vpop.permute.xlu1 %556 }
 0x2b2   :  { %v565_v10 = vsel %vm379_vm7, %v557_v9, 0 }
 0x2b3   :  { %574 = vmatpush.bf16.xpose.msrb.mxu2 %v565_v10 }
 0x2ba   :  { %553 = vrot.lane.b32.xlu0 %v377_v46, %s14749_s21 }
 0x2c6   :  { %551 = vrot.lane.b32.xlu2 %v15046_v27, %s14749_s21 }
 0x2dc   :  { %v411_v11 = vpop.xlane.xlu1 %410 }
 0x2dd   :  { %v421_v12 = vsub.f32 %v399_v57, %v411_v11  ;;  %v13509_v57 = vld [vmem:[%s19542_s6] sm:$0xff] }
 0x2de   :  { %542 = vmatpush.bf16.msra.mxu3 %v13509_v57 }
 0x2df   :  { %v425_v14 = vmul.f32 1.442695, %v421_v12 }
 0x2e1   :  { %14252 = vpow2.f32 %v425_v14 }
 0x2e7   :  { %v14253_v15 = vpop.eup %14252 }
 0x2e8   :  { %v433_v18 = vsel %vm408_vm8, %v14253_v15, 0.0 }
 0x2e9   :  { %434 = vadd.xlane.f32.xlu0 %v433_v18 }
 0x2ef   :  { %413 = vmax.xlane.f32.xlu2 %v412_v20 }
 0x319   :  { %v441_v21 = vpop.xlane.xlu0 %440 }
 0x31a   :  { %14254 = vrcp.f32 %v441_v21 }
 0x320   :  { %v14255_v23 = vpop.eup %14254 }
 0x321   :  { %v444_v22 = vpop.xlane.xlu2 %443  ;;  %v451_v25 = vmul.f32 %v14255_v23, %v14249_v4 }
 0x322   :  { %14256 = vrcp.f32 %v444_v22 }
 0x328   :  { %v14257_v24 = vpop.eup %14256 }
 0x329   :  { %v452_v26 = vmul.f32 %v14257_v24, %v14251_v7  ;;  %v552_v30 = vpop.permute.xlu2 %551 }
 0x32b   :  { %v454_v27 = vpack.c.bf16 %v452_v26, %v451_v25 }
 0x32c   :  { %v554_v40 = vpop.permute.xlu0 %553 }
 0x32d   :  { %9866 = vmatmul.msk.bf16.vlgmr.msrb.gmra.mxu3 %vm408_vm8, %v454_v27 }
 0x35c   :  { %v435_v41 = vpop.xlane.xlu0 %434 }
 0x362   :  { %v414_v31 = vpop.xlane.xlu2 %413 }
 0x363   :  { %v422_v33 = vsub.f32 %v401_v19, %v414_v31 }
 0x365   :  { %v427_v34 = vmul.f32 1.442695, %v422_v33 }
 0x367   :  { %14258 = vpow2.f32 %v427_v34 }
 0x368   :  { %14260 = vrcp.f32 %v435_v41 }
 0x36d   :  { %v14259_v36 = vpop.eup %14258 }
 0x36e   :  { %v436_v37 = vsel %vm408_vm8, %v14259_v36, 0.0  ;;  %v14261_v43 = vpop.eup %14260 }
 0x36f   :  { %437 = vadd.xlane.f32.xlu1 %v436_v37  ;;  %v449_v45 = vmul.f32 %v14261_v43, %v14253_v15  ;;  %v13514_v43 = vld [vmem:[%s19542_s6 + $0x28] sm:$0xff] }
 0x370   :  { %687 = vmatpush.bf16.msra.mxu0 %v13514_v43 }
 0x3b0   :  { %v476_v29 = vpop.f32.mrf.mxu3 }
 0x3b8   :  { %v478_v38 = vpop.f32.mrf.mxu3 }
 0x3b9   :  { %v486_v39 = vpack.c.bf16 %v478_v38, %v476_v29 }
 0x3bb   :  { %9875 = vmatmul.msk.bf16.vlgmr.msra.gmra.mxu2 %vm379_vm7, %v486_v39 }
 0x3cb   :  { %9885 = vmatmul.msk.bf16.vlgmr.msrb.gmra.mxu2 %vm379_vm7, %v552_v30 }
 0x3db   :  { %9886 = vmatmul.msk.bf16.gmra.mxu2 %vm379_vm7, %v554_v40 }
 0x3e2   :  { %v438_v42 = vpop.xlane.xlu1 %437 }
 0x3e3   :  { %14262 = vrcp.f32 %v438_v42 }
 0x3e9   :  { %v14263_v44 = vpop.eup %14262 }
 0x3ea   :  { %v450_v46 = vmul.f32 %v14263_v44, %v14259_v36  ;;  %v13513_v44 = vld [vmem:[%s19542_s6 + $0x20] sm:$0xff] }
 0x3eb   :  { %688 = vmatpush.bf16.msra.mxu0 %v13513_v44  ;;  %v9973_v44 = vld [vmem:[%s19544_s8 + $0x80] sm:$0xf] }
 0x3ec   :  { %v453_v48 = vpack.c.bf16 %v450_v46, %v449_v45  ;;  %v13516_v46 = vld [vmem:[%s19542_s6 + $0x38] sm:$0xff] }
 0x3ed   :  { %723 = vmatpush.bf16.msra.mxu1 %v13516_v46  ;;  %v13533_v46 = vld [vmem:[%s19544_s8 + $0x84] sm:$0xf] }
 0x3ee   :  { %9865 = vmatmul.msk.bf16.vlgmr.msrb.gmra.mxu1 %vm408_vm8, %v453_v48 }
 0x3f1   :  { %724 = vmatpush.bf16.msra.mxu1 %v13515_v52  ;;  %v9975_v52 = vld [vmem:[%s19544_s8 + $0x90] sm:$0xf0] }
 0x43e   :  { %v15106_v49 = vpop.f32.mrf.mxu2 }
 0x446   :  { %v15108_v50 = vpop.f32.mrf.mxu2 }
 0x44e   :  { %v576_v53 = vpop.f32.mrf.mxu2 }
 0x44f   :  { %v577_v54 = vadd.f32 %v576_v53, %v15079_v55 }
 0x451   :  { %v586_v56 = vsel %vm408_vm8, %v577_v54, -inf }
 0x452   :  { %587 = vmax.xlane.f32.xlu2 %v586_v56 }
 0x456   :  { %v578_v58 = vpop.f32.mrf.mxu2 }
 0x457   :  { %v579_v59 = vadd.f32 %v578_v58, %v43_v16 }
 0x459   :  { %v589_v60 = vsel %vm408_vm8, %v579_v59, -inf }
 0x45a   :  { %590 = vmax.xlane.f32.xlu1 %v589_v60 }
 0x45e   :  { %v581_v61 = vpop.f32.mrf.mxu2 }
 0x45f   :  { %v582_v62 = vadd.f32 %v581_v61, %v15064_v47 }
 0x461   :  { %v592_v63 = vsel %vm408_vm8, %v582_v62, -inf }
 0x462   :  { %593 = vmax.xlane.f32.xlu2 %v592_v63 }
 0x466   :  { %v583_v55 = vpop.f32.mrf.mxu2 }
 0x467   :  { %v584_v1 = vadd.f32 %v583_v55, %v15071_v51 }
 0x469   :  { %v595_v3 = vsel %vm408_vm8, %v584_v1, -inf }
 0x46a   :  { %596 = vmax.xlane.f32.xlu0 %v595_v3 }
 0x46b   :  { %v471_v4 = vpop.f32.mrf.mxu1 }
 0x473   :  { %v473_v5 = vpop.f32.mrf.mxu1 }
 0x474   :  { %v481_v6 = vpack.c.bf16 %v473_v5, %v471_v4 }
 0x476   :  { %9884 = vmatmul.msk.bf16.vlgmr.msra.gmra.mxu3 %vm379_vm7, %v481_v6 }
 0x47e   :  { %633 = vrot.lane.b32.xlu0 %v15052_v35, %s14750_s29 }
 0x4c5   :  { %v588_v7 = vpop.xlane.xlu2 %587 }
 0x4c6   :  { %v598_v8 = vsub.f32 %v577_v54, %v588_v7 }
 0x4c8   :  { %v602_v47 = vmul.f32 1.442695, %v598_v8 }
 0x4ca   :  { %14264 = vpow2.f32 %v602_v47 }
 0x4cd   :  { %v591_v9 = vpop.xlane.xlu1 %590 }
 0x4ce   :  { %v599_v10 = vsub.f32 %v579_v59, %v591_v9  ;;  %v13545_v9 = vld [vmem:[%s19544_s8 + $0xe4] sm:$0xf] }
 0x4d0   :  { %v14265_v11 = vpop.eup %14264  ;;  %v604_v12 = vmul.f32 1.442695, %v599_v10 }
 0x4d1   :  { %v610_v51 = vsel %vm408_vm8, %v14265_v11, 0.0 }
 0x4d2   :  { %14266 = vpow2.f32 %v604_v12  ;;  %611 = vadd.xlane.f32.xlu1 %v610_v51  ;;  %v13548_v12 = vld [vmem:[%s19544_s8 + $0xf4] sm:$0xf0] }
 0x4d5   :  { %v594_v14 = vpop.xlane.xlu2 %593 }
 0x4d6   :  { %v600_v15 = vsub.f32 %v582_v62, %v594_v14 }
 0x4d8   :  { %v14267_v16 = vpop.eup %14266  ;;  %v606_v17 = vmul.f32 1.442695, %v600_v15  ;;  %v13546_v15 = vld [vmem:[%s19544_s8 + $0xec] sm:$0xf] }
 0x4d9   :  { %v613_v18 = vsel %vm408_vm8, %v14267_v16, 0.0 }
 0x4da   :  { %14268 = vpow2.f32 %v606_v17  ;;  %614 = vadd.xlane.f32.xlu2 %v613_v18  ;;  %v10005_v18 = vld [vmem:[%s19544_s8 + $0xc0] sm:$0xf] }
 0x4dd   :  { %v597_v35 = vpop.xlane.xlu0 %596 }
 0x4de   :  { %v601_v19 = vsub.f32 %v584_v1, %v597_v35  ;;  %v13543_v35 = vld [vmem:[%s19544_s8 + $0xcc] sm:$0xf0] }
 0x4e0   :  { %v14269_v20 = vpop.eup %14268  ;;  %v608_v21 = vmul.f32 1.442695, %v601_v19  ;;  %v13541_v19 = vld [vmem:[%s19544_s8 + $0xc4] sm:$0xf] }
 0x4e1   :  { %v616_v22 = vsel %vm408_vm8, %v14269_v20, 0.0 }
 0x4e2   :  { %14270 = vpow2.f32 %v608_v21  ;;  %617 = vadd.xlane.f32.xlu1 %v616_v22  ;;  %v10007_v21 = vld [vmem:[%s19544_s8 + $0xd0] sm:$0xf0]  ;;  %v10013_v22 = vld [vmem:[%s19544_s8 + $0xc8] sm:$0xf] }
 0x4e8   :  { %v14271_v23 = vpop.eup %14270 }
 0x4e9   :  { %v619_v24 = vsel %vm408_vm8, %v14271_v23, 0.0 }
 0x4ea   :  { %620 = vadd.xlane.f32.xlu2 %v619_v24  ;;  %v10010_v24 = vor.u32 %v13541_v19, %v10007_v21  ;;  %v13523_v19 = vld [vmem:[%s19544_s8 + $0x2c] sm:$0xf0] }
 0x4f0   :  { %v634_v25 = vpop.permute.xlu0 %633 }
 0x4f1   :  { %649 = vmatpush.bf16.msrb.mxu3 %v634_v25 }
 0x4f9   :  { %v544_v45 = vpop.f32.mrf.mxu3 }
 0x4fa   :  { %v545_v61 = vadd.f32 %v544_v45, %v15106_v49  ;;  %v13535_v45 = vld [vmem:[%s19544_s8 + $0x8c] sm:$0xf0] }
 0x501   :  { %v546_v48 = vpop.f32.mrf.mxu3 }
 0x502   :  { %v547_v4 = vadd.f32 %v546_v48, %v15108_v50  ;;  %v13547_v50 = vld [vmem:[%s19544_s8 + $0xec] sm:$0xf0]  ;;  %v9974_v48 = vor.u32 %v13535_v45, %v9973_v44  ;;  %v9919_v45 = vld [vmem:[%s19544_s8 + $0x18] sm:$0xf0] }
 0x545   :  { %v612_v26 = vpop.xlane.xlu1 %611 }
 0x546   :  { %14272 = vrcp.f32 %v612_v26  ;;  %v13542_v26 = vld [vmem:[%s19544_s8 + $0xcc] sm:$0xf] }
 0x54c   :  { %v14273_v30 = vpop.eup %14272 }
 0x54d   :  { %v615_v27 = vpop.xlane.xlu2 %614  ;;  %v626_v33 = vmul.f32 %v14273_v30, %v14265_v11  ;;  %v10029_v11 = vld [vmem:[%s19544_s8 + $0xe8] sm:$0xf] }
 0x54e   :  { %14274 = vrcp.f32 %v615_v27  ;;  %v10030_v14 = vor.u32 %v13548_v12, %v10029_v11  ;;  %v10015_v27 = vld [vmem:[%s19544_s8 + $0xd8] sm:$0xf0]  ;;  %v9943_v11 = vld [vmem:[%s19544_s8 + $0x50] sm:$0xf0]  ;;  %v9949_v12 = vld [vmem:[%s19544_s8 + $0x48] sm:$0xf] }
 0x54f   :  { %v10018_v30 = vor.u32 %v13542_v26, %v10015_v27  ;;  %v13522_v27 = vld [vmem:[%s19544_s8 + $0x2c] sm:$0xf] }
 0x550   :  { %994 = vmatpush.bf16.msrb.mxu0 %v10030_v14 }
 0x554   :  { %v14275_v31 = vpop.eup %14274 }
 0x555   :  { %v627_v34 = vmul.f32 %v14275_v31, %v14267_v16  ;;  %v618_v37 = vpop.xlane.xlu1 %617  ;;  %v10031_v16 = vld [vmem:[%s19544_s8 + $0xf8] sm:$0xf0]  ;;  %v9989_v31 = vld [vmem:[%s19544_s8 + $0xa0] sm:$0xf] }
 0x556   :  { %14276 = vrcp.f32 %v618_v37  ;;  %v10034_v17 = vor.u32 %v13546_v15, %v10031_v16  ;;  %v9991_v37 = vld [vmem:[%s19544_s8 + $0xb0] sm:$0xf0]  ;;  %v13526_v16 = vld [vmem:[%s19544_s8 + $0x4c] sm:$0xf] }
 0x557   :  { %v630_v36 = vpack.c.bf16 %v627_v34, %v626_v33  ;;  %v13539_v33 = vld [vmem:[%s19544_s8 + $0xac] sm:$0xf0]  ;;  %v13537_v34 = vld [vmem:[%s19544_s8 + $0xa4] sm:$0xf] }
 0x558   :  { %1008 = vmatpush.bf16.msrb.mxu1 %v10034_v17  ;;  %v9951_v17 = vld [vmem:[%s19544_s8 + $0x58] sm:$0xf0] }
 0x559   :  { %9887 = vmatmul.msk.bf16.vlgmr.msrb.gmra.mxu3 %vm408_vm8, %v630_v36  ;;  %v9990_v36 = vor.u32 %v13539_v33, %v9989_v31  ;;  %v9909_v31 = vld [vmem:[%s19544_s8] sm:$0xf] }
 0x55c   :  { %v14277_v38 = vpop.eup %14276  ;;  %1009 = vmatpush.bf16.msrb.mxu1 %v10018_v30  ;;  %v9935_v30 = vld [vmem:[%s19544_s8 + $0x38] sm:$0xf0] }
 0x55d   :  { %v621_v29 = vpop.xlane.xlu2 %620  ;;  %v628_v40 = vmul.f32 %v14277_v38, %v14269_v20  ;;  %v10006_v20 = vor.u32 %v13543_v35, %v10005_v18  ;;  %v13540_v38 = vld [vmem:[%s19544_s8 + $0xb4] sm:$0xf0]  ;;  %v9954_v18 = vor.u32 %v13526_v16, %v9951_v17  ;;  %v9925_v35 = vld [vmem:[%s19544_s8 + $0x20] sm:$0xf] }
 0x55e   :  { %14278 = vrcp.f32 %v621_v29  ;;  %v9997_v29 = vld [vmem:[%s19544_s8 + $0xa8] sm:$0xf]  ;;  %v9926_v21 = vor.u32 %v13523_v19, %v9925_v35  ;;  %v13553_v16 = vld [vmem:[%s19545_s9 + $0x20] sm:$0xff]  ;;  %v13560_v35 = vld [vmem:[%s19545_s9 + $0x58] sm:$0xff] }
 0x55f   :  { %v13561_v17 = vld [vmem:[%s19545_s9 + $0x60] sm:$0xff] }
 0x564   :  { %v14279_v39 = vpop.eup %14278 }
 0x565   :  { %v629_v41 = vmul.f32 %v14279_v39, %v14271_v23  ;;  %v13544_v23 = vld [vmem:[%s19544_s8 + $0xd4] sm:$0xf0]  ;;  %v9994_v39 = vor.u32 %v13537_v34, %v9991_v37  ;;  %v9938_v34 = vor.u32 %v13522_v27, %v9935_v30  ;;  %v13517_v37 = vld [vmem:[%s19544_s8 + $0x4] sm:$0xf] }
 0x566   :  { %v10014_v25 = vor.u32 %v13544_v23, %v10013_v22  ;;  %v9927_v22 = vld [vmem:[%s19544_s8 + $0x30] sm:$0xf0]  ;;  %v9933_v23 = vld [vmem:[%s19544_s8 + $0x28] sm:$0xf] }
 0x567   :  { %v631_v42 = vpack.c.bf16 %v629_v41, %v628_v40  ;;  %v9998_v40 = vor.u32 %v13540_v38, %v9997_v29  ;;  %v13538_v41 = vld [vmem:[%s19544_s8 + $0xac] sm:$0xf]  ;;  %v9911_v29 = vld [vmem:[%s19544_s8 + $0x10] sm:$0xf0] }
 0x568   :  { %995 = vmatpush.bf16.msrb.mxu0 %v10014_v25 }
 0x569   :  { %9888 = vmatmul.msk.bf16.gmra.mxu3 %vm408_vm8, %v631_v42  ;;  %v9999_v42 = vld [vmem:[%s19544_s8 + $0xb8] sm:$0xf0] }
 0x56a   :  { %v10002_v43 = vor.u32 %v13538_v41, %v9999_v42  ;;  %v9917_v41 = vld [vmem:[%s19544_s8 + $0x8] sm:$0xf]  ;;  %v13520_v42 = vld [vmem:[%s19544_s8 + $0x14] sm:$0xf0] }
 0x56b   :  { %v9918_v44 = vor.u32 %v13520_v42, %v9917_v41 }
 0x56c   :  { %996 = vmatpush.bf16.msrb.mxu0 %v9998_v40  ;;  %1010 = vmatpush.bf16.msrb.mxu1 %v10002_v43  ;;  %v9914_v40 = vor.u32 %v13517_v37, %v9911_v29  ;;  %v13518_v43 = vld [vmem:[%s19544_s8 + $0xc] sm:$0xf]  ;;  %v13549_v29 = vld [vmem:[%s19545_s9] sm:$0xff] }
 0x5dc   :  { %v651_v53 = vpop.f32.mrf.mxu3 }
 0x5e4   :  { %v653_v54 = vpop.f32.mrf.mxu3 }
 0x5e5   :  { %v661_v56 = vpack.c.bf16 %v653_v54, %v651_v53  ;;  %v9981_v53 = vld [vmem:[%s19544_s8 + $0x88] sm:$0xf]  ;;  %v13536_v54 = vld [vmem:[%s19544_s8 + $0x94] sm:$0xf0] }
 0x5e7   :  { %9897 = vmatmul.msk.bf16.vlgmr.msra.gmra.mxu0 %vm379_vm7, %v661_v56  ;;  %v9978_v56 = vor.u32 %v13533_v46, %v9975_v52 }
 0x5ec   :  { %v656_v57 = vpop.f32.mrf.mxu3 }
 0x5f4   :  { %v658_v58 = vpop.f32.mrf.mxu3 }
 0x5f5   :  { %v697_v59 = vpack.c.bf16 %v658_v58, %v656_v57  ;;  %v9982_v57 = vor.u32 %v13536_v54, %v9981_v53  ;;  %v13534_v58 = vld [vmem:[%s19544_s8 + $0x8c] sm:$0xf] }
 0x5f7   :  { %9906 = vmatmul.msk.bf16.vlgmr.msra.gmra.mxu1 %vm379_vm7, %v697_v59  ;;  %v9983_v59 = vld [vmem:[%s19544_s8 + $0x98] sm:$0xf0]  ;;  %997 = vmatpush.bf16.msrb.mxu0 %v9982_v57 }
 0x664   :  { %v690_v60 = vpop.f32.mrf.mxu0 }
 0x665   :  { %v695_v62 = vadd.f32 %v690_v60, %v545_v61  ;;  %v9986_v60 = vor.u32 %v13534_v58, %v9983_v59  ;;  %v9957_v61 = vld [vmem:[%s19544_s8 + $0x60] sm:$0xf] }
 0x667   :  { %1011 = vmatpush.bf16.msrb.mxu1 %v9986_v60 }
 0x66c   :  { %v692_v3 = vpop.f32.mrf.mxu0 }
 0x66d   :  { %v696_v6 = vadd.f32 %v692_v3, %v547_v4  ;;  %v9959_v3 = vld [vmem:[%s19544_s8 + $0x70] sm:$0xf0]  ;;  %v9965_v4 = vld [vmem:[%s19544_s8 + $0x68] sm:$0xf] }
 0x674   :  { %v726_v63 = vpop.f32.mrf.mxu1 }
 0x675   :  { %v731_v55 = vadd.f32 %v726_v63, %v695_v62  ;;  %v13531_v62 = vld [vmem:[%s19544_s8 + $0x6c] sm:$0xf0]  ;;  %v13529_v63 = vld [vmem:[%s19544_s8 + $0x64] sm:$0xf] }
 0x677   :  { %v15148_v1 = vadd.f32 %v731_v55, %v14809_v0  ;;  %v10021_v0 = vld [vmem:[%s19544_s8 + $0xe0] sm:$0xf]  ;;  %v9958_v55 = vor.u32 %v13531_v62, %v9957_v61 }
 0x678   :  { %v10022_v10 = vor.u32 %v13547_v50, %v10021_v0  ;;  %v9941_v50 = vld [vmem:[%s19544_s8 + $0x40] sm:$0xf] }
 0x679   :  { %v736_v5 = vmul.f32 %v15148_v1, %v15148_v1 }
 0x67a   :  { %966 = vmatpush.bf16.msra.mxu2 %v10022_v10  ;;  %v13525_v10 = vld [vmem:[%s19544_s8 + $0x44] sm:$0xf] }
 0x67b   :  { %738 = vadd.xlane.f32.xlu1 %v736_v5  ;;  %v13532_v5 = vld [vmem:[%s19544_s8 + $0x74] sm:$0xf0]  ;;  %v9946_v14 = vor.u32 %v13525_v10, %v9943_v11 }
 0x67c   :  { %v728_v7 = vpop.f32.mrf.mxu1  ;;  %v13564_v11 = vld [vmem:[%s19545_s9 + $0x78] sm:$0xff] }
 0x67d   :  { %v732_v8 = vadd.f32 %v728_v7, %v696_v6  ;;  %v9962_v6 = vor.u32 %v13529_v63, %v9959_v3  ;;  %v9966_v7 = vor.u32 %v13532_v5, %v9965_v4 }
 0x67e   :  { %967 = vmatpush.bf16.msra.mxu2 %v10006_v20  ;;  %v13521_v20 = vld [vmem:[%s19544_s8 + $0x24] sm:$0xf] }
 0x67f   :  { %v15154_v47 = vadd.f32 %v732_v8, %v14816_v2  ;;  %v10023_v2 = vld [vmem:[%s19544_s8 + $0xf0] sm:$0xf0]  ;;  %v13530_v8 = vld [vmem:[%s19544_s8 + $0x6c] sm:$0xf]  ;;  %998 = vmatpush.bf16.msrb.mxu0 %v9966_v7  ;;  %v9930_v25 = vor.u32 %v13521_v20, %v9927_v22 }
 0x680   :  { %v10026_v51 = vor.u32 %v13545_v9, %v10023_v2  ;;  %v13527_v9 = vld [vmem:[%s19544_s8 + $0x4c] sm:$0xf0] }
 0x681   :  { %v737_v49 = vmul.f32 %v15154_v47, %v15154_v47  ;;  %v9942_v2 = vor.u32 %v13527_v9, %v9941_v50 }
 0x682   :  { %980 = vmatpush.bf16.msra.mxu3 %v10026_v51  ;;  %968 = vmatpush.bf16.msra.mxu2 %v9990_v36  ;;  %v13528_v51 = vld [vmem:[%s19544_s8 + $0x54] sm:$0xf0]  ;;  %v13519_v36 = vld [vmem:[%s19544_s8 + $0xc] sm:$0xf0] }
 0x683   :  { %740 = vadd.xlane.f32.xlu2 %v737_v49  ;;  %v9967_v49 = vld [vmem:[%s19544_s8 + $0x78] sm:$0xf0]  ;;  %v9950_v15 = vor.u32 %v13528_v51, %v9949_v12  ;;  %v13555_v12 = vld [vmem:[%s19545_s9 + $0x30] sm:$0xff] }
 0x684   :  { %v9970_v0 = vor.u32 %v13530_v8, %v9967_v49  ;;  %v14227_v8 = vld [vmem:[%s19543_s7] ss:$0 sm:$0xff]  ;;  %v13563_v51 = vld [vmem:[%s19545_s9 + $0x70] sm:$0xff] }
 0x685   :  { %999 = vmatpush.bf16.msrb.mxu0 %v9950_v15  ;;  %v13562_v15 = vld [vmem:[%s19545_s9 + $0x68] sm:$0xff] }
 0x686   :  { %981 = vmatpush.bf16.msra.mxu3 %v10010_v24  ;;  %969 = vmatpush.bf16.msra.mxu2 %v9974_v48  ;;  %v13524_v24 = vld [vmem:[%s19544_s8 + $0x34] sm:$0xf0]  ;;  %v9922_v48 = vor.u32 %v13518_v43, %v9919_v45 }
 0x687   :  { %1012 = vmatpush.bf16.msrb.mxu1 %v9970_v0  ;;  %v9934_v26 = vor.u32 %v13524_v24, %v9933_v23  ;;  %v13551_v23 = vld [vmem:[%s19545_s9 + $0x10] sm:$0xff] }
 0x688   :  { %v13559_v24 = vld [vmem:[%s19545_s9 + $0x50] sm:$0xff] }
 0x689   :  { %1000 = vmatpush.bf16.msrb.mxu0 %v9934_v26  ;;  %v13558_v26 = vld [vmem:[%s19545_s9 + $0x48] sm:$0xff] }
 0x68a   :  { %982 = vmatpush.bf16.msra.mxu3 %v9994_v39  ;;  %970 = vmatpush.bf16.msra.mxu2 %v9958_v55  ;;  %v9910_v39 = vor.u32 %v13519_v36, %v9909_v31 }
 0x68b   :  { %1013 = vmatpush.bf16.msrb.mxu1 %v9954_v18  ;;  %v13552_v18 = vld [vmem:[%s19545_s9 + $0x18] sm:$0xff] }
 0x68d   :  { %1001 = vmatpush.bf16.msrb.mxu0 %v9918_v44 }
 0x68e   :  { %983 = vmatpush.bf16.msra.mxu3 %v9978_v56  ;;  %971 = vmatpush.bf16.msra.mxu2 %v9942_v2  ;;  %v13556_v2 = vld [vmem:[%s19545_s9 + $0x38] sm:$0xff] }
 0x68f   :  { %1014 = vmatpush.bf16.msrb.mxu1 %v9938_v34 }
 0x692   :  { %984 = vmatpush.bf16.msra.mxu3 %v9962_v6  ;;  %972 = vmatpush.bf16.msra.mxu2 %v9926_v21 }
 0x693   :  { %1015 = vmatpush.bf16.msrb.mxu1 %v9922_v48 }
 0x696   :  { %985 = vmatpush.bf16.msra.mxu3 %v9946_v14  ;;  %973 = vmatpush.bf16.msra.mxu2 %v9910_v39  ;;  %v13554_v14 = vld [vmem:[%s19545_s9 + $0x28] sm:$0xff] }
 0x69a   :  { %986 = vmatpush.bf16.msra.mxu3 %v9930_v25  ;;  %1236 = vmatpush.bf16.msrb.mxu2 %v13556_v2  ;;  %v13550_v25 = vld [vmem:[%s19545_s9 + $0x8] sm:$0xff] }
 0x69e   :  { %987 = vmatpush.bf16.msra.mxu3 %v9914_v40  ;;  %1237 = vmatpush.bf16.msrb.mxu2 %v13555_v12 }
 0x6a2   :  { %1250 = vmatpush.bf16.msrb.mxu3 %v13564_v11  ;;  %1238 = vmatpush.bf16.msrb.mxu2 %v13554_v14 }
 0x6a6   :  { %1251 = vmatpush.bf16.msrb.mxu3 %v13563_v51  ;;  %1239 = vmatpush.bf16.msrb.mxu2 %v13553_v16 }
 0x6aa   :  { %1252 = vmatpush.bf16.msrb.mxu3 %v13562_v15  ;;  %1240 = vmatpush.bf16.msrb.mxu2 %v13552_v18 }
 0x6ae   :  { %1253 = vmatpush.bf16.msrb.mxu3 %v13561_v17  ;;  %1241 = vmatpush.bf16.msrb.mxu2 %v13551_v23 }
 0x6b2   :  { %1254 = vmatpush.bf16.msrb.mxu3 %v13560_v35  ;;  %1242 = vmatpush.bf16.msrb.mxu2 %v13550_v25 }
 0x6b6   :  { %1255 = vmatpush.bf16.msrb.mxu3 %v13559_v24  ;;  %1243 = vmatpush.bf16.msrb.mxu2 %v13549_v29 }
 0x6ba   :  { %1256 = vmatpush.bf16.msrb.mxu3 %v13558_v26 }
 0x6ee   :  { %v739_v33 = vpop.xlane.xlu1 %738 }
 0x6ef   :  { %v742_v38 = vmul.f32 %v739_v33, %v14995_v32 }
 0x6f1   :  { %v744_v46 = vadd.f32 1e-05, %v742_v38  ;;  %v13557_v38 = vld [vmem:[%s19545_s9 + $0x40] sm:$0xff] }
 0x6f2   :  { %1257 = vmatpush.bf16.msrb.mxu3 %v13557_v38 }
 0x6f3   :  { %14280 = vrsqrt.f32 %v744_v46  ;;  %vm752_vm10 = vweird.f32 %v744_v46 }
 0x6f6   :  { %v741_v52 = vpop.xlane.xlu2 %740 }
 0x6f7   :  { %v743_v53 = vmul.f32 %v741_v52, %v14995_v32 }
 0x6f9   :  { %v14281_v54 = vpop.eup %14280  ;;  %v745_v56 = vadd.f32 1e-05, %v743_v53 }
 0x6fa   :  { %v747_v57 = vmul.f32 %v14281_v54, %v744_v46  ;;  %vm753_vm9 = vweird.f32 %v14281_v54 }
 0x6fb   :  { %14282 = vrsqrt.f32 %v745_v56  ;;  %vm754_vm11 = vmor %vm752_vm10, %vm753_vm9  ;;  %vm762_vm13 = vweird.f32 %v745_v56 }
 0x6fc   :  { %v748_v58 = vmul.f32 %v14281_v54, %v747_v57 }
 0x6fe   :  { %v749_v59 = vmul.f32 0.5, %v748_v58 }
 0x700   :  { %v750_v60 = vsub.f32 1.5, %v749_v59 }
 0x701   :  { %v14283_v61 = vpop.eup %14282 }
 0x702   :  { %v757_v62 = vmul.f32 %v14283_v61, %v745_v56  ;;  %v751_v63 = vmul.f32 %v14281_v54, %v750_v60  ;;  %vm763_vm12 = vweird.f32 %v14283_v61 }
 0x703   :  { %vm764_vm14 = vmor %vm762_vm13, %vm763_vm12 }
 0x704   :  { %v758_v55 = vmul.f32 %v14283_v61, %v757_v62  ;;  %v755_v4 = vsel %vm754_vm11, %v14281_v54, %v751_v63  ;;  %v13594_v63 = vld [vmem:[%s19538_s5 + $0x1ec] sm:$0xf] }
 0x705   :  { %v766_v7 = vmul.f32 %v755_v4, %v15148_v1 }
 0x706   :  { %v759_v3 = vmul.f32 0.5, %v758_v55 }
 0x707   :  { %v771_v50 = vmul.f32 %v14227_v8, %v766_v7 }
 0x708   :  { %v760_v5 = vsub.f32 1.5, %v759_v3 }
 0x70a   :  { %v761_v6 = vmul.f32 %v14283_v61, %v760_v5 }
 0x70c   :  { %v765_v49 = vsel %vm764_vm14, %v14283_v61, %v761_v6 }
 0x70d   :  { %v767_v0 = vmul.f32 %v765_v49, %v15154_v47 }
 0x70f   :  { %v772_v9 = vmul.f32 %v14227_v8, %v767_v0 }
 0x711   :  { %v773_v10 = vpack.c.bf16 %v772_v9, %v771_v50 }
 0x713   :  { %974 = vmatmul.bf16.vlgmr.msra.gmra.mxu2 %v773_v10  ;;  %988 = vmatmul.bf16.vlgmr.msra.gmra.mxu3 %v773_v10 }
 0x714   :  { %1002 = vmatmul.bf16.vlgmr.msrb.gmra.mxu0 %v773_v10  ;;  %1016 = vmatmul.bf16.vlgmr.msrb.gmra.mxu1 %v773_v10 }
 0x791   :  { %v1003_v62 = vpop.f32.mrf.mxu0  ;;  %v1017_v50 = vpop.f32.mrf.mxu1 }
 0x796   :  { %v15387_v19 = vpop.f32.mrf.mxu2  ;;  %v15389_v20 = vpop.f32.mrf.mxu3 }
 0x797   :  { %v10035_v21 = vmul.f32 -1.442695, %v15387_v19  ;;  %v10036_v22 = vmul.f32 -1.442695, %v15389_v20 }
 0x799   :  { %14284 = vpow2.f32 %v10035_v21 }
 0x79a   :  { %14286 = vpow2.f32 %v10036_v22 }
 0x79e   :  { %v15405_v27 = vpop.f32.mrf.mxu2  ;;  %v15407_v30 = vpop.f32.mrf.mxu3 }
 0x79f   :  { %v14285_v31 = vpop.eup %14284  ;;  %v10037_v33 = vmul.f32 -1.442695, %v15405_v27  ;;  %v10038_v37 = vmul.f32 -1.442695, %v15407_v30 }
 0x7a0   :  { %v14287_v34 = vpop.eup %14286  ;;  %v1034_v36 = vadd.f32 1.0, %v14285_v31 }
 0x7a1   :  { %v1035_v39 = vadd.f32 1.0, %v14287_v34  ;;  %14288 = vpow2.f32 %v10037_v33  ;;  %v1005_v34 = vpop.f32.mrf.mxu0 }
 0x7a2   :  { %14290 = vrcp.f32 %v1034_v36  ;;  %v1049_v59 = vand.u32 2147483648, %v1034_v36  ;;  %vm1043_vm0 = vweird.f32 %v1034_v36  ;;  %v1047_v60 = vand.u32 2147483647, %v1034_v36 }
 0x7a3   :  { %14292 = vrcp.f32 %v1035_v39  ;;  %v1062_v3 = vand.u32 2147483647, %v1035_v39  ;;  %v1064_v6 = vand.u32 2147483648, %v1035_v39  ;;  %vm1058_vm3 = vweird.f32 %v1035_v39 }
 0x7a4   :  { %14294 = vpow2.f32 %v10038_v37  ;;  %v1050_v8 = vor.u32 1.1754944e-38, %v1049_v59  ;;  %vm1048_vm4 = vcmp.eq.f32.partialorder %v1047_v60, 8.507059e+37  ;;  %v10258_v59 = vld [vmem:[%s19538_s5 + $0x1e8] sm:$0xf]  ;;  %v13596_v60 = vld [vmem:[%s19538_s5 + $0x1f4] sm:$0xf0] }
 0x7a5   :  { %vm1063_vm9 = vcmp.eq.f32.partialorder %v1062_v3, 8.507059e+37  ;;  %v1065_v14 = vor.u32 1.1754944e-38, %v1064_v6  ;;  %v13589_v6 = vld [vmem:[%s19538_s5 + $0x1c4] sm:$0xf] }
 0x7a7   :  { %v14289_v40 = vpop.eup %14288 }
 0x7a8   :  { %v14291_v41 = vpop.eup %14290  ;;  %v1036_v42 = vadd.f32 1.0, %v14289_v40 }
 0x7a9   :  { %v14293_v43 = vpop.eup %14292  ;;  %v1039_v44 = vmul.f32 %v14291_v41, %v1034_v36  ;;  %vm1044_vm15 = vweird.f32 %v14291_v41 }
 0x7aa   :  { %v14295_v45 = vpop.eup %14294  ;;  %v1054_v46 = vmul.f32 %v14293_v43, %v1035_v39  ;;  %14296 = vrcp.f32 %v1036_v42  ;;  %vm15417_vm1 = vmor %vm1043_vm0, %vm1044_vm15  ;;  %vm1059_vm2 = vweird.f32 %v14293_v43  ;;  %v1079_v49 = vand.u32 2147483648, %v1036_v42  ;;  %v1019_v39 = vpop.f32.mrf.mxu1 }
 0x7ab   :  { %v1040_v48 = vsub.f32 1.0, %v1039_v44  ;;  %v1037_v52 = vadd.f32 1.0, %v14295_v45  ;;  %vm15423_vm5 = vmor %vm1058_vm3, %vm1059_vm2  ;;  %v1077_v2 = vand.u32 2147483647, %v1036_v42  ;;  %vm1073_vm10 = vweird.f32 %v1036_v42 }
 0x7ac   :  { %v1055_v53 = vsub.f32 1.0, %v1054_v46  ;;  %v1080_v17 = vor.u32 1.1754944e-38, %v1079_v49  ;;  %v10242_v49 = vld [vmem:[%s19538_s5 + $0x1c8] sm:$0xf] }
 0x7ad   :  { %v1041_v54 = vmul.f32 %v14291_v41, %v1040_v48  ;;  %14298 = vrcp.f32 %v1037_v52  ;;  %v1094_v16 = vand.u32 2147483648, %v1037_v52  ;;  %v1092_v35 = vand.u32 2147483647, %v1037_v52 }
 0x7ae   :  { %v1056_v56 = vmul.f32 %v14293_v43, %v1055_v53  ;;  %vm1078_vm13 = vcmp.eq.f32.partialorder %v1077_v2, 8.507059e+37  ;;  %vm1088_vm14 = vweird.f32 %v1037_v52  ;;  %v10244_v2 = vld [vmem:[%s19538_s5 + $0x1d8] sm:$0xf0] }
 0x7af   :  { %v1042_v57 = vadd.f32 %v14291_v41, %v1041_v54  ;;  %v1095_v31 = vor.u32 1.1754944e-38, %v1094_v16  ;;  %vm1093_vm0 = vcmp.eq.f32.partialorder %v1092_v35, 8.507059e+37  ;;  %v10220_v16 = vld [vmem:[%s19538_s5 + $0x1b0] sm:$0xf0] }
 0x7b0   :  { %v14297_v58 = vpop.eup %14296  ;;  %v1057_v55 = vadd.f32 %v14293_v43, %v1056_v56  ;;  %v10250_v56 = vld [vmem:[%s19538_s5 + $0x1e0] sm:$0xf] }
 0x7b1   :  { %v1069_v61 = vmul.f32 %v14297_v58, %v1036_v42  ;;  %v1046_v5 = vsel %vm15417_vm1, %v14291_v41, %v1042_v57  ;;  %vm1074_vm6 = vweird.f32 %v14297_v58  ;;  %v13593_v57 = vld [vmem:[%s19538_s5 + $0x1e4] sm:$0xf] }
 0x7b2   :  { %v1051_v11 = vsel %vm1048_vm4, %v1050_v8, %v1046_v5  ;;  %v1061_v12 = vsel %vm15423_vm5, %v14293_v43, %v1057_v55  ;;  %vm1075_vm11 = vmor %vm1073_vm10, %vm1074_vm6  ;;  %v10260_v55 = vld [vmem:[%s19538_s5 + $0x1f8] sm:$0xf0]  ;;  %v13591_v5 = vld [vmem:[%s19538_s5 + $0x1cc] sm:$0xf0] }
 0x7b3   :  { %v14299_v4 = vpop.eup %14298  ;;  %v1070_v7 = vsub.f32 1.0, %v1069_v61  ;;  %v1098_v21 = vmul.f32 %v1051_v11, %v15387_v19  ;;  %v1066_v22 = vsel %vm1063_vm9, %v1065_v14, %v1061_v12  ;;  %v10263_v3 = vor.u32 %v13594_v63, %v10260_v55  ;;  %v10236_v8 = vld [vmem:[%s19538_s5 + $0x1d0] sm:$0xf0]  ;;  %v10218_v12 = vld [vmem:[%s19538_s5 + $0x1a0] sm:$0xf] }
 0x7b4   :  { %v1084_v0 = vmul.f32 %v14299_v4, %v1037_v52  ;;  %vm1089_vm12 = vweird.f32 %v14299_v4  ;;  %v1099_v33 = vmul.f32 %v1066_v22, %v15389_v20  ;;  %v13585_v14 = vld [vmem:[%s19538_s5 + $0x1a4] sm:$0xf]  ;;  %v13586_v22 = vld [vmem:[%s19538_s5 + $0x1ac] sm:$0xf] }
 0x7b5   :  { %v1071_v10 = vmul.f32 %v14297_v58, %v1070_v7  ;;  %vm1090_vm15 = vmor %vm1088_vm14, %vm1089_vm12  ;;  %v1102_v37 = vmul.f32 %v1098_v21, %v1003_v62  ;;  %v10259_v62 = vor.u32 %v13596_v60, %v10258_v59  ;;  %1541 = vmatpush.bf16.msra.mxu3 %v10263_v3  ;;  %v10223_v35 = vor.u32 %v13585_v14, %v10220_v16  ;;  %v10172_v59 = vld [vmem:[%s19538_s5 + $0x150] sm:$0xf0]  ;;  %v10178_v60 = vld [vmem:[%s19538_s5 + $0x148] sm:$0xf] }
 0x7b6   :  { %v1085_v51 = vsub.f32 1.0, %v1084_v0  ;;  %v1103_v41 = vmul.f32 %v1099_v33, %v1017_v50  ;;  %v13592_v0 = vld [vmem:[%s19538_s5 + $0x1d4] sm:$0xf0]  ;;  %v10239_v50 = vor.u32 %v13589_v6, %v10236_v8  ;;  %v13574_v55 = vld [vmem:[%s19538_s5 + $0x14c] sm:$0xf] }
 0x7b7   :  { %v1072_v15 = vadd.f32 %v14297_v58, %v1071_v10  ;;  %1527 = vmatpush.bf16.msra.mxu2 %v10259_v62  ;;  %v10243_v9 = vor.u32 %v13592_v0, %v10242_v49  ;;  %v13590_v10 = vld [vmem:[%s19538_s5 + $0x1cc] sm:$0xf]  ;;  %v10180_v3 = vld [vmem:[%s19538_s5 + $0x158] sm:$0xf0]  ;;  %v13571_v6 = vld [vmem:[%s19538_s5 + $0x12c] sm:$0xf0] }
 0x7b8   :  { %v1086_v18 = vmul.f32 %v14299_v4, %v1085_v51  ;;  %v10247_v11 = vor.u32 %v13590_v10, %v10244_v2  ;;  %v13587_v51 = vld [vmem:[%s19538_s5 + $0x1ac] sm:$0xf0]  ;;  %v10156_v49 = vld [vmem:[%s19538_s5 + $0x130] sm:$0xf0]  ;;  %v10162_v0 = vld [vmem:[%s19538_s5 + $0x128] sm:$0xf] }
 0x7b9   :  { %v1076_v23 = vsel %vm1075_vm11, %v14297_v58, %v1072_v15  ;;  %v10219_v15 = vor.u32 %v13587_v51, %v10218_v12  ;;  %v13570_v2 = vld [vmem:[%s19538_s5 + $0x12c] sm:$0xf]  ;;  %v10138_v51 = vld [vmem:[%s19538_s5 + $0x100] sm:$0xf]  ;;  %v13567_v14 = vld [vmem:[%s19538_s5 + $0x10c] sm:$0xf0] }
 0x7ba   :  { %v1081_v24 = vsel %vm1078_vm13, %v1080_v17, %v1076_v23  ;;  %v1087_v25 = vadd.f32 %v14299_v4, %v1086_v18  ;;  %1542 = vmatpush.bf16.msra.mxu3 %v10247_v11  ;;  %v10226_v17 = vld [vmem:[%s19538_s5 + $0x1a8] sm:$0xf]  ;;  %v13588_v18 = vld [vmem:[%s19538_s5 + $0x1b4] sm:$0xf0]  ;;  %v10228_v23 = vld [vmem:[%s19538_s5 + $0x1b8] sm:$0xf0] }
 0x7bb   :  { %v1100_v26 = vmul.f32 %v1081_v24, %v15405_v27  ;;  %1528 = vmatpush.bf16.msra.mxu2 %v10243_v9  ;;  %v10227_v21 = vor.u32 %v13588_v18, %v10226_v17  ;;  %v10231_v24 = vor.u32 %v13586_v22, %v10228_v23  ;;  %v10164_v11 = vld [vmem:[%s19538_s5 + $0x138] sm:$0xf0]  ;;  %v10139_v17 = vor.u32 %v13567_v14, %v10138_v51  ;;  %v10140_v18 = vld [vmem:[%s19538_s5 + $0x110] sm:$0xf0] }
 0x7bc   :  { %v1091_v36 = vsel %vm1090_vm15, %v14299_v4, %v1087_v25  ;;  %v10234_v4 = vld [vmem:[%s19538_s5 + $0x1c0] sm:$0xf]  ;;  %v10167_v12 = vor.u32 %v13570_v2, %v10164_v11 }
 0x7bd   :  { %v1104_v29 = vmul.f32 %v1100_v26, %v1005_v34  ;;  %v1096_v38 = vsel %vm1093_vm0, %v1095_v31, %v1091_v36  ;;  %v10235_v7 = vor.u32 %v13591_v5, %v10234_v4  ;;  %v10202_v25 = vld [vmem:[%s19538_s5 + $0x180] sm:$0xf]  ;;  %v13583_v26 = vld [vmem:[%s19538_s5 + $0x18c] sm:$0xf0]  ;;  %v13581_v31 = vld [vmem:[%s19538_s5 + $0x184] sm:$0xf]  ;;  %v10183_v4 = vor.u32 %v13574_v55, %v10180_v3 }
 0x7be   :  { %v1101_v19 = vmul.f32 %v1096_v38, %v15407_v30  ;;  %1543 = vmatpush.bf16.msra.mxu3 %v10231_v24  ;;  %v10203_v33 = vor.u32 %v13583_v26, %v10202_v25  ;;  %v10204_v34 = vld [vmem:[%s19538_s5 + $0x190] sm:$0xf0]  ;;  %v10210_v36 = vld [vmem:[%s19538_s5 + $0x188] sm:$0xf]  ;;  %v10154_v5 = vld [vmem:[%s19538_s5 + $0x120] sm:$0xf] }
 0x7bf   :  { %v1106_v40 = vpack.c.bf16 %v1104_v29, %v1102_v37  ;;  %1529 = vmatpush.bf16.msra.mxu2 %v10227_v21  ;;  %v13584_v37 = vld [vmem:[%s19538_s5 + $0x194] sm:$0xf0]  ;;  %v10207_v29 = vor.u32 %v13581_v31, %v10204_v34  ;;  %v10155_v8 = vor.u32 %v13571_v6, %v10154_v5  ;;  %v13566_v25 = vld [vmem:[%s19538_s5 + $0x10c] sm:$0xf]  ;;  %v10148_v26 = vld [vmem:[%s19538_s5 + $0x118] sm:$0xf0] }
 0x7c0   :  { %v1105_v42 = vmul.f32 %v1101_v19, %v1019_v39  ;;  %v10211_v38 = vor.u32 %v13584_v37, %v10210_v36  ;;  %v13582_v19 = vld [vmem:[%s19538_s5 + $0x18c] sm:$0xf]  ;;  %v10212_v39 = vld [vmem:[%s19538_s5 + $0x198] sm:$0xf0]  ;;  %v13568_v21 = vld [vmem:[%s19538_s5 + $0x114] sm:$0xf0]  ;;  %v10151_v31 = vor.u32 %v13566_v25, %v10148_v26 }
 0x7c1   :  { %1244 = vmatmul.bf16.vlgmr.msrb.gmra.mxu2 %v1106_v40  ;;  %v10215_v40 = vor.u32 %v13582_v19, %v10212_v39  ;;  %v14692_v3 = vld [vmem:[%s19540_s1 + $0x8] sm:$0xff] }
 0x7c2   :  { %v1107_v43 = vpack.c.bf16 %v1105_v42, %v1103_v41  ;;  %v10186_v41 = vld [vmem:[%s19538_s5 + $0x160] sm:$0xf]  ;;  %v13579_v42 = vld [vmem:[%s19538_s5 + $0x16c] sm:$0xf0]  ;;  %v14693_v5 = vld [vmem:[%s19539_s2 + $0x8] sm:$0xff] }
 0x7c3   :  { %1530 = vmatpush.bf16.msra.mxu2 %v10211_v38  ;;  %1544 = vmatpush.bf16.msra.mxu3 %v10215_v40 }
 0x7c4   :  { %1258 = vmatmul.bf16.vlgmr.msrb.gmra.mxu3 %v1107_v43  ;;  %v13577_v43 = vld [vmem:[%s19538_s5 + $0x164] sm:$0xf] }
 0x844   :  { %v1245_v27 = vpop.f32.mrf.mxu2 }
 0x847   :  { %v1259_v44 = vpop.f32.mrf.mxu3 }
 0x848   :  { %v1260_v45 = vadd.f32 %v1259_v44, %v1245_v27  ;;  %v10187_v27 = vor.u32 %v13579_v42, %v10186_v41  ;;  %v10188_v44 = vld [vmem:[%s19538_s5 + $0x170] sm:$0xf0] }
 0x84a   :  { %v15434_v20 = vadd.f32 %v1260_v45, %v15148_v1  ;;  %v13595_v1 = vld [vmem:[%s19538_s5 + $0x1ec] sm:$0xf0]  ;;  %v10194_v45 = vld [vmem:[%s19538_s5 + $0x168] sm:$0xf] }
 0x84b   :  { %v10251_v58 = vor.u32 %v13595_v1, %v10250_v56  ;;  %v10170_v1 = vld [vmem:[%s19538_s5 + $0x140] sm:$0xf] }
 0x84c   :  { %v1268_v46 = vmul.f32 %v15434_v20, %v15434_v20  ;;  %v1247_v48 = vpop.f32.mrf.mxu2 }
 0x84d   :  { %1499 = vmatpush.bf16.msra.mxu0 %v10251_v58  ;;  %v13573_v58 = vld [vmem:[%s19538_s5 + $0x144] sm:$0xf] }
 0x84e   :  { %1270 = vadd.xlane.f32.xlu1 %v1268_v46  ;;  %v13580_v46 = vld [vmem:[%s19538_s5 + $0x174] sm:$0xf0]  ;;  %v10175_v62 = vor.u32 %v13573_v58, %v10172_v59 }
 0x84f   :  { %v1261_v52 = vpop.f32.mrf.mxu3 }
 0x850   :  { %v1262_v30 = vadd.f32 %v1261_v52, %v1247_v48  ;;  %v10191_v48 = vor.u32 %v13577_v43, %v10188_v44  ;;  %v10195_v52 = vor.u32 %v13580_v46, %v10194_v45 }
 0x851   :  { %1500 = vmatpush.bf16.msra.mxu0 %v10235_v7  ;;  %v13569_v7 = vld [vmem:[%s19538_s5 + $0x124] sm:$0xf] }
 0x852   :  { %v15439_v53 = vadd.f32 %v1262_v30, %v15154_v47  ;;  %v10252_v47 = vld [vmem:[%s19538_s5 + $0x1f0] sm:$0xf0]  ;;  %v13578_v30 = vld [vmem:[%s19538_s5 + $0x16c] sm:$0xf]  ;;  %1531 = vmatpush.bf16.msra.mxu2 %v10195_v52  ;;  %v10159_v9 = vor.u32 %v13569_v7, %v10156_v49  ;;  %v14694_v7 = vld [vmem:[%s19540_s1] sm:$0xff] }
 0x853   :  { %v10255_v61 = vor.u32 %v13593_v57, %v10252_v47  ;;  %v13575_v57 = vld [vmem:[%s19538_s5 + $0x14c] sm:$0xf0]  ;;  %v14695_v49 = vld [vmem:[%s19539_s2] sm:$0xff] }
 0x854   :  { %v1269_v54 = vmul.f32 %v15439_v53, %v15439_v53  ;;  %v10171_v47 = vor.u32 %v13575_v57, %v10170_v1 }
 0x855   :  { %1513 = vmatpush.bf16.msra.mxu1 %v10255_v61  ;;  %1501 = vmatpush.bf16.msra.mxu0 %v10219_v15  ;;  %v13576_v61 = vld [vmem:[%s19538_s5 + $0x154] sm:$0xf0]  ;;  %v13565_v15 = vld [vmem:[%s19538_s5 + $0x104] sm:$0xf] }
 0x856   :  { %1272 = vadd.xlane.f32.xlu0 %v1269_v54  ;;  %v10196_v54 = vld [vmem:[%s19538_s5 + $0x178] sm:$0xf0]  ;;  %v10179_v63 = vor.u32 %v13576_v61, %v10178_v60  ;;  %v10143_v23 = vor.u32 %v13565_v15, %v10140_v18 }
 0x857   :  { %v10199_v56 = vor.u32 %v13578_v30, %v10196_v54  ;;  %v14228_v30 = vld [vmem:[%s19537_s4 + $0x1] ss:$0 sm:$0xff] }
 0x858   :  { %1532 = vmatpush.bf16.msra.mxu2 %v10179_v63 }
 0x859   :  { %1514 = vmatpush.bf16.msra.mxu1 %v10239_v50  ;;  %1502 = vmatpush.bf16.msra.mxu0 %v10203_v33  ;;  %v13572_v50 = vld [vmem:[%s19538_s5 + $0x134] sm:$0xf0] }
 0x85a   :  { %1545 = vmatpush.bf16.msra.mxu3 %v10199_v56  ;;  %v10163_v10 = vor.u32 %v13572_v50, %v10162_v0 }
 0x85c   :  { %1533 = vmatpush.bf16.msra.mxu2 %v10163_v10 }
 0x85d   :  { %1515 = vmatpush.bf16.msra.mxu1 %v10223_v35  ;;  %1503 = vmatpush.bf16.msra.mxu0 %v10187_v27  ;;  %v10146_v35 = vld [vmem:[%s19538_s5 + $0x108] sm:$0xf] }
 0x85e   :  { %1546 = vmatpush.bf16.msra.mxu3 %v10183_v4  ;;  %v10147_v24 = vor.u32 %v13568_v21, %v10146_v35 }
 0x860   :  { %1534 = vmatpush.bf16.msra.mxu2 %v10147_v24 }
 0x861   :  { %1516 = vmatpush.bf16.msra.mxu1 %v10207_v29  ;;  %1504 = vmatpush.bf16.msra.mxu0 %v10171_v47 }
 0x862   :  { %1547 = vmatpush.bf16.msra.mxu3 %v10167_v12 }
 0x865   :  { %1517 = vmatpush.bf16.msra.mxu1 %v10191_v48  ;;  %1505 = vmatpush.bf16.msra.mxu0 %v10155_v8 }
 0x866   :  { %1548 = vmatpush.bf16.msra.mxu3 %v10151_v31 }
 0x869   :  { %1518 = vmatpush.bf16.msra.mxu1 %v10175_v62  ;;  %1506 = vmatpush.bf16.msra.mxu0 %v10139_v17 }
 0x86d   :  { %1519 = vmatpush.bf16.msra.mxu1 %v10159_v9 }
 0x871   :  { %1520 = vmatpush.bf16.msra.mxu1 %v10143_v23 }
 0x8c1   :  { %v1271_v16 = vpop.xlane.xlu1 %1270 }
 0x8c2   :  { %v1274_v22 = vmul.f32 %v1271_v16, %v14995_v32 }
 0x8c4   :  { %v1276_v33 = vadd.f32 1e-05, %v1274_v22 }
 0x8c6   :  { %14300 = vrsqrt.f32 %v1276_v33  ;;  %vm1284_vm2 = vweird.f32 %v1276_v33 }
 0x8c9   :  { %v1273_v34 = vpop.xlane.xlu0 %1272 }
 0x8ca   :  { %v1275_v36 = vmul.f32 %v1273_v34, %v14995_v32 }
 0x8cc   :  { %v14301_v37 = vpop.eup %14300  ;;  %v1277_v29 = vadd.f32 1e-05, %v1275_v36 }
 0x8cd   :  { %v1279_v38 = vmul.f32 %v14301_v37, %v1276_v33  ;;  %vm1285_vm1 = vweird.f32 %v14301_v37 }
 0x8ce   :  { %14302 = vrsqrt.f32 %v1277_v29  ;;  %vm1286_vm3 = vmor %vm1284_vm2, %vm1285_vm1  ;;  %vm1294_vm5 = vweird.f32 %v1277_v29 }
 0x8cf   :  { %v1280_v19 = vmul.f32 %v14301_v37, %v1279_v38 }
 0x8d1   :  { %v1281_v39 = vmul.f32 0.5, %v1280_v19 }
 0x8d3   :  { %v1282_v40 = vsub.f32 1.5, %v1281_v39 }
 0x8d4   :  { %v14303_v41 = vpop.eup %14302 }
 0x8d5   :  { %v1289_v42 = vmul.f32 %v14303_v41, %v1277_v29  ;;  %v1283_v43 = vmul.f32 %v14301_v37, %v1282_v40  ;;  %vm1295_vm4 = vweird.f32 %v14303_v41  ;;  %v14696_v29 = vld [vmem:[%s19541_s3] sm:$0xff] }
 0x8d6   :  { %vm1296_vm6 = vmor %vm1294_vm5, %vm1295_vm4 }
 0x8d7   :  { %v1290_v27 = vmul.f32 %v14303_v41, %v1289_v42  ;;  %v1287_v45 = vsel %vm1286_vm3, %v14301_v37, %v1283_v43 }
 0x8d8   :  { %v1298_v52 = vmul.f32 %v1287_v45, %v15434_v20 }
 0x8d9   :  { %v1291_v44 = vmul.f32 0.5, %v1290_v27 }
 0x8da   :  { %v1303_v1 = vmul.f32 %v14228_v30, %v1298_v52  ;;  %v14699_v52 = vld [vmem:[%s19541_s3 + $0x18] sm:$0xff] }
 0x8db   :  { %v1292_v46 = vsub.f32 1.5, %v1291_v44  ;;  %v14698_v44 = vld [vmem:[%s19541_s3 + $0x10] sm:$0xff] }
 0x8dd   :  { %v1293_v48 = vmul.f32 %v14303_v41, %v1292_v46 }
 0x8df   :  { %v1297_v54 = vsel %vm1296_vm6, %v14303_v41, %v1293_v48  ;;  %v14697_v41 = vld [vmem:[%s19541_s3 + $0x8] sm:$0xff] }
 0x8e0   :  { %v1299_v56 = vmul.f32 %v1297_v54, %v15439_v53 }
 0x8e2   :  { %v1304_v57 = vmul.f32 %v14228_v30, %v1299_v56 }
 0x8e4   :  { %v1305_v58 = vpack.c.bf16 %v1304_v57, %v1303_v1 }
 0x8e6   :  { %1507 = vmatmul.bf16.vlgmr.msra.gmra.mxu0 %v1305_v58  ;;  %1521 = vmatmul.bf16.vlgmr.msra.gmra.mxu1 %v1305_v58 }
 0x8e7   :  { %1535 = vmatmul.bf16.vlgmr.msra.gmra.mxu2 %v1305_v58  ;;  %1549 = vmatmul.bf16.vlgmr.msra.gmra.mxu3 %v1305_v58 }
 0x963   :  { %v1508_v47 = vpop.f32.mrf.mxu0  ;;  %v1522_v59 = vpop.f32.mrf.mxu1 }
 0x964   :  { %v1555_v8 = vmul.f32 %v14694_v7, %v1508_v47  ;;  %v1557_v0 = vmul.f32 %v14695_v49, %v1522_v59 }
 0x966   :  { %v1559_v9 = vadd.f32 %v1557_v0, %v1555_v8 }
 0x96a   :  { %v1536_v60 = vpop.f32.mrf.mxu2  ;;  %v1550_v61 = vpop.f32.mrf.mxu3 }
 0x96b   :  { %v1563_v62 = vmul.f32 %v1536_v60, %v15036_v13  ;;  %v1510_v63 = vpop.f32.mrf.mxu0  ;;  %v1524_v55 = vpop.f32.mrf.mxu1  ;;  %v1561_v16 = vmul.f32 %v14694_v7, %v1536_v60 }
 0x96c   :  { %v1556_v4 = vmul.f32 %v14692_v3, %v1510_v63  ;;  %v1558_v6 = vmul.f32 %v14693_v5, %v1524_v55 }
 0x96d   :  { %1567 = vrot.lane.b32.xlu2 %v1563_v62, %s14749_s21 }
 0x96e   :  { %v1560_v50 = vadd.f32 %v1558_v6, %v1556_v4 }
 0x970   :  { %v14191_v51 = vpack.i.bf16 %v1560_v50, %v1559_v9  ;;  %v1583_v14 = vpack.c.bf16 %v1560_v50, %v1559_v9 }
 0x972   :  { %v1538_v10 = vpop.f32.mrf.mxu2  ;;  %v1552_v2 = vpop.f32.mrf.mxu3 }
 0x973   :  { %v1564_v11 = vmul.f32 %v1538_v10, %v15048_v28  ;;  %v15657_v12 = vpack.c.bf16 %v1552_v2, %v1550_v61  ;;  %v1562_v17 = vmul.f32 %v14692_v3, %v1538_v10 }
 0x975   :  { %1674 = vmatpush.bf16.msrb.mxu1 %v15657_v12  ;;  %1569 = vrot.lane.b32.xlu1 %v1564_v11, %s14749_s21 }
 0x976   :  { %14192 = vrot.lane.b32.xlu2 %v14191_v51, %s14750_s29 }
 0x97e   :  { %1757 = vrot.lane.b32.xlu2 %v1583_v14, %s14749_s21 }
 0x9c7   :  { %v1568_v15 = vpop.permute.xlu2 %1567 }
 0x9c8   :  { %v1573_v35 = vadd.f32 %v1568_v15, %v1561_v16 }
 0x9d0   :  { %v14193_v23 = vpop.permute.xlu2 %14192 }
 0x9d1   :  { %v14195_v25 = vunpack.i.h.bf16 %v14193_v23  ;;  %v14194_v26 = vunpack.i.l.bf16 %v14193_v23 }
 0x9d3   :  { %v1584_v31 = vpack.c.bf16 %v14195_v25, %v14194_v26 }
 0x9d8   :  { %v1758_v36 = vpop.permute.xlu2 %1757 }
 0x9e7   :  { %v1570_v18 = vpop.permute.xlu1 %1569 }
 0x9e8   :  { %v1574_v21 = vadd.f32 %v1570_v18, %v1562_v17 }
 0x9ea   :  { %v1585_v22 = vpack.c.bf16 %v1574_v21, %v1573_v35 }
 0x9ec   :  { %1762 = vrot.lane.b32.xlu1 %v1585_v22, %s14750_s29  ;;  %v1593_v24 = vsel %vm379_vm7, %v1585_v22, 0 }
 0x9ed   :  { %1602 = vmatpush.bf16.xpose.msrb.mxu0 %v1593_v24 }
 0x9f4   :  { %1759 = vrot.lane.b32.xlu1 %v1584_v31, %s14749_s21  ;;  %10264 = vmatmul.msk.bf16.vlgmr.msrb.gmra.mxu0 %vm379_vm7, %v1583_v14 }
 0xa04   :  { %10265 = vmatmul.msk.bf16.gmra.mxu0 %vm379_vm7, %v1584_v31 }
 0xa5e   :  { %v1763_v33 = vpop.permute.xlu1 %1762 }
 0xa5f   :  { %v1771_v34 = vsel %vm379_vm7, %v1763_v33, 0 }
 0xa60   :  { %1780 = vmatpush.bf16.xpose.msra.mxu0 %v1771_v34 }
 0xa66   :  { %v1760_v39 = vpop.permute.xlu1 %1759 }
 0xa67   :  { %10294 = vmatmul.msk.bf16.vlgmr.msra.gmra.mxu0 %vm379_vm7, %v1758_v36 }
 0xa71   :  { %v1604_v37 = vpop.f32.mrf.mxu0 }
 0xa72   :  { %v1605_v38 = vadd.f32 %v14696_v29, %v1604_v37 }
 0xa74   :  { %v1614_v19 = vsel %vm408_vm8, %v1605_v38, -inf }
 0xa75   :  { %1615 = vmax.xlane.f32.xlu0 %v1614_v19 }
 0xa77   :  { %10295 = vmatmul.msk.bf16.gmra.mxu0 %vm379_vm7, %v1760_v39 }
 0xa79   :  { %v1606_v40 = vpop.f32.mrf.mxu0 }
 0xa7a   :  { %v1607_v42 = vadd.f32 %v14697_v41, %v1606_v40 }
 0xa7c   :  { %v1617_v43 = vsel %vm408_vm8, %v1607_v42, -inf }
 0xa7d   :  { %1618 = vmax.xlane.f32.xlu2 %v1617_v43 }
 0xa81   :  { %v1609_v27 = vpop.f32.mrf.mxu0 }
 0xa82   :  { %v1610_v45 = vadd.f32 %v14698_v44, %v1609_v27 }
 0xa84   :  { %v1620_v46 = vsel %vm408_vm8, %v1610_v45, -inf }
 0xa85   :  { %1621 = vmax.xlane.f32.xlu1 %v1620_v46 }
 0xa89   :  { %v1611_v48 = vpop.f32.mrf.mxu0 }
 0xa8a   :  { %v1612_v30 = vadd.f32 %v14699_v52, %v1611_v48 }
 0xa8c   :  { %v1623_v54 = vsel %vm408_vm8, %v1612_v30, -inf }
 0xa8d   :  { %1624 = vmax.xlane.f32.xlu0 %v1623_v54 }
 0xae4   :  { %v1782_v56 = vpop.f32.mrf.mxu0 }
 0xae5   :  { %v1783_v1 = vadd.f32 %v14696_v29, %v1782_v56 }
 0xae7   :  { %v1792_v57 = vsel %vm408_vm8, %v1783_v1, -inf }
 0xae8   :  { %1793 = vmax.xlane.f32.xlu0 %v1792_v57  ;;  %v1616_v58 = vpop.xlane.xlu0 %1615 }
 0xae9   :  { %v1626_v47 = vsub.f32 %v1605_v38, %v1616_v58 }
 0xaeb   :  { %v1630_v59 = vmul.f32 1.442695, %v1626_v47 }
 0xaec   :  { %v1784_v60 = vpop.f32.mrf.mxu0 }
 0xaed   :  { %14304 = vpow2.f32 %v1630_v59  ;;  %v1785_v61 = vadd.f32 %v14697_v41, %v1784_v60 }
 0xaef   :  { %v1795_v62 = vsel %vm408_vm8, %v1785_v61, -inf }
 0xaf0   :  { %v1619_v63 = vpop.xlane.xlu2 %1618  ;;  %1796 = vmax.xlane.f32.xlu0 %v1795_v62  ;;  %v13598_v62 = vld [vmem:[%s19542_s6 + $0x48] sm:$0xff] }
 0xaf1   :  { %v1627_v55 = vsub.f32 %v1607_v42, %v1619_v63  ;;  %1747 = vmatpush.bf16.msrb.mxu3 %v13598_v62  ;;  %v13634_v62 = vld [vmem:[%s19544_s8 + $0x1ec] sm:$0xf] }
 0xaf3   :  { %v14305_v3 = vpop.eup %14304  ;;  %v1632_v4 = vmul.f32 1.442695, %v1627_v55  ;;  %v13597_v55 = vld [vmem:[%s19542_s6 + $0x40] sm:$0xff] }
 0xaf4   :  { %v1787_v5 = vpop.f32.mrf.mxu0  ;;  %v1638_v6 = vsel %vm408_vm8, %v14305_v3, 0.0 }
 0xaf5   :  { %14306 = vpow2.f32 %v1632_v4  ;;  %v1788_v7 = vadd.f32 %v14698_v44, %v1787_v5  ;;  %1639 = vadd.xlane.f32.xlu2 %v1638_v6  ;;  %1748 = vmatpush.bf16.msrb.mxu3 %v13597_v55  ;;  %v13600_v5 = vld [vmem:[%s19542_s6 + $0x58] sm:$0xff] }
 0xaf6   :  { %1718 = vmatpush.bf16.msrb.mxu2 %v13600_v5  ;;  %v13629_v5 = vld [vmem:[%s19544_s8 + $0x1c4] sm:$0xf] }
 0xaf7   :  { %v1798_v8 = vsel %vm408_vm8, %v1788_v7, -inf }
 0xaf8   :  { %v1622_v49 = vpop.xlane.xlu1 %1621  ;;  %1799 = vmax.xlane.f32.xlu0 %v1798_v8 }
 0xaf9   :  { %v1628_v0 = vsub.f32 %v1610_v45, %v1622_v49 }
 0xafb   :  { %v14307_v50 = vpop.eup %14306  ;;  %v1634_v9 = vmul.f32 1.442695, %v1628_v0 }
 0xafc   :  { %v1789_v10 = vpop.f32.mrf.mxu0  ;;  %v1641_v2 = vsel %vm408_vm8, %v14307_v50, 0.0 }
 0xafd   :  { %v1790_v11 = vadd.f32 %v14699_v52, %v1789_v10  ;;  %1642 = vadd.xlane.f32.xlu1 %v1641_v2  ;;  %14308 = vpow2.f32 %v1634_v9 }
 0xaff   :  { %v1801_v51 = vsel %vm408_vm8, %v1790_v11, -inf }
 0xb00   :  { %1802 = vmax.xlane.f32.xlu0 %v1801_v51  ;;  %v1625_v14 = vpop.xlane.xlu0 %1624 }
 0xb01   :  { %v1629_v15 = vsub.f32 %v1612_v30, %v1625_v14 }
 0xb03   :  { %v1636_v16 = vmul.f32 1.442695, %v1629_v15  ;;  %v14309_v17 = vpop.eup %14308 }
 0xb04   :  { %v1644_v18 = vsel %vm408_vm8, %v14309_v17, 0.0 }
 0xb05   :  { %14310 = vpow2.f32 %v1636_v16 }
 0xb08   :  { %1645 = vadd.xlane.f32.xlu0 %v1644_v18 }
 0xb0b   :  { %v14311_v35 = vpop.eup %14310 }
 0xb0c   :  { %v1647_v21 = vsel %vm408_vm8, %v14311_v35, 0.0 }
 0xb0d   :  { %1648 = vadd.xlane.f32.xlu2 %v1647_v21 }
 0xb25   :  { %1839 = vrot.lane.b32.xlu2 %v15657_v12, %s14750_s29 }
 0xb5b   :  { %v1794_v22 = vpop.xlane.xlu0 %1793 }
 0xb5c   :  { %v1804_v23 = vsub.f32 %v1783_v1, %v1794_v22  ;;  %v13602_v22 = vld [vmem:[%s19542_s6 + $0x68] sm:$0xff] }
 0xb5e   :  { %v1808_v24 = vmul.f32 1.442695, %v1804_v23  ;;  %v13601_v23 = vld [vmem:[%s19542_s6 + $0x60] sm:$0xff] }
 0xb60   :  { %14312 = vpow2.f32 %v1808_v24  ;;  %v13604_v24 = vld [vmem:[%s19542_s6 + $0x78] sm:$0xff] }
 0xb61   :  { %1929 = vmatpush.bf16.msra.mxu3 %v13604_v24 }
 0xb63   :  { %v1797_v25 = vpop.xlane.xlu0 %1796 }
 0xb64   :  { %v1805_v26 = vsub.f32 %v1785_v61, %v1797_v25  ;;  %v13603_v25 = vld [vmem:[%s19542_s6 + $0x70] sm:$0xff] }
 0xb65   :  { %1930 = vmatpush.bf16.msra.mxu3 %v13603_v25  ;;  %v10423_v25 = vld [vmem:[%s19544_s8 + $0x180] sm:$0xf] }
 0xb66   :  { %v14313_v31 = vpop.eup %14312  ;;  %v1810_v33 = vmul.f32 1.442695, %v1805_v26 }
 0xb67   :  { %v1816_v34 = vsel %vm408_vm8, %v14313_v31, 0.0 }
 0xb68   :  { %14314 = vpow2.f32 %v1810_v33  ;;  %1817 = vadd.xlane.f32.xlu1 %v1816_v34  ;;  %v1640_v37 = vpop.xlane.xlu2 %1639 }
 0xb69   :  { %14316 = vrcp.f32 %v1640_v37 }
 0xb6b   :  { %v1800_v36 = vpop.xlane.xlu0 %1799 }
 0xb6c   :  { %v1806_v29 = vsub.f32 %v1788_v7, %v1800_v36 }
 0xb6e   :  { %v14315_v38 = vpop.eup %14314  ;;  %v1812_v19 = vmul.f32 1.442695, %v1806_v29 }
 0xb6f   :  { %v1819_v12 = vsel %vm408_vm8, %v14315_v38, 0.0  ;;  %v14317_v42 = vpop.eup %14316 }
 0xb70   :  { %14318 = vpow2.f32 %v1812_v19  ;;  %v1643_v39 = vpop.xlane.xlu1 %1642  ;;  %1820 = vadd.xlane.f32.xlu0 %v1819_v12  ;;  %v1654_v46 = vmul.f32 %v14317_v42, %v14305_v3 }
 0xb71   :  { %14320 = vrcp.f32 %v1643_v39 }
 0xb73   :  { %v1803_v40 = vpop.xlane.xlu0 %1802 }
 0xb74   :  { %v1807_v41 = vsub.f32 %v1790_v11, %v1803_v40 }
 0xb76   :  { %v14319_v43 = vpop.eup %14318  ;;  %v1814_v27 = vmul.f32 1.442695, %v1807_v41 }
 0xb77   :  { %v14321_v44 = vpop.eup %14320  ;;  %v1822_v45 = vsel %vm408_vm8, %v14319_v43, 0.0 }
 0xb78   :  { %v1655_v48 = vmul.f32 %v14321_v44, %v14307_v50  ;;  %14322 = vpow2.f32 %v1814_v27  ;;  %1823 = vadd.xlane.f32.xlu1 %v1822_v45  ;;  %v13599_v50 = vld [vmem:[%s19542_s6 + $0x50] sm:$0xff] }
 0xb79   :  { %1719 = vmatpush.bf16.msrb.mxu2 %v13599_v50 }
 0xb7a   :  { %v1658_v52 = vpack.c.bf16 %v1655_v48, %v1654_v46 }
 0xb7b   :  { %v1646_v30 = vpop.xlane.xlu0 %1645 }
 0xb7c   :  { %10266 = vmatmul.msk.bf16.vlgmr.msrb.gmra.mxu1 %vm408_vm8, %v1658_v52  ;;  %14324 = vrcp.f32 %v1646_v30 }
 0xb7d   :  { %1893 = vmatpush.bf16.msra.mxu2 %v13602_v22  ;;  %v13626_v22 = vld [vmem:[%s19544_s8 + $0x1ac] sm:$0xf] }
 0xb7e   :  { %v14323_v54 = vpop.eup %14322 }
 0xb7f   :  { %v1825_v56 = vsel %vm408_vm8, %v14323_v54, 0.0 }
 0xb80   :  { %v1649_v1 = vpop.xlane.xlu2 %1648  ;;  %1826 = vadd.xlane.f32.xlu0 %v1825_v56 }
 0xb81   :  { %14326 = vrcp.f32 %v1649_v1  ;;  %1894 = vmatpush.bf16.msra.mxu2 %v13601_v23  ;;  %v13635_v1 = vld [vmem:[%s19544_s8 + $0x1ec] sm:$0xf0]  ;;  %v10449_v23 = vld [vmem:[%s19544_s8 + $0x1b8] sm:$0xf0] }
 0xb82   :  { %v14325_v57 = vpop.eup %14324  ;;  %v10452_v24 = vor.u32 %v13626_v22, %v10449_v23 }
 0xb83   :  { %v1656_v59 = vmul.f32 %v14325_v57, %v14309_v17  ;;  %v13633_v57 = vld [vmem:[%s19544_s8 + $0x1e4] sm:$0xf] }
 0xb87   :  { %v14327_v58 = vpop.eup %14326 }
 0xb88   :  { %v1840_v47 = vpop.permute.xlu2 %1839  ;;  %v1657_v60 = vmul.f32 %v14327_v58, %v14311_v35 }
 0xb89   :  { %1855 = vmatpush.bf16.msra.mxu1 %v1840_v47  ;;  %v10479_v47 = vld [vmem:[%s19544_s8 + $0x1e8] sm:$0xf] }
 0xb8a   :  { %v1659_v61 = vpack.c.bf16 %v1657_v60, %v1656_v59  ;;  %v13636_v59 = vld [vmem:[%s19544_s8 + $0x1f4] sm:$0xf0] }
 0xb8c   :  { %10267 = vmatmul.msk.bf16.gmra.mxu1 %vm408_vm8, %v1659_v61  ;;  %v10480_v61 = vor.u32 %v13636_v59, %v10479_v47  ;;  %v10393_v47 = vld [vmem:[%s19544_s8 + $0x150] sm:$0xf0]  ;;  %v10399_v59 = vld [vmem:[%s19544_s8 + $0x148] sm:$0xf] }
 0xbdb   :  { %v1818_v63 = vpop.xlane.xlu1 %1817 }
 0xbdc   :  { %14328 = vrcp.f32 %v1818_v63  ;;  %v10481_v63 = vld [vmem:[%s19544_s8 + $0x1f8] sm:$0xf0] }
 0xbdd   :  { %v10484_v55 = vor.u32 %v13634_v62, %v10481_v63  ;;  %v13614_v63 = vld [vmem:[%s19544_s8 + $0x14c] sm:$0xf] }
 0xbe2   :  { %v14329_v4 = vpop.eup %14328 }
 0xbe3   :  { %v1821_v3 = vpop.xlane.xlu0 %1820  ;;  %v1832_v7 = vmul.f32 %v14329_v4, %v14313_v31  ;;  %v13631_v4 = vld [vmem:[%s19544_s8 + $0x1cc] sm:$0xf0] }
 0xbe4   :  { %14330 = vrcp.f32 %v1821_v3  ;;  %v10455_v3 = vld [vmem:[%s19544_s8 + $0x1c0] sm:$0xf] }
 0xbea   :  { %v14331_v6 = vpop.eup %14330 }
 0xbeb   :  { %v1833_v8 = vmul.f32 %v14331_v6, %v14315_v38  ;;  %v1824_v0 = vpop.xlane.xlu1 %1823  ;;  %v10456_v6 = vor.u32 %v13631_v4, %v10455_v3  ;;  %v10375_v4 = vld [vmem:[%s19544_s8 + $0x120] sm:$0xf] }
 0xbec   :  { %14332 = vrcp.f32 %v1824_v0 }
 0xbed   :  { %v1836_v49 = vpack.c.bf16 %v1833_v8, %v1832_v7  ;;  %v10457_v7 = vld [vmem:[%s19544_s8 + $0x1d0] sm:$0xf0]  ;;  %v10463_v8 = vld [vmem:[%s19544_s8 + $0x1c8] sm:$0xf] }
 0xbee   :  { %v10460_v0 = vor.u32 %v13629_v5, %v10457_v7  ;;  %v13611_v5 = vld [vmem:[%s19544_s8 + $0x12c] sm:$0xf0] }
 0xbef   :  { %10296 = vmatmul.msk.bf16.vlgmr.msra.gmra.mxu1 %vm408_vm8, %v1836_v49  ;;  %v13632_v49 = vld [vmem:[%s19544_s8 + $0x1d4] sm:$0xf0]  ;;  %v10376_v7 = vor.u32 %v13611_v5, %v10375_v4 }
 0xbf0   :  { %v10464_v50 = vor.u32 %v13632_v49, %v10463_v8  ;;  %v10377_v8 = vld [vmem:[%s19544_s8 + $0x130] sm:$0xf0]  ;;  %v10383_v49 = vld [vmem:[%s19544_s8 + $0x128] sm:$0xf]  ;;  %v13648_v4 = vld [vmem:[%s19545_s9 + $0xd8] sm:$0xff] }
 0xbf2   :  { %v14333_v10 = vpop.eup %14332 }
 0xbf3   :  { %v1827_v9 = vpop.xlane.xlu0 %1826  ;;  %v1834_v51 = vmul.f32 %v14333_v10, %v14319_v43  ;;  %v10465_v10 = vld [vmem:[%s19544_s8 + $0x1d8] sm:$0xf0] }
 0xbf4   :  { %14334 = vrcp.f32 %v1827_v9  ;;  %v13630_v9 = vld [vmem:[%s19544_s8 + $0x1cc] sm:$0xf] }
 0xbf9   :  { %v1676_v2 = vpop.f32.mrf.mxu1 }
 0xbfa   :  { %v14335_v11 = vpop.eup %14334 }
 0xbfb   :  { %v1835_v14 = vmul.f32 %v14335_v11, %v14323_v54  ;;  %v10439_v11 = vld [vmem:[%s19544_s8 + $0x1a0] sm:$0xf] }
 0xbfd   :  { %v1837_v15 = vpack.c.bf16 %v1835_v14, %v1834_v51  ;;  %v13627_v51 = vld [vmem:[%s19544_s8 + $0x1ac] sm:$0xf0]  ;;  %v13625_v14 = vld [vmem:[%s19544_s8 + $0x1a4] sm:$0xf] }
 0xbff   :  { %10297 = vmatmul.msk.bf16.gmra.mxu1 %vm408_vm8, %v1837_v15  ;;  %v10440_v15 = vor.u32 %v13627_v51, %v10439_v11  ;;  %v10359_v51 = vld [vmem:[%s19544_s8 + $0x100] sm:$0xf] }
 0xc01   :  { %v1678_v16 = vpop.f32.mrf.mxu1 }
 0xc02   :  { %v1686_v17 = vpack.c.bf16 %v1678_v16, %v1676_v2  ;;  %v10468_v2 = vor.u32 %v13630_v9, %v10465_v10  ;;  %v10441_v16 = vld [vmem:[%s19544_s8 + $0x1b0] sm:$0xf0]  ;;  %v13610_v10 = vld [vmem:[%s19544_s8 + $0x12c] sm:$0xf] }
 0xc04   :  { %10293 = vmatmul.msk.bf16.vlgmr.msrb.gmra.mxu3 %vm379_vm7, %v1686_v17  ;;  %v10447_v17 = vld [vmem:[%s19544_s8 + $0x1a8] sm:$0xf] }
 0xc05   :  { %2216 = vmatpush.bf16.msrb.mxu3 %v10484_v55  ;;  %v10401_v55 = vld [vmem:[%s19544_s8 + $0x158] sm:$0xf0] }
 0xc06   :  { %v10404_v3 = vor.u32 %v13614_v63, %v10401_v55  ;;  %v13641_v63 = vld [vmem:[%s19545_s9 + $0xa0] sm:$0xff] }
 0xc07   :  { %v13649_v55 = vld [vmem:[%s19545_s9 + $0xe0] sm:$0xff] }
 0xc09   :  { %v1681_v18 = vpop.f32.mrf.mxu1  ;;  %2217 = vmatpush.bf16.msrb.mxu3 %v10468_v2  ;;  %v10385_v2 = vld [vmem:[%s19544_s8 + $0x138] sm:$0xf0] }
 0xc0a   :  { %v10388_v11 = vor.u32 %v13610_v10, %v10385_v2 }
 0xc0d   :  { %2218 = vmatpush.bf16.msrb.mxu3 %v10452_v24 }
 0xc11   :  { %v1683_v35 = vpop.f32.mrf.mxu1 }
 0xc12   :  { %v1692_v21 = vpack.c.bf16 %v1683_v35, %v1681_v18  ;;  %v13628_v18 = vld [vmem:[%s19544_s8 + $0x1b4] sm:$0xf0]  ;;  %v10444_v35 = vor.u32 %v13625_v14, %v10441_v16  ;;  %v13607_v14 = vld [vmem:[%s19544_s8 + $0x10c] sm:$0xf0] }
 0xc14   :  { %10284 = vmatmul.msk.bf16.vlgmr.msrb.gmra.mxu2 %vm379_vm7, %v1692_v21  ;;  %v10448_v21 = vor.u32 %v13628_v18, %v10447_v17  ;;  %v10360_v17 = vor.u32 %v13607_v14, %v10359_v51  ;;  %v10361_v18 = vld [vmem:[%s19544_s8 + $0x110] sm:$0xf0] }
 0xc15   :  { %2202 = vmatpush.bf16.msrb.mxu2 %v10480_v61 }
 0xc19   :  { %2203 = vmatpush.bf16.msrb.mxu2 %v10464_v50 }
 0xc1d   :  { %2204 = vmatpush.bf16.msrb.mxu2 %v10448_v21  ;;  %v13608_v21 = vld [vmem:[%s19544_s8 + $0x114] sm:$0xf0] }
 0xc6c   :  { %v1857_v26 = vpop.f32.mrf.mxu1 }
 0xc74   :  { %v1859_v31 = vpop.f32.mrf.mxu1 }
 0xc75   :  { %v1867_v33 = vpack.c.bf16 %v1859_v31, %v1857_v26  ;;  %v13623_v26 = vld [vmem:[%s19544_s8 + $0x18c] sm:$0xf0]  ;;  %v13621_v31 = vld [vmem:[%s19544_s8 + $0x184] sm:$0xf] }
 0xc77   :  { %10310 = vmatmul.msk.bf16.vlgmr.msra.gmra.mxu2 %vm379_vm7, %v1867_v33  ;;  %v10424_v33 = vor.u32 %v13623_v26, %v10423_v25  ;;  %v13606_v25 = vld [vmem:[%s19544_s8 + $0x10c] sm:$0xf]  ;;  %v10369_v26 = vld [vmem:[%s19544_s8 + $0x118] sm:$0xf0] }
 0xc7c   :  { %v1862_v34 = vpop.f32.mrf.mxu1 }
 0xc84   :  { %v1864_v36 = vpop.f32.mrf.mxu1 }
 0xc85   :  { %v1903_v37 = vpack.c.bf16 %v1864_v36, %v1862_v34  ;;  %v10425_v34 = vld [vmem:[%s19544_s8 + $0x190] sm:$0xf0]  ;;  %v10431_v36 = vld [vmem:[%s19544_s8 + $0x188] sm:$0xf] }
 0xc87   :  { %10323 = vmatmul.msk.bf16.vlgmr.msra.gmra.mxu3 %vm379_vm7, %v1903_v37  ;;  %v1750_v38 = vpop.f32.mrf.mxu3  ;;  %v13624_v37 = vld [vmem:[%s19544_s8 + $0x194] sm:$0xf0] }
 0xc8f   :  { %v1752_v12 = vpop.f32.mrf.mxu3 }
 0xc97   :  { %v1721_v29 = vpop.f32.mrf.mxu2 }
 0xc98   :  { %v1751_v40 = vadd.f32 %v1750_v38, %v1721_v29  ;;  %v10428_v29 = vor.u32 %v13621_v31, %v10425_v34  ;;  %v10432_v38 = vor.u32 %v13624_v37, %v10431_v36  ;;  %v10372_v31 = vor.u32 %v13606_v25, %v10369_v26 }
 0xc9a   :  { %2205 = vmatpush.bf16.msrb.mxu2 %v10432_v38 }
 0xc9f   :  { %v1723_v19 = vpop.f32.mrf.mxu2 }
 0xca0   :  { %v1753_v45 = vadd.f32 %v1752_v12, %v1723_v19  ;;  %v13622_v19 = vld [vmem:[%s19544_s8 + $0x18c] sm:$0xf]  ;;  %v10433_v12 = vld [vmem:[%s19544_s8 + $0x198] sm:$0xf0] }
 0xcfa   :  { %v1896_v39 = vpop.f32.mrf.mxu2 }
 0xcfb   :  { %v1901_v41 = vadd.f32 %v1896_v39, %v1751_v40  ;;  %v10436_v39 = vor.u32 %v13622_v19, %v10433_v12  ;;  %v10407_v40 = vld [vmem:[%s19544_s8 + $0x160] sm:$0xf] }
 0xcfd   :  { %2219 = vmatpush.bf16.msrb.mxu3 %v10436_v39 }
 0xd02   :  { %v1898_v44 = vpop.f32.mrf.mxu2 }
 0xd03   :  { %v1902_v48 = vadd.f32 %v1898_v44, %v1753_v45  ;;  %v10409_v44 = vld [vmem:[%s19544_s8 + $0x170] sm:$0xf0]  ;;  %v10415_v45 = vld [vmem:[%s19544_s8 + $0x168] sm:$0xf] }
 0xd0a   :  { %v1932_v42 = vpop.f32.mrf.mxu3 }
 0xd0b   :  { %v1937_v43 = vadd.f32 %v1932_v42, %v1901_v41  ;;  %v13619_v41 = vld [vmem:[%s19544_s8 + $0x16c] sm:$0xf0]  ;;  %v13617_v42 = vld [vmem:[%s19544_s8 + $0x164] sm:$0xf] }
 0xd0d   :  { %v15734_v27 = vadd.f32 %v1937_v43, %v15434_v20  ;;  %v10471_v20 = vld [vmem:[%s19544_s8 + $0x1e0] sm:$0xf]  ;;  %v10408_v43 = vor.u32 %v13619_v41, %v10407_v40 }
 0xd0e   :  { %v10472_v58 = vor.u32 %v13635_v1, %v10471_v20  ;;  %v10391_v1 = vld [vmem:[%s19544_s8 + $0x140] sm:$0xf] }
 0xd0f   :  { %v1943_v46 = vmul.f32 %v15734_v27, %v15734_v27 }
 0xd10   :  { %2174 = vmatpush.bf16.msrb.mxu0 %v10472_v58  ;;  %v13613_v58 = vld [vmem:[%s19544_s8 + $0x144] sm:$0xf] }
 0xd11   :  { %1945 = vadd.xlane.f32.xlu1 %v1943_v46  ;;  %v13620_v46 = vld [vmem:[%s19544_s8 + $0x174] sm:$0xf0]  ;;  %v10396_v61 = vor.u32 %v13613_v58, %v10393_v47 }
 0xd12   :  { %v1934_v52 = vpop.f32.mrf.mxu3  ;;  %v13652_v47 = vld [vmem:[%s19545_s9 + $0xf8] sm:$0xff] }
 0xd13   :  { %v1938_v30 = vadd.f32 %v1934_v52, %v1902_v48  ;;  %v10412_v48 = vor.u32 %v13617_v42, %v10409_v44  ;;  %v10416_v52 = vor.u32 %v13620_v46, %v10415_v45 }
 0xd14   :  { %2175 = vmatpush.bf16.msrb.mxu0 %v10456_v6  ;;  %v13609_v6 = vld [vmem:[%s19544_s8 + $0x124] sm:$0xf] }
 0xd15   :  { %v15739_v54 = vadd.f32 %v1938_v30, %v15439_v53  ;;  %v10473_v53 = vld [vmem:[%s19544_s8 + $0x1f0] sm:$0xf0]  ;;  %v13618_v30 = vld [vmem:[%s19544_s8 + $0x16c] sm:$0xf]  ;;  %2206 = vmatpush.bf16.msrb.mxu2 %v10416_v52  ;;  %v10380_v50 = vor.u32 %v13609_v6, %v10377_v8 }
 0xd16   :  { %v10476_v60 = vor.u32 %v13633_v57, %v10473_v53  ;;  %v13615_v57 = vld [vmem:[%s19544_s8 + $0x14c] sm:$0xf0] }
 0xd17   :  { %v1944_v56 = vmul.f32 %v15739_v54, %v15739_v54  ;;  %v10392_v53 = vor.u32 %v13615_v57, %v10391_v1 }
 0xd18   :  { %2188 = vmatpush.bf16.msrb.mxu1 %v10476_v60  ;;  %2176 = vmatpush.bf16.msrb.mxu0 %v10440_v15  ;;  %v13616_v60 = vld [vmem:[%s19544_s8 + $0x154] sm:$0xf0]  ;;  %v13605_v15 = vld [vmem:[%s19544_s8 + $0x104] sm:$0xf] }
 0xd19   :  { %1947 = vadd.xlane.f32.xlu0 %v1944_v56  ;;  %v10417_v56 = vld [vmem:[%s19544_s8 + $0x178] sm:$0xf0]  ;;  %v10400_v62 = vor.u32 %v13616_v60, %v10399_v59  ;;  %v10364_v23 = vor.u32 %v13605_v15, %v10361_v18  ;;  %v13643_v59 = vld [vmem:[%s19545_s9 + $0xb0] sm:$0xff]  ;;  %v13645_v18 = vld [vmem:[%s19545_s9 + $0xc0] sm:$0xff] }
 0xd1a   :  { %v10420_v20 = vor.u32 %v13618_v30, %v10417_v56  ;;  %v14229_v30 = vld [vmem:[%s19543_s7 + $0x1] ss:$0 sm:$0xff]  ;;  %v13651_v60 = vld [vmem:[%s19545_s9 + $0xf0] sm:$0xff] }
 0xd1b   :  { %2207 = vmatpush.bf16.msrb.mxu2 %v10400_v62  ;;  %v13650_v62 = vld [vmem:[%s19545_s9 + $0xe8] sm:$0xff] }
 0xd1c   :  { %2189 = vmatpush.bf16.msrb.mxu1 %v10460_v0  ;;  %2177 = vmatpush.bf16.msrb.mxu0 %v10424_v33  ;;  %v13612_v0 = vld [vmem:[%s19544_s8 + $0x134] sm:$0xf0] }
 0xd1d   :  { %2220 = vmatpush.bf16.msrb.mxu3 %v10420_v20  ;;  %v10384_v9 = vor.u32 %v13612_v0, %v10383_v49  ;;  %v13639_v49 = vld [vmem:[%s19545_s9 + $0x90] sm:$0xff] }
 0xd1e   :  { %v13647_v0 = vld [vmem:[%s19545_s9 + $0xd0] sm:$0xff] }
 0xd1f   :  { %2208 = vmatpush.bf16.msrb.mxu2 %v10384_v9  ;;  %v13646_v9 = vld [vmem:[%s19545_s9 + $0xc8] sm:$0xff] }
 0xd20   :  { %2190 = vmatpush.bf16.msrb.mxu1 %v10444_v35  ;;  %2178 = vmatpush.bf16.msrb.mxu0 %v10408_v43  ;;  %v10367_v35 = vld [vmem:[%s19544_s8 + $0x108] sm:$0xf] }
 0xd21   :  { %2221 = vmatpush.bf16.msrb.mxu3 %v10404_v3  ;;  %v10368_v24 = vor.u32 %v13608_v21, %v10367_v35  ;;  %v13640_v3 = vld [vmem:[%s19545_s9 + $0x98] sm:$0xff] }
 0xd23   :  { %2209 = vmatpush.bf16.msrb.mxu2 %v10368_v24 }
 0xd24   :  { %2191 = vmatpush.bf16.msrb.mxu1 %v10428_v29  ;;  %2179 = vmatpush.bf16.msrb.mxu0 %v10392_v53  ;;  %v13644_v53 = vld [vmem:[%s19545_s9 + $0xb8] sm:$0xff] }
 0xd25   :  { %2222 = vmatpush.bf16.msrb.mxu3 %v10388_v11 }
 0xd28   :  { %2192 = vmatpush.bf16.msrb.mxu1 %v10412_v48  ;;  %2180 = vmatpush.bf16.msrb.mxu0 %v10376_v7 }
 0xd29   :  { %2223 = vmatpush.bf16.msrb.mxu3 %v10372_v31 }
 0xd2c   :  { %2193 = vmatpush.bf16.msrb.mxu1 %v10396_v61  ;;  %2181 = vmatpush.bf16.msrb.mxu0 %v10360_v17  ;;  %v13642_v61 = vld [vmem:[%s19545_s9 + $0xa8] sm:$0xff]  ;;  %v13637_v17 = vld [vmem:[%s19545_s9 + $0x80] sm:$0xff] }
 0xd30   :  { %2194 = vmatpush.bf16.msrb.mxu1 %v10380_v50  ;;  %2445 = vmatpush.bf16.msra.mxu0 %v13644_v53  ;;  %v13638_v50 = vld [vmem:[%s19545_s9 + $0x88] sm:$0xff] }
 0xd34   :  { %2195 = vmatpush.bf16.msrb.mxu1 %v10364_v23  ;;  %2446 = vmatpush.bf16.msra.mxu0 %v13643_v59 }
 0xd38   :  { %2459 = vmatpush.bf16.msra.mxu1 %v13652_v47  ;;  %2447 = vmatpush.bf16.msra.mxu0 %v13642_v61 }
 0xd3c   :  { %2460 = vmatpush.bf16.msra.mxu1 %v13651_v60  ;;  %2448 = vmatpush.bf16.msra.mxu0 %v13641_v63 }
 0xd40   :  { %2461 = vmatpush.bf16.msra.mxu1 %v13650_v62  ;;  %2449 = vmatpush.bf16.msra.mxu0 %v13640_v3 }
 0xd44   :  { %2462 = vmatpush.bf16.msra.mxu1 %v13649_v55  ;;  %2450 = vmatpush.bf16.msra.mxu0 %v13639_v49 }
 0xd48   :  { %2463 = vmatpush.bf16.msra.mxu1 %v13648_v4  ;;  %2451 = vmatpush.bf16.msra.mxu0 %v13638_v50 }
 0xd4c   :  { %2464 = vmatpush.bf16.msra.mxu1 %v13647_v0  ;;  %2452 = vmatpush.bf16.msra.mxu0 %v13637_v17 }
 0xd50   :  { %2465 = vmatpush.bf16.msra.mxu1 %v13646_v9 }
 0xd54   :  { %2466 = vmatpush.bf16.msra.mxu1 %v13645_v18 }
 0xd84   :  { %v1946_v16 = vpop.xlane.xlu1 %1945 }
 0xd85   :  { %v1949_v22 = vmul.f32 %v1946_v16, %v14995_v32 }
 0xd87   :  { %v1951_v33 = vadd.f32 1e-05, %v1949_v22 }
 0xd89   :  { %14336 = vrsqrt.f32 %v1951_v33  ;;  %vm1959_vm10 = vweird.f32 %v1951_v33 }
 0xd8c   :  { %v1948_v34 = vpop.xlane.xlu0 %1947 }
 0xd8d   :  { %v1950_v36 = vmul.f32 %v1948_v34, %v14995_v32 }
 0xd8f   :  { %v14337_v37 = vpop.eup %14336  ;;  %v1952_v29 = vadd.f32 1e-05, %v1950_v36 }
 0xd90   :  { %v1954_v38 = vmul.f32 %v14337_v37, %v1951_v33  ;;  %vm1960_vm9 = vweird.f32 %v14337_v37 }
 0xd91   :  { %14338 = vrsqrt.f32 %v1952_v29  ;;  %vm1961_vm11 = vmor %vm1959_vm10, %vm1960_vm9  ;;  %vm1969_vm13 = vweird.f32 %v1952_v29 }
 0xd92   :  { %v1955_v19 = vmul.f32 %v14337_v37, %v1954_v38 }
 0xd94   :  { %v1956_v12 = vmul.f32 0.5, %v1955_v19 }
 0xd96   :  { %v1957_v39 = vsub.f32 1.5, %v1956_v12 }
 0xd97   :  { %v14339_v40 = vpop.eup %14338 }
 0xd98   :  { %v1964_v41 = vmul.f32 %v14339_v40, %v1952_v29  ;;  %v1958_v42 = vmul.f32 %v14337_v37, %v1957_v39  ;;  %vm1970_vm12 = vweird.f32 %v14339_v40 }
 0xd99   :  { %vm1971_vm14 = vmor %vm1969_vm13, %vm1970_vm12 }
 0xd9a   :  { %v1965_v43 = vmul.f32 %v14339_v40, %v1964_v41  ;;  %v1962_v45 = vsel %vm1961_vm11, %v14337_v37, %v1958_v42 }
 0xd9b   :  { %v1973_v52 = vmul.f32 %v1962_v45, %v15734_v27 }
 0xd9c   :  { %v1966_v44 = vmul.f32 0.5, %v1965_v43 }
 0xd9d   :  { %v1978_v1 = vmul.f32 %v14229_v30, %v1973_v52 }
 0xd9e   :  { %v1967_v46 = vsub.f32 1.5, %v1966_v44 }
 0xda0   :  { %v1968_v48 = vmul.f32 %v14339_v40, %v1967_v46 }
 0xda2   :  { %v1972_v56 = vsel %vm1971_vm14, %v14339_v40, %v1968_v48 }
 0xda3   :  { %v1974_v20 = vmul.f32 %v1972_v56, %v15739_v54 }
 0xda5   :  { %v1979_v57 = vmul.f32 %v14229_v30, %v1974_v20 }
 0xda7   :  { %v1980_v58 = vpack.c.bf16 %v1979_v57, %v1978_v1 }
 0xda9   :  { %2182 = vmatmul.bf16.vlgmr.msrb.gmra.mxu0 %v1980_v58  ;;  %2196 = vmatmul.bf16.vlgmr.msrb.gmra.mxu1 %v1980_v58 }
 0xdaa   :  { %2210 = vmatmul.bf16.vlgmr.msrb.gmra.mxu2 %v1980_v58  ;;  %2224 = vmatmul.bf16.vlgmr.msrb.gmra.mxu3 %v1980_v58 }
 0xe26   :  { %v15972_v5 = vpop.f32.mrf.mxu0  ;;  %v15974_v6 = vpop.f32.mrf.mxu1 }
 0xe27   :  { %v10485_v7 = vmul.f32 -1.442695, %v15972_v5  ;;  %v10486_v8 = vmul.f32 -1.442695, %v15974_v6 }
 0xe29   :  { %14340 = vpow2.f32 %v10485_v7 }
 0xe2a   :  { %14342 = vpow2.f32 %v10486_v8 }
 0xe2d   :  { %v2211_v44 = vpop.f32.mrf.mxu2  ;;  %v2225_v57 = vpop.f32.mrf.mxu3 }
 0xe2e   :  { %v15990_v10 = vpop.f32.mrf.mxu0  ;;  %v15992_v2 = vpop.f32.mrf.mxu1 }
 0xe2f   :  { %v14341_v11 = vpop.eup %14340  ;;  %v10487_v51 = vmul.f32 -1.442695, %v15990_v10  ;;  %v10488_v16 = vmul.f32 -1.442695, %v15992_v2 }
 0xe30   :  { %v14343_v14 = vpop.eup %14342  ;;  %v2242_v15 = vadd.f32 1.0, %v14341_v11 }
 0xe31   :  { %v2243_v35 = vadd.f32 1.0, %v14343_v14  ;;  %14344 = vpow2.f32 %v10487_v51 }
 0xe32   :  { %14346 = vrcp.f32 %v2242_v15  ;;  %v2257_v12 = vand.u32 2147483648, %v2242_v15  ;;  %vm2251_vm0 = vweird.f32 %v2242_v15  ;;  %v2255_v39 = vand.u32 2147483647, %v2242_v15 }
 0xe33   :  { %14348 = vrcp.f32 %v2243_v35  ;;  %v2270_v43 = vand.u32 2147483647, %v2243_v35  ;;  %v2272_v48 = vand.u32 2147483648, %v2243_v35  ;;  %vm2266_vm3 = vweird.f32 %v2243_v35 }
 0xe34   :  { %14350 = vpow2.f32 %v10488_v16  ;;  %v2258_v30 = vor.u32 1.1754944e-38, %v2257_v12  ;;  %vm2256_vm4 = vcmp.eq.f32.partialorder %v2255_v39, 8.507059e+37  ;;  %v10740_v12 = vld [vmem:[%s19538_s5 + $0x2e8] sm:$0xf]  ;;  %v13684_v39 = vld [vmem:[%s19538_s5 + $0x2f4] sm:$0xf0] }
 0xe35   :  { %vm2271_vm9 = vcmp.eq.f32.partialorder %v2270_v43, 8.507059e+37  ;;  %v2273_v61 = vor.u32 1.1754944e-38, %v2272_v48  ;;  %v10741_v41 = vor.u32 %v13684_v39, %v10740_v12  ;;  %v10742_v43 = vld [vmem:[%s19538_s5 + $0x2f8] sm:$0xf0]  ;;  %v13677_v48 = vld [vmem:[%s19538_s5 + $0x2c4] sm:$0xf] }
 0xe36   :  { %v10654_v12 = vld [vmem:[%s19538_s5 + $0x250] sm:$0xf0]  ;;  %v10660_v39 = vld [vmem:[%s19538_s5 + $0x248] sm:$0xf] }
 0xe37   :  { %v14345_v21 = vpop.eup %14344  ;;  %2736 = vmatpush.bf16.msrb.mxu0 %v10741_v41 }
 0xe38   :  { %v14347_v22 = vpop.eup %14346  ;;  %v2244_v23 = vadd.f32 1.0, %v14345_v21  ;;  %v2227_v21 = vpop.f32.mrf.mxu3 }
 0xe39   :  { %v14349_v24 = vpop.eup %14348  ;;  %v2247_v25 = vmul.f32 %v14347_v22, %v2242_v15  ;;  %vm2252_vm15 = vweird.f32 %v14347_v22  ;;  %v2213_v15 = vpop.f32.mrf.mxu2 }
 0xe3a   :  { %v14351_v26 = vpop.eup %14350  ;;  %v2262_v31 = vmul.f32 %v14349_v24, %v2243_v35  ;;  %14352 = vrcp.f32 %v2244_v23  ;;  %vm16002_vm1 = vmor %vm2251_vm0, %vm2252_vm15  ;;  %vm2267_vm2 = vweird.f32 %v14349_v24  ;;  %v2287_v56 = vand.u32 2147483648, %v2244_v23 }
 0xe3b   :  { %v2248_v33 = vsub.f32 1.0, %v2247_v25  ;;  %v2245_v34 = vadd.f32 1.0, %v14351_v26  ;;  %vm16008_vm5 = vmor %vm2266_vm3, %vm2267_vm2  ;;  %v2285_v53 = vand.u32 2147483647, %v2244_v23  ;;  %vm2281_vm10 = vweird.f32 %v2244_v23 }
 0xe3c   :  { %v2263_v36 = vsub.f32 1.0, %v2262_v31  ;;  %v2288_v55 = vor.u32 1.1754944e-38, %v2287_v56  ;;  %v10724_v56 = vld [vmem:[%s19538_s5 + $0x2c8] sm:$0xf] }
 0xe3d   :  { %v2249_v37 = vmul.f32 %v14347_v22, %v2248_v33  ;;  %14354 = vrcp.f32 %v2245_v34  ;;  %v2302_v63 = vand.u32 2147483648, %v2245_v34  ;;  %v2300_v4 = vand.u32 2147483647, %v2245_v34 }
 0xe3e   :  { %v2264_v29 = vmul.f32 %v14349_v24, %v2263_v36  ;;  %vm2286_vm13 = vcmp.eq.f32.partialorder %v2285_v53, 8.507059e+37  ;;  %vm2296_vm14 = vweird.f32 %v2245_v34  ;;  %v10726_v53 = vld [vmem:[%s19538_s5 + $0x2d8] sm:$0xf0] }
 0xe3f   :  { %v2250_v38 = vadd.f32 %v14347_v22, %v2249_v37  ;;  %v2303_v11 = vor.u32 1.1754944e-38, %v2302_v63  ;;  %vm2301_vm0 = vcmp.eq.f32.partialorder %v2300_v4, 8.507059e+37  ;;  %v10702_v63 = vld [vmem:[%s19538_s5 + $0x2b0] sm:$0xf0] }
 0xe40   :  { %v14353_v19 = vpop.eup %14352  ;;  %v2265_v42 = vadd.f32 %v14349_v24, %v2264_v29  ;;  %v10732_v29 = vld [vmem:[%s19538_s5 + $0x2e0] sm:$0xf] }
 0xe41   :  { %v2277_v40 = vmul.f32 %v14353_v19, %v2244_v23  ;;  %v2254_v46 = vsel %vm16002_vm1, %v14347_v22, %v2250_v38  ;;  %vm2282_vm6 = vweird.f32 %v14353_v19  ;;  %v13681_v38 = vld [vmem:[%s19538_s5 + $0x2e4] sm:$0xf] }
 0xe42   :  { %v2259_v47 = vsel %vm2256_vm4, %v2258_v30, %v2254_v46  ;;  %v2269_v59 = vsel %vm16008_vm5, %v14349_v24, %v2265_v42  ;;  %vm2283_vm11 = vmor %vm2281_vm10, %vm2282_vm6  ;;  %v13682_v42 = vld [vmem:[%s19538_s5 + $0x2ec] sm:$0xf]  ;;  %v13679_v46 = vld [vmem:[%s19538_s5 + $0x2cc] sm:$0xf0] }
 0xe43   :  { %v14355_v45 = vpop.eup %14354  ;;  %v2278_v52 = vsub.f32 1.0, %v2277_v40  ;;  %v2306_v7 = vmul.f32 %v2259_v47, %v15972_v5  ;;  %v2274_v8 = vsel %vm2271_vm9, %v2273_v61, %v2269_v59  ;;  %v10718_v30 = vld [vmem:[%s19538_s5 + $0x2d0] sm:$0xf0]  ;;  %v10700_v59 = vld [vmem:[%s19538_s5 + $0x2a0] sm:$0xf] }
 0xe44   :  { %v2292_v20 = vmul.f32 %v14355_v45, %v2245_v34  ;;  %vm2297_vm12 = vweird.f32 %v14355_v45  ;;  %v2307_v51 = vmul.f32 %v2274_v8, %v15974_v6  ;;  %v10721_v1 = vor.u32 %v13677_v48, %v10718_v30  ;;  %v13673_v61 = vld [vmem:[%s19538_s5 + $0x2a4] sm:$0xf]  ;;  %v13674_v8 = vld [vmem:[%s19538_s5 + $0x2ac] sm:$0xf]  ;;  %v13659_v48 = vld [vmem:[%s19538_s5 + $0x22c] sm:$0xf0] }
 0xe45   :  { %v2279_v58 = vmul.f32 %v14353_v19, %v2278_v52  ;;  %vm2298_vm15 = vmor %vm2296_vm14, %vm2297_vm12  ;;  %v2310_v16 = vmul.f32 %v2306_v7, %v2211_v44  ;;  %v10745_v44 = vor.u32 %v13682_v42, %v10742_v43  ;;  %v10705_v4 = vor.u32 %v13673_v61, %v10702_v63  ;;  %v13662_v43 = vld [vmem:[%s19538_s5 + $0x24c] sm:$0xf]  ;;  %v13655_v61 = vld [vmem:[%s19538_s5 + $0x20c] sm:$0xf0] }
 0xe46   :  { %v2293_v60 = vsub.f32 1.0, %v2292_v20  ;;  %v2311_v22 = vmul.f32 %v2307_v51, %v2225_v57  ;;  %v13680_v20 = vld [vmem:[%s19538_s5 + $0x2d4] sm:$0xf0] }
 0xe47   :  { %v2280_v62 = vadd.f32 %v14353_v19, %v2279_v58  ;;  %2750 = vmatpush.bf16.msrb.mxu1 %v10745_v44  ;;  %v10725_v57 = vor.u32 %v13680_v20, %v10724_v56  ;;  %v13678_v58 = vld [vmem:[%s19538_s5 + $0x2cc] sm:$0xf]  ;;  %v10662_v44 = vld [vmem:[%s19538_s5 + $0x258] sm:$0xf0]  ;;  %v10638_v56 = vld [vmem:[%s19538_s5 + $0x230] sm:$0xf0] }
 0xe48   :  { %v2294_v3 = vmul.f32 %v14355_v45, %v2293_v60  ;;  %v10729_v47 = vor.u32 %v13678_v58, %v10726_v53  ;;  %v13675_v60 = vld [vmem:[%s19538_s5 + $0x2ac] sm:$0xf0]  ;;  %v10644_v20 = vld [vmem:[%s19538_s5 + $0x228] sm:$0xf]  ;;  %v13658_v53 = vld [vmem:[%s19538_s5 + $0x22c] sm:$0xf] }
 0xe49   :  { %v2284_v49 = vsel %vm2283_vm11, %v14353_v19, %v2280_v62  ;;  %2737 = vmatpush.bf16.msrb.mxu0 %v10725_v57  ;;  %v10701_v62 = vor.u32 %v13675_v60, %v10700_v59  ;;  %v10620_v60 = vld [vmem:[%s19538_s5 + $0x200] sm:$0xf] }
 0xe4a   :  { %v2289_v0 = vsel %vm2286_vm13, %v2288_v55, %v2284_v49  ;;  %v2295_v50 = vadd.f32 %v14355_v45, %v2294_v3  ;;  %v10708_v55 = vld [vmem:[%s19538_s5 + $0x2a8] sm:$0xf]  ;;  %v13676_v3 = vld [vmem:[%s19538_s5 + $0x2b4] sm:$0xf0]  ;;  %v10710_v49 = vld [vmem:[%s19538_s5 + $0x2b8] sm:$0xf0] }
 0xe4b   :  { %v2308_v9 = vmul.f32 %v2289_v0, %v15990_v10  ;;  %2751 = vmatpush.bf16.msrb.mxu1 %v10729_v47  ;;  %v10709_v7 = vor.u32 %v13676_v3, %v10708_v55  ;;  %v10713_v0 = vor.u32 %v13674_v8, %v10710_v49  ;;  %v10646_v47 = vld [vmem:[%s19538_s5 + $0x238] sm:$0xf0]  ;;  %v10621_v55 = vor.u32 %v13655_v61, %v10620_v60  ;;  %v10622_v3 = vld [vmem:[%s19538_s5 + $0x210] sm:$0xf0] }
 0xe4c   :  { %v2299_v14 = vsel %vm2298_vm15, %v14355_v45, %v2295_v50  ;;  %v10716_v45 = vld [vmem:[%s19538_s5 + $0x2c0] sm:$0xf]  ;;  %v10649_v59 = vor.u32 %v13658_v53, %v10646_v47 }
 0xe4d   :  { %v2304_v17 = vsel %vm2301_vm0, %v2303_v11, %v2299_v14  ;;  %v2312_v18 = vmul.f32 %v2308_v9, %v2213_v15  ;;  %v10717_v52 = vor.u32 %v13679_v46, %v10716_v45  ;;  %2738 = vmatpush.bf16.msrb.mxu0 %v10709_v7  ;;  %v10684_v50 = vld [vmem:[%s19538_s5 + $0x280] sm:$0xf]  ;;  %v13671_v9 = vld [vmem:[%s19538_s5 + $0x28c] sm:$0xf0]  ;;  %v13669_v11 = vld [vmem:[%s19538_s5 + $0x284] sm:$0xf]  ;;  %v10665_v45 = vor.u32 %v13662_v43, %v10662_v44 }
 0xe4e   :  { %v2309_v5 = vmul.f32 %v2304_v17, %v15992_v2  ;;  %v10685_v51 = vor.u32 %v13671_v9, %v10684_v50  ;;  %v10686_v14 = vld [vmem:[%s19538_s5 + $0x290] sm:$0xf0]  ;;  %v10692_v15 = vld [vmem:[%s19538_s5 + $0x288] sm:$0xf]  ;;  %v10636_v46 = vld [vmem:[%s19538_s5 + $0x220] sm:$0xf] }
 0xe4f   :  { %v2314_v35 = vpack.c.bf16 %v2312_v18, %v2310_v16  ;;  %2752 = vmatpush.bf16.msrb.mxu1 %v10713_v0  ;;  %v13672_v16 = vld [vmem:[%s19538_s5 + $0x294] sm:$0xf0]  ;;  %v10689_v17 = vor.u32 %v13669_v11, %v10686_v14  ;;  %v10637_v30 = vor.u32 %v13659_v48, %v10636_v46  ;;  %v13654_v50 = vld [vmem:[%s19538_s5 + $0x20c] sm:$0xf]  ;;  %v10630_v9 = vld [vmem:[%s19538_s5 + $0x218] sm:$0xf0] }
 0xe50   :  { %v2313_v23 = vmul.f32 %v2309_v5, %v2227_v21  ;;  %v10693_v18 = vor.u32 %v13672_v16, %v10692_v15  ;;  %v13670_v5 = vld [vmem:[%s19538_s5 + $0x28c] sm:$0xf]  ;;  %v13656_v7 = vld [vmem:[%s19538_s5 + $0x214] sm:$0xf0]  ;;  %v10633_v11 = vor.u32 %v13654_v50, %v10630_v9  ;;  %v14700_v46 = vld [vmem:[%s19540_s1] sm:$0xff] }
 0xe51   :  { %2453 = vmatmul.bf16.vlgmr.msra.gmra.mxu0 %v2314_v35  ;;  %v10694_v35 = vld [vmem:[%s19538_s5 + $0x298] sm:$0xf0] }
 0xe52   :  { %v2315_v24 = vpack.c.bf16 %v2313_v23, %v2311_v22  ;;  %v10697_v21 = vor.u32 %v13670_v5, %v10694_v35  ;;  %2739 = vmatpush.bf16.msrb.mxu0 %v10693_v18  ;;  %v10668_v22 = vld [vmem:[%s19538_s5 + $0x260] sm:$0xf]  ;;  %v13667_v23 = vld [vmem:[%s19538_s5 + $0x26c] sm:$0xf0] }
 0xe54   :  { %2467 = vmatmul.bf16.vlgmr.msra.gmra.mxu1 %v2315_v24  ;;  %v13665_v24 = vld [vmem:[%s19538_s5 + $0x264] sm:$0xf] }
 0xe55   :  { %2753 = vmatpush.bf16.msrb.mxu1 %v10697_v21 }
 0xece   :  { %v2454_v10 = vpop.f32.mrf.mxu0 }
 0xed1   :  { %v2468_v25 = vpop.f32.mrf.mxu1 }
 0xed2   :  { %v2469_v26 = vadd.f32 %v2468_v25, %v2454_v10  ;;  %v10669_v10 = vor.u32 %v13667_v23, %v10668_v22  ;;  %v10670_v25 = vld [vmem:[%s19538_s5 + $0x270] sm:$0xf0] }
 0xed4   :  { %v16019_v6 = vadd.f32 %v2469_v26, %v15734_v27  ;;  %v13683_v27 = vld [vmem:[%s19538_s5 + $0x2ec] sm:$0xf0]  ;;  %v10676_v26 = vld [vmem:[%s19538_s5 + $0x268] sm:$0xf] }
 0xed5   :  { %v10733_v19 = vor.u32 %v13683_v27, %v10732_v29  ;;  %v10652_v27 = vld [vmem:[%s19538_s5 + $0x240] sm:$0xf] }
 0xed6   :  { %v2477_v31 = vmul.f32 %v16019_v6, %v16019_v6  ;;  %v2456_v33 = vpop.f32.mrf.mxu0 }
 0xed7   :  { %2708 = vmatpush.bf16.msra.mxu2 %v10733_v19  ;;  %v13661_v19 = vld [vmem:[%s19538_s5 + $0x244] sm:$0xf] }
 0xed8   :  { %2479 = vadd.xlane.f32.xlu1 %v2477_v31  ;;  %v13668_v31 = vld [vmem:[%s19538_s5 + $0x274] sm:$0xf0]  ;;  %v10657_v41 = vor.u32 %v13661_v19, %v10654_v12 }
 0xed9   :  { %v2470_v34 = vpop.f32.mrf.mxu1 }
 0xeda   :  { %v2471_v2 = vadd.f32 %v2470_v34, %v2456_v33  ;;  %v10673_v33 = vor.u32 %v13665_v24, %v10670_v25  ;;  %v10677_v34 = vor.u32 %v13668_v31, %v10676_v26 }
 0xedb   :  { %2709 = vmatpush.bf16.msra.mxu2 %v10717_v52  ;;  %v13657_v52 = vld [vmem:[%s19538_s5 + $0x224] sm:$0xf] }
 0xedc   :  { %v16024_v36 = vadd.f32 %v2471_v2, %v15739_v54  ;;  %v10734_v54 = vld [vmem:[%s19538_s5 + $0x2f0] sm:$0xf0]  ;;  %v13666_v2 = vld [vmem:[%s19538_s5 + $0x26c] sm:$0xf]  ;;  %2740 = vmatpush.bf16.msrb.mxu0 %v10677_v34  ;;  %v10641_v57 = vor.u32 %v13657_v52, %v10638_v56  ;;  %v14701_v52 = vld [vmem:[%s19539_s2] sm:$0xff] }
 0xedd   :  { %v10737_v40 = vor.u32 %v13681_v38, %v10734_v54  ;;  %v13663_v38 = vld [vmem:[%s19538_s5 + $0x24c] sm:$0xf0] }
 0xede   :  { %v2478_v37 = vmul.f32 %v16024_v36, %v16024_v36  ;;  %v10653_v54 = vor.u32 %v13663_v38, %v10652_v27 }
 0xedf   :  { %2722 = vmatpush.bf16.msra.mxu3 %v10737_v40  ;;  %2710 = vmatpush.bf16.msra.mxu2 %v10701_v62  ;;  %v13664_v40 = vld [vmem:[%s19538_s5 + $0x254] sm:$0xf0]  ;;  %v13653_v62 = vld [vmem:[%s19538_s5 + $0x204] sm:$0xf] }
 0xee0   :  { %2481 = vadd.xlane.f32.xlu0 %v2478_v37  ;;  %v10678_v37 = vld [vmem:[%s19538_s5 + $0x278] sm:$0xf0]  ;;  %v10661_v42 = vor.u32 %v13664_v40, %v10660_v39  ;;  %v10625_v49 = vor.u32 %v13653_v62, %v10622_v3 }
 0xee1   :  { %v10681_v29 = vor.u32 %v13666_v2, %v10678_v37  ;;  %v14230_v2 = vld [vmem:[%s19537_s4 + $0x2] ss:$0 sm:$0xff] }
 0xee2   :  { %2741 = vmatpush.bf16.msrb.mxu0 %v10661_v42 }
 0xee3   :  { %2723 = vmatpush.bf16.msra.mxu3 %v10721_v1  ;;  %2711 = vmatpush.bf16.msra.mxu2 %v10685_v51  ;;  %v13660_v1 = vld [vmem:[%s19538_s5 + $0x234] sm:$0xf0] }
 0xee4   :  { %2754 = vmatpush.bf16.msrb.mxu1 %v10681_v29  ;;  %v10645_v58 = vor.u32 %v13660_v1, %v10644_v20  ;;  %v14702_v1 = vld [vmem:[%s19540_s1 + $0x8] sm:$0xff] }
 0xee6   :  { %2742 = vmatpush.bf16.msrb.mxu0 %v10645_v58  ;;  %v14703_v58 = vld [vmem:[%s19539_s2 + $0x8] sm:$0xff] }
 0xee7   :  { %2724 = vmatpush.bf16.msra.mxu3 %v10705_v4  ;;  %2712 = vmatpush.bf16.msra.mxu2 %v10669_v10  ;;  %v10628_v4 = vld [vmem:[%s19538_s5 + $0x208] sm:$0xf] }
 0xee8   :  { %2755 = vmatpush.bf16.msrb.mxu1 %v10665_v45  ;;  %v10629_v0 = vor.u32 %v13656_v7, %v10628_v4 }
 0xeea   :  { %2743 = vmatpush.bf16.msrb.mxu0 %v10629_v0 }
 0xeeb   :  { %2725 = vmatpush.bf16.msra.mxu3 %v10689_v17  ;;  %2713 = vmatpush.bf16.msra.mxu2 %v10653_v54 }
 0xeec   :  { %2756 = vmatpush.bf16.msrb.mxu1 %v10649_v59 }
 0xeef   :  { %2726 = vmatpush.bf16.msra.mxu3 %v10673_v33  ;;  %2714 = vmatpush.bf16.msra.mxu2 %v10637_v30 }
 0xef0   :  { %2757 = vmatpush.bf16.msrb.mxu1 %v10633_v11 }
 0xef3   :  { %2727 = vmatpush.bf16.msra.mxu3 %v10657_v41  ;;  %2715 = vmatpush.bf16.msra.mxu2 %v10621_v55 }
 0xef7   :  { %2728 = vmatpush.bf16.msra.mxu3 %v10641_v57 }
 0xefb   :  { %2729 = vmatpush.bf16.msra.mxu3 %v10625_v49 }
 0xf4b   :  { %v2480_v63 = vpop.xlane.xlu1 %2479 }
 0xf4c   :  { %v2483_v8 = vmul.f32 %v2480_v63, %v14995_v32 }
 0xf4e   :  { %v2485_v51 = vadd.f32 1e-05, %v2483_v8 }
 0xf50   :  { %14356 = vrsqrt.f32 %v2485_v51  ;;  %vm2493_vm2 = vweird.f32 %v2485_v51 }
 0xf53   :  { %v2482_v14 = vpop.xlane.xlu0 %2481 }
 0xf54   :  { %v2484_v15 = vmul.f32 %v2482_v14, %v14995_v32 }
 0xf56   :  { %v14357_v16 = vpop.eup %14356  ;;  %v2486_v17 = vadd.f32 1e-05, %v2484_v15 }
 0xf57   :  { %v2488_v18 = vmul.f32 %v14357_v16, %v2485_v51  ;;  %vm2494_vm1 = vweird.f32 %v14357_v16 }
 0xf58   :  { %14358 = vrsqrt.f32 %v2486_v17  ;;  %vm2495_vm3 = vmor %vm2493_vm2, %vm2494_vm1  ;;  %vm2503_vm5 = vweird.f32 %v2486_v17 }
 0xf59   :  { %v2489_v5 = vmul.f32 %v14357_v16, %v2488_v18  ;;  %v14704_v18 = vld [vmem:[%s19541_s3] sm:$0xff] }
 0xf5b   :  { %v2490_v35 = vmul.f32 0.5, %v2489_v5 }
 0xf5d   :  { %v2491_v21 = vsub.f32 1.5, %v2490_v35 }
 0xf5e   :  { %v14359_v22 = vpop.eup %14358 }
 0xf5f   :  { %v2498_v23 = vmul.f32 %v14359_v22, %v2486_v17  ;;  %v2492_v24 = vmul.f32 %v14357_v16, %v2491_v21  ;;  %vm2504_vm4 = vweird.f32 %v14359_v22 }
 0xf60   :  { %vm2505_vm6 = vmor %vm2503_vm5, %vm2504_vm4 }
 0xf61   :  { %v2499_v10 = vmul.f32 %v14359_v22, %v2498_v23  ;;  %v2496_v26 = vsel %vm2495_vm3, %v14357_v16, %v2492_v24 }
 0xf62   :  { %v2507_v34 = vmul.f32 %v2496_v26, %v16019_v6 }
 0xf63   :  { %v2500_v25 = vmul.f32 0.5, %v2499_v10 }
 0xf64   :  { %v2512_v27 = vmul.f32 %v14230_v2, %v2507_v34  ;;  %v14707_v34 = vld [vmem:[%s19541_s3 + $0x18] sm:$0xff] }
 0xf65   :  { %v2501_v31 = vsub.f32 1.5, %v2500_v25  ;;  %v14706_v25 = vld [vmem:[%s19541_s3 + $0x10] sm:$0xff] }
 0xf67   :  { %v2502_v33 = vmul.f32 %v14359_v22, %v2501_v31 }
 0xf69   :  { %v2506_v37 = vsel %vm2505_vm6, %v14359_v22, %v2502_v33  ;;  %v14705_v22 = vld [vmem:[%s19541_s3 + $0x8] sm:$0xff] }
 0xf6a   :  { %v2508_v29 = vmul.f32 %v2506_v37, %v16024_v36 }
 0xf6c   :  { %v2513_v38 = vmul.f32 %v14230_v2, %v2508_v29 }
 0xf6e   :  { %v2514_v19 = vpack.c.bf16 %v2513_v38, %v2512_v27 }
 0xf70   :  { %2716 = vmatmul.bf16.vlgmr.msra.gmra.mxu2 %v2514_v19  ;;  %2730 = vmatmul.bf16.vlgmr.msra.gmra.mxu3 %v2514_v19 }
 0xf71   :  { %2744 = vmatmul.bf16.vlgmr.msrb.gmra.mxu0 %v2514_v19  ;;  %2758 = vmatmul.bf16.vlgmr.msrb.gmra.mxu1 %v2514_v19 }
 0xfee   :  { %v2745_v54 = vpop.f32.mrf.mxu0  ;;  %v2759_v12 = vpop.f32.mrf.mxu1 }
 0xfef   :  { %v2772_v39 = vmul.f32 %v2745_v54, %v15036_v13  ;;  %v2770_v63 = vmul.f32 %v14700_v46, %v2745_v54 }
 0xff1   :  { %2776 = vrot.lane.b32.xlu2 %v2772_v39, %s14749_s21 }
 0xff3   :  { %v2717_v40 = vpop.f32.mrf.mxu2  ;;  %v2731_v41 = vpop.f32.mrf.mxu3 }
 0xff4   :  { %v2764_v48 = vmul.f32 %v14700_v46, %v2717_v40  ;;  %v2766_v30 = vmul.f32 %v14701_v52, %v2731_v41 }
 0xff6   :  { %v2747_v42 = vpop.f32.mrf.mxu0  ;;  %v2761_v43 = vpop.f32.mrf.mxu1  ;;  %v2768_v47 = vadd.f32 %v2766_v30, %v2764_v48 }
 0xff7   :  { %v2773_v44 = vmul.f32 %v2747_v42, %v15048_v28  ;;  %v16230_v45 = vpack.c.bf16 %v2761_v43, %v2759_v12  ;;  %v2771_v55 = vmul.f32 %v14702_v1, %v2747_v42 }
 0xff9   :  { %2883 = vmatpush.bf16.msrb.mxu3 %v16230_v45  ;;  %2778 = vrot.lane.b32.xlu1 %v2773_v44, %s14749_s21 }
 0xffb   :  { %v2719_v56 = vpop.f32.mrf.mxu2  ;;  %v2733_v20 = vpop.f32.mrf.mxu3 }
 0xffc   :  { %v2765_v57 = vmul.f32 %v14702_v1, %v2719_v56  ;;  %v2767_v53 = vmul.f32 %v14703_v58, %v2733_v20 }
 0xffe   :  { %v2769_v59 = vadd.f32 %v2767_v53, %v2765_v57 }
0x1000   :  { %v14196_v60 = vpack.i.bf16 %v2769_v59, %v2768_v47  ;;  %v2792_v61 = vpack.c.bf16 %v2769_v59, %v2768_v47 }
0x1002   :  { %14197 = vrot.lane.b32.xlu0 %v14196_v60, %s14750_s29 }
0x104b   :  { %v2777_v62 = vpop.permute.xlu2 %2776 }
0x104c   :  { %v2782_v4 = vadd.f32 %v2777_v62, %v2770_v63 }
0x106b   :  { %v2779_v3 = vpop.permute.xlu1 %2778 }
0x106c   :  { %v2783_v7 = vadd.f32 %v2779_v3, %v2771_v55 }
0x106e   :  { %v2794_v8 = vpack.c.bf16 %v2783_v7, %v2782_v4 }
0x1070   :  { %2971 = vrot.lane.b32.xlu2 %v2794_v8, %s14750_s29  ;;  %v2802_v49 = vsel %vm379_vm7, %v2794_v8, 0 }
0x1071   :  { %2811 = vmatpush.bf16.xpose.msrb.mxu2 %v2802_v49 }
0x1074   :  { %v14198_v0 = vpop.permute.xlu0 %14197 }
0x1075   :  { %v14200_v50 = vunpack.i.h.bf16 %v14198_v0  ;;  %v14199_v9 = vunpack.i.l.bf16 %v14198_v0 }
0x1077   :  { %v2793_v11 = vpack.c.bf16 %v14200_v50, %v14199_v9 }
0x1078   :  { %2966 = vrot.lane.b32.xlu2 %v2792_v61, %s14749_s21  ;;  %10746 = vmatmul.msk.bf16.vlgmr.msrb.gmra.mxu2 %vm379_vm7, %v2792_v61 }
0x1080   :  { %2968 = vrot.lane.b32.xlu2 %v2793_v11, %s14749_s21 }
0x1088   :  { %10747 = vmatmul.msk.bf16.gmra.mxu2 %vm379_vm7, %v2793_v11 }
0x10ca   :  { %v2972_v51 = vpop.permute.xlu2 %2971 }
0x10cb   :  { %v2980_v14 = vsel %vm379_vm7, %v2972_v51, 0 }
0x10cc   :  { %2989 = vmatpush.bf16.xpose.msra.mxu2 %v2980_v14 }
0x10d2   :  { %v2967_v15 = vpop.permute.xlu2 %2966 }
0x10d3   :  { %10776 = vmatmul.msk.bf16.vlgmr.msra.gmra.mxu2 %vm379_vm7, %v2967_v15 }
0x10da   :  { %v2969_v16 = vpop.permute.xlu2 %2968 }
0x10e3   :  { %10777 = vmatmul.msk.bf16.gmra.mxu2 %vm379_vm7, %v2969_v16 }
0x10fb   :  { %v2813_v17 = vpop.f32.mrf.mxu2 }
0x10fc   :  { %v2814_v5 = vadd.f32 %v14704_v18, %v2813_v17 }
0x10fe   :  { %v2823_v35 = vsel %vm408_vm8, %v2814_v5, -inf }
0x10ff   :  { %2824 = vmax.xlane.f32.xlu0 %v2823_v35 }
0x1103   :  { %v2815_v21 = vpop.f32.mrf.mxu2 }
0x1104   :  { %v2816_v23 = vadd.f32 %v14705_v22, %v2815_v21 }
0x1106   :  { %v2826_v24 = vsel %vm408_vm8, %v2816_v23, -inf }
0x1107   :  { %2827 = vmax.xlane.f32.xlu1 %v2826_v24 }
0x110b   :  { %v2818_v10 = vpop.f32.mrf.mxu2 }
0x110c   :  { %v2819_v26 = vadd.f32 %v14706_v25, %v2818_v10 }
0x110e   :  { %v2829_v31 = vsel %vm408_vm8, %v2819_v26, -inf }
0x110f   :  { %2830 = vmax.xlane.f32.xlu2 %v2829_v31 }
0x1113   :  { %v2820_v33 = vpop.f32.mrf.mxu2 }
0x1114   :  { %v2821_v2 = vadd.f32 %v14707_v34, %v2820_v33 }
0x1116   :  { %v2832_v37 = vsel %vm408_vm8, %v2821_v2, -inf }
0x1117   :  { %2833 = vmax.xlane.f32.xlu0 %v2832_v37 }
0x1156   :  { %v2991_v29 = vpop.f32.mrf.mxu2 }
0x1157   :  { %v2992_v27 = vadd.f32 %v14704_v18, %v2991_v29 }
0x1159   :  { %v3001_v38 = vsel %vm408_vm8, %v2992_v27, -inf }
0x115a   :  { %3002 = vmax.xlane.f32.xlu1 %v3001_v38 }
0x115e   :  { %v2993_v19 = vpop.f32.mrf.mxu2 }
0x115f   :  { %v2994_v54 = vadd.f32 %v14705_v22, %v2993_v19 }
0x1161   :  { %v3004_v12 = vsel %vm408_vm8, %v2994_v54, -inf }
0x1162   :  { %3005 = vmax.xlane.f32.xlu2 %v3004_v12 }
0x1166   :  { %v2996_v39 = vpop.f32.mrf.mxu2 }
0x1167   :  { %v2997_v40 = vadd.f32 %v14706_v25, %v2996_v39 }
0x1169   :  { %v3007_v41 = vsel %vm408_vm8, %v2997_v40, -inf }
0x116a   :  { %3008 = vmax.xlane.f32.xlu0 %v3007_v41 }
0x116e   :  { %v2998_v42 = vpop.f32.mrf.mxu2 }
0x116f   :  { %v2999_v43 = vadd.f32 %v14707_v34, %v2998_v42 }
0x1171   :  { %v3010_v44 = vsel %vm408_vm8, %v2999_v43, -inf }
0x1172   :  { %3011 = vmax.xlane.f32.xlu1 %v3010_v44  ;;  %v2825_v46 = vpop.xlane.xlu0 %2824 }
0x1173   :  { %v2835_v48 = vsub.f32 %v2814_v5, %v2825_v46 }
0x1175   :  { %v2839_v52 = vmul.f32 1.442695, %v2835_v48 }
0x1177   :  { %14360 = vpow2.f32 %v2839_v52 }
0x117a   :  { %v2828_v30 = vpop.xlane.xlu1 %2827 }
0x117b   :  { %v2836_v56 = vsub.f32 %v2816_v23, %v2828_v30 }
0x117d   :  { %v14361_v20 = vpop.eup %14360  ;;  %v2841_v1 = vmul.f32 1.442695, %v2836_v56 }
0x117e   :  { %v2847_v57 = vsel %vm408_vm8, %v14361_v20, 0.0 }
0x117f   :  { %14362 = vpow2.f32 %v2841_v1  ;;  %2848 = vadd.xlane.f32.xlu2 %v2847_v57 }
0x1182   :  { %v2831_v58 = vpop.xlane.xlu2 %2830 }
0x1183   :  { %v2837_v53 = vsub.f32 %v2819_v26, %v2831_v58 }
0x1185   :  { %v14363_v47 = vpop.eup %14362  ;;  %v2843_v59 = vmul.f32 1.442695, %v2837_v53 }
0x1186   :  { %v2850_v60 = vsel %vm408_vm8, %v14363_v47, 0.0 }
0x1187   :  { %14364 = vpow2.f32 %v2843_v59  ;;  %2851 = vadd.xlane.f32.xlu0 %v2850_v60  ;;  %v13685_v59 = vld [vmem:[%s19542_s6 + $0x80] sm:$0xff]  ;;  %v13688_v60 = vld [vmem:[%s19542_s6 + $0x98] sm:$0xff] }
0x1188   :  { %2927 = vmatpush.bf16.msra.mxu0 %v13688_v60  ;;  %v13715_v60 = vld [vmem:[%s19544_s8 + $0x2ac] sm:$0xf0] }
0x118a   :  { %v2834_v61 = vpop.xlane.xlu0 %2833 }
0x118b   :  { %v2838_v62 = vsub.f32 %v2821_v2, %v2834_v61  ;;  %v13687_v61 = vld [vmem:[%s19542_s6 + $0x90] sm:$0xff] }
0x118c   :  { %2928 = vmatpush.bf16.msra.mxu0 %v13687_v61  ;;  %v13713_v61 = vld [vmem:[%s19544_s8 + $0x2a4] sm:$0xf] }
0x118d   :  { %v14365_v63 = vpop.eup %14364  ;;  %v2845_v55 = vmul.f32 1.442695, %v2838_v62 }
0x118e   :  { %v2853_v3 = vsel %vm408_vm8, %v14365_v63, 0.0 }
0x118f   :  { %14366 = vpow2.f32 %v2845_v55  ;;  %2854 = vadd.xlane.f32.xlu1 %v2853_v3 }
0x1195   :  { %v14367_v4 = vpop.eup %14366 }
0x1196   :  { %v2856_v7 = vsel %vm408_vm8, %v14367_v4, 0.0 }
0x1197   :  { %2857 = vadd.xlane.f32.xlu2 %v2856_v7 }
0x11af   :  { %3048 = vrot.lane.b32.xlu2 %v16230_v45, %s14750_s29 }
0x11cd   :  { %v3003_v8 = vpop.xlane.xlu1 %3002 }
0x11ce   :  { %v3013_v49 = vsub.f32 %v2992_v27, %v3003_v8  ;;  %v13690_v8 = vld [vmem:[%s19542_s6 + $0xa8] sm:$0xff] }
0x11cf   :  { %3102 = vmatpush.bf16.msrb.mxu0 %v13690_v8  ;;  %v13714_v8 = vld [vmem:[%s19544_s8 + $0x2ac] sm:$0xf] }
0x11d0   :  { %v3017_v0 = vmul.f32 1.442695, %v3013_v49  ;;  %v13689_v49 = vld [vmem:[%s19542_s6 + $0xa0] sm:$0xff] }
0x11d2   :  { %14368 = vpow2.f32 %v3017_v0  ;;  %v13692_v0 = vld [vmem:[%s19542_s6 + $0xb8] sm:$0xff] }
0x11d3   :  { %3103 = vmatpush.bf16.msrb.mxu0 %v13689_v49  ;;  %v10931_v49 = vld [vmem:[%s19544_s8 + $0x2b8] sm:$0xf0] }
0x11d5   :  { %v3006_v50 = vpop.xlane.xlu2 %3005 }
0x11d6   :  { %v3014_v9 = vsub.f32 %v2994_v54, %v3006_v50  ;;  %v13691_v50 = vld [vmem:[%s19542_s6 + $0xb0] sm:$0xff] }
0x11d8   :  { %v14369_v11 = vpop.eup %14368  ;;  %v3019_v51 = vmul.f32 1.442695, %v3014_v9 }
0x11d9   :  { %v3025_v14 = vsel %vm408_vm8, %v14369_v11, 0.0 }
0x11da   :  { %14370 = vpow2.f32 %v3019_v51  ;;  %3026 = vadd.xlane.f32.xlu0 %v3025_v14 }
0x11dd   :  { %v3009_v15 = vpop.xlane.xlu0 %3008 }
0x11de   :  { %v3015_v16 = vsub.f32 %v2997_v40, %v3009_v15 }
0x11e0   :  { %v14371_v17 = vpop.eup %14370  ;;  %v3021_v18 = vmul.f32 1.442695, %v3015_v16 }
0x11e1   :  { %v3028_v5 = vsel %vm408_vm8, %v14371_v17, 0.0 }
0x11e2   :  { %14372 = vpow2.f32 %v3021_v18  ;;  %3029 = vadd.xlane.f32.xlu1 %v3028_v5 }
0x11e5   :  { %v3012_v45 = vpop.xlane.xlu1 %3011 }
0x11e6   :  { %v3016_v35 = vsub.f32 %v2999_v43, %v3012_v45 }
0x11e8   :  { %v14373_v21 = vpop.eup %14372  ;;  %v3023_v22 = vmul.f32 1.442695, %v3016_v35 }
0x11e9   :  { %v3031_v23 = vsel %vm408_vm8, %v14373_v21, 0.0 }
0x11ea   :  { %14374 = vpow2.f32 %v3023_v22  ;;  %3032 = vadd.xlane.f32.xlu0 %v3031_v23 }
0x11f0   :  { %v14375_v24 = vpop.eup %14374 }
0x11f1   :  { %v3034_v10 = vsel %vm408_vm8, %v14375_v24, 0.0 }
0x11f2   :  { %3035 = vadd.xlane.f32.xlu1 %v3034_v10  ;;  %v2849_v25 = vpop.xlane.xlu2 %2848 }
0x11f3   :  { %14376 = vrcp.f32 %v2849_v25 }
0x11f9   :  { %v14377_v31 = vpop.eup %14376 }
0x11fa   :  { %v2852_v26 = vpop.xlane.xlu0 %2851  ;;  %v2863_v34 = vmul.f32 %v14377_v31, %v14361_v20  ;;  %v13686_v20 = vld [vmem:[%s19542_s6 + $0x88] sm:$0xff] }
0x11fb   :  { %14378 = vrcp.f32 %v2852_v26  ;;  %2956 = vmatpush.bf16.msra.mxu1 %v13686_v20  ;;  %v13720_v20 = vld [vmem:[%s19544_s8 + $0x2d4] sm:$0xf0] }
0x11ff   :  { %2957 = vmatpush.bf16.msra.mxu1 %v13685_v59  ;;  %v10921_v59 = vld [vmem:[%s19544_s8 + $0x2a0] sm:$0xf] }
0x1201   :  { %v14379_v33 = vpop.eup %14378 }
0x1202   :  { %v2864_v2 = vmul.f32 %v14379_v33, %v14363_v47  ;;  %v2855_v29 = vpop.xlane.xlu1 %2854 }
0x1203   :  { %14380 = vrcp.f32 %v2855_v29  ;;  %3138 = vmatpush.bf16.msrb.mxu1 %v13692_v0  ;;  %v10934_v0 = vor.u32 %v13714_v8, %v10931_v49 }
0x1204   :  { %v2867_v37 = vpack.c.bf16 %v2864_v2, %v2863_v34 }
0x1206   :  { %10748 = vmatmul.msk.bf16.vlgmr.msrb.gmra.mxu3 %vm408_vm8, %v2867_v37 }
0x1207   :  { %3139 = vmatpush.bf16.msrb.mxu1 %v13691_v50  ;;  %v10905_v50 = vld [vmem:[%s19544_s8 + $0x280] sm:$0xf] }
0x1209   :  { %v14381_v38 = vpop.eup %14380 }
0x120a   :  { %v2858_v27 = vpop.xlane.xlu2 %2857  ;;  %v2865_v54 = vmul.f32 %v14381_v38, %v14365_v63  ;;  %v13721_v38 = vld [vmem:[%s19544_s8 + $0x2e4] sm:$0xf] }
0x120b   :  { %14382 = vrcp.f32 %v2858_v27  ;;  %v13723_v27 = vld [vmem:[%s19544_s8 + $0x2ec] sm:$0xf0] }
0x1211   :  { %v14383_v19 = vpop.eup %14382 }
0x1212   :  { %v2866_v12 = vmul.f32 %v14383_v19, %v14367_v4  ;;  %v3049_v39 = vpop.permute.xlu2 %3048 }
0x1213   :  { %3064 = vmatpush.bf16.msra.mxu3 %v3049_v39 }
0x1214   :  { %v2868_v40 = vpack.c.bf16 %v2866_v12, %v2865_v54  ;;  %v10961_v54 = vld [vmem:[%s19544_s8 + $0x2e8] sm:$0xf]  ;;  %v13724_v12 = vld [vmem:[%s19544_s8 + $0x2f4] sm:$0xf0] }
0x1216   :  { %10749 = vmatmul.msk.bf16.gmra.mxu3 %vm408_vm8, %v2868_v40  ;;  %v10962_v40 = vor.u32 %v13724_v12, %v10961_v54  ;;  %v10875_v54 = vld [vmem:[%s19544_s8 + $0x250] sm:$0xf0]  ;;  %v10881_v12 = vld [vmem:[%s19544_s8 + $0x248] sm:$0xf] }
0x124d   :  { %v3027_v41 = vpop.xlane.xlu0 %3026 }
0x124e   :  { %14384 = vrcp.f32 %v3027_v41  ;;  %v13722_v41 = vld [vmem:[%s19544_s8 + $0x2ec] sm:$0xf] }
0x1254   :  { %v14385_v43 = vpop.eup %14384 }
0x1255   :  { %v3030_v42 = vpop.xlane.xlu1 %3029  ;;  %v3041_v46 = vmul.f32 %v14385_v43, %v14369_v11 }
0x1256   :  { %14386 = vrcp.f32 %v3030_v42  ;;  %v10963_v42 = vld [vmem:[%s19544_s8 + $0x2f8] sm:$0xf0] }
0x1257   :  { %v10966_v43 = vor.u32 %v13722_v41, %v10963_v42  ;;  %v13702_v42 = vld [vmem:[%s19544_s8 + $0x24c] sm:$0xf] }
0x125c   :  { %v14387_v44 = vpop.eup %14386 }
0x125d   :  { %v3042_v48 = vmul.f32 %v14387_v44, %v14371_v17  ;;  %v3033_v30 = vpop.xlane.xlu0 %3032  ;;  %v10937_v44 = vld [vmem:[%s19544_s8 + $0x2c0] sm:$0xf] }
0x125e   :  { %14388 = vrcp.f32 %v3033_v30  ;;  %v10939_v30 = vld [vmem:[%s19544_s8 + $0x2d0] sm:$0xf0] }
0x125f   :  { %v3045_v52 = vpack.c.bf16 %v3042_v48, %v3041_v46  ;;  %v13719_v46 = vld [vmem:[%s19544_s8 + $0x2cc] sm:$0xf0]  ;;  %v13717_v48 = vld [vmem:[%s19544_s8 + $0x2c4] sm:$0xf] }
0x1261   :  { %10778 = vmatmul.msk.bf16.vlgmr.msra.gmra.mxu3 %vm408_vm8, %v3045_v52  ;;  %v10938_v52 = vor.u32 %v13719_v46, %v10937_v44  ;;  %v10857_v46 = vld [vmem:[%s19544_s8 + $0x220] sm:$0xf] }
0x1264   :  { %v14389_v1 = vpop.eup %14388 }
0x1265   :  { %v3036_v56 = vpop.xlane.xlu1 %3035  ;;  %v3043_v58 = vmul.f32 %v14389_v1, %v14373_v21  ;;  %v10942_v1 = vor.u32 %v13717_v48, %v10939_v30  ;;  %v13699_v48 = vld [vmem:[%s19544_s8 + $0x22c] sm:$0xf0] }
0x1266   :  { %14390 = vrcp.f32 %v3036_v56  ;;  %v10945_v56 = vld [vmem:[%s19544_s8 + $0x2c8] sm:$0xf]  ;;  %v10858_v30 = vor.u32 %v13699_v48, %v10857_v46  ;;  %v13736_v46 = vld [vmem:[%s19545_s9 + $0x158] sm:$0xff] }
0x126c   :  { %v14391_v57 = vpop.eup %14390 }
0x126d   :  { %v3044_v53 = vmul.f32 %v14391_v57, %v14375_v24  ;;  %v10946_v57 = vor.u32 %v13720_v20, %v10945_v56  ;;  %v10859_v56 = vld [vmem:[%s19544_s8 + $0x230] sm:$0xf0]  ;;  %v10865_v20 = vld [vmem:[%s19544_s8 + $0x228] sm:$0xf] }
0x126f   :  { %v3046_v47 = vpack.c.bf16 %v3044_v53, %v3043_v58  ;;  %v13718_v58 = vld [vmem:[%s19544_s8 + $0x2cc] sm:$0xf]  ;;  %v10947_v53 = vld [vmem:[%s19544_s8 + $0x2d8] sm:$0xf0] }
0x1271   :  { %10779 = vmatmul.msk.bf16.gmra.mxu3 %vm408_vm8, %v3046_v47  ;;  %v10950_v47 = vor.u32 %v13718_v58, %v10947_v53  ;;  %v13698_v53 = vld [vmem:[%s19544_s8 + $0x22c] sm:$0xf] }
0x1289   :  { %v2885_v62 = vpop.f32.mrf.mxu3 }
0x1291   :  { %v2887_v63 = vpop.f32.mrf.mxu3 }
0x1292   :  { %v2895_v55 = vpack.c.bf16 %v2887_v63, %v2885_v62  ;;  %v10922_v62 = vor.u32 %v13715_v60, %v10921_v59  ;;  %v10923_v63 = vld [vmem:[%s19544_s8 + $0x2b0] sm:$0xf0]  ;;  %v10841_v60 = vld [vmem:[%s19544_s8 + $0x200] sm:$0xf] }
0x1294   :  { %10775 = vmatmul.msk.bf16.vlgmr.msra.gmra.mxu1 %vm379_vm7, %v2895_v55  ;;  %v10929_v55 = vld [vmem:[%s19544_s8 + $0x2a8] sm:$0xf] }
0x1295   :  { %3425 = vmatpush.bf16.msra.mxu1 %v10966_v43  ;;  %v10883_v43 = vld [vmem:[%s19544_s8 + $0x258] sm:$0xf0] }
0x1296   :  { %v10886_v44 = vor.u32 %v13702_v42, %v10883_v43  ;;  %v13729_v42 = vld [vmem:[%s19545_s9 + $0x120] sm:$0xff] }
0x1297   :  { %v13737_v43 = vld [vmem:[%s19545_s9 + $0x160] sm:$0xff] }
0x1299   :  { %v2890_v3 = vpop.f32.mrf.mxu3  ;;  %3426 = vmatpush.bf16.msra.mxu1 %v10950_v47  ;;  %v10867_v47 = vld [vmem:[%s19544_s8 + $0x238] sm:$0xf0] }
0x129a   :  { %v10870_v59 = vor.u32 %v13698_v53, %v10867_v47 }
0x129d   :  { %3427 = vmatpush.bf16.msra.mxu1 %v10934_v0 }
0x12a1   :  { %v2892_v4 = vpop.f32.mrf.mxu3 }
0x12a2   :  { %v2901_v7 = vpack.c.bf16 %v2892_v4, %v2890_v3  ;;  %v13716_v3 = vld [vmem:[%s19544_s8 + $0x2b4] sm:$0xf0]  ;;  %v10926_v4 = vor.u32 %v13713_v61, %v10923_v63  ;;  %v13695_v61 = vld [vmem:[%s19544_s8 + $0x20c] sm:$0xf0] }
0x12a4   :  { %10766 = vmatmul.msk.bf16.vlgmr.msra.gmra.mxu0 %vm379_vm7, %v2901_v7  ;;  %v10930_v7 = vor.u32 %v13716_v3, %v10929_v55  ;;  %v10842_v55 = vor.u32 %v13695_v61, %v10841_v60  ;;  %v10843_v3 = vld [vmem:[%s19544_s8 + $0x210] sm:$0xf0] }
0x12a5   :  { %3411 = vmatpush.bf16.msra.mxu0 %v10962_v40 }
0x12a9   :  { %3412 = vmatpush.bf16.msra.mxu0 %v10946_v57 }
0x12ad   :  { %3413 = vmatpush.bf16.msra.mxu0 %v10930_v7  ;;  %v13696_v7 = vld [vmem:[%s19544_s8 + $0x214] sm:$0xf0] }
0x12e4   :  { %v3066_v9 = vpop.f32.mrf.mxu3 }
0x12ec   :  { %v3068_v11 = vpop.f32.mrf.mxu3 }
0x12ed   :  { %v3076_v51 = vpack.c.bf16 %v3068_v11, %v3066_v9  ;;  %v13711_v9 = vld [vmem:[%s19544_s8 + $0x28c] sm:$0xf0]  ;;  %v13709_v11 = vld [vmem:[%s19544_s8 + $0x284] sm:$0xf] }
0x12ef   :  { %10792 = vmatmul.msk.bf16.vlgmr.msrb.gmra.mxu0 %vm379_vm7, %v3076_v51  ;;  %v10906_v51 = vor.u32 %v13711_v9, %v10905_v50  ;;  %v13694_v50 = vld [vmem:[%s19544_s8 + $0x20c] sm:$0xf]  ;;  %v10851_v9 = vld [vmem:[%s19544_s8 + $0x218] sm:$0xf0] }
0x12f4   :  { %v3071_v14 = vpop.f32.mrf.mxu3 }
0x12fc   :  { %v3073_v15 = vpop.f32.mrf.mxu3 }
0x12fd   :  { %v3112_v16 = vpack.c.bf16 %v3073_v15, %v3071_v14  ;;  %v10907_v14 = vld [vmem:[%s19544_s8 + $0x290] sm:$0xf0]  ;;  %v10913_v15 = vld [vmem:[%s19544_s8 + $0x288] sm:$0xf] }
0x12ff   :  { %10805 = vmatmul.msk.bf16.vlgmr.msrb.gmra.mxu1 %vm379_vm7, %v3112_v16  ;;  %v13712_v16 = vld [vmem:[%s19544_s8 + $0x294] sm:$0xf0] }
0x1311   :  { %v2959_v18 = vpop.f32.mrf.mxu1 }
0x1319   :  { %v2961_v45 = vpop.f32.mrf.mxu1 }
0x1321   :  { %v2930_v17 = vpop.f32.mrf.mxu0 }
0x1322   :  { %v2960_v21 = vadd.f32 %v2959_v18, %v2930_v17  ;;  %v10910_v17 = vor.u32 %v13709_v11, %v10907_v14  ;;  %v10914_v18 = vor.u32 %v13712_v16, %v10913_v15  ;;  %v10854_v11 = vor.u32 %v13694_v50, %v10851_v9 }
0x1324   :  { %3414 = vmatpush.bf16.msra.mxu0 %v10914_v18 }
0x1329   :  { %v2932_v5 = vpop.f32.mrf.mxu0 }
0x132a   :  { %v2962_v26 = vadd.f32 %v2961_v45, %v2932_v5  ;;  %v13710_v5 = vld [vmem:[%s19544_s8 + $0x28c] sm:$0xf]  ;;  %v10915_v45 = vld [vmem:[%s19544_s8 + $0x298] sm:$0xf0] }
0x136c   :  { %v3105_v35 = vpop.f32.mrf.mxu0 }
0x136d   :  { %v3110_v22 = vadd.f32 %v3105_v35, %v2960_v21  ;;  %v10918_v35 = vor.u32 %v13710_v5, %v10915_v45  ;;  %v10889_v21 = vld [vmem:[%s19544_s8 + $0x260] sm:$0xf] }
0x136f   :  { %3428 = vmatpush.bf16.msra.mxu1 %v10918_v35 }
0x1374   :  { %v3107_v25 = vpop.f32.mrf.mxu0 }
0x1375   :  { %v3111_v33 = vadd.f32 %v3107_v25, %v2962_v26  ;;  %v10891_v25 = vld [vmem:[%s19544_s8 + $0x270] sm:$0xf0]  ;;  %v10897_v26 = vld [vmem:[%s19544_s8 + $0x268] sm:$0xf] }
0x137c   :  { %v3141_v23 = vpop.f32.mrf.mxu1 }
0x137d   :  { %v3146_v24 = vadd.f32 %v3141_v23, %v3110_v22  ;;  %v13707_v22 = vld [vmem:[%s19544_s8 + $0x26c] sm:$0xf0]  ;;  %v13705_v23 = vld [vmem:[%s19544_s8 + $0x264] sm:$0xf] }
0x137f   :  { %v16319_v10 = vadd.f32 %v3146_v24, %v16019_v6  ;;  %v10953_v6 = vld [vmem:[%s19544_s8 + $0x2e0] sm:$0xf]  ;;  %v10890_v24 = vor.u32 %v13707_v22, %v10889_v21 }
0x1380   :  { %v10954_v19 = vor.u32 %v13723_v27, %v10953_v6  ;;  %v10873_v27 = vld [vmem:[%s19544_s8 + $0x240] sm:$0xf] }
0x1381   :  { %v3152_v31 = vmul.f32 %v16319_v10, %v16319_v10 }
0x1382   :  { %3383 = vmatpush.bf16.msrb.mxu2 %v10954_v19  ;;  %v13701_v19 = vld [vmem:[%s19544_s8 + $0x244] sm:$0xf] }
0x1383   :  { %3154 = vadd.xlane.f32.xlu0 %v3152_v31  ;;  %v13708_v31 = vld [vmem:[%s19544_s8 + $0x274] sm:$0xf0]  ;;  %v10878_v40 = vor.u32 %v13701_v19, %v10875_v54 }
0x1384   :  { %v3143_v34 = vpop.f32.mrf.mxu1  ;;  %v13740_v54 = vld [vmem:[%s19545_s9 + $0x178] sm:$0xff] }
0x1385   :  { %v3147_v2 = vadd.f32 %v3143_v34, %v3111_v33  ;;  %v10894_v33 = vor.u32 %v13705_v23, %v10891_v25  ;;  %v10898_v34 = vor.u32 %v13708_v31, %v10897_v26 }
0x1386   :  { %3384 = vmatpush.bf16.msrb.mxu2 %v10938_v52  ;;  %v13697_v52 = vld [vmem:[%s19544_s8 + $0x224] sm:$0xf] }
0x1387   :  { %v16324_v37 = vadd.f32 %v3147_v2, %v16024_v36  ;;  %v10955_v36 = vld [vmem:[%s19544_s8 + $0x2f0] sm:$0xf0]  ;;  %v13706_v2 = vld [vmem:[%s19544_s8 + $0x26c] sm:$0xf]  ;;  %3415 = vmatpush.bf16.msra.mxu0 %v10898_v34  ;;  %v10862_v57 = vor.u32 %v13697_v52, %v10859_v56  ;;  %v14231_v34 = vld [vmem:[%s19543_s7 + $0x2] ss:$0 sm:$0xff] }
0x1388   :  { %v10958_v39 = vor.u32 %v13721_v38, %v10955_v36  ;;  %v13703_v38 = vld [vmem:[%s19544_s8 + $0x24c] sm:$0xf0] }
0x1389   :  { %v3153_v29 = vmul.f32 %v16324_v37, %v16324_v37  ;;  %v10874_v36 = vor.u32 %v13703_v38, %v10873_v27 }
0x138a   :  { %3397 = vmatpush.bf16.msrb.mxu3 %v10958_v39  ;;  %3385 = vmatpush.bf16.msrb.mxu2 %v10922_v62  ;;  %v13704_v39 = vld [vmem:[%s19544_s8 + $0x254] sm:$0xf0]  ;;  %v13693_v62 = vld [vmem:[%s19544_s8 + $0x204] sm:$0xf] }
0x138b   :  { %3156 = vadd.xlane.f32.xlu1 %v3153_v29  ;;  %v10899_v29 = vld [vmem:[%s19544_s8 + $0x278] sm:$0xf0]  ;;  %v10882_v41 = vor.u32 %v13704_v39, %v10881_v12  ;;  %v10846_v49 = vor.u32 %v13693_v62, %v10843_v3  ;;  %v13731_v12 = vld [vmem:[%s19545_s9 + $0x130] sm:$0xff]  ;;  %v13733_v3 = vld [vmem:[%s19545_s9 + $0x140] sm:$0xff] }
0x138c   :  { %v10902_v6 = vor.u32 %v13706_v2, %v10899_v29  ;;  %v13739_v39 = vld [vmem:[%s19545_s9 + $0x170] sm:$0xff] }
0x138d   :  { %3416 = vmatpush.bf16.msra.mxu0 %v10882_v41  ;;  %v13738_v41 = vld [vmem:[%s19545_s9 + $0x168] sm:$0xff] }
0x138e   :  { %3398 = vmatpush.bf16.msrb.mxu3 %v10942_v1  ;;  %3386 = vmatpush.bf16.msrb.mxu2 %v10906_v51  ;;  %v13700_v1 = vld [vmem:[%s19544_s8 + $0x234] sm:$0xf0] }
0x138f   :  { %3429 = vmatpush.bf16.msra.mxu1 %v10902_v6  ;;  %v10866_v58 = vor.u32 %v13700_v1, %v10865_v20  ;;  %v13727_v20 = vld [vmem:[%s19545_s9 + $0x110] sm:$0xff] }
0x1390   :  { %v13735_v1 = vld [vmem:[%s19545_s9 + $0x150] sm:$0xff] }
0x1391   :  { %3417 = vmatpush.bf16.msra.mxu0 %v10866_v58  ;;  %v13734_v58 = vld [vmem:[%s19545_s9 + $0x148] sm:$0xff] }
0x1392   :  { %3399 = vmatpush.bf16.msrb.mxu3 %v10926_v4  ;;  %3387 = vmatpush.bf16.msrb.mxu2 %v10890_v24  ;;  %v10849_v4 = vld [vmem:[%s19544_s8 + $0x208] sm:$0xf] }
0x1393   :  { %3430 = vmatpush.bf16.msra.mxu1 %v10886_v44  ;;  %v10850_v0 = vor.u32 %v13696_v7, %v10849_v4  ;;  %v13728_v44 = vld [vmem:[%s19545_s9 + $0x118] sm:$0xff] }
0x1395   :  { %3418 = vmatpush.bf16.msra.mxu0 %v10850_v0 }
0x1396   :  { %3400 = vmatpush.bf16.msrb.mxu3 %v10910_v17  ;;  %3388 = vmatpush.bf16.msrb.mxu2 %v10874_v36  ;;  %v13732_v36 = vld [vmem:[%s19545_s9 + $0x138] sm:$0xff] }
0x1397   :  { %3431 = vmatpush.bf16.msra.mxu1 %v10870_v59 }
0x139a   :  { %3401 = vmatpush.bf16.msrb.mxu3 %v10894_v33  ;;  %3389 = vmatpush.bf16.msrb.mxu2 %v10858_v30 }
0x139b   :  { %3432 = vmatpush.bf16.msra.mxu1 %v10854_v11 }
0x139e   :  { %3402 = vmatpush.bf16.msrb.mxu3 %v10878_v40  ;;  %3390 = vmatpush.bf16.msrb.mxu2 %v10842_v55  ;;  %v13730_v40 = vld [vmem:[%s19545_s9 + $0x128] sm:$0xff]  ;;  %v13725_v55 = vld [vmem:[%s19545_s9 + $0x100] sm:$0xff] }
0x13a2   :  { %3403 = vmatpush.bf16.msrb.mxu3 %v10862_v57  ;;  %3654 = vmatpush.bf16.msra.mxu2 %v13732_v36  ;;  %v13726_v57 = vld [vmem:[%s19545_s9 + $0x108] sm:$0xff] }
0x13a6   :  { %3404 = vmatpush.bf16.msrb.mxu3 %v10846_v49  ;;  %3655 = vmatpush.bf16.msra.mxu2 %v13731_v12 }
0x13aa   :  { %3668 = vmatpush.bf16.msra.mxu3 %v13740_v54  ;;  %3656 = vmatpush.bf16.msra.mxu2 %v13730_v40 }
0x13ae   :  { %3669 = vmatpush.bf16.msra.mxu3 %v13739_v39  ;;  %3657 = vmatpush.bf16.msra.mxu2 %v13729_v42 }
0x13b2   :  { %3670 = vmatpush.bf16.msra.mxu3 %v13738_v41  ;;  %3658 = vmatpush.bf16.msra.mxu2 %v13728_v44 }
0x13b6   :  { %3671 = vmatpush.bf16.msra.mxu3 %v13737_v43  ;;  %3659 = vmatpush.bf16.msra.mxu2 %v13727_v20 }
0x13ba   :  { %3672 = vmatpush.bf16.msra.mxu3 %v13736_v46  ;;  %3660 = vmatpush.bf16.msra.mxu2 %v13726_v57 }
0x13be   :  { %3673 = vmatpush.bf16.msra.mxu3 %v13735_v1  ;;  %3661 = vmatpush.bf16.msra.mxu2 %v13725_v55 }
0x13c2   :  { %3674 = vmatpush.bf16.msra.mxu3 %v13734_v58 }
0x13c6   :  { %3675 = vmatpush.bf16.msra.mxu3 %v13733_v3 }
0x13f6   :  { %v3155_v63 = vpop.xlane.xlu0 %3154 }
0x13f7   :  { %v3158_v8 = vmul.f32 %v3155_v63, %v14995_v32 }
0x13f9   :  { %v3160_v51 = vadd.f32 1e-05, %v3158_v8 }
0x13fb   :  { %14392 = vrsqrt.f32 %v3160_v51  ;;  %vm3168_vm10 = vweird.f32 %v3160_v51 }
0x13fe   :  { %v3157_v14 = vpop.xlane.xlu1 %3156 }
0x13ff   :  { %v3159_v15 = vmul.f32 %v3157_v14, %v14995_v32 }
0x1401   :  { %v14393_v16 = vpop.eup %14392  ;;  %v3161_v17 = vadd.f32 1e-05, %v3159_v15 }
0x1402   :  { %v3163_v18 = vmul.f32 %v14393_v16, %v3160_v51  ;;  %vm3169_vm9 = vweird.f32 %v14393_v16 }
0x1403   :  { %14394 = vrsqrt.f32 %v3161_v17  ;;  %vm3170_vm11 = vmor %vm3168_vm10, %vm3169_vm9  ;;  %vm3178_vm13 = vweird.f32 %v3161_v17 }
0x1404   :  { %v3164_v5 = vmul.f32 %v14393_v16, %v3163_v18 }
0x1406   :  { %v3165_v45 = vmul.f32 0.5, %v3164_v5 }
0x1408   :  { %v3166_v35 = vsub.f32 1.5, %v3165_v45 }
0x1409   :  { %v14395_v21 = vpop.eup %14394 }
0x140a   :  { %v3173_v22 = vmul.f32 %v14395_v21, %v3161_v17  ;;  %v3167_v23 = vmul.f32 %v14393_v16, %v3166_v35  ;;  %vm3179_vm12 = vweird.f32 %v14395_v21 }
0x140b   :  { %vm3180_vm14 = vmor %vm3178_vm13, %vm3179_vm12 }
0x140c   :  { %v3174_v24 = vmul.f32 %v14395_v21, %v3173_v22  ;;  %v3171_v26 = vsel %vm3170_vm11, %v14393_v16, %v3167_v23  ;;  %v13770_v23 = vld [vmem:[%s19538_s5 + $0x3ec] sm:$0xf] }
0x140d   :  { %v3182_v2 = vmul.f32 %v3171_v26, %v16319_v10 }
0x140e   :  { %v3175_v25 = vmul.f32 0.5, %v3174_v24 }
0x140f   :  { %v3187_v27 = vmul.f32 %v14231_v34, %v3182_v2 }
0x1410   :  { %v3176_v31 = vsub.f32 1.5, %v3175_v25 }
0x1412   :  { %v3177_v33 = vmul.f32 %v14395_v21, %v3176_v31 }
0x1414   :  { %v3181_v29 = vsel %vm3180_vm14, %v14395_v21, %v3177_v33 }
0x1415   :  { %v3183_v6 = vmul.f32 %v3181_v29, %v16324_v37 }
0x1417   :  { %v3188_v38 = vmul.f32 %v14231_v34, %v3183_v6 }
0x1419   :  { %v3189_v19 = vpack.c.bf16 %v3188_v38, %v3187_v27 }
0x141b   :  { %3391 = vmatmul.bf16.vlgmr.msrb.gmra.mxu2 %v3189_v19  ;;  %3405 = vmatmul.bf16.vlgmr.msrb.gmra.mxu3 %v3189_v19 }
0x141c   :  { %3419 = vmatmul.bf16.vlgmr.msra.gmra.mxu0 %v3189_v19  ;;  %3433 = vmatmul.bf16.vlgmr.msra.gmra.mxu1 %v3189_v19 }
0x1499   :  { %v3420_v22 = vpop.f32.mrf.mxu0  ;;  %v3434_v27 = vpop.f32.mrf.mxu1 }
0x149e   :  { %v16557_v48 = vpop.f32.mrf.mxu2  ;;  %v16559_v52 = vpop.f32.mrf.mxu3 }
0x149f   :  { %v10967_v30 = vmul.f32 -1.442695, %v16557_v48  ;;  %v10968_v56 = vmul.f32 -1.442695, %v16559_v52 }
0x14a1   :  { %14396 = vpow2.f32 %v10967_v30 }
0x14a2   :  { %14398 = vpow2.f32 %v10968_v56 }
0x14a6   :  { %v16575_v53 = vpop.f32.mrf.mxu2  ;;  %v16577_v47 = vpop.f32.mrf.mxu3 }
0x14a7   :  { %v14397_v59 = vpop.eup %14396  ;;  %v10969_v60 = vmul.f32 -1.442695, %v16575_v53  ;;  %v10970_v63 = vmul.f32 -1.442695, %v16577_v47 }
0x14a8   :  { %v14399_v61 = vpop.eup %14398  ;;  %v3451_v62 = vadd.f32 1.0, %v14397_v59 }
0x14a9   :  { %v3452_v4 = vadd.f32 1.0, %v14399_v61  ;;  %14400 = vpow2.f32 %v10969_v60  ;;  %v3422_v61 = vpop.f32.mrf.mxu0 }
0x14aa   :  { %14402 = vrcp.f32 %v3451_v62  ;;  %v3466_v45 = vand.u32 2147483648, %v3451_v62  ;;  %vm3460_vm0 = vweird.f32 %v3451_v62  ;;  %v3464_v35 = vand.u32 2147483647, %v3451_v62 }
0x14ab   :  { %14404 = vrcp.f32 %v3452_v4  ;;  %v3479_v25 = vand.u32 2147483647, %v3452_v4  ;;  %v3481_v33 = vand.u32 2147483648, %v3452_v4  ;;  %vm3475_vm3 = vweird.f32 %v3452_v4 }
0x14ac   :  { %14406 = vpow2.f32 %v10970_v63  ;;  %v3467_v2 = vor.u32 1.1754944e-38, %v3466_v45  ;;  %vm3465_vm4 = vcmp.eq.f32.partialorder %v3464_v35, 8.507059e+37  ;;  %v11222_v45 = vld [vmem:[%s19538_s5 + $0x3e8] sm:$0xf]  ;;  %v13772_v35 = vld [vmem:[%s19538_s5 + $0x3f4] sm:$0xf0] }
0x14ad   :  { %vm3480_vm9 = vcmp.eq.f32.partialorder %v3479_v25, 8.507059e+37  ;;  %v3482_v40 = vor.u32 1.1754944e-38, %v3481_v33  ;;  %v13765_v33 = vld [vmem:[%s19538_s5 + $0x3c4] sm:$0xf] }
0x14af   :  { %v14401_v7 = vpop.eup %14400 }
0x14b0   :  { %v14403_v8 = vpop.eup %14402  ;;  %v3453_v49 = vadd.f32 1.0, %v14401_v7 }
0x14b1   :  { %v14405_v0 = vpop.eup %14404  ;;  %v3456_v50 = vmul.f32 %v14403_v8, %v3451_v62  ;;  %vm3461_vm15 = vweird.f32 %v14403_v8 }
0x14b2   :  { %v14407_v9 = vpop.eup %14406  ;;  %v3471_v11 = vmul.f32 %v14405_v0, %v3452_v4  ;;  %14408 = vrcp.f32 %v3453_v49  ;;  %vm16587_vm1 = vmor %vm3460_vm0, %vm3461_vm15  ;;  %vm3476_vm2 = vweird.f32 %v14405_v0  ;;  %v3496_v29 = vand.u32 2147483648, %v3453_v49  ;;  %v3436_v4 = vpop.f32.mrf.mxu1 }
0x14b3   :  { %v3457_v51 = vsub.f32 1.0, %v3456_v50  ;;  %v3454_v14 = vadd.f32 1.0, %v14407_v9  ;;  %vm16593_vm5 = vmor %vm3475_vm3, %vm3476_vm2  ;;  %v3494_v36 = vand.u32 2147483647, %v3453_v49  ;;  %vm3490_vm10 = vweird.f32 %v3453_v49 }
0x14b4   :  { %v3472_v15 = vsub.f32 1.0, %v3471_v11  ;;  %v3497_v43 = vor.u32 1.1754944e-38, %v3496_v29  ;;  %v11206_v29 = vld [vmem:[%s19538_s5 + $0x3c8] sm:$0xf] }
0x14b5   :  { %v3458_v16 = vmul.f32 %v14403_v8, %v3457_v51  ;;  %14410 = vrcp.f32 %v3454_v14  ;;  %v3511_v42 = vand.u32 2147483648, %v3454_v14  ;;  %v3509_v46 = vand.u32 2147483647, %v3454_v14 }
0x14b6   :  { %v3473_v17 = vmul.f32 %v14405_v0, %v3472_v15  ;;  %vm3495_vm13 = vcmp.eq.f32.partialorder %v3494_v36, 8.507059e+37  ;;  %vm3505_vm14 = vweird.f32 %v3454_v14  ;;  %v11208_v36 = vld [vmem:[%s19538_s5 + $0x3d8] sm:$0xf0] }
0x14b7   :  { %v3459_v18 = vadd.f32 %v14403_v8, %v3458_v16  ;;  %v3512_v59 = vor.u32 1.1754944e-38, %v3511_v42  ;;  %vm3510_vm0 = vcmp.eq.f32.partialorder %v3509_v46, 8.507059e+37  ;;  %v11184_v42 = vld [vmem:[%s19538_s5 + $0x3b0] sm:$0xf0] }
0x14b8   :  { %v14409_v5 = vpop.eup %14408  ;;  %v3474_v24 = vadd.f32 %v14405_v0, %v3473_v17  ;;  %v11214_v17 = vld [vmem:[%s19538_s5 + $0x3e0] sm:$0xf] }
0x14b9   :  { %v3486_v21 = vmul.f32 %v14409_v5, %v3453_v49  ;;  %v3463_v31 = vsel %vm16587_vm1, %v14403_v8, %v3459_v18  ;;  %vm3491_vm6 = vweird.f32 %v14409_v5  ;;  %v13769_v18 = vld [vmem:[%s19538_s5 + $0x3e4] sm:$0xf] }
0x14ba   :  { %v3468_v54 = vsel %vm3465_vm4, %v3467_v2, %v3463_v31  ;;  %v3478_v12 = vsel %vm16593_vm5, %v14405_v0, %v3474_v24  ;;  %vm3492_vm11 = vmor %vm3490_vm10, %vm3491_vm6  ;;  %v11224_v24 = vld [vmem:[%s19538_s5 + $0x3f8] sm:$0xf0]  ;;  %v13767_v31 = vld [vmem:[%s19538_s5 + $0x3cc] sm:$0xf0] }
0x14bb   :  { %v14411_v26 = vpop.eup %14410  ;;  %v3487_v34 = vsub.f32 1.0, %v3486_v21  ;;  %v3515_v30 = vmul.f32 %v3468_v54, %v16557_v48  ;;  %v3483_v56 = vsel %vm3480_vm9, %v3482_v40, %v3478_v12  ;;  %v11227_v25 = vor.u32 %v13770_v23, %v11224_v24  ;;  %v11200_v2 = vld [vmem:[%s19538_s5 + $0x3d0] sm:$0xf0]  ;;  %v11182_v12 = vld [vmem:[%s19538_s5 + $0x3a0] sm:$0xf] }
0x14bc   :  { %v3501_v6 = vmul.f32 %v14411_v26, %v3454_v14  ;;  %vm3506_vm12 = vweird.f32 %v14411_v26  ;;  %v3516_v60 = vmul.f32 %v3483_v56, %v16559_v52  ;;  %v13761_v40 = vld [vmem:[%s19538_s5 + $0x3a4] sm:$0xf]  ;;  %v13762_v56 = vld [vmem:[%s19538_s5 + $0x3ac] sm:$0xf] }
0x14bd   :  { %v3488_v19 = vmul.f32 %v14409_v5, %v3487_v34  ;;  %vm3507_vm15 = vmor %vm3505_vm14, %vm3506_vm12  ;;  %v3519_v63 = vmul.f32 %v3515_v30, %v3420_v22  ;;  %v11223_v22 = vor.u32 %v13772_v35, %v11222_v45  ;;  %3959 = vmatpush.bf16.msrb.mxu3 %v11227_v25  ;;  %v11187_v46 = vor.u32 %v13761_v40, %v11184_v42  ;;  %v11136_v45 = vld [vmem:[%s19538_s5 + $0x350] sm:$0xf0]  ;;  %v11142_v35 = vld [vmem:[%s19538_s5 + $0x348] sm:$0xf] }
0x14be   :  { %v3502_v39 = vsub.f32 1.0, %v3501_v6  ;;  %v3520_v8 = vmul.f32 %v3516_v60, %v3434_v27  ;;  %v13768_v6 = vld [vmem:[%s19538_s5 + $0x3d4] sm:$0xf0]  ;;  %v11203_v27 = vor.u32 %v13765_v33, %v11200_v2  ;;  %v13750_v24 = vld [vmem:[%s19538_s5 + $0x34c] sm:$0xf] }
0x14bf   :  { %v3489_v41 = vadd.f32 %v14409_v5, %v3488_v19  ;;  %3945 = vmatpush.bf16.msrb.mxu2 %v11223_v22  ;;  %v11207_v38 = vor.u32 %v13768_v6, %v11206_v29  ;;  %v13766_v19 = vld [vmem:[%s19538_s5 + $0x3cc] sm:$0xf]  ;;  %v11144_v25 = vld [vmem:[%s19538_s5 + $0x358] sm:$0xf0]  ;;  %v13747_v33 = vld [vmem:[%s19538_s5 + $0x32c] sm:$0xf0] }
0x14c0   :  { %v3503_v44 = vmul.f32 %v14411_v26, %v3502_v39  ;;  %v11211_v54 = vor.u32 %v13766_v19, %v11208_v36  ;;  %v13763_v39 = vld [vmem:[%s19538_s5 + $0x3ac] sm:$0xf0]  ;;  %v11120_v29 = vld [vmem:[%s19538_s5 + $0x330] sm:$0xf0]  ;;  %v11126_v6 = vld [vmem:[%s19538_s5 + $0x328] sm:$0xf] }
0x14c1   :  { %v3493_v20 = vsel %vm3492_vm11, %v14409_v5, %v3489_v41  ;;  %v11183_v41 = vor.u32 %v13763_v39, %v11182_v12  ;;  %v13746_v36 = vld [vmem:[%s19538_s5 + $0x32c] sm:$0xf]  ;;  %v11102_v40 = vld [vmem:[%s19538_s5 + $0x300] sm:$0xf]  ;;  %v13741_v42 = vld [vmem:[%s19538_s5 + $0x304] sm:$0xf] }
0x14c2   :  { %v3498_v1 = vsel %vm3495_vm13, %v3497_v43, %v3493_v20  ;;  %v3504_v57 = vadd.f32 %v14411_v26, %v3503_v44  ;;  %3960 = vmatpush.bf16.msrb.mxu3 %v11211_v54  ;;  %v11190_v43 = vld [vmem:[%s19538_s5 + $0x3a8] sm:$0xf]  ;;  %v13764_v44 = vld [vmem:[%s19538_s5 + $0x3b4] sm:$0xf0]  ;;  %v11192_v20 = vld [vmem:[%s19538_s5 + $0x3b8] sm:$0xf0] }
0x14c3   :  { %v3517_v58 = vmul.f32 %v3498_v1, %v16575_v53  ;;  %3946 = vmatpush.bf16.msrb.mxu2 %v11207_v38  ;;  %v11191_v30 = vor.u32 %v13764_v44, %v11190_v43  ;;  %v11195_v1 = vor.u32 %v13762_v56, %v11192_v20  ;;  %v11128_v54 = vld [vmem:[%s19538_s5 + $0x338] sm:$0xf0]  ;;  %v13744_v56 = vld [vmem:[%s19538_s5 + $0x314] sm:$0xf0] }
0x14c4   :  { %v3508_v62 = vsel %vm3507_vm15, %v14411_v26, %v3504_v57  ;;  %v11198_v26 = vld [vmem:[%s19538_s5 + $0x3c0] sm:$0xf]  ;;  %v11131_v12 = vor.u32 %v13746_v36, %v11128_v54 }
0x14c5   :  { %v3521_v55 = vmul.f32 %v3517_v58, %v3422_v61  ;;  %v3513_v3 = vsel %vm3510_vm0, %v3512_v59, %v3508_v62  ;;  %v11199_v34 = vor.u32 %v13767_v31, %v11198_v26  ;;  %v11166_v57 = vld [vmem:[%s19538_s5 + $0x380] sm:$0xf]  ;;  %v13759_v58 = vld [vmem:[%s19538_s5 + $0x38c] sm:$0xf0]  ;;  %v13757_v59 = vld [vmem:[%s19538_s5 + $0x384] sm:$0xf]  ;;  %v11147_v26 = vor.u32 %v13750_v24, %v11144_v25 }
0x14c6   :  { %v3518_v48 = vmul.f32 %v3513_v3, %v16577_v47  ;;  %3961 = vmatpush.bf16.msrb.mxu3 %v11195_v1  ;;  %v11167_v60 = vor.u32 %v13759_v58, %v11166_v57  ;;  %v11168_v61 = vld [vmem:[%s19538_s5 + $0x390] sm:$0xf0]  ;;  %v11174_v62 = vld [vmem:[%s19538_s5 + $0x388] sm:$0xf]  ;;  %v11118_v31 = vld [vmem:[%s19538_s5 + $0x320] sm:$0xf] }
0x14c7   :  { %v3523_v7 = vpack.c.bf16 %v3521_v55, %v3519_v63  ;;  %3947 = vmatpush.bf16.msrb.mxu2 %v11191_v30  ;;  %v13760_v63 = vld [vmem:[%s19538_s5 + $0x394] sm:$0xf0]  ;;  %v11171_v55 = vor.u32 %v13757_v59, %v11168_v61  ;;  %v11119_v2 = vor.u32 %v13747_v33, %v11118_v31  ;;  %v11110_v30 = vld [vmem:[%s19538_s5 + $0x308] sm:$0xf]  ;;  %v13742_v57 = vld [vmem:[%s19538_s5 + $0x30c] sm:$0xf] }
0x14c8   :  { %v3522_v49 = vmul.f32 %v3518_v48, %v3436_v4  ;;  %v11175_v3 = vor.u32 %v13760_v63, %v11174_v62  ;;  %v13758_v48 = vld [vmem:[%s19538_s5 + $0x38c] sm:$0xf]  ;;  %v11176_v4 = vld [vmem:[%s19538_s5 + $0x398] sm:$0xf0]  ;;  %v11111_v1 = vor.u32 %v13744_v56, %v11110_v30 }
0x14c9   :  { %3662 = vmatmul.bf16.vlgmr.msra.gmra.mxu2 %v3523_v7  ;;  %v11179_v7 = vor.u32 %v13758_v48, %v11176_v4  ;;  %v11112_v58 = vld [vmem:[%s19538_s5 + $0x318] sm:$0xf0] }
0x14ca   :  { %v3524_v0 = vpack.c.bf16 %v3522_v49, %v3520_v8  ;;  %v11150_v8 = vld [vmem:[%s19538_s5 + $0x360] sm:$0xf]  ;;  %v13755_v49 = vld [vmem:[%s19538_s5 + $0x36c] sm:$0xf0] }
0x14cb   :  { %3948 = vmatpush.bf16.msrb.mxu2 %v11175_v3  ;;  %3962 = vmatpush.bf16.msrb.mxu3 %v11179_v7 }
0x14cc   :  { %3676 = vmatmul.bf16.vlgmr.msra.gmra.mxu3 %v3524_v0  ;;  %v13753_v0 = vld [vmem:[%s19538_s5 + $0x364] sm:$0xf] }
0x154c   :  { %v3663_v53 = vpop.f32.mrf.mxu2 }
0x154f   :  { %v3677_v50 = vpop.f32.mrf.mxu3 }
0x1550   :  { %v3678_v9 = vadd.f32 %v3677_v50, %v3663_v53  ;;  %v11151_v53 = vor.u32 %v13755_v49, %v11150_v8  ;;  %v11152_v50 = vld [vmem:[%s19538_s5 + $0x370] sm:$0xf0] }
0x1552   :  { %v16604_v52 = vadd.f32 %v3678_v9, %v16319_v10  ;;  %v13771_v10 = vld [vmem:[%s19538_s5 + $0x3ec] sm:$0xf0]  ;;  %v11158_v9 = vld [vmem:[%s19538_s5 + $0x368] sm:$0xf] }
0x1553   :  { %v11215_v5 = vor.u32 %v13771_v10, %v11214_v17  ;;  %v11134_v10 = vld [vmem:[%s19538_s5 + $0x340] sm:$0xf] }
0x1554   :  { %v3686_v11 = vmul.f32 %v16604_v52, %v16604_v52  ;;  %v3665_v51 = vpop.f32.mrf.mxu2 }
0x1555   :  { %3917 = vmatpush.bf16.msrb.mxu0 %v11215_v5  ;;  %v13749_v5 = vld [vmem:[%s19538_s5 + $0x344] sm:$0xf] }
0x1556   :  { %3688 = vadd.xlane.f32.xlu0 %v3686_v11  ;;  %v13756_v11 = vld [vmem:[%s19538_s5 + $0x374] sm:$0xf0]  ;;  %v11139_v22 = vor.u32 %v13749_v5, %v11136_v45 }
0x1557   :  { %v3679_v14 = vpop.f32.mrf.mxu3 }
0x1558   :  { %v3680_v47 = vadd.f32 %v3679_v14, %v3665_v51  ;;  %v11155_v51 = vor.u32 %v13753_v0, %v11152_v50  ;;  %v11159_v14 = vor.u32 %v13756_v11, %v11158_v9 }
0x1559   :  { %3918 = vmatpush.bf16.msrb.mxu0 %v11199_v34  ;;  %v13745_v34 = vld [vmem:[%s19538_s5 + $0x324] sm:$0xf] }
0x155a   :  { %v16609_v15 = vadd.f32 %v3680_v47, %v16324_v37  ;;  %v11216_v37 = vld [vmem:[%s19538_s5 + $0x3f0] sm:$0xf0]  ;;  %v13754_v47 = vld [vmem:[%s19538_s5 + $0x36c] sm:$0xf]  ;;  %3949 = vmatpush.bf16.msrb.mxu2 %v11159_v14  ;;  %v11123_v38 = vor.u32 %v13745_v34, %v11120_v29  ;;  %v14232_v14 = vld [vmem:[%s19537_s4 + $0x3] ss:$0 sm:$0xff] }
0x155b   :  { %v11219_v21 = vor.u32 %v13769_v18, %v11216_v37  ;;  %v13751_v18 = vld [vmem:[%s19538_s5 + $0x34c] sm:$0xf0]  ;;  %v14710_v34 = vld [vmem:[%s19540_s1 + $0x8] sm:$0xff] }
0x155c   :  { %v3687_v16 = vmul.f32 %v16609_v15, %v16609_v15  ;;  %v11135_v37 = vor.u32 %v13751_v18, %v11134_v10  ;;  %v14711_v29 = vld [vmem:[%s19539_s2 + $0x8] sm:$0xff] }
0x155d   :  { %3931 = vmatpush.bf16.msrb.mxu1 %v11219_v21  ;;  %3919 = vmatpush.bf16.msrb.mxu0 %v11183_v41  ;;  %v13752_v21 = vld [vmem:[%s19538_s5 + $0x354] sm:$0xf0]  ;;  %v13743_v41 = vld [vmem:[%s19538_s5 + $0x30c] sm:$0xf0] }
0x155e   :  { %3690 = vadd.xlane.f32.xlu1 %v3687_v16  ;;  %v11160_v16 = vld [vmem:[%s19538_s5 + $0x378] sm:$0xf0]  ;;  %v11143_v23 = vor.u32 %v13752_v21, %v11142_v35  ;;  %v11103_v44 = vor.u32 %v13743_v41, %v11102_v40  ;;  %v14708_v35 = vld [vmem:[%s19540_s1] sm:$0xff] }
0x155f   :  { %v11163_v17 = vor.u32 %v13754_v47, %v11160_v16 }
0x1560   :  { %3950 = vmatpush.bf16.msrb.mxu2 %v11143_v23 }
0x1561   :  { %3932 = vmatpush.bf16.msrb.mxu1 %v11203_v27  ;;  %3920 = vmatpush.bf16.msrb.mxu0 %v11167_v60  ;;  %v13748_v27 = vld [vmem:[%s19538_s5 + $0x334] sm:$0xf0]  ;;  %v11115_v60 = vor.u32 %v13742_v57, %v11112_v58 }
0x1562   :  { %3963 = vmatpush.bf16.msrb.mxu3 %v11163_v17  ;;  %v11127_v19 = vor.u32 %v13748_v27, %v11126_v6 }
0x1564   :  { %3951 = vmatpush.bf16.msrb.mxu2 %v11127_v19 }
0x1565   :  { %3933 = vmatpush.bf16.msrb.mxu1 %v11187_v46  ;;  %3921 = vmatpush.bf16.msrb.mxu0 %v11151_v53  ;;  %v11104_v46 = vld [vmem:[%s19538_s5 + $0x310] sm:$0xf0] }
0x1566   :  { %3964 = vmatpush.bf16.msrb.mxu3 %v11147_v26  ;;  %v11107_v20 = vor.u32 %v13741_v42, %v11104_v46 }
0x1568   :  { %3952 = vmatpush.bf16.msrb.mxu2 %v11111_v1 }
0x1569   :  { %3934 = vmatpush.bf16.msrb.mxu1 %v11171_v55  ;;  %3922 = vmatpush.bf16.msrb.mxu0 %v11135_v37 }
0x156a   :  { %3965 = vmatpush.bf16.msrb.mxu3 %v11131_v12 }
0x156d   :  { %3935 = vmatpush.bf16.msrb.mxu1 %v11155_v51  ;;  %3923 = vmatpush.bf16.msrb.mxu0 %v11119_v2 }
0x156e   :  { %3966 = vmatpush.bf16.msrb.mxu3 %v11115_v60 }
0x1571   :  { %3936 = vmatpush.bf16.msrb.mxu1 %v11139_v22  ;;  %3924 = vmatpush.bf16.msrb.mxu0 %v11103_v44  ;;  %v14709_v22 = vld [vmem:[%s19539_s2] sm:$0xff] }
0x1575   :  { %3937 = vmatpush.bf16.msrb.mxu1 %v11123_v38 }
0x1579   :  { %3938 = vmatpush.bf16.msrb.mxu1 %v11107_v20 }
0x15c9   :  { %v3689_v39 = vpop.xlane.xlu0 %3688 }
0x15ca   :  { %v3692_v43 = vmul.f32 %v3689_v39, %v14995_v32 }
0x15cc   :  { %v3694_v59 = vadd.f32 1e-05, %v3692_v43 }
0x15ce   :  { %14412 = vrsqrt.f32 %v3694_v59  ;;  %vm3702_vm2 = vweird.f32 %v3694_v59 }
0x15d1   :  { %v3691_v61 = vpop.xlane.xlu1 %3690 }
0x15d2   :  { %v3693_v62 = vmul.f32 %v3691_v61, %v14995_v32 }
0x15d4   :  { %v14413_v63 = vpop.eup %14412  ;;  %v3695_v55 = vadd.f32 1e-05, %v3693_v62 }
0x15d5   :  { %v3697_v3 = vmul.f32 %v14413_v63, %v3694_v59  ;;  %vm3703_vm1 = vweird.f32 %v14413_v63 }
0x15d6   :  { %14414 = vrsqrt.f32 %v3695_v55  ;;  %vm3704_vm3 = vmor %vm3702_vm2, %vm3703_vm1  ;;  %vm3712_vm5 = vweird.f32 %v3695_v55 }
0x15d7   :  { %v3698_v48 = vmul.f32 %v14413_v63, %v3697_v3  ;;  %v14712_v3 = vld [vmem:[%s19541_s3] sm:$0xff] }
0x15d9   :  { %v3699_v4 = vmul.f32 0.5, %v3698_v48 }
0x15db   :  { %v3700_v7 = vsub.f32 1.5, %v3699_v4 }
0x15dc   :  { %v14415_v8 = vpop.eup %14414 }
0x15dd   :  { %v3707_v49 = vmul.f32 %v14415_v8, %v3695_v55  ;;  %v3701_v0 = vmul.f32 %v14413_v63, %v3700_v7  ;;  %vm3713_vm4 = vweird.f32 %v14415_v8 }
0x15de   :  { %vm3714_vm6 = vmor %vm3712_vm5, %vm3713_vm4 }
0x15df   :  { %v3708_v53 = vmul.f32 %v14415_v8, %v3707_v49  ;;  %v3705_v9 = vsel %vm3704_vm3, %v14413_v63, %v3701_v0 }
0x15e0   :  { %v3716_v47 = vmul.f32 %v3705_v9, %v16604_v52 }
0x15e1   :  { %v3709_v50 = vmul.f32 0.5, %v3708_v53 }
0x15e2   :  { %v3721_v10 = vmul.f32 %v14232_v14, %v3716_v47 }
0x15e3   :  { %v3710_v11 = vsub.f32 1.5, %v3709_v50  ;;  %v14714_v50 = vld [vmem:[%s19541_s3 + $0x10] sm:$0xff] }
0x15e5   :  { %v3711_v51 = vmul.f32 %v14415_v8, %v3710_v11 }
0x15e7   :  { %v3715_v16 = vsel %vm3714_vm6, %v14415_v8, %v3711_v51  ;;  %v14713_v8 = vld [vmem:[%s19541_s3 + $0x8] sm:$0xff] }
0x15e8   :  { %v3717_v17 = vmul.f32 %v3715_v16, %v16609_v15 }
0x15ea   :  { %v3722_v18 = vmul.f32 %v14232_v14, %v3717_v17  ;;  %v14715_v14 = vld [vmem:[%s19541_s3 + $0x18] sm:$0xff] }
0x15ec   :  { %v3723_v5 = vpack.c.bf16 %v3722_v18, %v3721_v10 }
0x15ee   :  { %3925 = vmatmul.bf16.vlgmr.msrb.gmra.mxu0 %v3723_v5  ;;  %3939 = vmatmul.bf16.vlgmr.msrb.gmra.mxu1 %v3723_v5 }
0x15ef   :  { %3953 = vmatmul.bf16.vlgmr.msrb.gmra.mxu2 %v3723_v5  ;;  %3967 = vmatmul.bf16.vlgmr.msrb.gmra.mxu3 %v3723_v5 }
0x166b   :  { %v3926_v37 = vpop.f32.mrf.mxu0  ;;  %v3940_v45 = vpop.f32.mrf.mxu1 }
0x166c   :  { %v3973_v21 = vmul.f32 %v14708_v35, %v3926_v37  ;;  %v3975_v23 = vmul.f32 %v14709_v22, %v3940_v45 }
0x166e   :  { %v3977_v27 = vadd.f32 %v3975_v23, %v3973_v21 }
0x1672   :  { %v3954_v24 = vpop.f32.mrf.mxu2  ;;  %v3968_v25 = vpop.f32.mrf.mxu3 }
0x1673   :  { %v3981_v26 = vmul.f32 %v3954_v24, %v15036_v13  ;;  %v3928_v31 = vpop.f32.mrf.mxu0  ;;  %v3942_v33 = vpop.f32.mrf.mxu1  ;;  %v3979_v46 = vmul.f32 %v14708_v35, %v3954_v24 }
0x1674   :  { %v3974_v2 = vmul.f32 %v14710_v34, %v3928_v31  ;;  %v3976_v6 = vmul.f32 %v14711_v29, %v3942_v33 }
0x1675   :  { %3985 = vrot.lane.b32.xlu2 %v3981_v26, %s14749_s21 }
0x1676   :  { %v3978_v38 = vadd.f32 %v3976_v6, %v3974_v2 }
0x1678   :  { %v14201_v19 = vpack.i.bf16 %v3978_v38, %v3977_v27  ;;  %v4001_v36 = vpack.c.bf16 %v3978_v38, %v3977_v27 }
0x167a   :  { %v3956_v54 = vpop.f32.mrf.mxu2  ;;  %v3970_v12 = vpop.f32.mrf.mxu3  ;;  %14202 = vrot.lane.b32.xlu1 %v14201_v19, %s14750_s29 }
0x167b   :  { %v3982_v39 = vmul.f32 %v3956_v54, %v15048_v28  ;;  %v16828_v40 = vpack.c.bf16 %v3970_v12, %v3968_v25  ;;  %v3980_v30 = vmul.f32 %v14710_v34, %v3956_v54 }
0x167d   :  { %4092 = vmatpush.bf16.msra.mxu1 %v16828_v40  ;;  %3987 = vrot.lane.b32.xlu0 %v3982_v39, %s14749_s21 }
0x16cf   :  { %v3986_v42 = vpop.permute.xlu2 %3985 }
0x16d0   :  { %v3991_v1 = vadd.f32 %v3986_v42, %v3979_v46 }
0x16ec   :  { %v14203_v41 = vpop.permute.xlu1 %14202 }
0x16ed   :  { %v14205_v43 = vunpack.i.h.bf16 %v14203_v41  ;;  %v14204_v44 = vunpack.i.l.bf16 %v14203_v41 }
0x16ef   :  { %v4002_v56 = vpack.c.bf16 %v14205_v43, %v14204_v44  ;;  %v3988_v20 = vpop.permute.xlu0 %3987 }
0x16f0   :  { %v3992_v57 = vadd.f32 %v3988_v20, %v3980_v30 }
0x16f1   :  { %4177 = vrot.lane.b32.xlu0 %v4002_v56, %s14749_s21 }
0x16f2   :  { %v4003_v58 = vpack.c.bf16 %v3992_v57, %v3991_v1 }
0x16f4   :  { %4180 = vrot.lane.b32.xlu2 %v4003_v58, %s14750_s29  ;;  %v4011_v59 = vsel %vm379_vm7, %v4003_v58, 0 }
0x16f5   :  { %4020 = vmatpush.bf16.xpose.msra.mxu0 %v4011_v59 }
0x16fc   :  { %4175 = vrot.lane.b32.xlu2 %v4001_v36, %s14749_s21  ;;  %11228 = vmatmul.msk.bf16.vlgmr.msra.gmra.mxu0 %vm379_vm7, %v4001_v36 }
0x170c   :  { %11229 = vmatmul.msk.bf16.gmra.mxu0 %vm379_vm7, %v4002_v56 }
0x174e   :  { %v4181_v60 = vpop.permute.xlu2 %4180 }
0x174f   :  { %v4189_v61 = vsel %vm379_vm7, %v4181_v60, 0 }
0x1750   :  { %4198 = vmatpush.bf16.xpose.msrb.mxu0 %v4189_v61 }
0x1756   :  { %v4176_v62 = vpop.permute.xlu2 %4175 }
0x1757   :  { %11258 = vmatmul.msk.bf16.vlgmr.msrb.gmra.mxu0 %vm379_vm7, %v4176_v62 }
0x1763   :  { %v4178_v63 = vpop.permute.xlu0 %4177 }
0x1767   :  { %11259 = vmatmul.msk.bf16.gmra.mxu0 %vm379_vm7, %v4178_v63 }
0x1779   :  { %v4022_v55 = vpop.f32.mrf.mxu0 }
0x177a   :  { %v4023_v48 = vadd.f32 %v14712_v3, %v4022_v55 }
0x177c   :  { %v4032_v4 = vsel %vm408_vm8, %v4023_v48, -inf }
0x177d   :  { %4033 = vmax.xlane.f32.xlu2 %v4032_v4 }
0x1781   :  { %v4024_v7 = vpop.f32.mrf.mxu0 }
0x1782   :  { %v4025_v49 = vadd.f32 %v14713_v8, %v4024_v7 }
0x1784   :  { %v4035_v0 = vsel %vm408_vm8, %v4025_v49, -inf }
0x1785   :  { %4036 = vmax.xlane.f32.xlu0 %v4035_v0 }
0x1789   :  { %v4027_v53 = vpop.f32.mrf.mxu0 }
0x178a   :  { %v4028_v9 = vadd.f32 %v14714_v50, %v4027_v53 }
0x178c   :  { %v4038_v11 = vsel %vm408_vm8, %v4028_v9, -inf }
0x178d   :  { %4039 = vmax.xlane.f32.xlu1 %v4038_v11 }
0x1791   :  { %v4029_v51 = vpop.f32.mrf.mxu0 }
0x1792   :  { %v4030_v47 = vadd.f32 %v14715_v14, %v4029_v51 }
0x1794   :  { %v4041_v16 = vsel %vm408_vm8, %v4030_v47, -inf }
0x1795   :  { %4042 = vmax.xlane.f32.xlu2 %v4041_v16 }
0x17d4   :  { %v4200_v17 = vpop.f32.mrf.mxu0 }
0x17d5   :  { %v4201_v10 = vadd.f32 %v14712_v3, %v4200_v17 }
0x17d7   :  { %v4210_v18 = vsel %vm408_vm8, %v4201_v10, -inf }
0x17d8   :  { %4211 = vmax.xlane.f32.xlu2 %v4210_v18 }
0x17dc   :  { %v4202_v5 = vpop.f32.mrf.mxu0 }
0x17dd   :  { %v4203_v37 = vadd.f32 %v14713_v8, %v4202_v5 }
0x17df   :  { %v4213_v45 = vsel %vm408_vm8, %v4203_v37, -inf }
0x17e0   :  { %4214 = vmax.xlane.f32.xlu0 %v4213_v45 }
0x17e4   :  { %v4205_v35 = vpop.f32.mrf.mxu0 }
0x17e5   :  { %v4206_v21 = vadd.f32 %v14714_v50, %v4205_v35 }
0x17e7   :  { %v4216_v22 = vsel %vm408_vm8, %v4206_v21, -inf }
0x17e8   :  { %4217 = vmax.xlane.f32.xlu1 %v4216_v22 }
0x17ec   :  { %v4207_v23 = vpop.f32.mrf.mxu0 }
0x17ed   :  { %v4208_v24 = vadd.f32 %v14715_v14, %v4207_v23 }
0x17ef   :  { %v4219_v25 = vsel %vm408_vm8, %v4208_v24, -inf }
0x17f0   :  { %4220 = vmax.xlane.f32.xlu2 %v4219_v25  ;;  %v4034_v26 = vpop.xlane.xlu2 %4033 }
0x17f1   :  { %v4044_v31 = vsub.f32 %v4023_v48, %v4034_v26 }
0x17f3   :  { %v4048_v33 = vmul.f32 1.442695, %v4044_v31 }
0x17f5   :  { %14416 = vpow2.f32 %v4048_v33 }
0x17f8   :  { %v4037_v34 = vpop.xlane.xlu0 %4036 }
0x17f9   :  { %v4045_v2 = vsub.f32 %v4025_v49, %v4037_v34 }
0x17fb   :  { %v14417_v29 = vpop.eup %14416  ;;  %v4050_v6 = vmul.f32 1.442695, %v4045_v2  ;;  %v13774_v2 = vld [vmem:[%s19542_s6 + $0xc8] sm:$0xff] }
0x17fc   :  { %v4056_v27 = vsel %vm408_vm8, %v14417_v29, 0.0  ;;  %4165 = vmatpush.bf16.msra.mxu3 %v13774_v2  ;;  %v11427_v2 = vld [vmem:[%s19544_s8 + $0x3c8] sm:$0xf] }
0x17fd   :  { %14418 = vpow2.f32 %v4050_v6  ;;  %4057 = vadd.xlane.f32.xlu0 %v4056_v27  ;;  %v13773_v6 = vld [vmem:[%s19542_s6 + $0xc0] sm:$0xff] }
0x1800   :  { %v4040_v38 = vpop.xlane.xlu1 %4039  ;;  %4166 = vmatpush.bf16.msra.mxu3 %v13773_v6 }
0x1801   :  { %v4046_v19 = vsub.f32 %v4028_v9, %v4040_v38 }
0x1803   :  { %v14419_v36 = vpop.eup %14418  ;;  %v4052_v54 = vmul.f32 1.442695, %v4046_v19 }
0x1804   :  { %v4059_v12 = vsel %vm408_vm8, %v14419_v36, 0.0 }
0x1805   :  { %14420 = vpow2.f32 %v4052_v54  ;;  %4060 = vadd.xlane.f32.xlu1 %v4059_v12  ;;  %v13776_v12 = vld [vmem:[%s19542_s6 + $0xd8] sm:$0xff] }
0x1806   :  { %4136 = vmatpush.bf16.msra.mxu2 %v13776_v12  ;;  %v13803_v12 = vld [vmem:[%s19544_s8 + $0x3ac] sm:$0xf0] }
0x1808   :  { %v4043_v39 = vpop.xlane.xlu2 %4042 }
0x1809   :  { %v4047_v41 = vsub.f32 %v4030_v47, %v4043_v39  ;;  %v13775_v39 = vld [vmem:[%s19542_s6 + $0xd0] sm:$0xff] }
0x180a   :  { %4137 = vmatpush.bf16.msra.mxu2 %v13775_v39  ;;  %v13801_v39 = vld [vmem:[%s19544_s8 + $0x3a4] sm:$0xf] }
0x180b   :  { %v14421_v42 = vpop.eup %14420  ;;  %v4054_v43 = vmul.f32 1.442695, %v4047_v41 }
0x180c   :  { %v4062_v44 = vsel %vm408_vm8, %v14421_v42, 0.0 }
0x180d   :  { %14422 = vpow2.f32 %v4054_v43  ;;  %4063 = vadd.xlane.f32.xlu2 %v4062_v44 }
0x1813   :  { %v14423_v46 = vpop.eup %14422 }
0x1814   :  { %v4065_v30 = vsel %vm408_vm8, %v14423_v46, 0.0 }
0x1815   :  { %4066 = vadd.xlane.f32.xlu0 %v4065_v30 }
0x1829   :  { %4257 = vrot.lane.b32.xlu0 %v16828_v40, %s14750_s29 }
0x184b   :  { %v4212_v56 = vpop.xlane.xlu2 %4211 }
0x184c   :  { %v4222_v20 = vsub.f32 %v4201_v10, %v4212_v56  ;;  %v13778_v56 = vld [vmem:[%s19542_s6 + $0xe8] sm:$0xff] }
0x184d   :  { %4311 = vmatpush.bf16.msrb.mxu2 %v13778_v56  ;;  %v13802_v56 = vld [vmem:[%s19544_s8 + $0x3ac] sm:$0xf] }
0x184e   :  { %v4226_v1 = vmul.f32 1.442695, %v4222_v20  ;;  %v13777_v20 = vld [vmem:[%s19542_s6 + $0xe0] sm:$0xff] }
0x1850   :  { %14424 = vpow2.f32 %v4226_v1  ;;  %v13780_v1 = vld [vmem:[%s19542_s6 + $0xf8] sm:$0xff] }
0x1851   :  { %4312 = vmatpush.bf16.msrb.mxu2 %v13777_v20  ;;  %4347 = vmatpush.bf16.msrb.mxu3 %v13780_v1  ;;  %v11413_v20 = vld [vmem:[%s19544_s8 + $0x3b8] sm:$0xf0] }
0x1852   :  { %v11416_v1 = vor.u32 %v13802_v56, %v11413_v20 }
0x1853   :  { %v4215_v57 = vpop.xlane.xlu0 %4214 }
0x1854   :  { %v4223_v58 = vsub.f32 %v4203_v37, %v4215_v57  ;;  %v13779_v57 = vld [vmem:[%s19542_s6 + $0xf0] sm:$0xff] }
0x1855   :  { %4348 = vmatpush.bf16.msrb.mxu3 %v13779_v57  ;;  %v11387_v57 = vld [vmem:[%s19544_s8 + $0x380] sm:$0xf] }
0x1856   :  { %v14425_v59 = vpop.eup %14424  ;;  %v4228_v60 = vmul.f32 1.442695, %v4223_v58 }
0x1857   :  { %v4234_v61 = vsel %vm408_vm8, %v14425_v59, 0.0 }
0x1858   :  { %14426 = vpow2.f32 %v4228_v60  ;;  %4235 = vadd.xlane.f32.xlu1 %v4234_v61 }
0x185b   :  { %v4218_v62 = vpop.xlane.xlu1 %4217 }
0x185c   :  { %v4224_v63 = vsub.f32 %v4206_v21, %v4218_v62 }
0x185e   :  { %v14427_v55 = vpop.eup %14426  ;;  %v4230_v3 = vmul.f32 1.442695, %v4224_v63 }
0x185f   :  { %v4237_v48 = vsel %vm408_vm8, %v14427_v55, 0.0 }
0x1860   :  { %14428 = vpow2.f32 %v4230_v3  ;;  %4238 = vadd.xlane.f32.xlu2 %v4237_v48 }
0x1863   :  { %v4221_v40 = vpop.xlane.xlu2 %4220 }
0x1864   :  { %v4225_v4 = vsub.f32 %v4208_v24, %v4221_v40 }
0x1866   :  { %v14429_v7 = vpop.eup %14428  ;;  %v4232_v8 = vmul.f32 1.442695, %v4225_v4 }
0x1867   :  { %v4240_v49 = vsel %vm408_vm8, %v14429_v7, 0.0 }
0x1868   :  { %14430 = vpow2.f32 %v4232_v8  ;;  %4241 = vadd.xlane.f32.xlu1 %v4240_v49 }
0x186e   :  { %v14431_v0 = vpop.eup %14430 }
0x186f   :  { %v4243_v53 = vsel %vm408_vm8, %v14431_v0, 0.0 }
0x1870   :  { %4244 = vadd.xlane.f32.xlu2 %v4243_v53  ;;  %v4058_v50 = vpop.xlane.xlu0 %4057 }
0x1871   :  { %14432 = vrcp.f32 %v4058_v50 }
0x1877   :  { %v14433_v11 = vpop.eup %14432 }
0x1878   :  { %v4061_v9 = vpop.xlane.xlu1 %4060  ;;  %v4072_v14 = vmul.f32 %v14433_v11, %v14417_v29 }
0x1879   :  { %14434 = vrcp.f32 %v4061_v9 }
0x187f   :  { %v14435_v51 = vpop.eup %14434 }
0x1880   :  { %v4073_v47 = vmul.f32 %v14435_v51, %v14419_v36  ;;  %v4064_v17 = vpop.xlane.xlu2 %4063 }
0x1881   :  { %14436 = vrcp.f32 %v4064_v17 }
0x1882   :  { %v4076_v16 = vpack.c.bf16 %v4073_v47, %v4072_v14 }
0x1884   :  { %11230 = vmatmul.msk.bf16.vlgmr.msra.gmra.mxu1 %vm408_vm8, %v4076_v16 }
0x1887   :  { %v14437_v18 = vpop.eup %14436 }
0x1888   :  { %v4067_v10 = vpop.xlane.xlu0 %4066  ;;  %v4074_v37 = vmul.f32 %v14437_v18, %v14421_v42  ;;  %v13809_v18 = vld [vmem:[%s19544_s8 + $0x3e4] sm:$0xf] }
0x1889   :  { %14438 = vrcp.f32 %v4067_v10  ;;  %v13811_v10 = vld [vmem:[%s19544_s8 + $0x3ec] sm:$0xf0] }
0x188f   :  { %v14439_v5 = vpop.eup %14438 }
0x1890   :  { %v4075_v45 = vmul.f32 %v14439_v5, %v14423_v46 }
0x1892   :  { %v4077_v35 = vpack.c.bf16 %v4075_v45, %v4074_v37  ;;  %v11443_v37 = vld [vmem:[%s19544_s8 + $0x3e8] sm:$0xf]  ;;  %v13812_v45 = vld [vmem:[%s19544_s8 + $0x3f4] sm:$0xf0] }
0x1894   :  { %11231 = vmatmul.msk.bf16.gmra.mxu1 %vm408_vm8, %v4077_v35 }
0x189b   :  { %v4258_v21 = vpop.permute.xlu0 %4257 }
0x189c   :  { %4273 = vmatpush.bf16.msrb.mxu1 %v4258_v21  ;;  %v11444_v21 = vor.u32 %v13812_v45, %v11443_v37  ;;  %v11357_v37 = vld [vmem:[%s19544_s8 + $0x350] sm:$0xf0]  ;;  %v11363_v45 = vld [vmem:[%s19544_s8 + $0x348] sm:$0xf] }
0x18cb   :  { %v4236_v22 = vpop.xlane.xlu1 %4235 }
0x18cc   :  { %14440 = vrcp.f32 %v4236_v22  ;;  %v13810_v22 = vld [vmem:[%s19544_s8 + $0x3ec] sm:$0xf] }
0x18d2   :  { %v14441_v24 = vpop.eup %14440 }
0x18d3   :  { %v4239_v23 = vpop.xlane.xlu2 %4238  ;;  %v4250_v26 = vmul.f32 %v14441_v24, %v14425_v59 }
0x18d4   :  { %14442 = vrcp.f32 %v4239_v23  ;;  %v11445_v23 = vld [vmem:[%s19544_s8 + $0x3f8] sm:$0xf0] }
0x18d5   :  { %v11448_v24 = vor.u32 %v13810_v22, %v11445_v23  ;;  %v13790_v23 = vld [vmem:[%s19544_s8 + $0x34c] sm:$0xf] }
0x18da   :  { %v14443_v25 = vpop.eup %14442 }
0x18db   :  { %v4251_v31 = vmul.f32 %v14443_v25, %v14427_v55  ;;  %v4242_v34 = vpop.xlane.xlu1 %4241  ;;  %v11419_v25 = vld [vmem:[%s19544_s8 + $0x3c0] sm:$0xf] }
0x18dc   :  { %14444 = vrcp.f32 %v4242_v34  ;;  %v11421_v34 = vld [vmem:[%s19544_s8 + $0x3d0] sm:$0xf0] }
0x18dd   :  { %v4254_v33 = vpack.c.bf16 %v4251_v31, %v4250_v26  ;;  %v13807_v26 = vld [vmem:[%s19544_s8 + $0x3cc] sm:$0xf0]  ;;  %v13805_v31 = vld [vmem:[%s19544_s8 + $0x3c4] sm:$0xf] }
0x18de   :  { %v11424_v6 = vor.u32 %v13805_v31, %v11421_v34  ;;  %v13787_v31 = vld [vmem:[%s19544_s8 + $0x32c] sm:$0xf0] }
0x18df   :  { %11260 = vmatmul.msk.bf16.vlgmr.msrb.gmra.mxu1 %vm408_vm8, %v4254_v33  ;;  %v11420_v33 = vor.u32 %v13807_v26, %v11419_v25  ;;  %v11339_v26 = vld [vmem:[%s19544_s8 + $0x320] sm:$0xf] }
0x18e0   :  { %v11340_v34 = vor.u32 %v13787_v31, %v11339_v26  ;;  %v13824_v26 = vld [vmem:[%s19545_s9 + $0x1d8] sm:$0xff] }
0x18e2   :  { %v14445_v27 = vpop.eup %14444 }
0x18e3   :  { %v4245_v29 = vpop.xlane.xlu2 %4244  ;;  %v4252_v19 = vmul.f32 %v14445_v27, %v14429_v7 }
0x18e4   :  { %14446 = vrcp.f32 %v4245_v29  ;;  %v13808_v29 = vld [vmem:[%s19544_s8 + $0x3d4] sm:$0xf0] }
0x18e5   :  { %v11428_v27 = vor.u32 %v13808_v29, %v11427_v2  ;;  %v11341_v2 = vld [vmem:[%s19544_s8 + $0x330] sm:$0xf0]  ;;  %v11347_v29 = vld [vmem:[%s19544_s8 + $0x328] sm:$0xf] }
0x18ea   :  { %v14447_v38 = vpop.eup %14446 }
0x18eb   :  { %v4253_v36 = vmul.f32 %v14447_v38, %v14431_v0  ;;  %v13806_v38 = vld [vmem:[%s19544_s8 + $0x3cc] sm:$0xf] }
0x18ed   :  { %v4255_v54 = vpack.c.bf16 %v4253_v36, %v4252_v19  ;;  %v11429_v19 = vld [vmem:[%s19544_s8 + $0x3d8] sm:$0xf0] }
0x18ee   :  { %v11432_v36 = vor.u32 %v13806_v38, %v11429_v19  ;;  %v13786_v19 = vld [vmem:[%s19544_s8 + $0x32c] sm:$0xf] }
0x18ef   :  { %11261 = vmatmul.msk.bf16.gmra.mxu1 %vm408_vm8, %v4255_v54  ;;  %v11403_v54 = vld [vmem:[%s19544_s8 + $0x3a0] sm:$0xf] }
0x1901   :  { %v4094_v41 = vpop.f32.mrf.mxu1 }
0x1909   :  { %v4096_v42 = vpop.f32.mrf.mxu1 }
0x190a   :  { %v4104_v43 = vpack.c.bf16 %v4096_v42, %v4094_v41  ;;  %v11404_v41 = vor.u32 %v13803_v12, %v11403_v54  ;;  %v11405_v42 = vld [vmem:[%s19544_s8 + $0x3b0] sm:$0xf0]  ;;  %v11323_v12 = vld [vmem:[%s19544_s8 + $0x300] sm:$0xf] }
0x190c   :  { %11257 = vmatmul.msk.bf16.vlgmr.msra.gmra.mxu3 %vm379_vm7, %v4104_v43  ;;  %v11411_v43 = vld [vmem:[%s19544_s8 + $0x3a8] sm:$0xf] }
0x190d   :  { %4634 = vmatpush.bf16.msra.mxu3 %v11448_v24  ;;  %v11365_v24 = vld [vmem:[%s19544_s8 + $0x358] sm:$0xf0] }
0x190e   :  { %v11368_v25 = vor.u32 %v13790_v23, %v11365_v24  ;;  %v13817_v23 = vld [vmem:[%s19545_s9 + $0x1a0] sm:$0xff] }
0x190f   :  { %v13825_v24 = vld [vmem:[%s19545_s9 + $0x1e0] sm:$0xff] }
0x1911   :  { %v4099_v44 = vpop.f32.mrf.mxu1  ;;  %4635 = vmatpush.bf16.msra.mxu3 %v11432_v36  ;;  %v11349_v36 = vld [vmem:[%s19544_s8 + $0x338] sm:$0xf0] }
0x1912   :  { %v11352_v54 = vor.u32 %v13786_v19, %v11349_v36 }
0x1915   :  { %4636 = vmatpush.bf16.msra.mxu3 %v11416_v1 }
0x1919   :  { %v4101_v46 = vpop.f32.mrf.mxu1 }
0x191a   :  { %v4110_v30 = vpack.c.bf16 %v4101_v46, %v4099_v44  ;;  %v13804_v44 = vld [vmem:[%s19544_s8 + $0x3b4] sm:$0xf0]  ;;  %v11408_v46 = vor.u32 %v13801_v39, %v11405_v42  ;;  %v13783_v39 = vld [vmem:[%s19544_s8 + $0x30c] sm:$0xf0] }
0x191c   :  { %11248 = vmatmul.msk.bf16.vlgmr.msra.gmra.mxu2 %vm379_vm7, %v4110_v30  ;;  %v11412_v30 = vor.u32 %v13804_v44, %v11411_v43  ;;  %v11324_v43 = vor.u32 %v13783_v39, %v11323_v12  ;;  %v11325_v44 = vld [vmem:[%s19544_s8 + $0x310] sm:$0xf0] }
0x191d   :  { %4620 = vmatpush.bf16.msra.mxu2 %v11444_v21 }
0x1921   :  { %4621 = vmatpush.bf16.msra.mxu2 %v11428_v27 }
0x1925   :  { %4622 = vmatpush.bf16.msra.mxu2 %v11412_v30  ;;  %v13784_v30 = vld [vmem:[%s19544_s8 + $0x314] sm:$0xf0] }
0x195c   :  { %v4275_v58 = vpop.f32.mrf.mxu1 }
0x1964   :  { %v4277_v59 = vpop.f32.mrf.mxu1 }
0x1965   :  { %v4285_v60 = vpack.c.bf16 %v4277_v59, %v4275_v58  ;;  %v13799_v58 = vld [vmem:[%s19544_s8 + $0x38c] sm:$0xf0]  ;;  %v13797_v59 = vld [vmem:[%s19544_s8 + $0x384] sm:$0xf] }
0x1967   :  { %11274 = vmatmul.msk.bf16.vlgmr.msrb.gmra.mxu2 %vm379_vm7, %v4285_v60  ;;  %v11388_v60 = vor.u32 %v13799_v58, %v11387_v57  ;;  %v13782_v57 = vld [vmem:[%s19544_s8 + $0x30c] sm:$0xf]  ;;  %v11333_v58 = vld [vmem:[%s19544_s8 + $0x318] sm:$0xf0] }
0x196c   :  { %v4280_v61 = vpop.f32.mrf.mxu1 }
0x1974   :  { %v4282_v62 = vpop.f32.mrf.mxu1 }
0x1975   :  { %v4321_v63 = vpack.c.bf16 %v4282_v62, %v4280_v61  ;;  %v11389_v61 = vld [vmem:[%s19544_s8 + $0x390] sm:$0xf0]  ;;  %v11395_v62 = vld [vmem:[%s19544_s8 + $0x388] sm:$0xf] }
0x1977   :  { %11287 = vmatmul.msk.bf16.vlgmr.msrb.gmra.mxu3 %vm379_vm7, %v4321_v63  ;;  %v13800_v63 = vld [vmem:[%s19544_s8 + $0x394] sm:$0xf0] }
0x198f   :  { %v4168_v3 = vpop.f32.mrf.mxu3 }
0x1997   :  { %v4170_v40 = vpop.f32.mrf.mxu3 }
0x199f   :  { %v4139_v55 = vpop.f32.mrf.mxu2 }
0x19a0   :  { %v4169_v7 = vadd.f32 %v4168_v3, %v4139_v55  ;;  %v11392_v55 = vor.u32 %v13797_v59, %v11389_v61  ;;  %v11396_v3 = vor.u32 %v13800_v63, %v11395_v62  ;;  %v11336_v59 = vor.u32 %v13782_v57, %v11333_v58 }
0x19a2   :  { %4623 = vmatpush.bf16.msra.mxu2 %v11396_v3 }
0x19a7   :  { %v4141_v48 = vpop.f32.mrf.mxu2 }
0x19a8   :  { %v4171_v9 = vadd.f32 %v4170_v40, %v4141_v48  ;;  %v13798_v48 = vld [vmem:[%s19544_s8 + $0x38c] sm:$0xf]  ;;  %v11397_v40 = vld [vmem:[%s19544_s8 + $0x398] sm:$0xf0] }
0x19ea   :  { %v4314_v4 = vpop.f32.mrf.mxu2 }
0x19eb   :  { %v4319_v8 = vadd.f32 %v4314_v4, %v4169_v7  ;;  %v11400_v4 = vor.u32 %v13798_v48, %v11397_v40  ;;  %v11371_v7 = vld [vmem:[%s19544_s8 + $0x360] sm:$0xf] }
0x19ed   :  { %4637 = vmatpush.bf16.msra.mxu3 %v11400_v4 }
0x19f2   :  { %v4316_v50 = vpop.f32.mrf.mxu2 }
0x19f3   :  { %v4320_v51 = vadd.f32 %v4316_v50, %v4171_v9  ;;  %v11373_v50 = vld [vmem:[%s19544_s8 + $0x370] sm:$0xf0]  ;;  %v11379_v9 = vld [vmem:[%s19544_s8 + $0x368] sm:$0xf] }
0x19fa   :  { %v4350_v49 = vpop.f32.mrf.mxu3 }
0x19fb   :  { %v4355_v0 = vadd.f32 %v4350_v49, %v4319_v8  ;;  %v13795_v8 = vld [vmem:[%s19544_s8 + $0x36c] sm:$0xf0]  ;;  %v13793_v49 = vld [vmem:[%s19544_s8 + $0x364] sm:$0xf] }
0x19fd   :  { %v16904_v53 = vadd.f32 %v4355_v0, %v16604_v52  ;;  %v11435_v52 = vld [vmem:[%s19544_s8 + $0x3e0] sm:$0xf]  ;;  %v11372_v0 = vor.u32 %v13795_v8, %v11371_v7 }
0x19fe   :  { %v11436_v5 = vor.u32 %v13811_v10, %v11435_v52  ;;  %v11355_v10 = vld [vmem:[%s19544_s8 + $0x340] sm:$0xf] }
0x19ff   :  { %v4361_v11 = vmul.f32 %v16904_v53, %v16904_v53 }
0x1a00   :  { %4592 = vmatpush.bf16.msra.mxu0 %v11436_v5  ;;  %v13789_v5 = vld [vmem:[%s19544_s8 + $0x344] sm:$0xf] }
0x1a01   :  { %4363 = vadd.xlane.f32.xlu1 %v4361_v11  ;;  %v13796_v11 = vld [vmem:[%s19544_s8 + $0x374] sm:$0xf0]  ;;  %v11360_v21 = vor.u32 %v13789_v5, %v11357_v37 }
0x1a02   :  { %v4352_v14 = vpop.f32.mrf.mxu3  ;;  %v13828_v37 = vld [vmem:[%s19545_s9 + $0x1f8] sm:$0xff] }
0x1a03   :  { %v4356_v47 = vadd.f32 %v4352_v14, %v4320_v51  ;;  %v11376_v51 = vor.u32 %v13793_v49, %v11373_v50  ;;  %v11380_v14 = vor.u32 %v13796_v11, %v11379_v9 }
0x1a04   :  { %4593 = vmatpush.bf16.msra.mxu0 %v11420_v33  ;;  %v13785_v33 = vld [vmem:[%s19544_s8 + $0x324] sm:$0xf] }
0x1a05   :  { %v16909_v16 = vadd.f32 %v4356_v47, %v16609_v15  ;;  %v11437_v15 = vld [vmem:[%s19544_s8 + $0x3f0] sm:$0xf0]  ;;  %v13794_v47 = vld [vmem:[%s19544_s8 + $0x36c] sm:$0xf]  ;;  %4624 = vmatpush.bf16.msra.mxu2 %v11380_v14  ;;  %v11344_v27 = vor.u32 %v13785_v33, %v11341_v2  ;;  %v14233_v14 = vld [vmem:[%s19543_s7 + $0x3] ss:$0 sm:$0xff] }
0x1a06   :  { %v11440_v35 = vor.u32 %v13809_v18, %v11437_v15  ;;  %v13791_v18 = vld [vmem:[%s19544_s8 + $0x34c] sm:$0xf0] }
0x1a07   :  { %v4362_v17 = vmul.f32 %v16909_v16, %v16909_v16  ;;  %v11356_v15 = vor.u32 %v13791_v18, %v11355_v10 }
0x1a08   :  { %4606 = vmatpush.bf16.msra.mxu1 %v11440_v35  ;;  %4594 = vmatpush.bf16.msra.mxu0 %v11404_v41  ;;  %v13792_v35 = vld [vmem:[%s19544_s8 + $0x354] sm:$0xf0]  ;;  %v13781_v41 = vld [vmem:[%s19544_s8 + $0x304] sm:$0xf] }
0x1a09   :  { %4365 = vadd.xlane.f32.xlu2 %v4362_v17  ;;  %v11381_v17 = vld [vmem:[%s19544_s8 + $0x378] sm:$0xf0]  ;;  %v11364_v22 = vor.u32 %v13792_v35, %v11363_v45  ;;  %v11328_v20 = vor.u32 %v13781_v41, %v11325_v44  ;;  %v13819_v45 = vld [vmem:[%s19545_s9 + $0x1b0] sm:$0xff]  ;;  %v13821_v44 = vld [vmem:[%s19545_s9 + $0x1c0] sm:$0xff] }
0x1a0a   :  { %v11384_v52 = vor.u32 %v13794_v47, %v11381_v17  ;;  %v13827_v35 = vld [vmem:[%s19545_s9 + $0x1f0] sm:$0xff] }
0x1a0b   :  { %4625 = vmatpush.bf16.msra.mxu2 %v11364_v22  ;;  %v13826_v22 = vld [vmem:[%s19545_s9 + $0x1e8] sm:$0xff] }
0x1a0c   :  { %4607 = vmatpush.bf16.msra.mxu1 %v11424_v6  ;;  %4595 = vmatpush.bf16.msra.mxu0 %v11388_v60  ;;  %v13788_v6 = vld [vmem:[%s19544_s8 + $0x334] sm:$0xf0] }
0x1a0d   :  { %4638 = vmatpush.bf16.msra.mxu3 %v11384_v52  ;;  %v11348_v38 = vor.u32 %v13788_v6, %v11347_v29  ;;  %v13815_v29 = vld [vmem:[%s19545_s9 + $0x190] sm:$0xff] }
0x1a0e   :  { %v13823_v6 = vld [vmem:[%s19545_s9 + $0x1d0] sm:$0xff] }
0x1a0f   :  { %4626 = vmatpush.bf16.msra.mxu2 %v11348_v38  ;;  %v13822_v38 = vld [vmem:[%s19545_s9 + $0x1c8] sm:$0xff] }
0x1a10   :  { %4608 = vmatpush.bf16.msra.mxu1 %v11408_v46  ;;  %4596 = vmatpush.bf16.msra.mxu0 %v11372_v0  ;;  %v11331_v46 = vld [vmem:[%s19544_s8 + $0x308] sm:$0xf] }
0x1a11   :  { %4639 = vmatpush.bf16.msra.mxu3 %v11368_v25  ;;  %v11332_v1 = vor.u32 %v13784_v30, %v11331_v46  ;;  %v13816_v25 = vld [vmem:[%s19545_s9 + $0x198] sm:$0xff] }
0x1a13   :  { %4627 = vmatpush.bf16.msra.mxu2 %v11332_v1 }
0x1a14   :  { %4609 = vmatpush.bf16.msra.mxu1 %v11392_v55  ;;  %4597 = vmatpush.bf16.msra.mxu0 %v11356_v15  ;;  %v13820_v15 = vld [vmem:[%s19545_s9 + $0x1b8] sm:$0xff] }
0x1a15   :  { %4640 = vmatpush.bf16.msra.mxu3 %v11352_v54 }
0x1a18   :  { %4610 = vmatpush.bf16.msra.mxu1 %v11376_v51  ;;  %4598 = vmatpush.bf16.msra.mxu0 %v11340_v34 }
0x1a19   :  { %4641 = vmatpush.bf16.msra.mxu3 %v11336_v59 }
0x1a1c   :  { %4611 = vmatpush.bf16.msra.mxu1 %v11360_v21  ;;  %4599 = vmatpush.bf16.msra.mxu0 %v11324_v43  ;;  %v13818_v21 = vld [vmem:[%s19545_s9 + $0x1a8] sm:$0xff]  ;;  %v13813_v43 = vld [vmem:[%s19545_s9 + $0x180] sm:$0xff] }
0x1a20   :  { %4612 = vmatpush.bf16.msra.mxu1 %v11344_v27  ;;  %4863 = vmatpush.bf16.msrb.mxu0 %v13820_v15  ;;  %v13814_v27 = vld [vmem:[%s19545_s9 + $0x188] sm:$0xff] }
0x1a24   :  { %4613 = vmatpush.bf16.msra.mxu1 %v11328_v20  ;;  %4864 = vmatpush.bf16.msrb.mxu0 %v13819_v45 }
0x1a28   :  { %4877 = vmatpush.bf16.msrb.mxu1 %v13828_v37  ;;  %4865 = vmatpush.bf16.msrb.mxu0 %v13818_v21 }
0x1a2c   :  { %4878 = vmatpush.bf16.msrb.mxu1 %v13827_v35  ;;  %4866 = vmatpush.bf16.msrb.mxu0 %v13817_v23 }
0x1a30   :  { %4879 = vmatpush.bf16.msrb.mxu1 %v13826_v22  ;;  %4867 = vmatpush.bf16.msrb.mxu0 %v13816_v25 }
0x1a34   :  { %4880 = vmatpush.bf16.msrb.mxu1 %v13825_v24  ;;  %4868 = vmatpush.bf16.msrb.mxu0 %v13815_v29 }
0x1a38   :  { %4881 = vmatpush.bf16.msrb.mxu1 %v13824_v26  ;;  %4869 = vmatpush.bf16.msrb.mxu0 %v13814_v27 }
0x1a3c   :  { %4882 = vmatpush.bf16.msrb.mxu1 %v13823_v6  ;;  %4870 = vmatpush.bf16.msrb.mxu0 %v13813_v43 }
0x1a40   :  { %4883 = vmatpush.bf16.msrb.mxu1 %v13822_v38 }
0x1a44   :  { %4884 = vmatpush.bf16.msrb.mxu1 %v13821_v44 }
0x1a74   :  { %v4364_v42 = vpop.xlane.xlu1 %4363 }
0x1a75   :  { %v4367_v56 = vmul.f32 %v4364_v42, %v14995_v32 }
0x1a77   :  { %v4369_v60 = vadd.f32 1e-05, %v4367_v56 }
0x1a79   :  { %14448 = vrsqrt.f32 %v4369_v60  ;;  %vm4377_vm10 = vweird.f32 %v4369_v60 }
0x1a7c   :  { %v4366_v61 = vpop.xlane.xlu2 %4365 }
0x1a7d   :  { %v4368_v62 = vmul.f32 %v4366_v61, %v14995_v32 }
0x1a7f   :  { %v14449_v63 = vpop.eup %14448  ;;  %v4370_v55 = vadd.f32 1e-05, %v4368_v62 }
0x1a80   :  { %v4372_v3 = vmul.f32 %v14449_v63, %v4369_v60  ;;  %vm4378_vm9 = vweird.f32 %v14449_v63 }
0x1a81   :  { %14450 = vrsqrt.f32 %v4370_v55  ;;  %vm4379_vm11 = vmor %vm4377_vm10, %vm4378_vm9  ;;  %vm4387_vm13 = vweird.f32 %v4370_v55 }
0x1a82   :  { %v4373_v48 = vmul.f32 %v14449_v63, %v4372_v3 }
0x1a84   :  { %v4374_v40 = vmul.f32 0.5, %v4373_v48 }
0x1a86   :  { %v4375_v4 = vsub.f32 1.5, %v4374_v40 }
0x1a87   :  { %v14451_v7 = vpop.eup %14450 }
0x1a88   :  { %v4382_v8 = vmul.f32 %v14451_v7, %v4370_v55  ;;  %v4376_v49 = vmul.f32 %v14449_v63, %v4375_v4  ;;  %vm4388_vm12 = vweird.f32 %v14451_v7 }
0x1a89   :  { %vm4389_vm14 = vmor %vm4387_vm13, %vm4388_vm12 }
0x1a8a   :  { %v4383_v0 = vmul.f32 %v14451_v7, %v4382_v8  ;;  %v4380_v9 = vsel %vm4379_vm11, %v14449_v63, %v4376_v49 }
0x1a8b   :  { %v4391_v47 = vmul.f32 %v4380_v9, %v16904_v53 }
0x1a8c   :  { %v4384_v50 = vmul.f32 0.5, %v4383_v0 }
0x1a8d   :  { %v4396_v10 = vmul.f32 %v14233_v14, %v4391_v47 }
0x1a8e   :  { %v4385_v11 = vsub.f32 1.5, %v4384_v50 }
0x1a90   :  { %v4386_v51 = vmul.f32 %v14451_v7, %v4385_v11 }
0x1a92   :  { %v4390_v17 = vsel %vm4389_vm14, %v14451_v7, %v4386_v51 }
0x1a93   :  { %v4392_v52 = vmul.f32 %v4390_v17, %v16909_v16 }
0x1a95   :  { %v4397_v18 = vmul.f32 %v14233_v14, %v4392_v52 }
0x1a97   :  { %v4398_v5 = vpack.c.bf16 %v4397_v18, %v4396_v10 }
0x1a99   :  { %4600 = vmatmul.bf16.vlgmr.msra.gmra.mxu0 %v4398_v5  ;;  %4614 = vmatmul.bf16.vlgmr.msra.gmra.mxu1 %v4398_v5 }
0x1a9a   :  { %4628 = vmatmul.bf16.vlgmr.msra.gmra.mxu2 %v4398_v5  ;;  %4642 = vmatmul.bf16.vlgmr.msra.gmra.mxu3 %v4398_v5 }
0x1b16   :  { %v17142_v31 = vpop.f32.mrf.mxu0  ;;  %v17144_v33 = vpop.f32.mrf.mxu1 }
0x1b17   :  { %v11449_v34 = vmul.f32 -1.442695, %v17142_v31  ;;  %v11450_v2 = vmul.f32 -1.442695, %v17144_v33 }
0x1b19   :  { %14452 = vpow2.f32 %v11449_v34 }
0x1b1a   :  { %14454 = vpow2.f32 %v11450_v2 }
0x1b1d   :  { %v4629_v50 = vpop.f32.mrf.mxu2  ;;  %v4643_v18 = vpop.f32.mrf.mxu3 }
0x1b1e   :  { %v17160_v19 = vpop.f32.mrf.mxu0  ;;  %v17162_v36 = vpop.f32.mrf.mxu1 }
0x1b1f   :  { %v14453_v54 = vpop.eup %14452  ;;  %v11451_v12 = vmul.f32 -1.442695, %v17160_v19  ;;  %v11452_v42 = vmul.f32 -1.442695, %v17162_v36 }
0x1b20   :  { %v14455_v39 = vpop.eup %14454  ;;  %v4660_v41 = vadd.f32 1.0, %v14453_v54 }
0x1b21   :  { %v4661_v46 = vadd.f32 1.0, %v14455_v39  ;;  %14456 = vpow2.f32 %v11451_v12 }
0x1b22   :  { %14458 = vrcp.f32 %v4660_v41  ;;  %v4675_v40 = vand.u32 2147483648, %v4660_v41  ;;  %vm4669_vm0 = vweird.f32 %v4660_v41  ;;  %v4673_v4 = vand.u32 2147483647, %v4660_v41 }
0x1b23   :  { %14460 = vrcp.f32 %v4661_v46  ;;  %v4688_v0 = vand.u32 2147483647, %v4661_v46  ;;  %v4690_v51 = vand.u32 2147483648, %v4661_v46  ;;  %vm4684_vm3 = vweird.f32 %v4661_v46 }
0x1b24   :  { %14462 = vpow2.f32 %v11452_v42  ;;  %v4676_v47 = vor.u32 1.1754944e-38, %v4675_v40  ;;  %vm4674_vm4 = vcmp.eq.f32.partialorder %v4673_v4, 8.507059e+37  ;;  %v11704_v40 = vld [vmem:[%s19538_s5 + $0x4e8] sm:$0xf]  ;;  %v13860_v4 = vld [vmem:[%s19538_s5 + $0x4f4] sm:$0xf0] }
0x1b25   :  { %vm4689_vm9 = vcmp.eq.f32.partialorder %v4688_v0, 8.507059e+37  ;;  %v4691_v21 = vor.u32 1.1754944e-38, %v4690_v51  ;;  %v11705_v8 = vor.u32 %v13860_v4, %v11704_v40  ;;  %v11706_v0 = vld [vmem:[%s19538_s5 + $0x4f8] sm:$0xf0]  ;;  %v13853_v51 = vld [vmem:[%s19538_s5 + $0x4c4] sm:$0xf] }
0x1b26   :  { %v11618_v40 = vld [vmem:[%s19538_s5 + $0x450] sm:$0xf0]  ;;  %v11624_v4 = vld [vmem:[%s19538_s5 + $0x448] sm:$0xf] }
0x1b27   :  { %v14457_v30 = vpop.eup %14456  ;;  %5154 = vmatpush.bf16.msra.mxu0 %v11705_v8 }
0x1b28   :  { %v14459_v56 = vpop.eup %14458  ;;  %v4662_v20 = vadd.f32 1.0, %v14457_v30  ;;  %v4645_v30 = vpop.f32.mrf.mxu3 }
0x1b29   :  { %v14461_v1 = vpop.eup %14460  ;;  %v4665_v57 = vmul.f32 %v14459_v56, %v4660_v41  ;;  %vm4670_vm15 = vweird.f32 %v14459_v56  ;;  %v4631_v41 = vpop.f32.mrf.mxu2 }
0x1b2a   :  { %v14463_v58 = vpop.eup %14462  ;;  %v4680_v59 = vmul.f32 %v14461_v1, %v4661_v46  ;;  %14464 = vrcp.f32 %v4662_v20  ;;  %vm17172_vm1 = vmor %vm4669_vm0, %vm4670_vm15  ;;  %vm4685_vm2 = vweird.f32 %v14461_v1  ;;  %v4705_v17 = vand.u32 2147483648, %v4662_v20 }
0x1b2b   :  { %v4666_v60 = vsub.f32 1.0, %v4665_v57  ;;  %v4663_v61 = vadd.f32 1.0, %v14463_v58  ;;  %vm17178_vm5 = vmor %vm4684_vm3, %vm4685_vm2  ;;  %v4703_v15 = vand.u32 2147483647, %v4662_v20  ;;  %vm4699_vm10 = vweird.f32 %v4662_v20 }
0x1b2c   :  { %v4681_v62 = vsub.f32 1.0, %v4680_v59  ;;  %v4706_v24 = vor.u32 1.1754944e-38, %v4705_v17  ;;  %v11688_v17 = vld [vmem:[%s19538_s5 + $0x4c8] sm:$0xf] }
0x1b2d   :  { %v4667_v63 = vmul.f32 %v14459_v56, %v4666_v60  ;;  %14466 = vrcp.f32 %v4663_v61  ;;  %v4720_v23 = vand.u32 2147483648, %v4663_v61  ;;  %v4718_v26 = vand.u32 2147483647, %v4663_v61 }
0x1b2e   :  { %v4682_v55 = vmul.f32 %v14461_v1, %v4681_v62  ;;  %vm4704_vm13 = vcmp.eq.f32.partialorder %v4703_v15, 8.507059e+37  ;;  %vm4714_vm14 = vweird.f32 %v4663_v61  ;;  %v11690_v15 = vld [vmem:[%s19538_s5 + $0x4d8] sm:$0xf0] }
0x1b2f   :  { %v4668_v3 = vadd.f32 %v14459_v56, %v4667_v63  ;;  %v4721_v54 = vor.u32 1.1754944e-38, %v4720_v23  ;;  %vm4719_vm0 = vcmp.eq.f32.partialorder %v4718_v26, 8.507059e+37  ;;  %v11666_v23 = vld [vmem:[%s19538_s5 + $0x4b0] sm:$0xf0] }
0x1b30   :  { %v14465_v48 = vpop.eup %14464  ;;  %v4683_v49 = vadd.f32 %v14461_v1, %v4682_v55  ;;  %v11696_v55 = vld [vmem:[%s19538_s5 + $0x4e0] sm:$0xf] }
0x1b31   :  { %v4695_v7 = vmul.f32 %v14465_v48, %v4662_v20  ;;  %v4672_v11 = vsel %vm17172_vm1, %v14459_v56, %v4668_v3  ;;  %vm4700_vm6 = vweird.f32 %v14465_v48  ;;  %v13857_v3 = vld [vmem:[%s19538_s5 + $0x4e4] sm:$0xf] }
0x1b32   :  { %v4677_v37 = vsel %vm4674_vm4, %v4676_v47, %v4672_v11  ;;  %v4687_v45 = vsel %vm17178_vm5, %v14461_v1, %v4683_v49  ;;  %vm4701_vm11 = vmor %vm4699_vm10, %vm4700_vm6  ;;  %v13858_v49 = vld [vmem:[%s19538_s5 + $0x4ec] sm:$0xf]  ;;  %v13855_v11 = vld [vmem:[%s19538_s5 + $0x4cc] sm:$0xf0] }
0x1b33   :  { %v14467_v9 = vpop.eup %14466  ;;  %v4696_v14 = vsub.f32 1.0, %v4695_v7  ;;  %v4724_v34 = vmul.f32 %v4677_v37, %v17142_v31  ;;  %v4692_v2 = vsel %vm4689_vm9, %v4691_v21, %v4687_v45  ;;  %v11682_v47 = vld [vmem:[%s19538_s5 + $0x4d0] sm:$0xf0]  ;;  %v11664_v45 = vld [vmem:[%s19538_s5 + $0x4a0] sm:$0xf] }
0x1b34   :  { %v4710_v52 = vmul.f32 %v14467_v9, %v4663_v61  ;;  %vm4715_vm12 = vweird.f32 %v14467_v9  ;;  %v4725_v12 = vmul.f32 %v4692_v2, %v17144_v33  ;;  %v11685_v10 = vor.u32 %v13853_v51, %v11682_v47  ;;  %v13849_v21 = vld [vmem:[%s19538_s5 + $0x4a4] sm:$0xf]  ;;  %v13850_v2 = vld [vmem:[%s19538_s5 + $0x4ac] sm:$0xf]  ;;  %v13835_v51 = vld [vmem:[%s19538_s5 + $0x42c] sm:$0xf0] }
0x1b35   :  { %v4697_v5 = vmul.f32 %v14465_v48, %v4696_v14  ;;  %vm4716_vm15 = vmor %vm4714_vm14, %vm4715_vm12  ;;  %v4728_v42 = vmul.f32 %v4724_v34, %v4629_v50  ;;  %v11709_v50 = vor.u32 %v13858_v49, %v11706_v0  ;;  %v11669_v26 = vor.u32 %v13849_v21, %v11666_v23  ;;  %v13838_v0 = vld [vmem:[%s19538_s5 + $0x44c] sm:$0xf]  ;;  %v11584_v21 = vld [vmem:[%s19538_s5 + $0x400] sm:$0xf] }
0x1b36   :  { %v4711_v35 = vsub.f32 1.0, %v4710_v52  ;;  %v4729_v56 = vmul.f32 %v4725_v12, %v4643_v18  ;;  %v13856_v52 = vld [vmem:[%s19538_s5 + $0x4d4] sm:$0xf0]  ;;  %v13829_v23 = vld [vmem:[%s19538_s5 + $0x404] sm:$0xf] }
0x1b37   :  { %v4698_v22 = vadd.f32 %v14465_v48, %v4697_v5  ;;  %5168 = vmatpush.bf16.msra.mxu1 %v11709_v50  ;;  %v11689_v18 = vor.u32 %v13856_v52, %v11688_v17  ;;  %v13854_v5 = vld [vmem:[%s19538_s5 + $0x4cc] sm:$0xf]  ;;  %v11626_v50 = vld [vmem:[%s19538_s5 + $0x458] sm:$0xf0]  ;;  %v11602_v17 = vld [vmem:[%s19538_s5 + $0x430] sm:$0xf0] }
0x1b38   :  { %v4712_v25 = vmul.f32 %v14467_v9, %v4711_v35  ;;  %v11693_v37 = vor.u32 %v13854_v5, %v11690_v15  ;;  %v13851_v35 = vld [vmem:[%s19538_s5 + $0x4ac] sm:$0xf0]  ;;  %v11608_v52 = vld [vmem:[%s19538_s5 + $0x428] sm:$0xf]  ;;  %v13834_v15 = vld [vmem:[%s19538_s5 + $0x42c] sm:$0xf] }
0x1b39   :  { %v4702_v29 = vsel %vm4701_vm11, %v14465_v48, %v4698_v22  ;;  %5155 = vmatpush.bf16.msra.mxu0 %v11689_v18  ;;  %v11665_v22 = vor.u32 %v13851_v35, %v11664_v45 }
0x1b3a   :  { %v4707_v6 = vsel %vm4704_vm13, %v4706_v24, %v4702_v29  ;;  %v4713_v27 = vadd.f32 %v14467_v9, %v4712_v25  ;;  %v11672_v24 = vld [vmem:[%s19538_s5 + $0x4a8] sm:$0xf]  ;;  %v13852_v25 = vld [vmem:[%s19538_s5 + $0x4b4] sm:$0xf0]  ;;  %v11674_v29 = vld [vmem:[%s19538_s5 + $0x4b8] sm:$0xf0] }
0x1b3b   :  { %v4726_v38 = vmul.f32 %v4707_v6, %v17160_v19  ;;  %5169 = vmatpush.bf16.msra.mxu1 %v11693_v37  ;;  %v11673_v34 = vor.u32 %v13852_v25, %v11672_v24  ;;  %v11677_v6 = vor.u32 %v13850_v2, %v11674_v29  ;;  %v11610_v37 = vld [vmem:[%s19538_s5 + $0x438] sm:$0xf0]  ;;  %v13832_v2 = vld [vmem:[%s19538_s5 + $0x414] sm:$0xf0] }
0x1b3c   :  { %v4717_v39 = vsel %vm4716_vm15, %v14467_v9, %v4713_v27  ;;  %v11680_v9 = vld [vmem:[%s19538_s5 + $0x4c0] sm:$0xf]  ;;  %v11613_v45 = vor.u32 %v13834_v15, %v11610_v37 }
0x1b3d   :  { %v4722_v43 = vsel %vm4719_vm0, %v4721_v54, %v4717_v39  ;;  %v4730_v44 = vmul.f32 %v4726_v38, %v4631_v41  ;;  %v11681_v14 = vor.u32 %v13855_v11, %v11680_v9  ;;  %5156 = vmatpush.bf16.msra.mxu0 %v11673_v34  ;;  %v11648_v27 = vld [vmem:[%s19538_s5 + $0x480] sm:$0xf]  ;;  %v13847_v38 = vld [vmem:[%s19538_s5 + $0x48c] sm:$0xf0]  ;;  %v13845_v54 = vld [vmem:[%s19538_s5 + $0x484] sm:$0xf]  ;;  %v11629_v9 = vor.u32 %v13838_v0, %v11626_v50 }
0x1b3e   :  { %v4727_v31 = vmul.f32 %v4722_v43, %v17162_v36  ;;  %v11649_v12 = vor.u32 %v13847_v38, %v11648_v27  ;;  %v11650_v39 = vld [vmem:[%s19538_s5 + $0x490] sm:$0xf0]  ;;  %v11656_v41 = vld [vmem:[%s19538_s5 + $0x488] sm:$0xf]  ;;  %v11600_v11 = vld [vmem:[%s19538_s5 + $0x420] sm:$0xf] }
0x1b3f   :  { %v4732_v46 = vpack.c.bf16 %v4730_v44, %v4728_v42  ;;  %5170 = vmatpush.bf16.msra.mxu1 %v11677_v6  ;;  %v13848_v42 = vld [vmem:[%s19538_s5 + $0x494] sm:$0xf0]  ;;  %v11653_v43 = vor.u32 %v13845_v54, %v11650_v39  ;;  %v11601_v47 = vor.u32 %v13835_v51, %v11600_v11  ;;  %v11592_v34 = vld [vmem:[%s19538_s5 + $0x408] sm:$0xf]  ;;  %v13830_v27 = vld [vmem:[%s19538_s5 + $0x40c] sm:$0xf] }
0x1b40   :  { %v4731_v20 = vmul.f32 %v4727_v31, %v4645_v30  ;;  %v11657_v44 = vor.u32 %v13848_v42, %v11656_v41  ;;  %v13846_v31 = vld [vmem:[%s19538_s5 + $0x48c] sm:$0xf]  ;;  %v11593_v6 = vor.u32 %v13832_v2, %v11592_v34  ;;  %v11594_v38 = vld [vmem:[%s19538_s5 + $0x418] sm:$0xf0]  ;;  %v14716_v11 = vld [vmem:[%s19540_s1] sm:$0xff] }
0x1b41   :  { %4871 = vmatmul.bf16.vlgmr.msrb.gmra.mxu0 %v4732_v46  ;;  %v11658_v46 = vld [vmem:[%s19538_s5 + $0x498] sm:$0xf0] }
0x1b42   :  { %v4733_v1 = vpack.c.bf16 %v4731_v20, %v4729_v56  ;;  %v11661_v30 = vor.u32 %v13846_v31, %v11658_v46  ;;  %5157 = vmatpush.bf16.msra.mxu0 %v11657_v44  ;;  %v11632_v56 = vld [vmem:[%s19538_s5 + $0x460] sm:$0xf]  ;;  %v13843_v20 = vld [vmem:[%s19538_s5 + $0x46c] sm:$0xf0] }
0x1b44   :  { %4885 = vmatmul.bf16.vlgmr.msrb.gmra.mxu1 %v4733_v1  ;;  %v13841_v1 = vld [vmem:[%s19538_s5 + $0x464] sm:$0xf] }
0x1b45   :  { %5171 = vmatpush.bf16.msra.mxu1 %v11661_v30 }
0x1bbe   :  { %v4872_v19 = vpop.f32.mrf.mxu0 }
0x1bc1   :  { %v4886_v57 = vpop.f32.mrf.mxu1 }
0x1bc2   :  { %v4887_v58 = vadd.f32 %v4886_v57, %v4872_v19  ;;  %v11633_v19 = vor.u32 %v13843_v20, %v11632_v56  ;;  %v11634_v57 = vld [vmem:[%s19538_s5 + $0x470] sm:$0xf0] }
0x1bc4   :  { %v17189_v33 = vadd.f32 %v4887_v58, %v16904_v53  ;;  %v13859_v53 = vld [vmem:[%s19538_s5 + $0x4ec] sm:$0xf0]  ;;  %v11640_v58 = vld [vmem:[%s19538_s5 + $0x468] sm:$0xf] }
0x1bc5   :  { %v11697_v48 = vor.u32 %v13859_v53, %v11696_v55  ;;  %v11616_v53 = vld [vmem:[%s19538_s5 + $0x440] sm:$0xf] }
0x1bc6   :  { %v4895_v59 = vmul.f32 %v17189_v33, %v17189_v33  ;;  %v4874_v60 = vpop.f32.mrf.mxu0 }
0x1bc7   :  { %5126 = vmatpush.bf16.msrb.mxu2 %v11697_v48  ;;  %v13837_v48 = vld [vmem:[%s19538_s5 + $0x444] sm:$0xf] }
0x1bc8   :  { %4897 = vadd.xlane.f32.xlu1 %v4895_v59  ;;  %v13844_v59 = vld [vmem:[%s19538_s5 + $0x474] sm:$0xf0]  ;;  %v11621_v8 = vor.u32 %v13837_v48, %v11618_v40 }
0x1bc9   :  { %v4888_v61 = vpop.f32.mrf.mxu1 }
0x1bca   :  { %v4889_v36 = vadd.f32 %v4888_v61, %v4874_v60  ;;  %v11637_v60 = vor.u32 %v13841_v1, %v11634_v57  ;;  %v11641_v61 = vor.u32 %v13844_v59, %v11640_v58 }
0x1bcb   :  { %5127 = vmatpush.bf16.msrb.mxu2 %v11681_v14  ;;  %v13833_v14 = vld [vmem:[%s19538_s5 + $0x424] sm:$0xf] }
0x1bcc   :  { %v17194_v62 = vadd.f32 %v4889_v36, %v16909_v16  ;;  %v11698_v16 = vld [vmem:[%s19538_s5 + $0x4f0] sm:$0xf0]  ;;  %v13842_v36 = vld [vmem:[%s19538_s5 + $0x46c] sm:$0xf]  ;;  %5158 = vmatpush.bf16.msra.mxu0 %v11641_v61  ;;  %v11605_v18 = vor.u32 %v13833_v14, %v11602_v17  ;;  %v14234_v61 = vld [vmem:[%s19537_s4 + $0x4] ss:$0 sm:$0xff] }
0x1bcd   :  { %v11701_v7 = vor.u32 %v13857_v3, %v11698_v16  ;;  %v13839_v3 = vld [vmem:[%s19538_s5 + $0x44c] sm:$0xf0]  ;;  %v14717_v14 = vld [vmem:[%s19539_s2] sm:$0xff] }
0x1bce   :  { %v4896_v63 = vmul.f32 %v17194_v62, %v17194_v62  ;;  %v11617_v16 = vor.u32 %v13839_v3, %v11616_v53 }
0x1bcf   :  { %5140 = vmatpush.bf16.msrb.mxu3 %v11701_v7  ;;  %5128 = vmatpush.bf16.msrb.mxu2 %v11665_v22  ;;  %v13840_v7 = vld [vmem:[%s19538_s5 + $0x454] sm:$0xf0]  ;;  %v13831_v22 = vld [vmem:[%s19538_s5 + $0x40c] sm:$0xf0] }
0x1bd0   :  { %4899 = vadd.xlane.f32.xlu0 %v4896_v63  ;;  %v11642_v63 = vld [vmem:[%s19538_s5 + $0x478] sm:$0xf0]  ;;  %v11625_v49 = vor.u32 %v13840_v7, %v11624_v4  ;;  %v11585_v25 = vor.u32 %v13831_v22, %v11584_v21 }
0x1bd1   :  { %v11645_v55 = vor.u32 %v13842_v36, %v11642_v63 }
0x1bd2   :  { %5159 = vmatpush.bf16.msra.mxu0 %v11625_v49 }
0x1bd3   :  { %5141 = vmatpush.bf16.msrb.mxu3 %v11685_v10  ;;  %5129 = vmatpush.bf16.msrb.mxu2 %v11649_v12  ;;  %v13836_v10 = vld [vmem:[%s19538_s5 + $0x434] sm:$0xf0]  ;;  %v11597_v12 = vor.u32 %v13830_v27, %v11594_v38 }
0x1bd4   :  { %5172 = vmatpush.bf16.msra.mxu1 %v11645_v55  ;;  %v11609_v5 = vor.u32 %v13836_v10, %v11608_v52  ;;  %v14718_v10 = vld [vmem:[%s19540_s1 + $0x8] sm:$0xff] }
0x1bd6   :  { %5160 = vmatpush.bf16.msra.mxu0 %v11609_v5  ;;  %v14719_v5 = vld [vmem:[%s19539_s2 + $0x8] sm:$0xff] }
0x1bd7   :  { %5142 = vmatpush.bf16.msrb.mxu3 %v11669_v26  ;;  %5130 = vmatpush.bf16.msrb.mxu2 %v11633_v19  ;;  %v11586_v26 = vld [vmem:[%s19538_s5 + $0x410] sm:$0xf0] }
0x1bd8   :  { %5173 = vmatpush.bf16.msra.mxu1 %v11629_v9  ;;  %v11589_v29 = vor.u32 %v13829_v23, %v11586_v26 }
0x1bda   :  { %5161 = vmatpush.bf16.msra.mxu0 %v11593_v6 }
0x1bdb   :  { %5143 = vmatpush.bf16.msrb.mxu3 %v11653_v43  ;;  %5131 = vmatpush.bf16.msrb.mxu2 %v11617_v16 }
0x1bdc   :  { %5174 = vmatpush.bf16.msra.mxu1 %v11613_v45 }
0x1bdf   :  { %5144 = vmatpush.bf16.msrb.mxu3 %v11637_v60  ;;  %5132 = vmatpush.bf16.msrb.mxu2 %v11601_v47 }
0x1be0   :  { %5175 = vmatpush.bf16.msra.mxu1 %v11597_v12 }
0x1be3   :  { %5145 = vmatpush.bf16.msrb.mxu3 %v11621_v8  ;;  %5133 = vmatpush.bf16.msrb.mxu2 %v11585_v25 }
0x1be7   :  { %5146 = vmatpush.bf16.msrb.mxu3 %v11605_v18 }
0x1beb   :  { %5147 = vmatpush.bf16.msrb.mxu3 %v11589_v29 }
0x1c3b   :  { %v4898_v35 = vpop.xlane.xlu1 %4897 }
0x1c3c   :  { %v4901_v24 = vmul.f32 %v4898_v35, %v14995_v32 }
0x1c3e   :  { %v4903_v54 = vadd.f32 1e-05, %v4901_v24 }
0x1c40   :  { %14468 = vrsqrt.f32 %v4903_v54  ;;  %vm4911_vm2 = vweird.f32 %v4903_v54 }
0x1c43   :  { %v4900_v39 = vpop.xlane.xlu0 %4899 }
0x1c44   :  { %v4902_v41 = vmul.f32 %v4900_v39, %v14995_v32 }
0x1c46   :  { %v14469_v42 = vpop.eup %14468  ;;  %v4904_v43 = vadd.f32 1e-05, %v4902_v41 }
0x1c47   :  { %v4906_v44 = vmul.f32 %v14469_v42, %v4903_v54  ;;  %vm4912_vm1 = vweird.f32 %v14469_v42 }
0x1c48   :  { %14470 = vrsqrt.f32 %v4904_v43  ;;  %vm4913_vm3 = vmor %vm4911_vm2, %vm4912_vm1  ;;  %vm4921_vm5 = vweird.f32 %v4904_v43 }
0x1c49   :  { %v4907_v31 = vmul.f32 %v14469_v42, %v4906_v44  ;;  %v14720_v44 = vld [vmem:[%s19541_s3] sm:$0xff] }
0x1c4b   :  { %v4908_v46 = vmul.f32 0.5, %v4907_v31 }
0x1c4d   :  { %v4909_v30 = vsub.f32 1.5, %v4908_v46 }
0x1c4e   :  { %v14471_v56 = vpop.eup %14470 }
0x1c4f   :  { %v4916_v20 = vmul.f32 %v14471_v56, %v4904_v43  ;;  %v4910_v1 = vmul.f32 %v14469_v42, %v4909_v30  ;;  %vm4922_vm4 = vweird.f32 %v14471_v56 }
0x1c50   :  { %vm4923_vm6 = vmor %vm4921_vm5, %vm4922_vm4 }
0x1c51   :  { %v4917_v19 = vmul.f32 %v14471_v56, %v4916_v20  ;;  %v4914_v58 = vsel %vm4913_vm3, %v14469_v42, %v4910_v1 }
0x1c52   :  { %v4925_v36 = vmul.f32 %v4914_v58, %v17189_v33 }
0x1c53   :  { %v4918_v57 = vmul.f32 0.5, %v4917_v19 }
0x1c54   :  { %v4930_v53 = vmul.f32 %v14234_v61, %v4925_v36 }
0x1c55   :  { %v4919_v59 = vsub.f32 1.5, %v4918_v57  ;;  %v14722_v57 = vld [vmem:[%s19541_s3 + $0x10] sm:$0xff] }
0x1c57   :  { %v4920_v60 = vmul.f32 %v14471_v56, %v4919_v59 }
0x1c59   :  { %v4924_v63 = vsel %vm4923_vm6, %v14471_v56, %v4920_v60  ;;  %v14721_v56 = vld [vmem:[%s19541_s3 + $0x8] sm:$0xff] }
0x1c5a   :  { %v4926_v55 = vmul.f32 %v4924_v63, %v17194_v62 }
0x1c5c   :  { %v4931_v3 = vmul.f32 %v14234_v61, %v4926_v55  ;;  %v14723_v61 = vld [vmem:[%s19541_s3 + $0x18] sm:$0xff] }
0x1c5e   :  { %v4932_v48 = vpack.c.bf16 %v4931_v3, %v4930_v53 }
0x1c60   :  { %5134 = vmatmul.bf16.vlgmr.msrb.gmra.mxu2 %v4932_v48  ;;  %5148 = vmatmul.bf16.vlgmr.msrb.gmra.mxu3 %v4932_v48 }
0x1c61   :  { %5162 = vmatmul.bf16.vlgmr.msra.gmra.mxu0 %v4932_v48  ;;  %5176 = vmatmul.bf16.vlgmr.msra.gmra.mxu1 %v4932_v48 }
0x1cde   :  { %v5163_v16 = vpop.f32.mrf.mxu0  ;;  %v5177_v40 = vpop.f32.mrf.mxu1 }
0x1cdf   :  { %v5190_v4 = vmul.f32 %v5163_v16, %v15036_v13  ;;  %v5188_v23 = vmul.f32 %v14716_v11, %v5163_v16 }
0x1ce1   :  { %5194 = vrot.lane.b32.xlu2 %v5190_v4, %s14749_s21 }
0x1ce3   :  { %v5135_v7 = vpop.f32.mrf.mxu2  ;;  %v5149_v8 = vpop.f32.mrf.mxu3 }
0x1ce4   :  { %v5182_v51 = vmul.f32 %v14716_v11, %v5135_v7  ;;  %v5184_v47 = vmul.f32 %v14717_v14, %v5149_v8 }
0x1ce6   :  { %v5165_v49 = vpop.f32.mrf.mxu0  ;;  %v5179_v0 = vpop.f32.mrf.mxu1  ;;  %v5186_v37 = vadd.f32 %v5184_v47, %v5182_v51 }
0x1ce7   :  { %v5191_v50 = vmul.f32 %v5165_v49, %v15048_v28  ;;  %v17400_v9 = vpack.c.bf16 %v5179_v0, %v5177_v40  ;;  %v5189_v24 = vmul.f32 %v14718_v10, %v5165_v49 }
0x1ce9   :  { %5301 = vmatpush.bf16.msra.mxu3 %v17400_v9  ;;  %5196 = vrot.lane.b32.xlu1 %v5191_v50, %s14749_s21 }
0x1ceb   :  { %v5137_v17 = vpop.f32.mrf.mxu2  ;;  %v5151_v52 = vpop.f32.mrf.mxu3 }
0x1cec   :  { %v5183_v18 = vmul.f32 %v14718_v10, %v5137_v17  ;;  %v5185_v15 = vmul.f32 %v14719_v5, %v5151_v52 }
0x1cee   :  { %v5187_v45 = vadd.f32 %v5185_v15, %v5183_v18 }
0x1cf0   :  { %v14206_v35 = vpack.i.bf16 %v5187_v45, %v5186_v37  ;;  %v5210_v21 = vpack.c.bf16 %v5187_v45, %v5186_v37 }
0x1cf2   :  { %14207 = vrot.lane.b32.xlu2 %v14206_v35, %s14750_s29 }
0x1cfa   :  { %5384 = vrot.lane.b32.xlu2 %v5210_v21, %s14749_s21 }
0x1d3b   :  { %v5195_v22 = vpop.permute.xlu2 %5194 }
0x1d3c   :  { %v5200_v26 = vadd.f32 %v5195_v22, %v5188_v23 }
0x1d4c   :  { %v14208_v29 = vpop.permute.xlu2 %14207 }
0x1d4d   :  { %v14210_v27 = vunpack.i.h.bf16 %v14208_v29  ;;  %v14209_v38 = vunpack.i.l.bf16 %v14208_v29 }
0x1d4f   :  { %v5211_v54 = vpack.c.bf16 %v14210_v27, %v14209_v38 }
0x1d54   :  { %v5385_v41 = vpop.permute.xlu2 %5384 }
0x1d5b   :  { %v5197_v25 = vpop.permute.xlu1 %5196 }
0x1d5c   :  { %v5201_v34 = vadd.f32 %v5197_v25, %v5189_v24 }
0x1d5e   :  { %v5212_v2 = vpack.c.bf16 %v5201_v34, %v5200_v26 }
0x1d60   :  { %5389 = vrot.lane.b32.xlu1 %v5212_v2, %s14750_s29  ;;  %v5220_v6 = vsel %vm379_vm7, %v5212_v2, 0 }
0x1d61   :  { %5229 = vmatpush.bf16.xpose.msra.mxu2 %v5220_v6 }
0x1d68   :  { %5386 = vrot.lane.b32.xlu1 %v5211_v54, %s14749_s21  ;;  %11710 = vmatmul.msk.bf16.vlgmr.msra.gmra.mxu2 %vm379_vm7, %v5210_v21 }
0x1d78   :  { %11711 = vmatmul.msk.bf16.gmra.mxu2 %vm379_vm7, %v5211_v54 }
0x1dd2   :  { %v5390_v12 = vpop.permute.xlu1 %5389 }
0x1dd3   :  { %v5398_v39 = vsel %vm379_vm7, %v5390_v12, 0 }
0x1dd4   :  { %5407 = vmatpush.bf16.xpose.msrb.mxu2 %v5398_v39 }
0x1dda   :  { %v5387_v42 = vpop.permute.xlu1 %5386 }
0x1ddb   :  { %11740 = vmatmul.msk.bf16.vlgmr.msrb.gmra.mxu2 %vm379_vm7, %v5385_v41 }
0x1deb   :  { %v5231_v43 = vpop.f32.mrf.mxu2  ;;  %11741 = vmatmul.msk.bf16.gmra.mxu2 %vm379_vm7, %v5387_v42 }
0x1dec   :  { %v5232_v31 = vadd.f32 %v14720_v44, %v5231_v43 }
0x1dee   :  { %v5241_v46 = vsel %vm408_vm8, %v5232_v31, -inf }
0x1def   :  { %5242 = vmax.xlane.f32.xlu0 %v5241_v46 }
0x1df3   :  { %v5233_v30 = vpop.f32.mrf.mxu2 }
0x1df4   :  { %v5234_v20 = vadd.f32 %v14721_v56, %v5233_v30 }
0x1df6   :  { %v5244_v1 = vsel %vm408_vm8, %v5234_v20, -inf }
0x1df7   :  { %5245 = vmax.xlane.f32.xlu2 %v5244_v1 }
0x1dfb   :  { %v5236_v19 = vpop.f32.mrf.mxu2 }
0x1dfc   :  { %v5237_v58 = vadd.f32 %v14722_v57, %v5236_v19 }
0x1dfe   :  { %v5247_v59 = vsel %vm408_vm8, %v5237_v58, -inf }
0x1dff   :  { %5248 = vmax.xlane.f32.xlu1 %v5247_v59 }
0x1e03   :  { %v5238_v60 = vpop.f32.mrf.mxu2 }
0x1e04   :  { %v5239_v36 = vadd.f32 %v14723_v61, %v5238_v60 }
0x1e06   :  { %v5250_v63 = vsel %vm408_vm8, %v5239_v36, -inf }
0x1e07   :  { %5251 = vmax.xlane.f32.xlu0 %v5250_v63 }
0x1e5e   :  { %v5409_v55 = vpop.f32.mrf.mxu2 }
0x1e5f   :  { %v5410_v53 = vadd.f32 %v14720_v44, %v5409_v55 }
0x1e61   :  { %v5419_v3 = vsel %vm408_vm8, %v5410_v53, -inf }
0x1e62   :  { %5420 = vmax.xlane.f32.xlu0 %v5419_v3  ;;  %v5243_v48 = vpop.xlane.xlu0 %5242 }
0x1e63   :  { %v5253_v16 = vsub.f32 %v5232_v31, %v5243_v48 }
0x1e65   :  { %v5257_v40 = vmul.f32 1.442695, %v5253_v16 }
0x1e66   :  { %v5411_v4 = vpop.f32.mrf.mxu2 }
0x1e67   :  { %14472 = vpow2.f32 %v5257_v40  ;;  %v5412_v7 = vadd.f32 %v14721_v56, %v5411_v4 }
0x1e69   :  { %v5422_v8 = vsel %vm408_vm8, %v5412_v7, -inf }
0x1e6a   :  { %v5246_v49 = vpop.xlane.xlu2 %5245  ;;  %5423 = vmax.xlane.f32.xlu0 %v5422_v8 }
0x1e6b   :  { %v5254_v0 = vsub.f32 %v5234_v20, %v5246_v49  ;;  %v13862_v49 = vld [vmem:[%s19542_s6 + $0x108] sm:$0xff] }
0x1e6c   :  { %5374 = vmatpush.bf16.msrb.mxu1 %v13862_v49  ;;  %v11927_v49 = vld [vmem:[%s19544_s8 + $0x4f8] sm:$0xf0] }
0x1e6d   :  { %v14473_v50 = vpop.eup %14472  ;;  %v5259_v11 = vmul.f32 1.442695, %v5254_v0 }
0x1e6e   :  { %v5414_v51 = vpop.f32.mrf.mxu2  ;;  %v5265_v14 = vsel %vm408_vm8, %v14473_v50, 0.0 }
0x1e6f   :  { %14474 = vpow2.f32 %v5259_v11  ;;  %v5415_v47 = vadd.f32 %v14722_v57, %v5414_v51  ;;  %5266 = vadd.xlane.f32.xlu2 %v5265_v14 }
0x1e71   :  { %v5425_v17 = vsel %vm408_vm8, %v5415_v47, -inf }
0x1e72   :  { %v5249_v52 = vpop.xlane.xlu1 %5248  ;;  %5426 = vmax.xlane.f32.xlu0 %v5425_v17 }
0x1e73   :  { %v5255_v10 = vsub.f32 %v5237_v58, %v5249_v52 }
0x1e75   :  { %v14475_v18 = vpop.eup %14474  ;;  %v5261_v5 = vmul.f32 1.442695, %v5255_v10  ;;  %v13864_v10 = vld [vmem:[%s19542_s6 + $0x118] sm:$0xff] }
0x1e76   :  { %v5416_v15 = vpop.f32.mrf.mxu2  ;;  %v5268_v37 = vsel %vm408_vm8, %v14475_v18, 0.0  ;;  %5345 = vmatpush.bf16.msrb.mxu0 %v13864_v10 }
0x1e77   :  { %v5417_v45 = vadd.f32 %v14723_v61, %v5416_v15  ;;  %5269 = vadd.xlane.f32.xlu1 %v5268_v37  ;;  %14476 = vpow2.f32 %v5261_v5  ;;  %v13863_v5 = vld [vmem:[%s19542_s6 + $0x110] sm:$0xff] }
0x1e79   :  { %v5428_v35 = vsel %vm408_vm8, %v5417_v45, -inf }
0x1e7a   :  { %5429 = vmax.xlane.f32.xlu0 %v5428_v35  ;;  %v5252_v21 = vpop.xlane.xlu0 %5251  ;;  %5346 = vmatpush.bf16.msrb.mxu0 %v13863_v5  ;;  %v13894_v5 = vld [vmem:[%s19544_s8 + $0x4cc] sm:$0xf] }
0x1e7b   :  { %v5256_v22 = vsub.f32 %v5239_v36, %v5252_v21 }
0x1e7d   :  { %v5263_v23 = vmul.f32 1.442695, %v5256_v22  ;;  %v14477_v24 = vpop.eup %14476 }
0x1e7e   :  { %v5271_v25 = vsel %vm408_vm8, %v14477_v24, 0.0 }
0x1e7f   :  { %14478 = vpow2.f32 %v5263_v23 }
0x1e82   :  { %5272 = vadd.xlane.f32.xlu0 %v5271_v25 }
0x1e85   :  { %v14479_v26 = vpop.eup %14478 }
0x1e86   :  { %v5274_v34 = vsel %vm408_vm8, %v14479_v26, 0.0 }
0x1e87   :  { %5275 = vadd.xlane.f32.xlu2 %v5274_v34 }
0x1e9f   :  { %5466 = vrot.lane.b32.xlu2 %v17400_v9, %s14750_s29 }
0x1ed5   :  { %v5421_v2 = vpop.xlane.xlu0 %5420 }
0x1ed6   :  { %v5431_v29 = vsub.f32 %v5410_v53, %v5421_v2  ;;  %v13866_v2 = vld [vmem:[%s19542_s6 + $0x128] sm:$0xff] }
0x1ed7   :  { %5520 = vmatpush.bf16.msra.mxu0 %v13866_v2  ;;  %v13890_v2 = vld [vmem:[%s19544_s8 + $0x4ac] sm:$0xf] }
0x1ed8   :  { %v5435_v6 = vmul.f32 1.442695, %v5431_v29  ;;  %v13865_v29 = vld [vmem:[%s19542_s6 + $0x120] sm:$0xff] }
0x1eda   :  { %14480 = vpow2.f32 %v5435_v6  ;;  %v13868_v6 = vld [vmem:[%s19542_s6 + $0x138] sm:$0xff] }
0x1edb   :  { %5521 = vmatpush.bf16.msra.mxu0 %v13865_v29  ;;  %v11895_v29 = vld [vmem:[%s19544_s8 + $0x4b8] sm:$0xf0] }
0x1edd   :  { %v5424_v27 = vpop.xlane.xlu0 %5423 }
0x1ede   :  { %v5432_v38 = vsub.f32 %v5412_v7, %v5424_v27  ;;  %v13867_v27 = vld [vmem:[%s19542_s6 + $0x130] sm:$0xff] }
0x1ee0   :  { %v14481_v54 = vpop.eup %14480  ;;  %v5437_v12 = vmul.f32 1.442695, %v5432_v38 }
0x1ee1   :  { %v5443_v39 = vsel %vm408_vm8, %v14481_v54, 0.0 }
0x1ee2   :  { %14482 = vpow2.f32 %v5437_v12  ;;  %5444 = vadd.xlane.f32.xlu1 %v5443_v39  ;;  %v5267_v42 = vpop.xlane.xlu2 %5266 }
0x1ee3   :  { %14484 = vrcp.f32 %v5267_v42 }
0x1ee5   :  { %v5427_v41 = vpop.xlane.xlu0 %5426 }
0x1ee6   :  { %v5433_v43 = vsub.f32 %v5415_v47, %v5427_v41 }
0x1ee8   :  { %v14483_v44 = vpop.eup %14482  ;;  %v5439_v31 = vmul.f32 1.442695, %v5433_v43 }
0x1ee9   :  { %v5446_v9 = vsel %vm408_vm8, %v14483_v44, 0.0  ;;  %v14485_v20 = vpop.eup %14484 }
0x1eea   :  { %14486 = vpow2.f32 %v5439_v31  ;;  %v5270_v46 = vpop.xlane.xlu1 %5269  ;;  %5447 = vadd.xlane.f32.xlu0 %v5446_v9  ;;  %v5281_v59 = vmul.f32 %v14485_v20, %v14473_v50  ;;  %v13861_v50 = vld [vmem:[%s19542_s6 + $0x100] sm:$0xff] }
0x1eeb   :  { %14488 = vrcp.f32 %v5270_v46  ;;  %5375 = vmatpush.bf16.msrb.mxu1 %v13861_v50  ;;  %v11901_v50 = vld [vmem:[%s19544_s8 + $0x4c0] sm:$0xf] }
0x1eed   :  { %v5430_v30 = vpop.xlane.xlu0 %5429 }
0x1eee   :  { %v5434_v56 = vsub.f32 %v5417_v45, %v5430_v30 }
0x1eef   :  { %5556 = vmatpush.bf16.msra.mxu1 %v13868_v6  ;;  %v11898_v6 = vor.u32 %v13890_v2, %v11895_v29 }
0x1ef0   :  { %v14487_v1 = vpop.eup %14486  ;;  %v5441_v19 = vmul.f32 1.442695, %v5434_v56 }
0x1ef1   :  { %v14489_v57 = vpop.eup %14488  ;;  %v5449_v58 = vsel %vm408_vm8, %v14487_v1, 0.0 }
0x1ef2   :  { %v5282_v60 = vmul.f32 %v14489_v57, %v14475_v18  ;;  %14490 = vpow2.f32 %v5441_v19  ;;  %5450 = vadd.xlane.f32.xlu1 %v5449_v58 }
0x1ef3   :  { %5557 = vmatpush.bf16.msra.mxu1 %v13867_v27  ;;  %v11869_v27 = vld [vmem:[%s19544_s8 + $0x480] sm:$0xf] }
0x1ef4   :  { %v5285_v61 = vpack.c.bf16 %v5282_v60, %v5281_v59 }
0x1ef5   :  { %v5273_v36 = vpop.xlane.xlu0 %5272 }
0x1ef6   :  { %11712 = vmatmul.msk.bf16.vlgmr.msra.gmra.mxu3 %vm408_vm8, %v5285_v61  ;;  %14492 = vrcp.f32 %v5273_v36 }
0x1ef8   :  { %v14491_v63 = vpop.eup %14490 }
0x1ef9   :  { %v5452_v55 = vsel %vm408_vm8, %v14491_v63, 0.0 }
0x1efa   :  { %v5276_v53 = vpop.xlane.xlu2 %5275  ;;  %5453 = vadd.xlane.f32.xlu0 %v5452_v55 }
0x1efb   :  { %14494 = vrcp.f32 %v5276_v53  ;;  %v13899_v53 = vld [vmem:[%s19544_s8 + $0x4ec] sm:$0xf0] }
0x1efc   :  { %v14493_v3 = vpop.eup %14492 }
0x1efd   :  { %v5283_v16 = vmul.f32 %v14493_v3, %v14477_v24  ;;  %v13897_v3 = vld [vmem:[%s19544_s8 + $0x4e4] sm:$0xf] }
0x1f01   :  { %v14495_v48 = vpop.eup %14494 }
0x1f02   :  { %v5284_v40 = vmul.f32 %v14495_v48, %v14479_v26  ;;  %v5467_v4 = vpop.permute.xlu2 %5466 }
0x1f03   :  { %5482 = vmatpush.bf16.msrb.mxu3 %v5467_v4 }
0x1f04   :  { %v5286_v7 = vpack.c.bf16 %v5284_v40, %v5283_v16  ;;  %v11925_v16 = vld [vmem:[%s19544_s8 + $0x4e8] sm:$0xf]  ;;  %v13900_v40 = vld [vmem:[%s19544_s8 + $0x4f4] sm:$0xf0] }
0x1f06   :  { %11713 = vmatmul.msk.bf16.gmra.mxu3 %vm408_vm8, %v5286_v7  ;;  %v11926_v7 = vor.u32 %v13900_v40, %v11925_v16  ;;  %v11839_v16 = vld [vmem:[%s19544_s8 + $0x450] sm:$0xf0]  ;;  %v11845_v40 = vld [vmem:[%s19544_s8 + $0x448] sm:$0xf] }
0x1f55   :  { %v5445_v8 = vpop.xlane.xlu1 %5444 }
0x1f56   :  { %14496 = vrcp.f32 %v5445_v8  ;;  %v13898_v8 = vld [vmem:[%s19544_s8 + $0x4ec] sm:$0xf] }
0x1f5c   :  { %v14497_v11 = vpop.eup %14496 }
0x1f5d   :  { %v5448_v0 = vpop.xlane.xlu0 %5447  ;;  %v5459_v14 = vmul.f32 %v14497_v11, %v14481_v54  ;;  %v13895_v11 = vld [vmem:[%s19544_s8 + $0x4cc] sm:$0xf0] }
0x1f5e   :  { %14498 = vrcp.f32 %v5448_v0  ;;  %v11930_v0 = vor.u32 %v13898_v8, %v11927_v49  ;;  %v13878_v49 = vld [vmem:[%s19544_s8 + $0x44c] sm:$0xf] }
0x1f64   :  { %v14499_v51 = vpop.eup %14498 }
0x1f65   :  { %v5460_v47 = vmul.f32 %v14499_v51, %v14483_v44  ;;  %v5451_v52 = vpop.xlane.xlu1 %5450  ;;  %v13893_v51 = vld [vmem:[%s19544_s8 + $0x4c4] sm:$0xf] }
0x1f66   :  { %14500 = vrcp.f32 %v5451_v52  ;;  %v13896_v52 = vld [vmem:[%s19544_s8 + $0x4d4] sm:$0xf0] }
0x1f67   :  { %v5463_v17 = vpack.c.bf16 %v5460_v47, %v5459_v14  ;;  %v11902_v14 = vor.u32 %v13895_v11, %v11901_v50  ;;  %v11903_v47 = vld [vmem:[%s19544_s8 + $0x4d0] sm:$0xf0]  ;;  %v11821_v11 = vld [vmem:[%s19544_s8 + $0x420] sm:$0xf] }
0x1f68   :  { %v11906_v10 = vor.u32 %v13893_v51, %v11903_v47  ;;  %v13875_v51 = vld [vmem:[%s19544_s8 + $0x42c] sm:$0xf0] }
0x1f69   :  { %11742 = vmatmul.msk.bf16.vlgmr.msrb.gmra.mxu3 %vm408_vm8, %v5463_v17  ;;  %v11909_v17 = vld [vmem:[%s19544_s8 + $0x4c8] sm:$0xf]  ;;  %v11822_v47 = vor.u32 %v13875_v51, %v11821_v11  ;;  %v13912_v11 = vld [vmem:[%s19545_s9 + $0x258] sm:$0xff] }
0x1f6c   :  { %v14501_v15 = vpop.eup %14500 }
0x1f6d   :  { %v5454_v18 = vpop.xlane.xlu0 %5453  ;;  %v5461_v45 = vmul.f32 %v14501_v15, %v14487_v1  ;;  %v11911_v15 = vld [vmem:[%s19544_s8 + $0x4d8] sm:$0xf0] }
0x1f6e   :  { %14502 = vrcp.f32 %v5454_v18  ;;  %v11910_v18 = vor.u32 %v13896_v52, %v11909_v17  ;;  %v11823_v17 = vld [vmem:[%s19544_s8 + $0x430] sm:$0xf0]  ;;  %v11829_v52 = vld [vmem:[%s19544_s8 + $0x428] sm:$0xf] }
0x1f74   :  { %v14503_v37 = vpop.eup %14502 }
0x1f75   :  { %v5462_v35 = vmul.f32 %v14503_v37, %v14491_v63  ;;  %v11914_v37 = vor.u32 %v13894_v5, %v11911_v15  ;;  %v13874_v15 = vld [vmem:[%s19544_s8 + $0x42c] sm:$0xf] }
0x1f77   :  { %v5464_v21 = vpack.c.bf16 %v5462_v35, %v5461_v45  ;;  %v11885_v45 = vld [vmem:[%s19544_s8 + $0x4a0] sm:$0xf]  ;;  %v13891_v35 = vld [vmem:[%s19544_s8 + $0x4ac] sm:$0xf0] }
0x1f79   :  { %v5303_v22 = vpop.f32.mrf.mxu3  ;;  %11743 = vmatmul.msk.bf16.gmra.mxu3 %vm408_vm8, %v5464_v21  ;;  %v13889_v21 = vld [vmem:[%s19544_s8 + $0x4a4] sm:$0xf] }
0x1f81   :  { %v5305_v23 = vpop.f32.mrf.mxu3 }
0x1f82   :  { %v5313_v24 = vpack.c.bf16 %v5305_v23, %v5303_v22  ;;  %v11886_v22 = vor.u32 %v13891_v35, %v11885_v45  ;;  %v11887_v23 = vld [vmem:[%s19544_s8 + $0x4b0] sm:$0xf0]  ;;  %v11805_v35 = vld [vmem:[%s19544_s8 + $0x400] sm:$0xf] }
0x1f84   :  { %11739 = vmatmul.msk.bf16.vlgmr.msrb.gmra.mxu1 %vm379_vm7, %v5313_v24  ;;  %v11893_v24 = vld [vmem:[%s19544_s8 + $0x4a8] sm:$0xf] }
0x1f85   :  { %5843 = vmatpush.bf16.msrb.mxu1 %v11930_v0  ;;  %v11847_v0 = vld [vmem:[%s19544_s8 + $0x458] sm:$0xf0] }
0x1f86   :  { %v11850_v50 = vor.u32 %v13878_v49, %v11847_v0  ;;  %v13905_v49 = vld [vmem:[%s19545_s9 + $0x220] sm:$0xff] }
0x1f87   :  { %v13913_v0 = vld [vmem:[%s19545_s9 + $0x260] sm:$0xff] }
0x1f89   :  { %v5308_v25 = vpop.f32.mrf.mxu3  ;;  %5844 = vmatpush.bf16.msrb.mxu1 %v11914_v37  ;;  %v11831_v37 = vld [vmem:[%s19544_s8 + $0x438] sm:$0xf0] }
0x1f8a   :  { %v11834_v45 = vor.u32 %v13874_v15, %v11831_v37 }
0x1f8d   :  { %5845 = vmatpush.bf16.msrb.mxu1 %v11898_v6 }
0x1f91   :  { %v5310_v26 = vpop.f32.mrf.mxu3 }
0x1f92   :  { %v5319_v34 = vpack.c.bf16 %v5310_v26, %v5308_v25  ;;  %v13892_v25 = vld [vmem:[%s19544_s8 + $0x4b4] sm:$0xf0]  ;;  %v11890_v26 = vor.u32 %v13889_v21, %v11887_v23  ;;  %v13871_v21 = vld [vmem:[%s19544_s8 + $0x40c] sm:$0xf0] }
0x1f94   :  { %11730 = vmatmul.msk.bf16.vlgmr.msrb.gmra.mxu0 %vm379_vm7, %v5319_v34  ;;  %v11894_v34 = vor.u32 %v13892_v25, %v11893_v24  ;;  %v11806_v24 = vor.u32 %v13871_v21, %v11805_v35  ;;  %v11807_v25 = vld [vmem:[%s19544_s8 + $0x410] sm:$0xf0] }
0x1f95   :  { %5829 = vmatpush.bf16.msrb.mxu0 %v11926_v7 }
0x1f99   :  { %5830 = vmatpush.bf16.msrb.mxu0 %v11910_v18 }
0x1f9d   :  { %5831 = vmatpush.bf16.msrb.mxu0 %v11894_v34  ;;  %v13872_v34 = vld [vmem:[%s19544_s8 + $0x414] sm:$0xf0] }
0x1fec   :  { %v5484_v38 = vpop.f32.mrf.mxu3 }
0x1ff4   :  { %v5486_v54 = vpop.f32.mrf.mxu3 }
0x1ff5   :  { %v5494_v12 = vpack.c.bf16 %v5486_v54, %v5484_v38  ;;  %v13887_v38 = vld [vmem:[%s19544_s8 + $0x48c] sm:$0xf0]  ;;  %v13885_v54 = vld [vmem:[%s19544_s8 + $0x484] sm:$0xf] }
0x1ff7   :  { %11756 = vmatmul.msk.bf16.vlgmr.msra.gmra.mxu0 %vm379_vm7, %v5494_v12  ;;  %v11870_v12 = vor.u32 %v13887_v38, %v11869_v27  ;;  %v13870_v27 = vld [vmem:[%s19544_s8 + $0x40c] sm:$0xf]  ;;  %v11815_v38 = vld [vmem:[%s19544_s8 + $0x418] sm:$0xf0] }
0x1ffc   :  { %v5489_v39 = vpop.f32.mrf.mxu3 }
0x2001   :  { %v5377_v44 = vpop.f32.mrf.mxu1 }
0x2004   :  { %v5491_v41 = vpop.f32.mrf.mxu3 }
0x2005   :  { %v5530_v42 = vpack.c.bf16 %v5491_v41, %v5489_v39  ;;  %v11871_v39 = vld [vmem:[%s19544_s8 + $0x490] sm:$0xf0]  ;;  %v11877_v41 = vld [vmem:[%s19544_s8 + $0x488] sm:$0xf] }
0x2007   :  { %11769 = vmatmul.msk.bf16.vlgmr.msra.gmra.mxu1 %vm379_vm7, %v5530_v42  ;;  %v13888_v42 = vld [vmem:[%s19544_s8 + $0x494] sm:$0xf0] }
0x2009   :  { %v5379_v9 = vpop.f32.mrf.mxu1 }
0x2011   :  { %v5348_v43 = vpop.f32.mrf.mxu0 }
0x2012   :  { %v5378_v30 = vadd.f32 %v5377_v44, %v5348_v43  ;;  %v11874_v43 = vor.u32 %v13885_v54, %v11871_v39  ;;  %v11878_v44 = vor.u32 %v13888_v42, %v11877_v41  ;;  %v11818_v54 = vor.u32 %v13870_v27, %v11815_v38 }
0x2014   :  { %5832 = vmatpush.bf16.msrb.mxu0 %v11878_v44 }
0x2019   :  { %v5350_v31 = vpop.f32.mrf.mxu0 }
0x201a   :  { %v5380_v58 = vadd.f32 %v5379_v9, %v5350_v31  ;;  %v13886_v31 = vld [vmem:[%s19544_s8 + $0x48c] sm:$0xf]  ;;  %v11879_v9 = vld [vmem:[%s19544_s8 + $0x498] sm:$0xf0] }
0x2074   :  { %v5523_v46 = vpop.f32.mrf.mxu0 }
0x2075   :  { %v5528_v56 = vadd.f32 %v5523_v46, %v5378_v30  ;;  %v11882_v46 = vor.u32 %v13886_v31, %v11879_v9  ;;  %v11853_v30 = vld [vmem:[%s19544_s8 + $0x460] sm:$0xf] }
0x2077   :  { %5846 = vmatpush.bf16.msrb.mxu1 %v11882_v46 }
0x207c   :  { %v5525_v57 = vpop.f32.mrf.mxu0 }
0x207d   :  { %v5529_v60 = vadd.f32 %v5525_v57, %v5380_v58  ;;  %v11855_v57 = vld [vmem:[%s19544_s8 + $0x470] sm:$0xf0]  ;;  %v11861_v58 = vld [vmem:[%s19544_s8 + $0x468] sm:$0xf] }
0x2084   :  { %v5559_v20 = vpop.f32.mrf.mxu1 }
0x2085   :  { %v5564_v1 = vadd.f32 %v5559_v20, %v5528_v56  ;;  %v13883_v56 = vld [vmem:[%s19544_s8 + $0x46c] sm:$0xf0]  ;;  %v13881_v20 = vld [vmem:[%s19544_s8 + $0x464] sm:$0xf] }
0x2087   :  { %v17489_v19 = vadd.f32 %v5564_v1, %v17189_v33  ;;  %v11917_v33 = vld [vmem:[%s19544_s8 + $0x4e0] sm:$0xf]  ;;  %v11854_v1 = vor.u32 %v13883_v56, %v11853_v30 }
0x2088   :  { %v11918_v48 = vor.u32 %v13899_v53, %v11917_v33  ;;  %v11837_v53 = vld [vmem:[%s19544_s8 + $0x440] sm:$0xf] }
0x2089   :  { %v5570_v59 = vmul.f32 %v17489_v19, %v17489_v19 }
0x208a   :  { %5801 = vmatpush.bf16.msra.mxu2 %v11918_v48  ;;  %v13877_v48 = vld [vmem:[%s19544_s8 + $0x444] sm:$0xf] }
0x208b   :  { %5572 = vadd.xlane.f32.xlu1 %v5570_v59  ;;  %v13884_v59 = vld [vmem:[%s19544_s8 + $0x474] sm:$0xf0]  ;;  %v11842_v7 = vor.u32 %v13877_v48, %v11839_v16 }
0x208c   :  { %v5561_v61 = vpop.f32.mrf.mxu1  ;;  %v13916_v16 = vld [vmem:[%s19545_s9 + $0x278] sm:$0xff] }
0x208d   :  { %v5565_v36 = vadd.f32 %v5561_v61, %v5529_v60  ;;  %v11858_v60 = vor.u32 %v13881_v20, %v11855_v57  ;;  %v11862_v61 = vor.u32 %v13884_v59, %v11861_v58 }
0x208e   :  { %5802 = vmatpush.bf16.msra.mxu2 %v11902_v14  ;;  %v13873_v14 = vld [vmem:[%s19544_s8 + $0x424] sm:$0xf] }
0x208f   :  { %v17494_v63 = vadd.f32 %v5565_v36, %v17194_v62  ;;  %v11919_v62 = vld [vmem:[%s19544_s8 + $0x4f0] sm:$0xf0]  ;;  %v13882_v36 = vld [vmem:[%s19544_s8 + $0x46c] sm:$0xf]  ;;  %5833 = vmatpush.bf16.msrb.mxu0 %v11862_v61  ;;  %v11826_v18 = vor.u32 %v13873_v14, %v11823_v17  ;;  %v14235_v61 = vld [vmem:[%s19543_s7 + $0x4] ss:$0 sm:$0xff] }
0x2090   :  { %v11922_v4 = vor.u32 %v13897_v3, %v11919_v62  ;;  %v13879_v3 = vld [vmem:[%s19544_s8 + $0x44c] sm:$0xf0] }
0x2091   :  { %v5571_v55 = vmul.f32 %v17494_v63, %v17494_v63  ;;  %v11838_v62 = vor.u32 %v13879_v3, %v11837_v53 }
0x2092   :  { %5815 = vmatpush.bf16.msra.mxu3 %v11922_v4  ;;  %5803 = vmatpush.bf16.msra.mxu2 %v11886_v22  ;;  %v13880_v4 = vld [vmem:[%s19544_s8 + $0x454] sm:$0xf0]  ;;  %v13869_v22 = vld [vmem:[%s19544_s8 + $0x404] sm:$0xf] }
0x2093   :  { %5574 = vadd.xlane.f32.xlu0 %v5571_v55  ;;  %v11863_v55 = vld [vmem:[%s19544_s8 + $0x478] sm:$0xf0]  ;;  %v11846_v8 = vor.u32 %v13880_v4, %v11845_v40  ;;  %v11810_v29 = vor.u32 %v13869_v22, %v11807_v25  ;;  %v13907_v40 = vld [vmem:[%s19545_s9 + $0x230] sm:$0xff]  ;;  %v13909_v25 = vld [vmem:[%s19545_s9 + $0x240] sm:$0xff] }
0x2094   :  { %v11866_v33 = vor.u32 %v13882_v36, %v11863_v55  ;;  %v13915_v4 = vld [vmem:[%s19545_s9 + $0x270] sm:$0xff] }
0x2095   :  { %5834 = vmatpush.bf16.msrb.mxu0 %v11846_v8  ;;  %v13914_v8 = vld [vmem:[%s19545_s9 + $0x268] sm:$0xff] }
0x2096   :  { %5816 = vmatpush.bf16.msra.mxu3 %v11906_v10  ;;  %5804 = vmatpush.bf16.msra.mxu2 %v11870_v12  ;;  %v13876_v10 = vld [vmem:[%s19544_s8 + $0x434] sm:$0xf0] }
0x2097   :  { %5847 = vmatpush.bf16.msrb.mxu1 %v11866_v33  ;;  %v11830_v5 = vor.u32 %v13876_v10, %v11829_v52  ;;  %v13903_v52 = vld [vmem:[%s19545_s9 + $0x210] sm:$0xff] }
0x2098   :  { %v13911_v10 = vld [vmem:[%s19545_s9 + $0x250] sm:$0xff] }
0x2099   :  { %5835 = vmatpush.bf16.msrb.mxu0 %v11830_v5  ;;  %v13910_v5 = vld [vmem:[%s19545_s9 + $0x248] sm:$0xff] }
0x209a   :  { %5817 = vmatpush.bf16.msra.mxu3 %v11890_v26  ;;  %5805 = vmatpush.bf16.msra.mxu2 %v11854_v1  ;;  %v11813_v26 = vld [vmem:[%s19544_s8 + $0x408] sm:$0xf] }
0x209b   :  { %5848 = vmatpush.bf16.msrb.mxu1 %v11850_v50  ;;  %v11814_v6 = vor.u32 %v13872_v34, %v11813_v26  ;;  %v13904_v50 = vld [vmem:[%s19545_s9 + $0x218] sm:$0xff] }
0x209d   :  { %5836 = vmatpush.bf16.msrb.mxu0 %v11814_v6 }
0x209e   :  { %5818 = vmatpush.bf16.msra.mxu3 %v11874_v43  ;;  %5806 = vmatpush.bf16.msra.mxu2 %v11838_v62  ;;  %v13908_v62 = vld [vmem:[%s19545_s9 + $0x238] sm:$0xff] }
0x209f   :  { %5849 = vmatpush.bf16.msrb.mxu1 %v11834_v45 }
0x20a2   :  { %5819 = vmatpush.bf16.msra.mxu3 %v11858_v60  ;;  %5807 = vmatpush.bf16.msra.mxu2 %v11822_v47 }
0x20a3   :  { %5850 = vmatpush.bf16.msrb.mxu1 %v11818_v54 }
0x20a6   :  { %5820 = vmatpush.bf16.msra.mxu3 %v11842_v7  ;;  %5808 = vmatpush.bf16.msra.mxu2 %v11806_v24  ;;  %v13906_v7 = vld [vmem:[%s19545_s9 + $0x228] sm:$0xff]  ;;  %v13901_v24 = vld [vmem:[%s19545_s9 + $0x200] sm:$0xff] }
0x20aa   :  { %5821 = vmatpush.bf16.msra.mxu3 %v11826_v18  ;;  %6072 = vmatpush.bf16.msrb.mxu2 %v13908_v62  ;;  %v13902_v18 = vld [vmem:[%s19545_s9 + $0x208] sm:$0xff] }
0x20ae   :  { %5822 = vmatpush.bf16.msra.mxu3 %v11810_v29  ;;  %6073 = vmatpush.bf16.msrb.mxu2 %v13907_v40 }
0x20b2   :  { %6086 = vmatpush.bf16.msrb.mxu3 %v13916_v16  ;;  %6074 = vmatpush.bf16.msrb.mxu2 %v13906_v7 }
0x20b6   :  { %6087 = vmatpush.bf16.msrb.mxu3 %v13915_v4  ;;  %6075 = vmatpush.bf16.msrb.mxu2 %v13905_v49 }
0x20ba   :  { %6088 = vmatpush.bf16.msrb.mxu3 %v13914_v8  ;;  %6076 = vmatpush.bf16.msrb.mxu2 %v13904_v50 }
0x20be   :  { %6089 = vmatpush.bf16.msrb.mxu3 %v13913_v0  ;;  %6077 = vmatpush.bf16.msrb.mxu2 %v13903_v52 }
0x20c2   :  { %6090 = vmatpush.bf16.msrb.mxu3 %v13912_v11  ;;  %6078 = vmatpush.bf16.msrb.mxu2 %v13902_v18 }
0x20c6   :  { %6091 = vmatpush.bf16.msrb.mxu3 %v13911_v10  ;;  %6079 = vmatpush.bf16.msrb.mxu2 %v13901_v24 }
0x20ca   :  { %6092 = vmatpush.bf16.msrb.mxu3 %v13910_v5 }
0x20ce   :  { %6093 = vmatpush.bf16.msrb.mxu3 %v13909_v25 }
0x20fe   :  { %v5573_v23 = vpop.xlane.xlu1 %5572 }
0x20ff   :  { %v5576_v2 = vmul.f32 %v5573_v23, %v14995_v32 }
0x2101   :  { %v5578_v12 = vadd.f32 1e-05, %v5576_v2 }
0x2103   :  { %14504 = vrsqrt.f32 %v5578_v12  ;;  %vm5586_vm10 = vweird.f32 %v5578_v12 }
0x2106   :  { %v5575_v39 = vpop.xlane.xlu0 %5574 }
0x2107   :  { %v5577_v41 = vmul.f32 %v5575_v39, %v14995_v32 }
0x2109   :  { %v14505_v42 = vpop.eup %14504  ;;  %v5579_v43 = vadd.f32 1e-05, %v5577_v41 }
0x210a   :  { %v5581_v44 = vmul.f32 %v14505_v42, %v5578_v12  ;;  %vm5587_vm9 = vweird.f32 %v14505_v42 }
0x210b   :  { %14506 = vrsqrt.f32 %v5579_v43  ;;  %vm5588_vm11 = vmor %vm5586_vm10, %vm5587_vm9  ;;  %vm5596_vm13 = vweird.f32 %v5579_v43 }
0x210c   :  { %v5582_v31 = vmul.f32 %v14505_v42, %v5581_v44 }
0x210e   :  { %v5583_v9 = vmul.f32 0.5, %v5582_v31 }
0x2110   :  { %v5584_v46 = vsub.f32 1.5, %v5583_v9 }
0x2111   :  { %v14507_v30 = vpop.eup %14506 }
0x2112   :  { %v5591_v56 = vmul.f32 %v14507_v30, %v5579_v43  ;;  %v5585_v20 = vmul.f32 %v14505_v42, %v5584_v46  ;;  %vm5597_vm12 = vweird.f32 %v14507_v30 }
0x2113   :  { %vm5598_vm14 = vmor %vm5596_vm13, %vm5597_vm12 }
0x2114   :  { %v5592_v1 = vmul.f32 %v14507_v30, %v5591_v56  ;;  %v5589_v58 = vsel %vm5588_vm11, %v14505_v42, %v5585_v20  ;;  %v13946_v20 = vld [vmem:[%s19538_s5 + $0x5ec] sm:$0xf] }
0x2115   :  { %v5600_v36 = vmul.f32 %v5589_v58, %v17489_v19 }
0x2116   :  { %v5593_v57 = vmul.f32 0.5, %v5592_v1 }
0x2117   :  { %v5605_v53 = vmul.f32 %v14235_v61, %v5600_v36 }
0x2118   :  { %v5594_v59 = vsub.f32 1.5, %v5593_v57 }
0x211a   :  { %v5595_v60 = vmul.f32 %v14507_v30, %v5594_v59 }
0x211c   :  { %v5599_v55 = vsel %vm5598_vm14, %v14507_v30, %v5595_v60 }
0x211d   :  { %v5601_v33 = vmul.f32 %v5599_v55, %v17494_v63 }
0x211f   :  { %v5606_v3 = vmul.f32 %v14235_v61, %v5601_v33 }
0x2121   :  { %v5607_v48 = vpack.c.bf16 %v5606_v3, %v5605_v53 }
0x2123   :  { %5809 = vmatmul.bf16.vlgmr.msra.gmra.mxu2 %v5607_v48  ;;  %5823 = vmatmul.bf16.vlgmr.msra.gmra.mxu3 %v5607_v48 }
0x2124   :  { %5837 = vmatmul.bf16.vlgmr.msrb.gmra.mxu0 %v5607_v48  ;;  %5851 = vmatmul.bf16.vlgmr.msrb.gmra.mxu1 %v5607_v48 }
0x21a1   :  { %v5838_v56 = vpop.f32.mrf.mxu0  ;;  %v5852_v53 = vpop.f32.mrf.mxu1 }
0x21a6   :  { %v17727_v51 = vpop.f32.mrf.mxu2  ;;  %v17729_v14 = vpop.f32.mrf.mxu3 }
0x21a7   :  { %v11931_v47 = vmul.f32 -1.442695, %v17727_v51  ;;  %v11932_v17 = vmul.f32 -1.442695, %v17729_v14 }
0x21a9   :  { %14508 = vpow2.f32 %v11931_v47 }
0x21aa   :  { %14510 = vpow2.f32 %v11932_v17 }
0x21ae   :  { %v17745_v15 = vpop.f32.mrf.mxu2  ;;  %v17747_v37 = vpop.f32.mrf.mxu3 }
0x21af   :  { %v14509_v45 = vpop.eup %14508  ;;  %v11933_v35 = vmul.f32 -1.442695, %v17745_v15  ;;  %v11934_v23 = vmul.f32 -1.442695, %v17747_v37 }
0x21b0   :  { %v14511_v21 = vpop.eup %14510  ;;  %v5869_v22 = vadd.f32 1.0, %v14509_v45 }
0x21b1   :  { %v5870_v26 = vadd.f32 1.0, %v14511_v21  ;;  %14512 = vpow2.f32 %v11933_v35  ;;  %v5840_v21 = vpop.f32.mrf.mxu0 }
0x21b2   :  { %14514 = vrcp.f32 %v5869_v22  ;;  %v5884_v9 = vand.u32 2147483648, %v5869_v22  ;;  %vm5878_vm0 = vweird.f32 %v5869_v22  ;;  %v5882_v46 = vand.u32 2147483647, %v5869_v22 }
0x21b3   :  { %14516 = vrcp.f32 %v5870_v26  ;;  %v5897_v57 = vand.u32 2147483647, %v5870_v26  ;;  %v5899_v60 = vand.u32 2147483648, %v5870_v26  ;;  %vm5893_vm3 = vweird.f32 %v5870_v26 }
0x21b4   :  { %14518 = vpow2.f32 %v11934_v23  ;;  %v5885_v36 = vor.u32 1.1754944e-38, %v5884_v9  ;;  %vm5883_vm4 = vcmp.eq.f32.partialorder %v5882_v46, 8.507059e+37  ;;  %v12186_v9 = vld [vmem:[%s19538_s5 + $0x5e8] sm:$0xf]  ;;  %v13948_v46 = vld [vmem:[%s19538_s5 + $0x5f4] sm:$0xf0] }
0x21b5   :  { %vm5898_vm9 = vcmp.eq.f32.partialorder %v5897_v57, 8.507059e+37  ;;  %v5900_v7 = vor.u32 1.1754944e-38, %v5899_v60  ;;  %v13941_v60 = vld [vmem:[%s19538_s5 + $0x5c4] sm:$0xf] }
0x21b7   :  { %v14513_v34 = vpop.eup %14512 }
0x21b8   :  { %v14515_v2 = vpop.eup %14514  ;;  %v5871_v29 = vadd.f32 1.0, %v14513_v34 }
0x21b9   :  { %v14517_v6 = vpop.eup %14516  ;;  %v5874_v27 = vmul.f32 %v14515_v2, %v5869_v22  ;;  %vm5879_vm15 = vweird.f32 %v14515_v2 }
0x21ba   :  { %v14519_v38 = vpop.eup %14518  ;;  %v5889_v54 = vmul.f32 %v14517_v6, %v5870_v26  ;;  %14520 = vrcp.f32 %v5871_v29  ;;  %vm17757_vm1 = vmor %vm5878_vm0, %vm5879_vm15  ;;  %vm5894_vm2 = vweird.f32 %v14517_v6  ;;  %v5914_v55 = vand.u32 2147483648, %v5871_v29  ;;  %v5854_v26 = vpop.f32.mrf.mxu1 }
0x21bb   :  { %v5875_v12 = vsub.f32 1.0, %v5874_v27  ;;  %v5872_v39 = vadd.f32 1.0, %v14519_v38  ;;  %vm17763_vm5 = vmor %vm5893_vm3, %vm5894_vm2  ;;  %v5912_v62 = vand.u32 2147483647, %v5871_v29  ;;  %vm5908_vm10 = vweird.f32 %v5871_v29 }
0x21bc   :  { %v5890_v41 = vsub.f32 1.0, %v5889_v54  ;;  %v5915_v0 = vor.u32 1.1754944e-38, %v5914_v55  ;;  %v12170_v55 = vld [vmem:[%s19538_s5 + $0x5c8] sm:$0xf] }
0x21bd   :  { %v5876_v42 = vmul.f32 %v14515_v2, %v5875_v12  ;;  %14522 = vrcp.f32 %v5872_v39  ;;  %v5929_v49 = vand.u32 2147483648, %v5872_v39  ;;  %v5927_v11 = vand.u32 2147483647, %v5872_v39 }
0x21be   :  { %v5891_v43 = vmul.f32 %v14517_v6, %v5890_v41  ;;  %vm5913_vm13 = vcmp.eq.f32.partialorder %v5912_v62, 8.507059e+37  ;;  %vm5923_vm14 = vweird.f32 %v5872_v39  ;;  %v12172_v62 = vld [vmem:[%s19538_s5 + $0x5d8] sm:$0xf0] }
0x21bf   :  { %v5877_v44 = vadd.f32 %v14515_v2, %v5876_v42  ;;  %v5930_v45 = vor.u32 1.1754944e-38, %v5929_v49  ;;  %vm5928_vm0 = vcmp.eq.f32.partialorder %v5927_v11, 8.507059e+37  ;;  %v12148_v49 = vld [vmem:[%s19538_s5 + $0x5b0] sm:$0xf0] }
0x21c0   :  { %v14521_v31 = vpop.eup %14520  ;;  %v5892_v1 = vadd.f32 %v14517_v6, %v5891_v43  ;;  %v12178_v43 = vld [vmem:[%s19538_s5 + $0x5e0] sm:$0xf] }
0x21c1   :  { %v5904_v30 = vmul.f32 %v14521_v31, %v5871_v29  ;;  %v5881_v59 = vsel %vm17757_vm1, %v14515_v2, %v5877_v44  ;;  %vm5909_vm6 = vweird.f32 %v14521_v31  ;;  %v13945_v44 = vld [vmem:[%s19538_s5 + $0x5e4] sm:$0xf] }
0x21c2   :  { %v5886_v16 = vsel %vm5883_vm4, %v5885_v36, %v5881_v59  ;;  %v5896_v40 = vsel %vm17763_vm5, %v14517_v6, %v5892_v1  ;;  %vm5910_vm11 = vmor %vm5908_vm10, %vm5909_vm6  ;;  %v12188_v1 = vld [vmem:[%s19538_s5 + $0x5f8] sm:$0xf0]  ;;  %v13943_v59 = vld [vmem:[%s19538_s5 + $0x5cc] sm:$0xf0] }
0x21c3   :  { %v14523_v58 = vpop.eup %14522  ;;  %v5905_v61 = vsub.f32 1.0, %v5904_v30  ;;  %v5933_v47 = vmul.f32 %v5886_v16, %v17727_v51  ;;  %v5901_v17 = vsel %vm5898_vm9, %v5900_v7, %v5896_v40  ;;  %v12191_v57 = vor.u32 %v13946_v20, %v12188_v1  ;;  %v12164_v36 = vld [vmem:[%s19538_s5 + $0x5d0] sm:$0xf0]  ;;  %v12146_v40 = vld [vmem:[%s19538_s5 + $0x5a0] sm:$0xf] }
0x21c4   :  { %v5919_v33 = vmul.f32 %v14523_v58, %v5872_v39  ;;  %vm5924_vm12 = vweird.f32 %v14523_v58  ;;  %v5934_v35 = vmul.f32 %v5901_v17, %v17729_v14  ;;  %v13937_v7 = vld [vmem:[%s19538_s5 + $0x5a4] sm:$0xf]  ;;  %v13938_v17 = vld [vmem:[%s19538_s5 + $0x5ac] sm:$0xf] }
0x21c5   :  { %v5906_v48 = vmul.f32 %v14521_v31, %v5905_v61  ;;  %vm5925_vm15 = vmor %vm5923_vm14, %vm5924_vm12  ;;  %v5937_v23 = vmul.f32 %v5933_v47, %v5838_v56  ;;  %v12187_v56 = vor.u32 %v13948_v46, %v12186_v9  ;;  %6377 = vmatpush.bf16.msra.mxu3 %v12191_v57  ;;  %v12151_v11 = vor.u32 %v13937_v7, %v12148_v49  ;;  %v12100_v9 = vld [vmem:[%s19538_s5 + $0x550] sm:$0xf0]  ;;  %v12106_v46 = vld [vmem:[%s19538_s5 + $0x548] sm:$0xf] }
0x21c6   :  { %v5920_v4 = vsub.f32 1.0, %v5919_v33  ;;  %v5938_v2 = vmul.f32 %v5934_v35, %v5852_v53  ;;  %v13944_v33 = vld [vmem:[%s19538_s5 + $0x5d4] sm:$0xf0]  ;;  %v12167_v53 = vor.u32 %v13941_v60, %v12164_v36  ;;  %v13926_v1 = vld [vmem:[%s19538_s5 + $0x54c] sm:$0xf] }
0x21c7   :  { %v5907_v8 = vadd.f32 %v14521_v31, %v5906_v48  ;;  %6363 = vmatpush.bf16.msra.mxu2 %v12187_v56  ;;  %v12171_v3 = vor.u32 %v13944_v33, %v12170_v55  ;;  %v13942_v48 = vld [vmem:[%s19538_s5 + $0x5cc] sm:$0xf]  ;;  %v12108_v57 = vld [vmem:[%s19538_s5 + $0x558] sm:$0xf0]  ;;  %v13923_v60 = vld [vmem:[%s19538_s5 + $0x52c] sm:$0xf0] }
0x21c8   :  { %v5921_v50 = vmul.f32 %v14523_v58, %v5920_v4  ;;  %v12175_v16 = vor.u32 %v13942_v48, %v12172_v62  ;;  %v13939_v4 = vld [vmem:[%s19538_s5 + $0x5ac] sm:$0xf0]  ;;  %v12084_v55 = vld [vmem:[%s19538_s5 + $0x530] sm:$0xf0]  ;;  %v12090_v33 = vld [vmem:[%s19538_s5 + $0x528] sm:$0xf] }
0x21c9   :  { %v5911_v52 = vsel %vm5910_vm11, %v14521_v31, %v5907_v8  ;;  %v12147_v8 = vor.u32 %v13939_v4, %v12146_v40  ;;  %v13922_v62 = vld [vmem:[%s19538_s5 + $0x52c] sm:$0xf]  ;;  %v12066_v7 = vld [vmem:[%s19538_s5 + $0x500] sm:$0xf]  ;;  %v13917_v49 = vld [vmem:[%s19538_s5 + $0x504] sm:$0xf] }
0x21ca   :  { %v5916_v10 = vsel %vm5913_vm13, %v5915_v0, %v5911_v52  ;;  %v5922_v18 = vadd.f32 %v14523_v58, %v5921_v50  ;;  %6378 = vmatpush.bf16.msra.mxu3 %v12175_v16  ;;  %v12154_v0 = vld [vmem:[%s19538_s5 + $0x5a8] sm:$0xf]  ;;  %v13940_v50 = vld [vmem:[%s19538_s5 + $0x5b4] sm:$0xf0]  ;;  %v12156_v52 = vld [vmem:[%s19538_s5 + $0x5b8] sm:$0xf0] }
0x21cb   :  { %v5935_v5 = vmul.f32 %v5916_v10, %v17745_v15  ;;  %6364 = vmatpush.bf16.msra.mxu2 %v12171_v3  ;;  %v12155_v47 = vor.u32 %v13940_v50, %v12154_v0  ;;  %v12159_v10 = vor.u32 %v13938_v17, %v12156_v52  ;;  %v12092_v16 = vld [vmem:[%s19538_s5 + $0x538] sm:$0xf0]  ;;  %v13920_v17 = vld [vmem:[%s19538_s5 + $0x514] sm:$0xf0] }
0x21cc   :  { %v5926_v22 = vsel %vm5925_vm15, %v14523_v58, %v5922_v18  ;;  %v12162_v58 = vld [vmem:[%s19538_s5 + $0x5c0] sm:$0xf]  ;;  %v12095_v40 = vor.u32 %v13922_v62, %v12092_v16 }
0x21cd   :  { %v5939_v24 = vmul.f32 %v5935_v5, %v5840_v21  ;;  %v5931_v25 = vsel %vm5928_vm0, %v5930_v45, %v5926_v22  ;;  %v12163_v61 = vor.u32 %v13943_v59, %v12162_v58  ;;  %v12130_v18 = vld [vmem:[%s19538_s5 + $0x580] sm:$0xf]  ;;  %v13935_v5 = vld [vmem:[%s19538_s5 + $0x58c] sm:$0xf0]  ;;  %v13933_v45 = vld [vmem:[%s19538_s5 + $0x584] sm:$0xf]  ;;  %v12111_v58 = vor.u32 %v13926_v1, %v12108_v57 }
0x21ce   :  { %v5936_v51 = vmul.f32 %v5931_v25, %v17747_v37  ;;  %6379 = vmatpush.bf16.msra.mxu3 %v12159_v10  ;;  %v12131_v35 = vor.u32 %v13935_v5, %v12130_v18  ;;  %v12132_v21 = vld [vmem:[%s19538_s5 + $0x590] sm:$0xf0]  ;;  %v12138_v22 = vld [vmem:[%s19538_s5 + $0x588] sm:$0xf]  ;;  %v12082_v59 = vld [vmem:[%s19538_s5 + $0x520] sm:$0xf] }
0x21cf   :  { %v5941_v34 = vpack.c.bf16 %v5939_v24, %v5937_v23  ;;  %6365 = vmatpush.bf16.msra.mxu2 %v12155_v47  ;;  %v13936_v23 = vld [vmem:[%s19538_s5 + $0x594] sm:$0xf0]  ;;  %v12135_v24 = vor.u32 %v13933_v45, %v12132_v21  ;;  %v12083_v36 = vor.u32 %v13923_v60, %v12082_v59  ;;  %v12074_v47 = vld [vmem:[%s19538_s5 + $0x508] sm:$0xf]  ;;  %v13918_v18 = vld [vmem:[%s19538_s5 + $0x50c] sm:$0xf] }
0x21d0   :  { %v5940_v29 = vmul.f32 %v5936_v51, %v5854_v26  ;;  %v12139_v25 = vor.u32 %v13936_v23, %v12138_v22  ;;  %v13934_v51 = vld [vmem:[%s19538_s5 + $0x58c] sm:$0xf]  ;;  %v12140_v26 = vld [vmem:[%s19538_s5 + $0x598] sm:$0xf0]  ;;  %v12075_v10 = vor.u32 %v13920_v17, %v12074_v47 }
0x21d1   :  { %6080 = vmatmul.bf16.vlgmr.msrb.gmra.mxu2 %v5941_v34  ;;  %v12143_v34 = vor.u32 %v13934_v51, %v12140_v26  ;;  %v12076_v5 = vld [vmem:[%s19538_s5 + $0x518] sm:$0xf0] }
0x21d2   :  { %v5942_v6 = vpack.c.bf16 %v5940_v29, %v5938_v2  ;;  %v12114_v2 = vld [vmem:[%s19538_s5 + $0x560] sm:$0xf]  ;;  %v13931_v29 = vld [vmem:[%s19538_s5 + $0x56c] sm:$0xf0] }
0x21d3   :  { %6366 = vmatpush.bf16.msra.mxu2 %v12139_v25  ;;  %6380 = vmatpush.bf16.msra.mxu3 %v12143_v34 }
0x21d4   :  { %6094 = vmatmul.bf16.vlgmr.msrb.gmra.mxu3 %v5942_v6  ;;  %v13929_v6 = vld [vmem:[%s19538_s5 + $0x564] sm:$0xf] }
0x2254   :  { %v6081_v15 = vpop.f32.mrf.mxu2 }
0x2257   :  { %v6095_v27 = vpop.f32.mrf.mxu3 }
0x2258   :  { %v6096_v38 = vadd.f32 %v6095_v27, %v6081_v15  ;;  %v12115_v15 = vor.u32 %v13931_v29, %v12114_v2  ;;  %v12116_v27 = vld [vmem:[%s19538_s5 + $0x570] sm:$0xf0] }
0x225a   :  { %v17774_v14 = vadd.f32 %v6096_v38, %v17489_v19  ;;  %v13947_v19 = vld [vmem:[%s19538_s5 + $0x5ec] sm:$0xf0]  ;;  %v12122_v38 = vld [vmem:[%s19538_s5 + $0x568] sm:$0xf] }
0x225b   :  { %v12179_v31 = vor.u32 %v13947_v19, %v12178_v43  ;;  %v12098_v19 = vld [vmem:[%s19538_s5 + $0x540] sm:$0xf] }
0x225c   :  { %v6104_v54 = vmul.f32 %v17774_v14, %v17774_v14  ;;  %v6083_v12 = vpop.f32.mrf.mxu2 }
0x225d   :  { %6335 = vmatpush.bf16.msra.mxu0 %v12179_v31  ;;  %v13925_v31 = vld [vmem:[%s19538_s5 + $0x544] sm:$0xf] }
0x225e   :  { %6106 = vadd.xlane.f32.xlu1 %v6104_v54  ;;  %v13932_v54 = vld [vmem:[%s19538_s5 + $0x574] sm:$0xf0]  ;;  %v12103_v56 = vor.u32 %v13925_v31, %v12100_v9 }
0x225f   :  { %v6097_v39 = vpop.f32.mrf.mxu3 }
0x2260   :  { %v6098_v37 = vadd.f32 %v6097_v39, %v6083_v12  ;;  %v12119_v12 = vor.u32 %v13929_v6, %v12116_v27  ;;  %v12123_v39 = vor.u32 %v13932_v54, %v12122_v38 }
0x2261   :  { %6336 = vmatpush.bf16.msra.mxu0 %v12163_v61  ;;  %v13921_v61 = vld [vmem:[%s19538_s5 + $0x524] sm:$0xf] }
0x2262   :  { %v17779_v41 = vadd.f32 %v6098_v37, %v17494_v63  ;;  %v12180_v63 = vld [vmem:[%s19538_s5 + $0x5f0] sm:$0xf0]  ;;  %v13930_v37 = vld [vmem:[%s19538_s5 + $0x56c] sm:$0xf]  ;;  %6367 = vmatpush.bf16.msra.mxu2 %v12123_v39  ;;  %v12087_v3 = vor.u32 %v13921_v61, %v12084_v55  ;;  %v14236_v39 = vld [vmem:[%s19537_s4 + $0x5] ss:$0 sm:$0xff] }
0x2263   :  { %v12183_v30 = vor.u32 %v13945_v44, %v12180_v63  ;;  %v13927_v44 = vld [vmem:[%s19538_s5 + $0x54c] sm:$0xf0]  ;;  %v14726_v61 = vld [vmem:[%s19540_s1 + $0x8] sm:$0xff] }
0x2264   :  { %v6105_v42 = vmul.f32 %v17779_v41, %v17779_v41  ;;  %v12099_v63 = vor.u32 %v13927_v44, %v12098_v19  ;;  %v14727_v55 = vld [vmem:[%s19539_s2 + $0x8] sm:$0xff] }
0x2265   :  { %6349 = vmatpush.bf16.msra.mxu1 %v12183_v30  ;;  %6337 = vmatpush.bf16.msra.mxu0 %v12147_v8  ;;  %v13928_v30 = vld [vmem:[%s19538_s5 + $0x554] sm:$0xf0]  ;;  %v13919_v8 = vld [vmem:[%s19538_s5 + $0x50c] sm:$0xf0] }
0x2266   :  { %6108 = vadd.xlane.f32.xlu0 %v6105_v42  ;;  %v12124_v42 = vld [vmem:[%s19538_s5 + $0x578] sm:$0xf0]  ;;  %v12107_v20 = vor.u32 %v13928_v30, %v12106_v46  ;;  %v12067_v50 = vor.u32 %v13919_v8, %v12066_v7  ;;  %v14724_v46 = vld [vmem:[%s19540_s1] sm:$0xff] }
0x2267   :  { %v12127_v43 = vor.u32 %v13930_v37, %v12124_v42 }
0x2268   :  { %6368 = vmatpush.bf16.msra.mxu2 %v12107_v20 }
0x2269   :  { %6350 = vmatpush.bf16.msra.mxu1 %v12167_v53  ;;  %6338 = vmatpush.bf16.msra.mxu0 %v12131_v35  ;;  %v13924_v53 = vld [vmem:[%s19538_s5 + $0x534] sm:$0xf0]  ;;  %v12079_v35 = vor.u32 %v13918_v18, %v12076_v5 }
0x226a   :  { %6381 = vmatpush.bf16.msra.mxu3 %v12127_v43  ;;  %v12091_v48 = vor.u32 %v13924_v53, %v12090_v33 }
0x226c   :  { %6369 = vmatpush.bf16.msra.mxu2 %v12091_v48 }
0x226d   :  { %6351 = vmatpush.bf16.msra.mxu1 %v12151_v11  ;;  %6339 = vmatpush.bf16.msra.mxu0 %v12115_v15  ;;  %v12068_v11 = vld [vmem:[%s19538_s5 + $0x510] sm:$0xf0] }
0x226e   :  { %6382 = vmatpush.bf16.msra.mxu3 %v12111_v58  ;;  %v12071_v52 = vor.u32 %v13917_v49, %v12068_v11 }
0x2270   :  { %6370 = vmatpush.bf16.msra.mxu2 %v12075_v10 }
0x2271   :  { %6352 = vmatpush.bf16.msra.mxu1 %v12135_v24  ;;  %6340 = vmatpush.bf16.msra.mxu0 %v12099_v63 }
0x2272   :  { %6383 = vmatpush.bf16.msra.mxu3 %v12095_v40 }
0x2275   :  { %6353 = vmatpush.bf16.msra.mxu1 %v12119_v12  ;;  %6341 = vmatpush.bf16.msra.mxu0 %v12083_v36 }
0x2276   :  { %6384 = vmatpush.bf16.msra.mxu3 %v12079_v35 }
0x2279   :  { %6354 = vmatpush.bf16.msra.mxu1 %v12103_v56  ;;  %6342 = vmatpush.bf16.msra.mxu0 %v12067_v50  ;;  %v14725_v56 = vld [vmem:[%s19539_s2] sm:$0xff] }
0x227d   :  { %6355 = vmatpush.bf16.msra.mxu1 %v12087_v3 }
0x2281   :  { %6356 = vmatpush.bf16.msra.mxu1 %v12071_v52 }
0x22d1   :  { %v6107_v4 = vpop.xlane.xlu1 %6106 }
0x22d2   :  { %v6110_v0 = vmul.f32 %v6107_v4, %v14995_v32 }
0x22d4   :  { %v6112_v45 = vadd.f32 1e-05, %v6110_v0 }
0x22d6   :  { %14524 = vrsqrt.f32 %v6112_v45  ;;  %vm6120_vm2 = vweird.f32 %v6112_v45 }
0x22d9   :  { %v6109_v21 = vpop.xlane.xlu0 %6108 }
0x22da   :  { %v6111_v22 = vmul.f32 %v6109_v21, %v14995_v32 }
0x22dc   :  { %v14525_v23 = vpop.eup %14524  ;;  %v6113_v24 = vadd.f32 1e-05, %v6111_v22 }
0x22dd   :  { %v6115_v25 = vmul.f32 %v14525_v23, %v6112_v45  ;;  %vm6121_vm1 = vweird.f32 %v14525_v23 }
0x22de   :  { %14526 = vrsqrt.f32 %v6113_v24  ;;  %vm6122_vm3 = vmor %vm6120_vm2, %vm6121_vm1  ;;  %vm6130_vm5 = vweird.f32 %v6113_v24 }
0x22df   :  { %v6116_v51 = vmul.f32 %v14525_v23, %v6115_v25  ;;  %v14728_v25 = vld [vmem:[%s19541_s3] sm:$0xff] }
0x22e1   :  { %v6117_v26 = vmul.f32 0.5, %v6116_v51 }
0x22e3   :  { %v6118_v34 = vsub.f32 1.5, %v6117_v26 }
0x22e4   :  { %v14527_v2 = vpop.eup %14526 }
0x22e5   :  { %v6125_v29 = vmul.f32 %v14527_v2, %v6113_v24  ;;  %v6119_v6 = vmul.f32 %v14525_v23, %v6118_v34  ;;  %vm6131_vm4 = vweird.f32 %v14527_v2 }
0x22e6   :  { %vm6132_vm6 = vmor %vm6130_vm5, %vm6131_vm4 }
0x22e7   :  { %v6126_v15 = vmul.f32 %v14527_v2, %v6125_v29  ;;  %v6123_v38 = vsel %vm6122_vm3, %v14525_v23, %v6119_v6 }
0x22e8   :  { %v6134_v37 = vmul.f32 %v6123_v38, %v17774_v14 }
0x22e9   :  { %v6127_v27 = vmul.f32 0.5, %v6126_v15 }
0x22ea   :  { %v6139_v19 = vmul.f32 %v14236_v39, %v6134_v37 }
0x22eb   :  { %v6128_v54 = vsub.f32 1.5, %v6127_v27  ;;  %v14730_v27 = vld [vmem:[%s19541_s3 + $0x10] sm:$0xff] }
0x22ed   :  { %v6129_v12 = vmul.f32 %v14527_v2, %v6128_v54 }
0x22ef   :  { %v6133_v42 = vsel %vm6132_vm6, %v14527_v2, %v6129_v12  ;;  %v14729_v2 = vld [vmem:[%s19541_s3 + $0x8] sm:$0xff] }
0x22f0   :  { %v6135_v43 = vmul.f32 %v6133_v42, %v17779_v41 }
0x22f2   :  { %v6140_v44 = vmul.f32 %v14236_v39, %v6135_v43  ;;  %v14731_v39 = vld [vmem:[%s19541_s3 + $0x18] sm:$0xff] }
0x22f4   :  { %v6141_v31 = vpack.c.bf16 %v6140_v44, %v6139_v19 }
0x22f6   :  { %6343 = vmatmul.bf16.vlgmr.msra.gmra.mxu0 %v6141_v31  ;;  %6357 = vmatmul.bf16.vlgmr.msra.gmra.mxu1 %v6141_v31 }
0x22f7   :  { %6371 = vmatmul.bf16.vlgmr.msra.gmra.mxu2 %v6141_v31  ;;  %6385 = vmatmul.bf16.vlgmr.msra.gmra.mxu3 %v6141_v31 }
0x2373   :  { %v6344_v63 = vpop.f32.mrf.mxu0  ;;  %v6358_v9 = vpop.f32.mrf.mxu1 }
0x2374   :  { %v6391_v30 = vmul.f32 %v14724_v46, %v6344_v63  ;;  %v6393_v20 = vmul.f32 %v14725_v56, %v6358_v9 }
0x2376   :  { %v6395_v53 = vadd.f32 %v6393_v20, %v6391_v30 }
0x237a   :  { %v6372_v1 = vpop.f32.mrf.mxu2  ;;  %v6386_v57 = vpop.f32.mrf.mxu3 }
0x237b   :  { %v6399_v58 = vmul.f32 %v6372_v1, %v15036_v13  ;;  %v6346_v59 = vpop.f32.mrf.mxu0  ;;  %v6360_v60 = vpop.f32.mrf.mxu1  ;;  %v6397_v49 = vmul.f32 %v14724_v46, %v6372_v1 }
0x237c   :  { %v6392_v36 = vmul.f32 %v14726_v61, %v6346_v59  ;;  %v6394_v33 = vmul.f32 %v14727_v55, %v6360_v60 }
0x237d   :  { %6403 = vrot.lane.b32.xlu2 %v6399_v58, %s14749_s21 }
0x237e   :  { %v6396_v3 = vadd.f32 %v6394_v33, %v6392_v36 }
0x2380   :  { %v14211_v48 = vpack.i.bf16 %v6396_v3, %v6395_v53  ;;  %v6419_v62 = vpack.c.bf16 %v6396_v3, %v6395_v53 }
0x2382   :  { %v6374_v16 = vpop.f32.mrf.mxu2  ;;  %v6388_v40 = vpop.f32.mrf.mxu3  ;;  %14212 = vrot.lane.b32.xlu0 %v14211_v48, %s14750_s29 }
0x2383   :  { %v6400_v4 = vmul.f32 %v6374_v16, %v15048_v28  ;;  %v17998_v7 = vpack.c.bf16 %v6388_v40, %v6386_v57  ;;  %v6398_v0 = vmul.f32 %v14726_v61, %v6374_v16 }
0x2385   :  { %6510 = vmatpush.bf16.msrb.mxu1 %v17998_v7  ;;  %6405 = vrot.lane.b32.xlu1 %v6400_v4, %s14749_s21 }
0x23d7   :  { %v6404_v8 = vpop.permute.xlu2 %6403 }
0x23d8   :  { %v6409_v11 = vadd.f32 %v6404_v8, %v6397_v49 }
0x23f4   :  { %v14213_v10 = vpop.permute.xlu0 %14212 }
0x23f5   :  { %v14215_v18 = vunpack.i.h.bf16 %v14213_v10  ;;  %v14214_v5 = vunpack.i.l.bf16 %v14213_v10 }
0x23f7   :  { %v6406_v50 = vpop.permute.xlu1 %6405  ;;  %v6420_v45 = vpack.c.bf16 %v14215_v18, %v14214_v5 }
0x23f8   :  { %v6410_v47 = vadd.f32 %v6406_v50, %v6398_v0 }
0x23fa   :  { %v6421_v17 = vpack.c.bf16 %v6410_v47, %v6409_v11 }
0x23fc   :  { %6598 = vrot.lane.b32.xlu2 %v6421_v17, %s14750_s29  ;;  %v6429_v52 = vsel %vm379_vm7, %v6421_v17, 0 }
0x23fd   :  { %6438 = vmatpush.bf16.xpose.msrb.mxu0 %v6429_v52 }
0x2404   :  { %6593 = vrot.lane.b32.xlu2 %v6419_v62, %s14749_s21  ;;  %12192 = vmatmul.msk.bf16.vlgmr.msrb.gmra.mxu0 %vm379_vm7, %v6419_v62 }
0x240c   :  { %6595 = vrot.lane.b32.xlu2 %v6420_v45, %s14749_s21 }
0x2414   :  { %12193 = vmatmul.msk.bf16.gmra.mxu0 %vm379_vm7, %v6420_v45 }
0x2456   :  { %v6599_v35 = vpop.permute.xlu2 %6598 }
0x2457   :  { %v6607_v21 = vsel %vm379_vm7, %v6599_v35, 0 }
0x2458   :  { %6616 = vmatpush.bf16.xpose.msra.mxu0 %v6607_v21 }
0x245e   :  { %v6594_v22 = vpop.permute.xlu2 %6593 }
0x245f   :  { %12222 = vmatmul.msk.bf16.vlgmr.msra.gmra.mxu0 %vm379_vm7, %v6594_v22 }
0x2466   :  { %v6596_v23 = vpop.permute.xlu2 %6595 }
0x246f   :  { %12223 = vmatmul.msk.bf16.gmra.mxu0 %vm379_vm7, %v6596_v23 }
0x2481   :  { %v6440_v24 = vpop.f32.mrf.mxu0 }
0x2482   :  { %v6441_v51 = vadd.f32 %v14728_v25, %v6440_v24 }
0x2484   :  { %v6450_v26 = vsel %vm408_vm8, %v6441_v51, -inf }
0x2485   :  { %6451 = vmax.xlane.f32.xlu0 %v6450_v26 }
0x2489   :  { %v6442_v34 = vpop.f32.mrf.mxu0 }
0x248a   :  { %v6443_v29 = vadd.f32 %v14729_v2, %v6442_v34 }
0x248c   :  { %v6453_v6 = vsel %vm408_vm8, %v6443_v29, -inf }
0x248d   :  { %6454 = vmax.xlane.f32.xlu1 %v6453_v6 }
0x2491   :  { %v6445_v15 = vpop.f32.mrf.mxu0 }
0x2492   :  { %v6446_v38 = vadd.f32 %v14730_v27, %v6445_v15 }
0x2494   :  { %v6456_v54 = vsel %vm408_vm8, %v6446_v38, -inf }
0x2495   :  { %6457 = vmax.xlane.f32.xlu2 %v6456_v54 }
0x2499   :  { %v6447_v12 = vpop.f32.mrf.mxu0 }
0x249a   :  { %v6448_v37 = vadd.f32 %v14731_v39, %v6447_v12 }
0x249c   :  { %v6459_v42 = vsel %vm408_vm8, %v6448_v37, -inf }
0x249d   :  { %6460 = vmax.xlane.f32.xlu0 %v6459_v42 }
0x24dc   :  { %v6618_v43 = vpop.f32.mrf.mxu0 }
0x24dd   :  { %v6619_v19 = vadd.f32 %v14728_v25, %v6618_v43 }
0x24df   :  { %v6628_v44 = vsel %vm408_vm8, %v6619_v19, -inf }
0x24e0   :  { %6629 = vmax.xlane.f32.xlu1 %v6628_v44 }
0x24e4   :  { %v6620_v31 = vpop.f32.mrf.mxu0 }
0x24e5   :  { %v6621_v63 = vadd.f32 %v14729_v2, %v6620_v31 }
0x24e7   :  { %v6631_v9 = vsel %vm408_vm8, %v6621_v63, -inf }
0x24e8   :  { %6632 = vmax.xlane.f32.xlu2 %v6631_v9 }
0x24ec   :  { %v6623_v46 = vpop.f32.mrf.mxu0 }
0x24ed   :  { %v6624_v30 = vadd.f32 %v14730_v27, %v6623_v46 }
0x24ef   :  { %v6634_v56 = vsel %vm408_vm8, %v6624_v30, -inf }
0x24f0   :  { %6635 = vmax.xlane.f32.xlu0 %v6634_v56 }
0x24f4   :  { %v6625_v20 = vpop.f32.mrf.mxu0 }
0x24f5   :  { %v6626_v1 = vadd.f32 %v14731_v39, %v6625_v20 }
0x24f7   :  { %v6637_v57 = vsel %vm408_vm8, %v6626_v1, -inf }
0x24f8   :  { %6638 = vmax.xlane.f32.xlu1 %v6637_v57  ;;  %v6452_v58 = vpop.xlane.xlu0 %6451 }
0x24f9   :  { %v6462_v59 = vsub.f32 %v6441_v51, %v6452_v58 }
0x24fb   :  { %v6466_v60 = vmul.f32 1.442695, %v6462_v59 }
0x24fd   :  { %14528 = vpow2.f32 %v6466_v60 }
0x2500   :  { %v6455_v61 = vpop.xlane.xlu1 %6454 }
0x2501   :  { %v6463_v36 = vsub.f32 %v6443_v29, %v6455_v61 }
0x2503   :  { %v14529_v55 = vpop.eup %14528  ;;  %v6468_v33 = vmul.f32 1.442695, %v6463_v36  ;;  %v13950_v36 = vld [vmem:[%s19542_s6 + $0x148] sm:$0xff] }
0x2504   :  { %v6474_v53 = vsel %vm408_vm8, %v14529_v55, 0.0  ;;  %6583 = vmatpush.bf16.msrb.mxu3 %v13950_v36  ;;  %v12391_v36 = vld [vmem:[%s19544_s8 + $0x5c8] sm:$0xf] }
0x2505   :  { %14530 = vpow2.f32 %v6468_v33  ;;  %6475 = vadd.xlane.f32.xlu2 %v6474_v53  ;;  %v13949_v33 = vld [vmem:[%s19542_s6 + $0x140] sm:$0xff] }
0x2508   :  { %v6458_v3 = vpop.xlane.xlu2 %6457  ;;  %6584 = vmatpush.bf16.msrb.mxu3 %v13949_v33 }
0x2509   :  { %v6464_v48 = vsub.f32 %v6446_v38, %v6458_v3 }
0x250b   :  { %v14531_v62 = vpop.eup %14530  ;;  %v6470_v16 = vmul.f32 1.442695, %v6464_v48 }
0x250c   :  { %v6477_v40 = vsel %vm408_vm8, %v14531_v62, 0.0 }
0x250d   :  { %14532 = vpow2.f32 %v6470_v16  ;;  %6478 = vadd.xlane.f32.xlu0 %v6477_v40  ;;  %v13952_v40 = vld [vmem:[%s19542_s6 + $0x158] sm:$0xff] }
0x250e   :  { %6554 = vmatpush.bf16.msrb.mxu2 %v13952_v40  ;;  %v13979_v40 = vld [vmem:[%s19544_s8 + $0x5ac] sm:$0xf0] }
0x2510   :  { %v6461_v4 = vpop.xlane.xlu0 %6460 }
0x2511   :  { %v6465_v8 = vsub.f32 %v6448_v37, %v6461_v4  ;;  %v13951_v4 = vld [vmem:[%s19542_s6 + $0x150] sm:$0xff] }
0x2512   :  { %6555 = vmatpush.bf16.msrb.mxu2 %v13951_v4  ;;  %v13977_v4 = vld [vmem:[%s19544_s8 + $0x5a4] sm:$0xf] }
0x2513   :  { %v14533_v49 = vpop.eup %14532  ;;  %v6472_v0 = vmul.f32 1.442695, %v6465_v8 }
0x2514   :  { %v6480_v50 = vsel %vm408_vm8, %v14533_v49, 0.0 }
0x2515   :  { %14534 = vpow2.f32 %v6472_v0  ;;  %6481 = vadd.xlane.f32.xlu1 %v6480_v50 }
0x251b   :  { %v14535_v11 = vpop.eup %14534 }
0x251c   :  { %v6483_v47 = vsel %vm408_vm8, %v14535_v11, 0.0 }
0x251d   :  { %6484 = vadd.xlane.f32.xlu2 %v6483_v47 }
0x2535   :  { %6675 = vrot.lane.b32.xlu2 %v17998_v7, %s14750_s29 }
0x2553   :  { %v6630_v17 = vpop.xlane.xlu1 %6629 }
0x2554   :  { %v6640_v52 = vsub.f32 %v6619_v19, %v6630_v17  ;;  %v13954_v17 = vld [vmem:[%s19542_s6 + $0x168] sm:$0xff] }
0x2555   :  { %6729 = vmatpush.bf16.msra.mxu2 %v13954_v17  ;;  %v13978_v17 = vld [vmem:[%s19544_s8 + $0x5ac] sm:$0xf] }
0x2556   :  { %v6644_v10 = vmul.f32 1.442695, %v6640_v52  ;;  %v13953_v52 = vld [vmem:[%s19542_s6 + $0x160] sm:$0xff] }
0x2558   :  { %14536 = vpow2.f32 %v6644_v10  ;;  %v13956_v10 = vld [vmem:[%s19542_s6 + $0x178] sm:$0xff] }
0x2559   :  { %6730 = vmatpush.bf16.msra.mxu2 %v13953_v52  ;;  %6765 = vmatpush.bf16.msra.mxu3 %v13956_v10  ;;  %v12377_v52 = vld [vmem:[%s19544_s8 + $0x5b8] sm:$0xf0] }
0x255a   :  { %v12380_v10 = vor.u32 %v13978_v17, %v12377_v52 }
0x255b   :  { %v6633_v18 = vpop.xlane.xlu2 %6632 }
0x255c   :  { %v6641_v5 = vsub.f32 %v6621_v63, %v6633_v18  ;;  %v13955_v18 = vld [vmem:[%s19542_s6 + $0x170] sm:$0xff] }
0x255d   :  { %6766 = vmatpush.bf16.msra.mxu3 %v13955_v18  ;;  %v12351_v18 = vld [vmem:[%s19544_s8 + $0x580] sm:$0xf] }
0x255e   :  { %v14537_v45 = vpop.eup %14536  ;;  %v6646_v35 = vmul.f32 1.442695, %v6641_v5 }
0x255f   :  { %v6652_v21 = vsel %vm408_vm8, %v14537_v45, 0.0 }
0x2560   :  { %14538 = vpow2.f32 %v6646_v35  ;;  %6653 = vadd.xlane.f32.xlu0 %v6652_v21 }
0x2563   :  { %v6636_v22 = vpop.xlane.xlu0 %6635 }
0x2564   :  { %v6642_v23 = vsub.f32 %v6624_v30, %v6636_v22 }
0x2566   :  { %v14539_v24 = vpop.eup %14538  ;;  %v6648_v25 = vmul.f32 1.442695, %v6642_v23 }
0x2567   :  { %v6655_v51 = vsel %vm408_vm8, %v14539_v24, 0.0 }
0x2568   :  { %14540 = vpow2.f32 %v6648_v25  ;;  %6656 = vadd.xlane.f32.xlu1 %v6655_v51 }
0x256b   :  { %v6639_v7 = vpop.xlane.xlu1 %6638 }
0x256c   :  { %v6643_v26 = vsub.f32 %v6626_v1, %v6639_v7 }
0x256e   :  { %v14541_v34 = vpop.eup %14540  ;;  %v6650_v2 = vmul.f32 1.442695, %v6643_v26 }
0x256f   :  { %v6658_v29 = vsel %vm408_vm8, %v14541_v34, 0.0 }
0x2570   :  { %14542 = vpow2.f32 %v6650_v2  ;;  %6659 = vadd.xlane.f32.xlu0 %v6658_v29 }
0x2576   :  { %v14543_v6 = vpop.eup %14542 }
0x2577   :  { %v6661_v15 = vsel %vm408_vm8, %v14543_v6, 0.0 }
0x2578   :  { %6662 = vadd.xlane.f32.xlu1 %v6661_v15  ;;  %v6476_v27 = vpop.xlane.xlu2 %6475 }
0x2579   :  { %14544 = vrcp.f32 %v6476_v27 }
0x257f   :  { %v14545_v54 = vpop.eup %14544 }
0x2580   :  { %v6479_v38 = vpop.xlane.xlu0 %6478  ;;  %v6490_v39 = vmul.f32 %v14545_v54, %v14529_v55 }
0x2581   :  { %14546 = vrcp.f32 %v6479_v38 }
0x2587   :  { %v14547_v12 = vpop.eup %14546 }
0x2588   :  { %v6491_v37 = vmul.f32 %v14547_v12, %v14531_v62  ;;  %v6482_v43 = vpop.xlane.xlu1 %6481 }
0x2589   :  { %14548 = vrcp.f32 %v6482_v43 }
0x258a   :  { %v6494_v42 = vpack.c.bf16 %v6491_v37, %v6490_v39 }
0x258c   :  { %12194 = vmatmul.msk.bf16.vlgmr.msrb.gmra.mxu1 %vm408_vm8, %v6494_v42 }
0x258f   :  { %v14549_v44 = vpop.eup %14548 }
0x2590   :  { %v6485_v19 = vpop.xlane.xlu2 %6484  ;;  %v6492_v63 = vmul.f32 %v14549_v44, %v14533_v49  ;;  %v13985_v44 = vld [vmem:[%s19544_s8 + $0x5e4] sm:$0xf] }
0x2591   :  { %14550 = vrcp.f32 %v6485_v19  ;;  %v13987_v19 = vld [vmem:[%s19544_s8 + $0x5ec] sm:$0xf0] }
0x2597   :  { %v14551_v31 = vpop.eup %14550 }
0x2598   :  { %v6493_v9 = vmul.f32 %v14551_v31, %v14535_v11  ;;  %v6676_v46 = vpop.permute.xlu2 %6675 }
0x2599   :  { %6691 = vmatpush.bf16.msra.mxu1 %v6676_v46 }
0x259a   :  { %v6495_v30 = vpack.c.bf16 %v6493_v9, %v6492_v63  ;;  %v12407_v63 = vld [vmem:[%s19544_s8 + $0x5e8] sm:$0xf]  ;;  %v13988_v9 = vld [vmem:[%s19544_s8 + $0x5f4] sm:$0xf0] }
0x259c   :  { %12195 = vmatmul.msk.bf16.gmra.mxu1 %vm408_vm8, %v6495_v30  ;;  %v12408_v30 = vor.u32 %v13988_v9, %v12407_v63  ;;  %v12321_v63 = vld [vmem:[%s19544_s8 + $0x550] sm:$0xf0]  ;;  %v12327_v9 = vld [vmem:[%s19544_s8 + $0x548] sm:$0xf] }
0x25d3   :  { %v6654_v56 = vpop.xlane.xlu0 %6653 }
0x25d4   :  { %14552 = vrcp.f32 %v6654_v56  ;;  %v13986_v56 = vld [vmem:[%s19544_s8 + $0x5ec] sm:$0xf] }
0x25da   :  { %v14553_v1 = vpop.eup %14552 }
0x25db   :  { %v6657_v20 = vpop.xlane.xlu1 %6656  ;;  %v6668_v58 = vmul.f32 %v14553_v1, %v14537_v45 }
0x25dc   :  { %14554 = vrcp.f32 %v6657_v20  ;;  %v12409_v20 = vld [vmem:[%s19544_s8 + $0x5f8] sm:$0xf0] }
0x25dd   :  { %v12412_v1 = vor.u32 %v13986_v56, %v12409_v20  ;;  %v13966_v20 = vld [vmem:[%s19544_s8 + $0x54c] sm:$0xf] }
0x25e2   :  { %v14555_v57 = vpop.eup %14554 }
0x25e3   :  { %v6669_v59 = vmul.f32 %v14555_v57, %v14539_v24  ;;  %v6660_v61 = vpop.xlane.xlu0 %6659  ;;  %v12383_v57 = vld [vmem:[%s19544_s8 + $0x5c0] sm:$0xf] }
0x25e4   :  { %14556 = vrcp.f32 %v6660_v61  ;;  %v12385_v61 = vld [vmem:[%s19544_s8 + $0x5d0] sm:$0xf0] }
0x25e5   :  { %v6672_v60 = vpack.c.bf16 %v6669_v59, %v6668_v58  ;;  %v13983_v58 = vld [vmem:[%s19544_s8 + $0x5cc] sm:$0xf0]  ;;  %v13981_v59 = vld [vmem:[%s19544_s8 + $0x5c4] sm:$0xf] }
0x25e6   :  { %v12388_v33 = vor.u32 %v13981_v59, %v12385_v61  ;;  %v13963_v59 = vld [vmem:[%s19544_s8 + $0x52c] sm:$0xf0] }
0x25e7   :  { %12224 = vmatmul.msk.bf16.vlgmr.msra.gmra.mxu1 %vm408_vm8, %v6672_v60  ;;  %v12384_v60 = vor.u32 %v13983_v58, %v12383_v57  ;;  %v12303_v58 = vld [vmem:[%s19544_s8 + $0x520] sm:$0xf] }
0x25e8   :  { %v12304_v61 = vor.u32 %v13963_v59, %v12303_v58  ;;  %v14000_v58 = vld [vmem:[%s19545_s9 + $0x2d8] sm:$0xff] }
0x25ea   :  { %v14557_v53 = vpop.eup %14556 }
0x25eb   :  { %v6663_v55 = vpop.xlane.xlu1 %6662  ;;  %v6670_v48 = vmul.f32 %v14557_v53, %v14541_v34 }
0x25ec   :  { %14558 = vrcp.f32 %v6663_v55  ;;  %v13984_v55 = vld [vmem:[%s19544_s8 + $0x5d4] sm:$0xf0] }
0x25ed   :  { %v12392_v53 = vor.u32 %v13984_v55, %v12391_v36  ;;  %v12305_v36 = vld [vmem:[%s19544_s8 + $0x530] sm:$0xf0]  ;;  %v12311_v55 = vld [vmem:[%s19544_s8 + $0x528] sm:$0xf] }
0x25f2   :  { %v14559_v3 = vpop.eup %14558 }
0x25f3   :  { %v6671_v62 = vmul.f32 %v14559_v3, %v14543_v6  ;;  %v13982_v3 = vld [vmem:[%s19544_s8 + $0x5cc] sm:$0xf] }
0x25f5   :  { %v6673_v16 = vpack.c.bf16 %v6671_v62, %v6670_v48  ;;  %v12393_v48 = vld [vmem:[%s19544_s8 + $0x5d8] sm:$0xf0] }
0x25f6   :  { %v12396_v62 = vor.u32 %v13982_v3, %v12393_v48  ;;  %v13962_v48 = vld [vmem:[%s19544_s8 + $0x52c] sm:$0xf] }
0x25f7   :  { %12225 = vmatmul.msk.bf16.gmra.mxu1 %vm408_vm8, %v6673_v16  ;;  %v12367_v16 = vld [vmem:[%s19544_s8 + $0x5a0] sm:$0xf] }
0x2609   :  { %v6512_v8 = vpop.f32.mrf.mxu1 }
0x2611   :  { %v6514_v49 = vpop.f32.mrf.mxu1 }
0x2612   :  { %v6522_v0 = vpack.c.bf16 %v6514_v49, %v6512_v8  ;;  %v12368_v8 = vor.u32 %v13979_v40, %v12367_v16  ;;  %v12369_v49 = vld [vmem:[%s19544_s8 + $0x5b0] sm:$0xf0]  ;;  %v12287_v40 = vld [vmem:[%s19544_s8 + $0x500] sm:$0xf] }
0x2614   :  { %12221 = vmatmul.msk.bf16.vlgmr.msrb.gmra.mxu3 %vm379_vm7, %v6522_v0  ;;  %v12375_v0 = vld [vmem:[%s19544_s8 + $0x5a8] sm:$0xf] }
0x2615   :  { %7052 = vmatpush.bf16.msrb.mxu3 %v12412_v1  ;;  %v12329_v1 = vld [vmem:[%s19544_s8 + $0x558] sm:$0xf0] }
0x2616   :  { %v12332_v57 = vor.u32 %v13966_v20, %v12329_v1  ;;  %v13993_v20 = vld [vmem:[%s19545_s9 + $0x2a0] sm:$0xff] }
0x2617   :  { %v14001_v1 = vld [vmem:[%s19545_s9 + $0x2e0] sm:$0xff] }
0x2619   :  { %v6517_v50 = vpop.f32.mrf.mxu1  ;;  %7053 = vmatpush.bf16.msrb.mxu3 %v12396_v62  ;;  %v12313_v62 = vld [vmem:[%s19544_s8 + $0x538] sm:$0xf0] }
0x261a   :  { %v12316_v16 = vor.u32 %v13962_v48, %v12313_v62 }
0x261d   :  { %7054 = vmatpush.bf16.msrb.mxu3 %v12380_v10 }
0x2621   :  { %v6519_v11 = vpop.f32.mrf.mxu1 }
0x2622   :  { %v6528_v47 = vpack.c.bf16 %v6519_v11, %v6517_v50  ;;  %v13980_v50 = vld [vmem:[%s19544_s8 + $0x5b4] sm:$0xf0]  ;;  %v12372_v11 = vor.u32 %v13977_v4, %v12369_v49  ;;  %v13959_v4 = vld [vmem:[%s19544_s8 + $0x50c] sm:$0xf0] }
0x2624   :  { %12212 = vmatmul.msk.bf16.vlgmr.msrb.gmra.mxu2 %vm379_vm7, %v6528_v47  ;;  %v12376_v47 = vor.u32 %v13980_v50, %v12375_v0  ;;  %v12288_v0 = vor.u32 %v13959_v4, %v12287_v40  ;;  %v12289_v50 = vld [vmem:[%s19544_s8 + $0x510] sm:$0xf0] }
0x2625   :  { %7038 = vmatpush.bf16.msrb.mxu2 %v12408_v30 }
0x2629   :  { %7039 = vmatpush.bf16.msrb.mxu2 %v12392_v53 }
0x262d   :  { %7040 = vmatpush.bf16.msrb.mxu2 %v12376_v47  ;;  %v13960_v47 = vld [vmem:[%s19544_s8 + $0x514] sm:$0xf0] }
0x2664   :  { %v6693_v5 = vpop.f32.mrf.mxu1 }
0x266c   :  { %v6695_v45 = vpop.f32.mrf.mxu1 }
0x266d   :  { %v6703_v35 = vpack.c.bf16 %v6695_v45, %v6693_v5  ;;  %v13975_v5 = vld [vmem:[%s19544_s8 + $0x58c] sm:$0xf0]  ;;  %v13973_v45 = vld [vmem:[%s19544_s8 + $0x584] sm:$0xf] }
0x266f   :  { %12238 = vmatmul.msk.bf16.vlgmr.msra.gmra.mxu2 %vm379_vm7, %v6703_v35  ;;  %v12352_v35 = vor.u32 %v13975_v5, %v12351_v18  ;;  %v13958_v18 = vld [vmem:[%s19544_s8 + $0x50c] sm:$0xf]  ;;  %v12297_v5 = vld [vmem:[%s19544_s8 + $0x518] sm:$0xf0] }
0x2674   :  { %v6698_v21 = vpop.f32.mrf.mxu1 }
0x267c   :  { %v6700_v22 = vpop.f32.mrf.mxu1 }
0x267d   :  { %v6739_v23 = vpack.c.bf16 %v6700_v22, %v6698_v21  ;;  %v12353_v21 = vld [vmem:[%s19544_s8 + $0x590] sm:$0xf0]  ;;  %v12359_v22 = vld [vmem:[%s19544_s8 + $0x588] sm:$0xf] }
0x267f   :  { %12251 = vmatmul.msk.bf16.vlgmr.msra.gmra.mxu3 %vm379_vm7, %v6739_v23  ;;  %v13976_v23 = vld [vmem:[%s19544_s8 + $0x594] sm:$0xf0] }
0x2697   :  { %v6586_v25 = vpop.f32.mrf.mxu3 }
0x269f   :  { %v6588_v7 = vpop.f32.mrf.mxu3 }
0x26a7   :  { %v6557_v24 = vpop.f32.mrf.mxu2 }
0x26a8   :  { %v6587_v34 = vadd.f32 %v6586_v25, %v6557_v24  ;;  %v12356_v24 = vor.u32 %v13973_v45, %v12353_v21  ;;  %v12360_v25 = vor.u32 %v13976_v23, %v12359_v22  ;;  %v12300_v45 = vor.u32 %v13958_v18, %v12297_v5 }
0x26aa   :  { %7041 = vmatpush.bf16.msrb.mxu2 %v12360_v25 }
0x26af   :  { %v6559_v51 = vpop.f32.mrf.mxu2 }
0x26b0   :  { %v6589_v38 = vadd.f32 %v6588_v7, %v6559_v51  ;;  %v13974_v51 = vld [vmem:[%s19544_s8 + $0x58c] sm:$0xf]  ;;  %v12361_v7 = vld [vmem:[%s19544_s8 + $0x598] sm:$0xf0] }
0x26f2   :  { %v6732_v26 = vpop.f32.mrf.mxu2 }
0x26f3   :  { %v6737_v2 = vadd.f32 %v6732_v26, %v6587_v34  ;;  %v12364_v26 = vor.u32 %v13974_v51, %v12361_v7  ;;  %v12335_v34 = vld [vmem:[%s19544_s8 + $0x560] sm:$0xf] }
0x26f5   :  { %7055 = vmatpush.bf16.msrb.mxu3 %v12364_v26 }
0x26fa   :  { %v6734_v27 = vpop.f32.mrf.mxu2 }
0x26fb   :  { %v6738_v12 = vadd.f32 %v6734_v27, %v6589_v38  ;;  %v12337_v27 = vld [vmem:[%s19544_s8 + $0x570] sm:$0xf0]  ;;  %v12343_v38 = vld [vmem:[%s19544_s8 + $0x568] sm:$0xf] }
0x2702   :  { %v6768_v29 = vpop.f32.mrf.mxu3 }
0x2703   :  { %v6773_v6 = vadd.f32 %v6768_v29, %v6737_v2  ;;  %v13971_v2 = vld [vmem:[%s19544_s8 + $0x56c] sm:$0xf0]  ;;  %v13969_v29 = vld [vmem:[%s19544_s8 + $0x564] sm:$0xf] }
0x2705   :  { %v18074_v15 = vadd.f32 %v6773_v6, %v17774_v14  ;;  %v12399_v14 = vld [vmem:[%s19544_s8 + $0x5e0] sm:$0xf]  ;;  %v12336_v6 = vor.u32 %v13971_v2, %v12335_v34 }
0x2706   :  { %v12400_v31 = vor.u32 %v13987_v19, %v12399_v14  ;;  %v12319_v19 = vld [vmem:[%s19544_s8 + $0x540] sm:$0xf] }
0x2707   :  { %v6779_v54 = vmul.f32 %v18074_v15, %v18074_v15 }
0x2708   :  { %7010 = vmatpush.bf16.msrb.mxu0 %v12400_v31  ;;  %v13965_v31 = vld [vmem:[%s19544_s8 + $0x544] sm:$0xf] }
0x2709   :  { %6781 = vadd.xlane.f32.xlu0 %v6779_v54  ;;  %v13972_v54 = vld [vmem:[%s19544_s8 + $0x574] sm:$0xf0]  ;;  %v12324_v30 = vor.u32 %v13965_v31, %v12321_v63 }
0x270a   :  { %v6770_v39 = vpop.f32.mrf.mxu3  ;;  %v14004_v63 = vld [vmem:[%s19545_s9 + $0x2f8] sm:$0xff] }
0x270b   :  { %v6774_v37 = vadd.f32 %v6770_v39, %v6738_v12  ;;  %v12340_v12 = vor.u32 %v13969_v29, %v12337_v27  ;;  %v12344_v39 = vor.u32 %v13972_v54, %v12343_v38 }
0x270c   :  { %7011 = vmatpush.bf16.msrb.mxu0 %v12384_v60  ;;  %v13961_v60 = vld [vmem:[%s19544_s8 + $0x524] sm:$0xf] }
0x270d   :  { %v18079_v42 = vadd.f32 %v6774_v37, %v17779_v41  ;;  %v12401_v41 = vld [vmem:[%s19544_s8 + $0x5f0] sm:$0xf0]  ;;  %v13970_v37 = vld [vmem:[%s19544_s8 + $0x56c] sm:$0xf]  ;;  %7042 = vmatpush.bf16.msrb.mxu2 %v12344_v39  ;;  %v12308_v53 = vor.u32 %v13961_v60, %v12305_v36  ;;  %v14237_v39 = vld [vmem:[%s19543_s7 + $0x5] ss:$0 sm:$0xff] }
0x270e   :  { %v12404_v46 = vor.u32 %v13985_v44, %v12401_v41  ;;  %v13967_v44 = vld [vmem:[%s19544_s8 + $0x54c] sm:$0xf0] }
0x270f   :  { %v6780_v43 = vmul.f32 %v18079_v42, %v18079_v42  ;;  %v12320_v41 = vor.u32 %v13967_v44, %v12319_v19 }
0x2710   :  { %7024 = vmatpush.bf16.msrb.mxu1 %v12404_v46  ;;  %7012 = vmatpush.bf16.msrb.mxu0 %v12368_v8  ;;  %v13968_v46 = vld [vmem:[%s19544_s8 + $0x554] sm:$0xf0]  ;;  %v13957_v8 = vld [vmem:[%s19544_s8 + $0x504] sm:$0xf] }
0x2711   :  { %6783 = vadd.xlane.f32.xlu1 %v6780_v43  ;;  %v12345_v43 = vld [vmem:[%s19544_s8 + $0x578] sm:$0xf0]  ;;  %v12328_v56 = vor.u32 %v13968_v46, %v12327_v9  ;;  %v12292_v52 = vor.u32 %v13957_v8, %v12289_v50  ;;  %v13995_v9 = vld [vmem:[%s19545_s9 + $0x2b0] sm:$0xff]  ;;  %v13997_v50 = vld [vmem:[%s19545_s9 + $0x2c0] sm:$0xff] }
0x2712   :  { %v12348_v14 = vor.u32 %v13970_v37, %v12345_v43  ;;  %v14003_v46 = vld [vmem:[%s19545_s9 + $0x2f0] sm:$0xff] }
0x2713   :  { %7043 = vmatpush.bf16.msrb.mxu2 %v12328_v56  ;;  %v14002_v56 = vld [vmem:[%s19545_s9 + $0x2e8] sm:$0xff] }
0x2714   :  { %7025 = vmatpush.bf16.msrb.mxu1 %v12388_v33  ;;  %7013 = vmatpush.bf16.msrb.mxu0 %v12352_v35  ;;  %v13964_v33 = vld [vmem:[%s19544_s8 + $0x534] sm:$0xf0] }
0x2715   :  { %7056 = vmatpush.bf16.msrb.mxu3 %v12348_v14  ;;  %v12312_v3 = vor.u32 %v13964_v33, %v12311_v55  ;;  %v13991_v55 = vld [vmem:[%s19545_s9 + $0x290] sm:$0xff] }
0x2716   :  { %v13999_v33 = vld [vmem:[%s19545_s9 + $0x2d0] sm:$0xff] }
0x2717   :  { %7044 = vmatpush.bf16.msrb.mxu2 %v12312_v3  ;;  %v13998_v3 = vld [vmem:[%s19545_s9 + $0x2c8] sm:$0xff] }
0x2718   :  { %7026 = vmatpush.bf16.msrb.mxu1 %v12372_v11  ;;  %7014 = vmatpush.bf16.msrb.mxu0 %v12336_v6  ;;  %v12295_v11 = vld [vmem:[%s19544_s8 + $0x508] sm:$0xf] }
0x2719   :  { %7057 = vmatpush.bf16.msrb.mxu3 %v12332_v57  ;;  %v12296_v10 = vor.u32 %v13960_v47, %v12295_v11  ;;  %v13992_v57 = vld [vmem:[%s19545_s9 + $0x298] sm:$0xff] }
0x271b   :  { %7045 = vmatpush.bf16.msrb.mxu2 %v12296_v10 }
0x271c   :  { %7027 = vmatpush.bf16.msrb.mxu1 %v12356_v24  ;;  %7015 = vmatpush.bf16.msrb.mxu0 %v12320_v41  ;;  %v13996_v41 = vld [vmem:[%s19545_s9 + $0x2b8] sm:$0xff] }
0x271d   :  { %7058 = vmatpush.bf16.msrb.mxu3 %v12316_v16 }
0x2720   :  { %7028 = vmatpush.bf16.msrb.mxu1 %v12340_v12  ;;  %7016 = vmatpush.bf16.msrb.mxu0 %v12304_v61 }
0x2721   :  { %7059 = vmatpush.bf16.msrb.mxu3 %v12300_v45 }
0x2724   :  { %7029 = vmatpush.bf16.msrb.mxu1 %v12324_v30  ;;  %7017 = vmatpush.bf16.msrb.mxu0 %v12288_v0  ;;  %v13994_v30 = vld [vmem:[%s19545_s9 + $0x2a8] sm:$0xff]  ;;  %v13989_v0 = vld [vmem:[%s19545_s9 + $0x280] sm:$0xff] }
0x2728   :  { %7030 = vmatpush.bf16.msrb.mxu1 %v12308_v53  ;;  %7281 = vmatpush.bf16.msra.mxu0 %v13996_v41  ;;  %v13990_v53 = vld [vmem:[%s19545_s9 + $0x288] sm:$0xff] }
0x272c   :  { %7031 = vmatpush.bf16.msrb.mxu1 %v12292_v52  ;;  %7282 = vmatpush.bf16.msra.mxu0 %v13995_v9 }
0x2730   :  { %7295 = vmatpush.bf16.msra.mxu1 %v14004_v63  ;;  %7283 = vmatpush.bf16.msra.mxu0 %v13994_v30 }
0x2734   :  { %7296 = vmatpush.bf16.msra.mxu1 %v14003_v46  ;;  %7284 = vmatpush.bf16.msra.mxu0 %v13993_v20 }
0x2738   :  { %7297 = vmatpush.bf16.msra.mxu1 %v14002_v56  ;;  %7285 = vmatpush.bf16.msra.mxu0 %v13992_v57 }
0x273c   :  { %7298 = vmatpush.bf16.msra.mxu1 %v14001_v1  ;;  %7286 = vmatpush.bf16.msra.mxu0 %v13991_v55 }
0x2740   :  { %7299 = vmatpush.bf16.msra.mxu1 %v14000_v58  ;;  %7287 = vmatpush.bf16.msra.mxu0 %v13990_v53 }
0x2744   :  { %7300 = vmatpush.bf16.msra.mxu1 %v13999_v33  ;;  %7288 = vmatpush.bf16.msra.mxu0 %v13989_v0 }
0x2748   :  { %7301 = vmatpush.bf16.msra.mxu1 %v13998_v3 }
0x274c   :  { %7302 = vmatpush.bf16.msra.mxu1 %v13997_v50 }
0x277c   :  { %v6782_v49 = vpop.xlane.xlu0 %6781 }
0x277d   :  { %v6785_v17 = vmul.f32 %v6782_v49, %v14995_v32 }
0x277f   :  { %v6787_v35 = vadd.f32 1e-05, %v6785_v17 }
0x2781   :  { %14560 = vrsqrt.f32 %v6787_v35  ;;  %vm6795_vm10 = vweird.f32 %v6787_v35 }
0x2784   :  { %v6784_v21 = vpop.xlane.xlu1 %6783 }
0x2785   :  { %v6786_v22 = vmul.f32 %v6784_v21, %v14995_v32 }
0x2787   :  { %v14561_v23 = vpop.eup %14560  ;;  %v6788_v24 = vadd.f32 1e-05, %v6786_v22 }
0x2788   :  { %v6790_v25 = vmul.f32 %v14561_v23, %v6787_v35  ;;  %vm6796_vm9 = vweird.f32 %v14561_v23 }
0x2789   :  { %14562 = vrsqrt.f32 %v6788_v24  ;;  %vm6797_vm11 = vmor %vm6795_vm10, %vm6796_vm9  ;;  %vm6805_vm13 = vweird.f32 %v6788_v24 }
0x278a   :  { %v6791_v51 = vmul.f32 %v14561_v23, %v6790_v25 }
0x278c   :  { %v6792_v7 = vmul.f32 0.5, %v6791_v51 }
0x278e   :  { %v6793_v26 = vsub.f32 1.5, %v6792_v7 }
0x278f   :  { %v14563_v34 = vpop.eup %14562 }
0x2790   :  { %v6800_v2 = vmul.f32 %v14563_v34, %v6788_v24  ;;  %v6794_v29 = vmul.f32 %v14561_v23, %v6793_v26  ;;  %vm6806_vm12 = vweird.f32 %v14563_v34 }
0x2791   :  { %vm6807_vm14 = vmor %vm6805_vm13, %vm6806_vm12 }
0x2792   :  { %v6801_v6 = vmul.f32 %v14563_v34, %v6800_v2  ;;  %v6798_v38 = vsel %vm6797_vm11, %v14561_v23, %v6794_v29 }
0x2793   :  { %v6809_v37 = vmul.f32 %v6798_v38, %v18074_v15 }
0x2794   :  { %v6802_v27 = vmul.f32 0.5, %v6801_v6 }
0x2795   :  { %v6814_v19 = vmul.f32 %v14237_v39, %v6809_v37 }
0x2796   :  { %v6803_v54 = vsub.f32 1.5, %v6802_v27 }
0x2798   :  { %v6804_v12 = vmul.f32 %v14563_v34, %v6803_v54 }
0x279a   :  { %v6808_v43 = vsel %vm6807_vm14, %v14563_v34, %v6804_v12 }
0x279b   :  { %v6810_v14 = vmul.f32 %v6808_v43, %v18079_v42 }
0x279d   :  { %v6815_v44 = vmul.f32 %v14237_v39, %v6810_v14 }
0x279f   :  { %v6816_v31 = vpack.c.bf16 %v6815_v44, %v6814_v19 }
0x27a1   :  { %7018 = vmatmul.bf16.vlgmr.msrb.gmra.mxu0 %v6816_v31  ;;  %7032 = vmatmul.bf16.vlgmr.msrb.gmra.mxu1 %v6816_v31 }
0x27a2   :  { %7046 = vmatmul.bf16.vlgmr.msrb.gmra.mxu2 %v6816_v31  ;;  %7060 = vmatmul.bf16.vlgmr.msrb.gmra.mxu3 %v6816_v31 }
0x281e   :  { %v18312_v59 = vpop.f32.mrf.mxu0  ;;  %v18314_v60 = vpop.f32.mrf.mxu1 }
0x281f   :  { %v12413_v61 = vmul.f32 -1.442695, %v18312_v59  ;;  %v12414_v36 = vmul.f32 -1.442695, %v18314_v60 }
0x2821   :  { %14564 = vpow2.f32 %v12413_v61 }
0x2822   :  { %14566 = vpow2.f32 %v12414_v36 }
0x2825   :  { %v7047_v27 = vpop.f32.mrf.mxu2  ;;  %v7061_v44 = vpop.f32.mrf.mxu3 }
0x2826   :  { %v18330_v48 = vpop.f32.mrf.mxu0  ;;  %v18332_v62 = vpop.f32.mrf.mxu1 }
0x2827   :  { %v14565_v16 = vpop.eup %14564  ;;  %v12415_v40 = vmul.f32 -1.442695, %v18330_v48  ;;  %v12416_v49 = vmul.f32 -1.442695, %v18332_v62 }
0x2828   :  { %v14567_v4 = vpop.eup %14566  ;;  %v7078_v8 = vadd.f32 1.0, %v14565_v16 }
0x2829   :  { %v7079_v11 = vadd.f32 1.0, %v14567_v4  ;;  %14568 = vpow2.f32 %v12415_v40 }
0x282a   :  { %14570 = vrcp.f32 %v7078_v8  ;;  %v7093_v7 = vand.u32 2147483648, %v7078_v8  ;;  %vm7087_vm0 = vweird.f32 %v7078_v8  ;;  %v7091_v26 = vand.u32 2147483647, %v7078_v8 }
0x282b   :  { %14572 = vrcp.f32 %v7079_v11  ;;  %v7106_v6 = vand.u32 2147483647, %v7079_v11  ;;  %v7108_v12 = vand.u32 2147483648, %v7079_v11  ;;  %vm7102_vm3 = vweird.f32 %v7079_v11 }
0x282c   :  { %14574 = vpow2.f32 %v12416_v49  ;;  %v7094_v37 = vor.u32 1.1754944e-38, %v7093_v7  ;;  %vm7092_vm4 = vcmp.eq.f32.partialorder %v7091_v26, 8.507059e+37  ;;  %v12668_v7 = vld [vmem:[%s19538_s5 + $0x6e8] sm:$0xf]  ;;  %v14036_v26 = vld [vmem:[%s19538_s5 + $0x6f4] sm:$0xf0] }
0x282d   :  { %vm7107_vm9 = vcmp.eq.f32.partialorder %v7106_v6, 8.507059e+37  ;;  %v7109_v30 = vor.u32 1.1754944e-38, %v7108_v12  ;;  %v7049_v4 = vpop.f32.mrf.mxu2  ;;  %v12669_v2 = vor.u32 %v14036_v26, %v12668_v7  ;;  %v12670_v6 = vld [vmem:[%s19538_s5 + $0x6f8] sm:$0xf0]  ;;  %v14029_v12 = vld [vmem:[%s19538_s5 + $0x6c4] sm:$0xf] }
0x282e   :  { %v12582_v7 = vld [vmem:[%s19538_s5 + $0x650] sm:$0xf0]  ;;  %v12588_v26 = vld [vmem:[%s19538_s5 + $0x648] sm:$0xf] }
0x282f   :  { %v14569_v47 = vpop.eup %14568  ;;  %7572 = vmatpush.bf16.msrb.mxu0 %v12669_v2 }
0x2830   :  { %v14571_v17 = vpop.eup %14570  ;;  %v7080_v52 = vadd.f32 1.0, %v14569_v47  ;;  %v7063_v47 = vpop.f32.mrf.mxu3 }
0x2831   :  { %v14573_v10 = vpop.eup %14572  ;;  %v7083_v18 = vmul.f32 %v14571_v17, %v7078_v8  ;;  %vm7088_vm15 = vweird.f32 %v14571_v17 }
0x2832   :  { %v14575_v5 = vpop.eup %14574  ;;  %v7098_v45 = vmul.f32 %v14573_v10, %v7079_v11  ;;  %14576 = vrcp.f32 %v7080_v52  ;;  %vm18342_vm1 = vmor %vm7087_vm0, %vm7088_vm15  ;;  %vm7103_vm2 = vweird.f32 %v14573_v10  ;;  %v7123_v43 = vand.u32 2147483648, %v7080_v52 }
0x2833   :  { %v7084_v35 = vsub.f32 1.0, %v7083_v18  ;;  %v7081_v21 = vadd.f32 1.0, %v14575_v5  ;;  %vm18348_vm5 = vmor %vm7102_vm3, %vm7103_vm2  ;;  %v7121_v41 = vand.u32 2147483647, %v7080_v52  ;;  %vm7117_vm10 = vweird.f32 %v7080_v52 }
0x2834   :  { %v7099_v22 = vsub.f32 1.0, %v7098_v45  ;;  %v7124_v1 = vor.u32 1.1754944e-38, %v7123_v43  ;;  %v12652_v43 = vld [vmem:[%s19538_s5 + $0x6c8] sm:$0xf] }
0x2835   :  { %v7085_v23 = vmul.f32 %v14571_v17, %v7084_v35  ;;  %14578 = vrcp.f32 %v7081_v21  ;;  %v7138_v20 = vand.u32 2147483648, %v7081_v21  ;;  %v7136_v58 = vand.u32 2147483647, %v7081_v21 }
0x2836   :  { %v7100_v24 = vmul.f32 %v14573_v10, %v7099_v22  ;;  %vm7122_vm13 = vcmp.eq.f32.partialorder %v7121_v41, 8.507059e+37  ;;  %vm7132_vm14 = vweird.f32 %v7081_v21  ;;  %v12654_v41 = vld [vmem:[%s19538_s5 + $0x6d8] sm:$0xf0] }
0x2837   :  { %v7086_v25 = vadd.f32 %v14571_v17, %v7085_v23  ;;  %v7139_v16 = vor.u32 1.1754944e-38, %v7138_v20  ;;  %vm7137_vm0 = vcmp.eq.f32.partialorder %v7136_v58, 8.507059e+37  ;;  %v12630_v20 = vld [vmem:[%s19538_s5 + $0x6b0] sm:$0xf0] }
0x2838   :  { %v14577_v51 = vpop.eup %14576  ;;  %v7101_v29 = vadd.f32 %v14573_v10, %v7100_v24  ;;  %v12660_v24 = vld [vmem:[%s19538_s5 + $0x6e0] sm:$0xf] }
0x2839   :  { %v7113_v34 = vmul.f32 %v14577_v51, %v7080_v52  ;;  %v7090_v54 = vsel %vm18342_vm1, %v14571_v17, %v7086_v25  ;;  %vm7118_vm6 = vweird.f32 %v14577_v51  ;;  %v14033_v25 = vld [vmem:[%s19538_s5 + $0x6e4] sm:$0xf] }
0x283a   :  { %v7095_v63 = vsel %vm7092_vm4, %v7094_v37, %v7090_v54  ;;  %v7105_v9 = vsel %vm18348_vm5, %v14573_v10, %v7101_v29  ;;  %vm7119_vm11 = vmor %vm7117_vm10, %vm7118_vm6  ;;  %v14034_v29 = vld [vmem:[%s19538_s5 + $0x6ec] sm:$0xf]  ;;  %v14031_v54 = vld [vmem:[%s19538_s5 + $0x6cc] sm:$0xf0] }
0x283b   :  { %v14579_v38 = vpop.eup %14578  ;;  %v7114_v39 = vsub.f32 1.0, %v7113_v34  ;;  %v7142_v61 = vmul.f32 %v7095_v63, %v18312_v59  ;;  %v7110_v36 = vsel %vm7107_vm9, %v7109_v30, %v7105_v9  ;;  %v12646_v37 = vld [vmem:[%s19538_s5 + $0x6d0] sm:$0xf0]  ;;  %v12628_v9 = vld [vmem:[%s19538_s5 + $0x6a0] sm:$0xf] }
0x283c   :  { %v7128_v14 = vmul.f32 %v14579_v38, %v7081_v21  ;;  %vm7133_vm12 = vweird.f32 %v14579_v38  ;;  %v7143_v40 = vmul.f32 %v7110_v36, %v18314_v60  ;;  %v12649_v19 = vor.u32 %v14029_v12, %v12646_v37  ;;  %v14025_v30 = vld [vmem:[%s19538_s5 + $0x6a4] sm:$0xf]  ;;  %v14026_v36 = vld [vmem:[%s19538_s5 + $0x6ac] sm:$0xf]  ;;  %v14011_v12 = vld [vmem:[%s19538_s5 + $0x62c] sm:$0xf0] }
0x283d   :  { %v7115_v31 = vmul.f32 %v14577_v51, %v7114_v39  ;;  %vm7134_vm15 = vmor %vm7132_vm14, %vm7133_vm12  ;;  %v7146_v49 = vmul.f32 %v7142_v61, %v7047_v27  ;;  %v12673_v27 = vor.u32 %v14034_v29, %v12670_v6  ;;  %v12633_v58 = vor.u32 %v14025_v30, %v12630_v20  ;;  %v14014_v6 = vld [vmem:[%s19538_s5 + $0x64c] sm:$0xf]  ;;  %v12548_v30 = vld [vmem:[%s19538_s5 + $0x600] sm:$0xf] }
0x283e   :  { %v7129_v46 = vsub.f32 1.0, %v7128_v14  ;;  %v7147_v17 = vmul.f32 %v7143_v40, %v7061_v44  ;;  %v14032_v14 = vld [vmem:[%s19538_s5 + $0x6d4] sm:$0xf0]  ;;  %v14005_v20 = vld [vmem:[%s19538_s5 + $0x604] sm:$0xf] }
0x283f   :  { %v7116_v56 = vadd.f32 %v14577_v51, %v7115_v31  ;;  %7586 = vmatpush.bf16.msrb.mxu1 %v12673_v27  ;;  %v12653_v44 = vor.u32 %v14032_v14, %v12652_v43  ;;  %v14030_v31 = vld [vmem:[%s19538_s5 + $0x6cc] sm:$0xf]  ;;  %v12590_v27 = vld [vmem:[%s19538_s5 + $0x658] sm:$0xf0]  ;;  %v12566_v43 = vld [vmem:[%s19538_s5 + $0x630] sm:$0xf0] }
0x2840   :  { %v7130_v57 = vmul.f32 %v14579_v38, %v7129_v46  ;;  %v12657_v63 = vor.u32 %v14030_v31, %v12654_v41  ;;  %v14027_v46 = vld [vmem:[%s19538_s5 + $0x6ac] sm:$0xf0]  ;;  %v12572_v14 = vld [vmem:[%s19538_s5 + $0x628] sm:$0xf]  ;;  %v14010_v41 = vld [vmem:[%s19538_s5 + $0x62c] sm:$0xf] }
0x2841   :  { %v7120_v55 = vsel %vm7119_vm11, %v14577_v51, %v7116_v56  ;;  %7573 = vmatpush.bf16.msrb.mxu0 %v12653_v44  ;;  %v12629_v56 = vor.u32 %v14027_v46, %v12628_v9 }
0x2842   :  { %v7125_v33 = vsel %vm7122_vm13, %v7124_v1, %v7120_v55  ;;  %v7131_v53 = vadd.f32 %v14579_v38, %v7130_v57  ;;  %v12636_v1 = vld [vmem:[%s19538_s5 + $0x6a8] sm:$0xf]  ;;  %v14028_v57 = vld [vmem:[%s19538_s5 + $0x6b4] sm:$0xf0]  ;;  %v12638_v55 = vld [vmem:[%s19538_s5 + $0x6b8] sm:$0xf0] }
0x2843   :  { %v7144_v3 = vmul.f32 %v7125_v33, %v18330_v48  ;;  %7587 = vmatpush.bf16.msrb.mxu1 %v12657_v63  ;;  %v12637_v61 = vor.u32 %v14028_v57, %v12636_v1  ;;  %v12641_v33 = vor.u32 %v14026_v36, %v12638_v55  ;;  %v12574_v63 = vld [vmem:[%s19538_s5 + $0x638] sm:$0xf0]  ;;  %v14008_v36 = vld [vmem:[%s19538_s5 + $0x614] sm:$0xf0] }
0x2844   :  { %v7135_v8 = vsel %vm7134_vm15, %v14579_v38, %v7131_v53  ;;  %v12644_v38 = vld [vmem:[%s19538_s5 + $0x6c0] sm:$0xf]  ;;  %v12577_v9 = vor.u32 %v14010_v41, %v12574_v63 }
0x2845   :  { %v7148_v0 = vmul.f32 %v7144_v3, %v7049_v4  ;;  %v7140_v50 = vsel %vm7137_vm0, %v7139_v16, %v7135_v8  ;;  %v12645_v39 = vor.u32 %v14031_v54, %v12644_v38  ;;  %7574 = vmatpush.bf16.msrb.mxu0 %v12637_v61  ;;  %v12612_v53 = vld [vmem:[%s19538_s5 + $0x680] sm:$0xf]  ;;  %v14023_v3 = vld [vmem:[%s19538_s5 + $0x68c] sm:$0xf0]  ;;  %v14021_v16 = vld [vmem:[%s19538_s5 + $0x684] sm:$0xf]  ;;  %v12593_v38 = vor.u32 %v14014_v6, %v12590_v27 }
0x2846   :  { %v7145_v59 = vmul.f32 %v7140_v50, %v18332_v62  ;;  %v12613_v40 = vor.u32 %v14023_v3, %v12612_v53  ;;  %v12614_v4 = vld [vmem:[%s19538_s5 + $0x690] sm:$0xf0]  ;;  %v12620_v8 = vld [vmem:[%s19538_s5 + $0x688] sm:$0xf]  ;;  %v12564_v54 = vld [vmem:[%s19538_s5 + $0x620] sm:$0xf] }
0x2847   :  { %v7150_v11 = vpack.c.bf16 %v7148_v0, %v7146_v49  ;;  %7588 = vmatpush.bf16.msrb.mxu1 %v12641_v33  ;;  %v14024_v49 = vld [vmem:[%s19538_s5 + $0x694] sm:$0xf0]  ;;  %v12617_v0 = vor.u32 %v14021_v16, %v12614_v4  ;;  %v12565_v37 = vor.u32 %v14011_v12, %v12564_v54  ;;  %v12556_v61 = vld [vmem:[%s19538_s5 + $0x608] sm:$0xf]  ;;  %v14006_v53 = vld [vmem:[%s19538_s5 + $0x60c] sm:$0xf] }
0x2848   :  { %v7149_v52 = vmul.f32 %v7145_v59, %v7063_v47  ;;  %v12621_v50 = vor.u32 %v14024_v49, %v12620_v8  ;;  %v14022_v59 = vld [vmem:[%s19538_s5 + $0x68c] sm:$0xf]  ;;  %v12557_v33 = vor.u32 %v14008_v36, %v12556_v61  ;;  %v12558_v3 = vld [vmem:[%s19538_s5 + $0x618] sm:$0xf0]  ;;  %v14732_v54 = vld [vmem:[%s19540_s1] sm:$0xff] }
0x2849   :  { %7289 = vmatmul.bf16.vlgmr.msra.gmra.mxu0 %v7150_v11  ;;  %v12622_v11 = vld [vmem:[%s19538_s5 + $0x698] sm:$0xf0] }
0x284a   :  { %v7151_v10 = vpack.c.bf16 %v7149_v52, %v7147_v17  ;;  %v12625_v47 = vor.u32 %v14022_v59, %v12622_v11  ;;  %7575 = vmatpush.bf16.msrb.mxu0 %v12621_v50  ;;  %v12596_v17 = vld [vmem:[%s19538_s5 + $0x660] sm:$0xf]  ;;  %v14019_v52 = vld [vmem:[%s19538_s5 + $0x66c] sm:$0xf0] }
0x284c   :  { %7303 = vmatmul.bf16.vlgmr.msra.gmra.mxu1 %v7151_v10  ;;  %v14017_v10 = vld [vmem:[%s19538_s5 + $0x664] sm:$0xf] }
0x284d   :  { %7589 = vmatpush.bf16.msrb.mxu1 %v12625_v47 }
0x28c6   :  { %v7290_v48 = vpop.f32.mrf.mxu0 }
0x28c9   :  { %v7304_v18 = vpop.f32.mrf.mxu1 }
0x28ca   :  { %v7305_v5 = vadd.f32 %v7304_v18, %v7290_v48  ;;  %v12597_v48 = vor.u32 %v14019_v52, %v12596_v17  ;;  %v12598_v18 = vld [vmem:[%s19538_s5 + $0x670] sm:$0xf0] }
0x28cc   :  { %v18359_v60 = vadd.f32 %v7305_v5, %v18074_v15  ;;  %v14035_v15 = vld [vmem:[%s19538_s5 + $0x6ec] sm:$0xf0]  ;;  %v12604_v5 = vld [vmem:[%s19538_s5 + $0x668] sm:$0xf] }
0x28cd   :  { %v12661_v51 = vor.u32 %v14035_v15, %v12660_v24  ;;  %v12580_v15 = vld [vmem:[%s19538_s5 + $0x640] sm:$0xf] }
0x28ce   :  { %v7313_v45 = vmul.f32 %v18359_v60, %v18359_v60  ;;  %v7292_v35 = vpop.f32.mrf.mxu0 }
0x28cf   :  { %7544 = vmatpush.bf16.msra.mxu2 %v12661_v51  ;;  %v14013_v51 = vld [vmem:[%s19538_s5 + $0x644] sm:$0xf] }
0x28d0   :  { %7315 = vadd.xlane.f32.xlu0 %v7313_v45  ;;  %v14020_v45 = vld [vmem:[%s19538_s5 + $0x674] sm:$0xf0]  ;;  %v12585_v2 = vor.u32 %v14013_v51, %v12582_v7 }
0x28d1   :  { %v7306_v21 = vpop.f32.mrf.mxu1 }
0x28d2   :  { %v7307_v62 = vadd.f32 %v7306_v21, %v7292_v35  ;;  %v12601_v35 = vor.u32 %v14017_v10, %v12598_v18  ;;  %v12605_v21 = vor.u32 %v14020_v45, %v12604_v5 }
0x28d3   :  { %7545 = vmatpush.bf16.msra.mxu2 %v12645_v39  ;;  %v14009_v39 = vld [vmem:[%s19538_s5 + $0x624] sm:$0xf] }
0x28d4   :  { %v18364_v22 = vadd.f32 %v7307_v62, %v18079_v42  ;;  %v12662_v42 = vld [vmem:[%s19538_s5 + $0x6f0] sm:$0xf0]  ;;  %v14018_v62 = vld [vmem:[%s19538_s5 + $0x66c] sm:$0xf]  ;;  %7576 = vmatpush.bf16.msrb.mxu0 %v12605_v21  ;;  %v12569_v44 = vor.u32 %v14009_v39, %v12566_v43  ;;  %v14238_v21 = vld [vmem:[%s19537_s4 + $0x6] ss:$0 sm:$0xff] }
0x28d5   :  { %v12665_v34 = vor.u32 %v14033_v25, %v12662_v42  ;;  %v14015_v25 = vld [vmem:[%s19538_s5 + $0x64c] sm:$0xf0]  ;;  %v14733_v39 = vld [vmem:[%s19539_s2] sm:$0xff] }
0x28d6   :  { %v7314_v23 = vmul.f32 %v18364_v22, %v18364_v22  ;;  %v12581_v42 = vor.u32 %v14015_v25, %v12580_v15 }
0x28d7   :  { %7558 = vmatpush.bf16.msra.mxu3 %v12665_v34  ;;  %7546 = vmatpush.bf16.msra.mxu2 %v12629_v56  ;;  %v14016_v34 = vld [vmem:[%s19538_s5 + $0x654] sm:$0xf0]  ;;  %v14007_v56 = vld [vmem:[%s19538_s5 + $0x60c] sm:$0xf0] }
0x28d8   :  { %7317 = vadd.xlane.f32.xlu1 %v7314_v23  ;;  %v12606_v23 = vld [vmem:[%s19538_s5 + $0x678] sm:$0xf0]  ;;  %v12589_v29 = vor.u32 %v14016_v34, %v12588_v26  ;;  %v12549_v57 = vor.u32 %v14007_v56, %v12548_v30 }
0x28d9   :  { %v12609_v24 = vor.u32 %v14018_v62, %v12606_v23 }
0x28da   :  { %7577 = vmatpush.bf16.msrb.mxu0 %v12589_v29 }
0x28db   :  { %7559 = vmatpush.bf16.msra.mxu3 %v12649_v19  ;;  %7547 = vmatpush.bf16.msra.mxu2 %v12613_v40  ;;  %v14012_v19 = vld [vmem:[%s19538_s5 + $0x634] sm:$0xf0]  ;;  %v12561_v40 = vor.u32 %v14006_v53, %v12558_v3 }
0x28dc   :  { %7590 = vmatpush.bf16.msrb.mxu1 %v12609_v24  ;;  %v12573_v31 = vor.u32 %v14012_v19, %v12572_v14  ;;  %v14734_v19 = vld [vmem:[%s19540_s1 + $0x8] sm:$0xff] }
0x28de   :  { %7578 = vmatpush.bf16.msrb.mxu0 %v12573_v31  ;;  %v14735_v31 = vld [vmem:[%s19539_s2 + $0x8] sm:$0xff] }
0x28df   :  { %7560 = vmatpush.bf16.msra.mxu3 %v12633_v58  ;;  %7548 = vmatpush.bf16.msra.mxu2 %v12597_v48  ;;  %v12550_v58 = vld [vmem:[%s19538_s5 + $0x610] sm:$0xf0] }
0x28e0   :  { %7591 = vmatpush.bf16.msrb.mxu1 %v12593_v38  ;;  %v12553_v55 = vor.u32 %v14005_v20, %v12550_v58 }
0x28e2   :  { %7579 = vmatpush.bf16.msrb.mxu0 %v12557_v33 }
0x28e3   :  { %7561 = vmatpush.bf16.msra.mxu3 %v12617_v0  ;;  %7549 = vmatpush.bf16.msra.mxu2 %v12581_v42 }
0x28e4   :  { %7592 = vmatpush.bf16.msrb.mxu1 %v12577_v9 }
0x28e7   :  { %7562 = vmatpush.bf16.msra.mxu3 %v12601_v35  ;;  %7550 = vmatpush.bf16.msra.mxu2 %v12565_v37 }
0x28e8   :  { %7593 = vmatpush.bf16.msrb.mxu1 %v12561_v40 }
0x28eb   :  { %7563 = vmatpush.bf16.msra.mxu3 %v12585_v2  ;;  %7551 = vmatpush.bf16.msra.mxu2 %v12549_v57 }
0x28ef   :  { %7564 = vmatpush.bf16.msra.mxu3 %v12569_v44 }
0x28f3   :  { %7565 = vmatpush.bf16.msra.mxu3 %v12553_v55 }
0x2943   :  { %v7316_v46 = vpop.xlane.xlu0 %7315 }
0x2944   :  { %v7319_v1 = vmul.f32 %v7316_v46, %v14995_v32 }
0x2946   :  { %v7321_v16 = vadd.f32 1e-05, %v7319_v1 }
0x2948   :  { %14580 = vrsqrt.f32 %v7321_v16  ;;  %vm7329_vm2 = vweird.f32 %v7321_v16 }
0x294b   :  { %v7318_v4 = vpop.xlane.xlu1 %7317 }
0x294c   :  { %v7320_v8 = vmul.f32 %v7318_v4, %v14995_v32 }
0x294e   :  { %v14581_v49 = vpop.eup %14580  ;;  %v7322_v0 = vadd.f32 1e-05, %v7320_v8 }
0x294f   :  { %v7324_v50 = vmul.f32 %v14581_v49, %v7321_v16  ;;  %vm7330_vm1 = vweird.f32 %v14581_v49 }
0x2950   :  { %14582 = vrsqrt.f32 %v7322_v0  ;;  %vm7331_vm3 = vmor %vm7329_vm2, %vm7330_vm1  ;;  %vm7339_vm5 = vweird.f32 %v7322_v0 }
0x2951   :  { %v7325_v59 = vmul.f32 %v14581_v49, %v7324_v50  ;;  %v14736_v50 = vld [vmem:[%s19541_s3] sm:$0xff] }
0x2953   :  { %v7326_v11 = vmul.f32 0.5, %v7325_v59 }
0x2955   :  { %v7327_v47 = vsub.f32 1.5, %v7326_v11 }
0x2956   :  { %v14583_v17 = vpop.eup %14582 }
0x2957   :  { %v7334_v52 = vmul.f32 %v14583_v17, %v7322_v0  ;;  %v7328_v10 = vmul.f32 %v14581_v49, %v7327_v47  ;;  %vm7340_vm4 = vweird.f32 %v14583_v17 }
0x2958   :  { %vm7341_vm6 = vmor %vm7339_vm5, %vm7340_vm4 }
0x2959   :  { %v7335_v48 = vmul.f32 %v14583_v17, %v7334_v52  ;;  %v7332_v5 = vsel %vm7331_vm3, %v14581_v49, %v7328_v10 }
0x295a   :  { %v7343_v62 = vmul.f32 %v7332_v5, %v18359_v60 }
0x295b   :  { %v7336_v18 = vmul.f32 0.5, %v7335_v48 }
0x295c   :  { %v7348_v15 = vmul.f32 %v14238_v21, %v7343_v62 }
0x295d   :  { %v7337_v45 = vsub.f32 1.5, %v7336_v18  ;;  %v14738_v18 = vld [vmem:[%s19541_s3 + $0x10] sm:$0xff] }
0x295f   :  { %v7338_v35 = vmul.f32 %v14583_v17, %v7337_v45 }
0x2961   :  { %v7342_v23 = vsel %vm7341_vm6, %v14583_v17, %v7338_v35  ;;  %v14737_v17 = vld [vmem:[%s19541_s3 + $0x8] sm:$0xff] }
0x2962   :  { %v7344_v24 = vmul.f32 %v7342_v23, %v18364_v22 }
0x2964   :  { %v7349_v25 = vmul.f32 %v14238_v21, %v7344_v24  ;;  %v14739_v21 = vld [vmem:[%s19541_s3 + $0x18] sm:$0xff] }
0x2966   :  { %v7350_v51 = vpack.c.bf16 %v7349_v25, %v7348_v15 }
0x2968   :  { %7552 = vmatmul.bf16.vlgmr.msra.gmra.mxu2 %v7350_v51  ;;  %7566 = vmatmul.bf16.vlgmr.msra.gmra.mxu3 %v7350_v51 }
0x2969   :  { %7580 = vmatmul.bf16.vlgmr.msrb.gmra.mxu0 %v7350_v51  ;;  %7594 = vmatmul.bf16.vlgmr.msrb.gmra.mxu1 %v7350_v51 }
0x29e6   :  { %v7581_v42 = vpop.f32.mrf.mxu0  ;;  %v7595_v7 = vpop.f32.mrf.mxu1 }
0x29e7   :  { %v7608_v26 = vmul.f32 %v7581_v42, %v15036_v13  ;;  %v7606_v20 = vmul.f32 %v14732_v54, %v7581_v42 }
0x29e9   :  { %7612 = vrot.lane.b32.xlu2 %v7608_v26, %s14749_s21 }
0x29eb   :  { %v7553_v34 = vpop.f32.mrf.mxu2  ;;  %v7567_v2 = vpop.f32.mrf.mxu3 }
0x29ec   :  { %v7600_v12 = vmul.f32 %v14732_v54, %v7553_v34  ;;  %v7602_v37 = vmul.f32 %v14733_v39, %v7567_v2 }
0x29ee   :  { %v7583_v29 = vpop.f32.mrf.mxu0  ;;  %v7597_v6 = vpop.f32.mrf.mxu1  ;;  %v7604_v63 = vadd.f32 %v7602_v37, %v7600_v12 }
0x29ef   :  { %v7609_v27 = vmul.f32 %v7583_v29, %v15048_v28  ;;  %v18570_v38 = vpack.c.bf16 %v7597_v6, %v7595_v7  ;;  %v7607_v1 = vmul.f32 %v14734_v19, %v7583_v29 }
0x29f1   :  { %7719 = vmatpush.bf16.msrb.mxu3 %v18570_v38  ;;  %7614 = vrot.lane.b32.xlu0 %v7609_v27, %s14749_s21 }
0x29f3   :  { %v7555_v43 = vpop.f32.mrf.mxu2  ;;  %v7569_v14 = vpop.f32.mrf.mxu3 }
0x29f4   :  { %v7601_v44 = vmul.f32 %v14734_v19, %v7555_v43  ;;  %v7603_v41 = vmul.f32 %v14735_v31, %v7569_v14 }
0x29f6   :  { %v7605_v9 = vadd.f32 %v7603_v41, %v7601_v44 }
0x29f8   :  { %v14216_v46 = vpack.i.bf16 %v7605_v9, %v7604_v63  ;;  %v7628_v30 = vpack.c.bf16 %v7605_v9, %v7604_v63 }
0x29fa   :  { %14217 = vrot.lane.b32.xlu1 %v14216_v46, %s14750_s29 }
0x2a43   :  { %v7613_v56 = vpop.permute.xlu2 %7612 }
0x2a44   :  { %v7618_v58 = vadd.f32 %v7613_v56, %v7606_v20 }
0x2a63   :  { %v7615_v57 = vpop.permute.xlu0 %7614 }
0x2a64   :  { %v7619_v61 = vadd.f32 %v7615_v57, %v7607_v1 }
0x2a66   :  { %v7630_v36 = vpack.c.bf16 %v7619_v61, %v7618_v58 }
0x2a68   :  { %7807 = vrot.lane.b32.xlu2 %v7630_v36, %s14750_s29  ;;  %v7638_v55 = vsel %vm379_vm7, %v7630_v36, 0 }
0x2a69   :  { %7647 = vmatpush.bf16.xpose.msrb.mxu2 %v7638_v55 }
0x2a6c   :  { %v14218_v33 = vpop.permute.xlu1 %14217 }
0x2a6d   :  { %v14220_v53 = vunpack.i.h.bf16 %v14218_v33  ;;  %v14219_v3 = vunpack.i.l.bf16 %v14218_v33 }
0x2a6f   :  { %v7629_v16 = vpack.c.bf16 %v14220_v53, %v14219_v3 }
0x2a70   :  { %7802 = vrot.lane.b32.xlu2 %v7628_v30, %s14749_s21  ;;  %12674 = vmatmul.msk.bf16.vlgmr.msrb.gmra.mxu2 %vm379_vm7, %v7628_v30 }
0x2a71   :  { %7804 = vrot.lane.b32.xlu0 %v7629_v16, %s14749_s21 }
0x2a80   :  { %12675 = vmatmul.msk.bf16.gmra.mxu2 %vm379_vm7, %v7629_v16 }
0x2ac2   :  { %v7808_v40 = vpop.permute.xlu2 %7807 }
0x2ac3   :  { %v7816_v4 = vsel %vm379_vm7, %v7808_v40, 0 }
0x2ac4   :  { %7825 = vmatpush.bf16.xpose.msra.mxu2 %v7816_v4 }
0x2aca   :  { %v7803_v8 = vpop.permute.xlu2 %7802 }
0x2acb   :  { %12704 = vmatmul.msk.bf16.vlgmr.msra.gmra.mxu2 %vm379_vm7, %v7803_v8 }
0x2ae3   :  { %v7805_v49 = vpop.permute.xlu0 %7804 }
0x2ae4   :  { %12705 = vmatmul.msk.bf16.gmra.mxu2 %vm379_vm7, %v7805_v49 }
0x2af3   :  { %v7649_v0 = vpop.f32.mrf.mxu2 }
0x2af4   :  { %v7650_v59 = vadd.f32 %v14736_v50, %v7649_v0 }
0x2af6   :  { %v7659_v11 = vsel %vm408_vm8, %v7650_v59, -inf }
0x2af7   :  { %7660 = vmax.xlane.f32.xlu2 %v7659_v11 }
0x2afb   :  { %v7651_v47 = vpop.f32.mrf.mxu2 }
0x2afc   :  { %v7652_v52 = vadd.f32 %v14737_v17, %v7651_v47 }
0x2afe   :  { %v7662_v10 = vsel %vm408_vm8, %v7652_v52, -inf }
0x2aff   :  { %7663 = vmax.xlane.f32.xlu1 %v7662_v10 }
0x2b03   :  { %v7654_v48 = vpop.f32.mrf.mxu2 }
0x2b04   :  { %v7655_v5 = vadd.f32 %v14738_v18, %v7654_v48 }
0x2b06   :  { %v7665_v45 = vsel %vm408_vm8, %v7655_v5, -inf }
0x2b07   :  { %7666 = vmax.xlane.f32.xlu0 %v7665_v45 }
0x2b0b   :  { %v7656_v35 = vpop.f32.mrf.mxu2 }
0x2b0c   :  { %v7657_v62 = vadd.f32 %v14739_v21, %v7656_v35 }
0x2b0e   :  { %v7668_v23 = vsel %vm408_vm8, %v7657_v62, -inf }
0x2b0f   :  { %7669 = vmax.xlane.f32.xlu2 %v7668_v23 }
0x2b4e   :  { %v7827_v24 = vpop.f32.mrf.mxu2 }
0x2b4f   :  { %v7828_v15 = vadd.f32 %v14736_v50, %v7827_v24 }
0x2b51   :  { %v7837_v25 = vsel %vm408_vm8, %v7828_v15, -inf }
0x2b52   :  { %7838 = vmax.xlane.f32.xlu1 %v7837_v25 }
0x2b56   :  { %v7829_v51 = vpop.f32.mrf.mxu2 }
0x2b57   :  { %v7830_v42 = vadd.f32 %v14737_v17, %v7829_v51 }
0x2b59   :  { %v7840_v7 = vsel %vm408_vm8, %v7830_v42, -inf }
0x2b5a   :  { %7841 = vmax.xlane.f32.xlu0 %v7840_v7 }
0x2b67   :  { %v7832_v26 = vpop.f32.mrf.mxu2 }
0x2b68   :  { %v7833_v34 = vadd.f32 %v14738_v18, %v7832_v26 }
0x2b6a   :  { %v7661_v2 = vpop.xlane.xlu2 %7660  ;;  %v7843_v29 = vsel %vm408_vm8, %v7833_v34, -inf }
0x2b6b   :  { %v7671_v6 = vsub.f32 %v7650_v59, %v7661_v2  ;;  %7844 = vmax.xlane.f32.xlu2 %v7843_v29 }
0x2b6d   :  { %v7675_v27 = vmul.f32 1.442695, %v7671_v6 }
0x2b6f   :  { %14584 = vpow2.f32 %v7675_v27  ;;  %v7834_v54 = vpop.f32.mrf.mxu2 }
0x2b70   :  { %v7835_v12 = vadd.f32 %v14739_v21, %v7834_v54 }
0x2b72   :  { %v7664_v39 = vpop.xlane.xlu1 %7663  ;;  %v7846_v37 = vsel %vm408_vm8, %v7835_v12, -inf }
0x2b73   :  { %v7672_v43 = vsub.f32 %v7652_v52, %v7664_v39  ;;  %7847 = vmax.xlane.f32.xlu1 %v7846_v37  ;;  %v14038_v37 = vld [vmem:[%s19542_s6 + $0x188] sm:$0xff] }
0x2b74   :  { %7792 = vmatpush.bf16.msra.mxu1 %v14038_v37  ;;  %v12867_v37 = vld [vmem:[%s19544_s8 + $0x6d0] sm:$0xf0] }
0x2b75   :  { %v14585_v14 = vpop.eup %14584  ;;  %v7677_v19 = vmul.f32 1.442695, %v7672_v43 }
0x2b76   :  { %v7683_v44 = vsel %vm408_vm8, %v14585_v14, 0.0 }
0x2b77   :  { %14586 = vpow2.f32 %v7677_v19  ;;  %7684 = vadd.xlane.f32.xlu0 %v7683_v44  ;;  %v14037_v19 = vld [vmem:[%s19542_s6 + $0x180] sm:$0xff] }
0x2b78   :  { %7793 = vmatpush.bf16.msra.mxu1 %v14037_v19 }
0x2b7a   :  { %v7667_v31 = vpop.xlane.xlu0 %7666 }
0x2b7b   :  { %v7673_v41 = vsub.f32 %v7655_v5, %v7667_v31 }
0x2b7d   :  { %v14587_v63 = vpop.eup %14586  ;;  %v7679_v9 = vmul.f32 1.442695, %v7673_v41 }
0x2b7e   :  { %v7686_v46 = vsel %vm408_vm8, %v14587_v63, 0.0 }
0x2b7f   :  { %14588 = vpow2.f32 %v7679_v9  ;;  %7687 = vadd.xlane.f32.xlu2 %v7686_v46  ;;  %v14040_v46 = vld [vmem:[%s19542_s6 + $0x198] sm:$0xff] }
0x2b80   :  { %7763 = vmatpush.bf16.msra.mxu0 %v14040_v46  ;;  %v14067_v46 = vld [vmem:[%s19544_s8 + $0x6ac] sm:$0xf0] }
0x2b82   :  { %v7670_v30 = vpop.xlane.xlu2 %7669 }
0x2b83   :  { %v7674_v56 = vsub.f32 %v7657_v62, %v7670_v30  ;;  %v14039_v30 = vld [vmem:[%s19542_s6 + $0x190] sm:$0xff] }
0x2b84   :  { %7764 = vmatpush.bf16.msra.mxu0 %v14039_v30  ;;  %v14065_v30 = vld [vmem:[%s19544_s8 + $0x6a4] sm:$0xf] }
0x2b85   :  { %v14589_v20 = vpop.eup %14588  ;;  %v7681_v1 = vmul.f32 1.442695, %v7674_v56 }
0x2b86   :  { %v7689_v57 = vsel %vm408_vm8, %v14589_v20, 0.0 }
0x2b87   :  { %14590 = vpow2.f32 %v7681_v1  ;;  %7690 = vadd.xlane.f32.xlu1 %v7689_v57 }
0x2b8d   :  { %v14591_v58 = vpop.eup %14590 }
0x2b8e   :  { %v7692_v61 = vsel %vm408_vm8, %v14591_v58, 0.0 }
0x2b8f   :  { %7693 = vadd.xlane.f32.xlu0 %v7692_v61 }
0x2ba3   :  { %7884 = vrot.lane.b32.xlu0 %v18570_v38, %s14750_s29 }
0x2bc5   :  { %v7839_v36 = vpop.xlane.xlu1 %7838 }
0x2bc6   :  { %v7849_v55 = vsub.f32 %v7828_v15, %v7839_v36  ;;  %v14042_v36 = vld [vmem:[%s19542_s6 + $0x1a8] sm:$0xff] }
0x2bc7   :  { %7938 = vmatpush.bf16.msrb.mxu0 %v14042_v36  ;;  %v14066_v36 = vld [vmem:[%s19544_s8 + $0x6ac] sm:$0xf] }
0x2bc8   :  { %v7853_v33 = vmul.f32 1.442695, %v7849_v55  ;;  %v14041_v55 = vld [vmem:[%s19542_s6 + $0x1a0] sm:$0xff] }
0x2bca   :  { %14592 = vpow2.f32 %v7853_v33  ;;  %v14044_v33 = vld [vmem:[%s19542_s6 + $0x1b8] sm:$0xff] }
0x2bcb   :  { %7939 = vmatpush.bf16.msrb.mxu0 %v14041_v55  ;;  %7974 = vmatpush.bf16.msrb.mxu1 %v14044_v33  ;;  %v12859_v55 = vld [vmem:[%s19544_s8 + $0x6b8] sm:$0xf0] }
0x2bcc   :  { %v12862_v33 = vor.u32 %v14066_v36, %v12859_v55  ;;  %v14048_v36 = vld [vmem:[%s19544_s8 + $0x614] sm:$0xf0] }
0x2bcd   :  { %v7842_v53 = vpop.xlane.xlu0 %7841 }
0x2bce   :  { %v7850_v3 = vsub.f32 %v7830_v42, %v7842_v53 }
0x2bd0   :  { %v14593_v16 = vpop.eup %14592  ;;  %v7855_v40 = vmul.f32 1.442695, %v7850_v3  ;;  %v14043_v3 = vld [vmem:[%s19542_s6 + $0x1b0] sm:$0xff] }
0x2bd1   :  { %v7861_v4 = vsel %vm408_vm8, %v14593_v16, 0.0  ;;  %7975 = vmatpush.bf16.msrb.mxu1 %v14043_v3  ;;  %v14063_v3 = vld [vmem:[%s19544_s8 + $0x68c] sm:$0xf0] }
0x2bd2   :  { %14594 = vpow2.f32 %v7855_v40  ;;  %7862 = vadd.xlane.f32.xlu2 %v7861_v4 }
0x2bd8   :  { %v14595_v8 = vpop.eup %14594 }
0x2bd9   :  { %v7864_v49 = vsel %vm408_vm8, %v14595_v8, 0.0 }
0x2bda   :  { %7865 = vadd.xlane.f32.xlu1 %v7864_v49 }
0x2bde   :  { %v7845_v0 = vpop.xlane.xlu2 %7844 }
0x2bdf   :  { %v7851_v50 = vsub.f32 %v7833_v34, %v7845_v0 }
0x2be1   :  { %v7857_v59 = vmul.f32 1.442695, %v7851_v50 }
0x2be3   :  { %14596 = vpow2.f32 %v7857_v59 }
0x2be6   :  { %v7848_v38 = vpop.xlane.xlu1 %7847 }
0x2be7   :  { %v7852_v11 = vsub.f32 %v7835_v12, %v7848_v38 }
0x2be9   :  { %v14597_v47 = vpop.eup %14596  ;;  %v7859_v17 = vmul.f32 1.442695, %v7852_v11 }
0x2bea   :  { %v7867_v52 = vsel %vm408_vm8, %v14597_v47, 0.0  ;;  %v7685_v10 = vpop.xlane.xlu0 %7684 }
0x2beb   :  { %14598 = vpow2.f32 %v7859_v17  ;;  %7868 = vadd.xlane.f32.xlu2 %v7867_v52 }
0x2bec   :  { %14600 = vrcp.f32 %v7685_v10 }
0x2bf1   :  { %v14599_v48 = vpop.eup %14598 }
0x2bf2   :  { %v7688_v18 = vpop.xlane.xlu2 %7687  ;;  %v7870_v5 = vsel %vm408_vm8, %v14599_v48, 0.0  ;;  %v14601_v45 = vpop.eup %14600 }
0x2bf3   :  { %14602 = vrcp.f32 %v7688_v18  ;;  %7871 = vadd.xlane.f32.xlu1 %v7870_v5  ;;  %v7699_v21 = vmul.f32 %v14601_v45, %v14585_v14 }
0x2bf9   :  { %v14603_v35 = vpop.eup %14602 }
0x2bfa   :  { %v7700_v62 = vmul.f32 %v14603_v35, %v14587_v63  ;;  %v7691_v24 = vpop.xlane.xlu1 %7690 }
0x2bfb   :  { %14604 = vrcp.f32 %v7691_v24 }
0x2bfc   :  { %v7703_v23 = vpack.c.bf16 %v7700_v62, %v7699_v21 }
0x2bfe   :  { %12676 = vmatmul.msk.bf16.vlgmr.msrb.gmra.mxu3 %vm408_vm8, %v7703_v23 }
0x2c01   :  { %v14605_v25 = vpop.eup %14604 }
0x2c02   :  { %v7694_v15 = vpop.xlane.xlu0 %7693  ;;  %v7701_v42 = vmul.f32 %v14605_v25, %v14589_v20  ;;  %v14073_v25 = vld [vmem:[%s19544_s8 + $0x6e4] sm:$0xf] }
0x2c03   :  { %14606 = vrcp.f32 %v7694_v15  ;;  %v14075_v15 = vld [vmem:[%s19544_s8 + $0x6ec] sm:$0xf0] }
0x2c09   :  { %v14607_v51 = vpop.eup %14606 }
0x2c0a   :  { %v7702_v7 = vmul.f32 %v14607_v51, %v14591_v58 }
0x2c0c   :  { %v7704_v26 = vpack.c.bf16 %v7702_v7, %v7701_v42  ;;  %v12889_v42 = vld [vmem:[%s19544_s8 + $0x6e8] sm:$0xf]  ;;  %v14076_v7 = vld [vmem:[%s19544_s8 + $0x6f4] sm:$0xf0] }
0x2c0e   :  { %12677 = vmatmul.msk.bf16.gmra.mxu3 %vm408_vm8, %v7704_v26 }
0x2c15   :  { %v7885_v34 = vpop.permute.xlu0 %7884 }
0x2c16   :  { %7900 = vmatpush.bf16.msra.mxu3 %v7885_v34  ;;  %v12890_v34 = vor.u32 %v14076_v7, %v12889_v42  ;;  %v12803_v42 = vld [vmem:[%s19544_s8 + $0x650] sm:$0xf0]  ;;  %v12809_v7 = vld [vmem:[%s19544_s8 + $0x648] sm:$0xf] }
0x2c45   :  { %v7863_v2 = vpop.xlane.xlu2 %7862 }
0x2c46   :  { %14608 = vrcp.f32 %v7863_v2  ;;  %v14074_v2 = vld [vmem:[%s19544_s8 + $0x6ec] sm:$0xf] }
0x2c4c   :  { %v14609_v6 = vpop.eup %14608 }
0x2c4d   :  { %v7866_v29 = vpop.xlane.xlu1 %7865  ;;  %v7877_v54 = vmul.f32 %v14609_v6, %v14593_v16 }
0x2c4e   :  { %14610 = vrcp.f32 %v7866_v29  ;;  %v12891_v29 = vld [vmem:[%s19544_s8 + $0x6f8] sm:$0xf0] }
0x2c4f   :  { %v12894_v6 = vor.u32 %v14074_v2, %v12891_v29  ;;  %v14054_v29 = vld [vmem:[%s19544_s8 + $0x64c] sm:$0xf] }
0x2c54   :  { %v14611_v27 = vpop.eup %14610 }
0x2c55   :  { %v7878_v12 = vmul.f32 %v14611_v27, %v14595_v8  ;;  %v12865_v27 = vld [vmem:[%s19544_s8 + $0x6c0] sm:$0xf] }
0x2c57   :  { %v7881_v39 = vpack.c.bf16 %v7878_v12, %v7877_v54  ;;  %v14071_v54 = vld [vmem:[%s19544_s8 + $0x6cc] sm:$0xf0]  ;;  %v14069_v12 = vld [vmem:[%s19544_s8 + $0x6c4] sm:$0xf] }
0x2c58   :  { %v12870_v19 = vor.u32 %v14069_v12, %v12867_v37  ;;  %v14051_v12 = vld [vmem:[%s19544_s8 + $0x62c] sm:$0xf0] }
0x2c59   :  { %12706 = vmatmul.msk.bf16.vlgmr.msra.gmra.mxu3 %vm408_vm8, %v7881_v39  ;;  %v12866_v39 = vor.u32 %v14071_v54, %v12865_v27  ;;  %v12785_v54 = vld [vmem:[%s19544_s8 + $0x620] sm:$0xf] }
0x2c5a   :  { %v12786_v37 = vor.u32 %v14051_v12, %v12785_v54  ;;  %v14088_v54 = vld [vmem:[%s19545_s9 + $0x358] sm:$0xff] }
0x2c5e   :  { %v7869_v43 = vpop.xlane.xlu2 %7868 }
0x2c5f   :  { %14612 = vrcp.f32 %v7869_v43  ;;  %v12873_v43 = vld [vmem:[%s19544_s8 + $0x6c8] sm:$0xf] }
0x2c65   :  { %v14613_v44 = vpop.eup %14612 }
0x2c66   :  { %v7872_v14 = vpop.xlane.xlu1 %7871  ;;  %v7879_v41 = vmul.f32 %v14613_v44, %v14597_v47 }
0x2c67   :  { %14614 = vrcp.f32 %v7872_v14  ;;  %v14072_v14 = vld [vmem:[%s19544_s8 + $0x6d4] sm:$0xf0] }
0x2c68   :  { %v12874_v44 = vor.u32 %v14072_v14, %v12873_v43  ;;  %v12787_v43 = vld [vmem:[%s19544_s8 + $0x630] sm:$0xf0]  ;;  %v12793_v14 = vld [vmem:[%s19544_s8 + $0x628] sm:$0xf] }
0x2c6d   :  { %v14615_v31 = vpop.eup %14614 }
0x2c6e   :  { %v7880_v63 = vmul.f32 %v14615_v31, %v14599_v48  ;;  %v14070_v31 = vld [vmem:[%s19544_s8 + $0x6cc] sm:$0xf] }
0x2c70   :  { %v7882_v9 = vpack.c.bf16 %v7880_v63, %v7879_v41  ;;  %v12875_v41 = vld [vmem:[%s19544_s8 + $0x6d8] sm:$0xf0] }
0x2c71   :  { %v12878_v63 = vor.u32 %v14070_v31, %v12875_v41  ;;  %v14050_v41 = vld [vmem:[%s19544_s8 + $0x62c] sm:$0xf] }
0x2c72   :  { %12707 = vmatmul.msk.bf16.gmra.mxu3 %vm408_vm8, %v7882_v9  ;;  %v12849_v9 = vld [vmem:[%s19544_s8 + $0x6a0] sm:$0xf] }
0x2c81   :  { %v7721_v56 = vpop.f32.mrf.mxu3 }
0x2c89   :  { %v7723_v20 = vpop.f32.mrf.mxu3 }
0x2c8a   :  { %v7731_v1 = vpack.c.bf16 %v7723_v20, %v7721_v56  ;;  %v12850_v56 = vor.u32 %v14067_v46, %v12849_v9  ;;  %v12851_v20 = vld [vmem:[%s19544_s8 + $0x6b0] sm:$0xf0] }
0x2c8c   :  { %12703 = vmatmul.msk.bf16.vlgmr.msra.gmra.mxu1 %vm379_vm7, %v7731_v1  ;;  %v12857_v1 = vld [vmem:[%s19544_s8 + $0x6a8] sm:$0xf] }
0x2c8d   :  { %8261 = vmatpush.bf16.msra.mxu1 %v12894_v6  ;;  %v12811_v6 = vld [vmem:[%s19544_s8 + $0x658] sm:$0xf0] }
0x2c8e   :  { %v12814_v27 = vor.u32 %v14054_v29, %v12811_v6  ;;  %v14081_v29 = vld [vmem:[%s19545_s9 + $0x320] sm:$0xff] }
0x2c8f   :  { %v14089_v6 = vld [vmem:[%s19545_s9 + $0x360] sm:$0xff] }
0x2c91   :  { %v7726_v57 = vpop.f32.mrf.mxu3  ;;  %8262 = vmatpush.bf16.msra.mxu1 %v12878_v63  ;;  %v12795_v63 = vld [vmem:[%s19544_s8 + $0x638] sm:$0xf0] }
0x2c92   :  { %v12798_v46 = vor.u32 %v14050_v41, %v12795_v63 }
0x2c95   :  { %8263 = vmatpush.bf16.msra.mxu1 %v12862_v33 }
0x2c99   :  { %v7728_v58 = vpop.f32.mrf.mxu3 }
0x2c9a   :  { %v7737_v61 = vpack.c.bf16 %v7728_v58, %v7726_v57  ;;  %v14068_v57 = vld [vmem:[%s19544_s8 + $0x6b4] sm:$0xf0]  ;;  %v12854_v58 = vor.u32 %v14065_v30, %v12851_v20  ;;  %v14047_v20 = vld [vmem:[%s19544_s8 + $0x60c] sm:$0xf0] }
0x2c9c   :  { %12694 = vmatmul.msk.bf16.vlgmr.msra.gmra.mxu0 %vm379_vm7, %v7737_v61  ;;  %v12858_v61 = vor.u32 %v14068_v57, %v12857_v1  ;;  %v14045_v1 = vld [vmem:[%s19544_s8 + $0x604] sm:$0xf] }
0x2c9d   :  { %8247 = vmatpush.bf16.msra.mxu0 %v12890_v34 }
0x2ca1   :  { %8248 = vmatpush.bf16.msra.mxu0 %v12874_v44 }
0x2ca5   :  { %8249 = vmatpush.bf16.msra.mxu0 %v12858_v61  ;;  %v12777_v61 = vld [vmem:[%s19544_s8 + $0x608] sm:$0xf] }
0x2cdc   :  { %v7902_v53 = vpop.f32.mrf.mxu3 }
0x2ce4   :  { %v7904_v16 = vpop.f32.mrf.mxu3 }
0x2ce5   :  { %v7912_v40 = vpack.c.bf16 %v7904_v16, %v7902_v53  ;;  %v12833_v53 = vld [vmem:[%s19544_s8 + $0x680] sm:$0xf]  ;;  %v14061_v16 = vld [vmem:[%s19544_s8 + $0x684] sm:$0xf] }
0x2ce7   :  { %12720 = vmatmul.msk.bf16.vlgmr.msrb.gmra.mxu0 %vm379_vm7, %v7912_v40  ;;  %v12834_v40 = vor.u32 %v14063_v3, %v12833_v53  ;;  %v12778_v53 = vor.u32 %v14048_v36, %v12777_v61  ;;  %v14046_v3 = vld [vmem:[%s19544_s8 + $0x60c] sm:$0xf] }
0x2cf5   :  { %v7907_v4 = vpop.f32.mrf.mxu3 }
0x2cfd   :  { %v7909_v8 = vpop.f32.mrf.mxu3 }
0x2cfe   :  { %v7948_v49 = vpack.c.bf16 %v7909_v8, %v7907_v4  ;;  %v12835_v4 = vld [vmem:[%s19544_s8 + $0x690] sm:$0xf0]  ;;  %v12841_v8 = vld [vmem:[%s19544_s8 + $0x688] sm:$0xf] }
0x2d00   :  { %12733 = vmatmul.msk.bf16.vlgmr.msrb.gmra.mxu1 %vm379_vm7, %v7948_v49  ;;  %v14064_v49 = vld [vmem:[%s19544_s8 + $0x694] sm:$0xf0] }
0x2d09   :  { %v7795_v50 = vpop.f32.mrf.mxu1 }
0x2d11   :  { %v7797_v38 = vpop.f32.mrf.mxu1 }
0x2d19   :  { %v7766_v0 = vpop.f32.mrf.mxu0 }
0x2d1a   :  { %v7796_v47 = vadd.f32 %v7795_v50, %v7766_v0  ;;  %v12838_v0 = vor.u32 %v14061_v16, %v12835_v4  ;;  %v12842_v50 = vor.u32 %v14064_v49, %v12841_v8  ;;  %v12779_v16 = vld [vmem:[%s19544_s8 + $0x618] sm:$0xf0] }
0x2d1c   :  { %8250 = vmatpush.bf16.msra.mxu0 %v12842_v50 }
0x2d21   :  { %v7768_v59 = vpop.f32.mrf.mxu0 }
0x2d22   :  { %v7798_v5 = vadd.f32 %v7797_v38, %v7768_v59  ;;  %v14062_v59 = vld [vmem:[%s19544_s8 + $0x68c] sm:$0xf]  ;;  %v12843_v38 = vld [vmem:[%s19544_s8 + $0x698] sm:$0xf0] }
0x2d64   :  { %v7941_v11 = vpop.f32.mrf.mxu0 }
0x2d65   :  { %v7946_v17 = vadd.f32 %v7941_v11, %v7796_v47  ;;  %v12846_v11 = vor.u32 %v14062_v59, %v12843_v38  ;;  %v12817_v47 = vld [vmem:[%s19544_s8 + $0x660] sm:$0xf] }
0x2d67   :  { %8264 = vmatpush.bf16.msra.mxu1 %v12846_v11 }
0x2d6c   :  { %v7943_v18 = vpop.f32.mrf.mxu0 }
0x2d6d   :  { %v7947_v35 = vadd.f32 %v7943_v18, %v7798_v5  ;;  %v12819_v18 = vld [vmem:[%s19544_s8 + $0x670] sm:$0xf0]  ;;  %v12825_v5 = vld [vmem:[%s19544_s8 + $0x668] sm:$0xf] }
0x2d7d   :  { %v7977_v52 = vpop.f32.mrf.mxu1 }
0x2d7e   :  { %v7982_v10 = vadd.f32 %v7977_v52, %v7946_v17  ;;  %v14059_v17 = vld [vmem:[%s19544_s8 + $0x66c] sm:$0xf0]  ;;  %v14057_v52 = vld [vmem:[%s19544_s8 + $0x664] sm:$0xf] }
0x2d80   :  { %v18659_v48 = vadd.f32 %v7982_v10, %v18359_v60  ;;  %v12881_v60 = vld [vmem:[%s19544_s8 + $0x6e0] sm:$0xf]  ;;  %v12818_v10 = vor.u32 %v14059_v17, %v12817_v47 }
0x2d81   :  { %v12882_v51 = vor.u32 %v14075_v15, %v12881_v60  ;;  %v12801_v15 = vld [vmem:[%s19544_s8 + $0x640] sm:$0xf] }
0x2d82   :  { %v7988_v45 = vmul.f32 %v18659_v48, %v18659_v48 }
0x2d83   :  { %8219 = vmatpush.bf16.msrb.mxu2 %v12882_v51  ;;  %v14053_v51 = vld [vmem:[%s19544_s8 + $0x644] sm:$0xf] }
0x2d84   :  { %7990 = vadd.xlane.f32.xlu2 %v7988_v45  ;;  %v14060_v45 = vld [vmem:[%s19544_s8 + $0x674] sm:$0xf0]  ;;  %v12806_v34 = vor.u32 %v14053_v51, %v12803_v42 }
0x2d85   :  { %v7979_v21 = vpop.f32.mrf.mxu1  ;;  %v14092_v42 = vld [vmem:[%s19545_s9 + $0x378] sm:$0xff] }
0x2d86   :  { %v7983_v62 = vadd.f32 %v7979_v21, %v7947_v35  ;;  %v12822_v35 = vor.u32 %v14057_v52, %v12819_v18  ;;  %v12826_v21 = vor.u32 %v14060_v45, %v12825_v5 }
0x2d87   :  { %8220 = vmatpush.bf16.msrb.mxu2 %v12866_v39  ;;  %v14049_v39 = vld [vmem:[%s19544_s8 + $0x624] sm:$0xf] }
0x2d88   :  { %v18664_v23 = vadd.f32 %v7983_v62, %v18364_v22  ;;  %v12883_v22 = vld [vmem:[%s19544_s8 + $0x6f0] sm:$0xf0]  ;;  %v14058_v62 = vld [vmem:[%s19544_s8 + $0x66c] sm:$0xf]  ;;  %8251 = vmatpush.bf16.msra.mxu0 %v12826_v21  ;;  %v12790_v44 = vor.u32 %v14049_v39, %v12787_v43  ;;  %v14239_v21 = vld [vmem:[%s19543_s7 + $0x6] ss:$0 sm:$0xff] }
0x2d89   :  { %v12886_v26 = vor.u32 %v14073_v25, %v12883_v22  ;;  %v14055_v25 = vld [vmem:[%s19544_s8 + $0x64c] sm:$0xf0] }
0x2d8a   :  { %v7989_v24 = vmul.f32 %v18664_v23, %v18664_v23  ;;  %v12802_v22 = vor.u32 %v14055_v25, %v12801_v15 }
0x2d8b   :  { %8233 = vmatpush.bf16.msrb.mxu3 %v12886_v26  ;;  %8221 = vmatpush.bf16.msrb.mxu2 %v12850_v56  ;;  %v14056_v26 = vld [vmem:[%s19544_s8 + $0x654] sm:$0xf0]  ;;  %v12769_v56 = vld [vmem:[%s19544_s8 + $0x600] sm:$0xf] }
0x2d8c   :  { %7992 = vadd.xlane.f32.xlu1 %v7989_v24  ;;  %v12827_v24 = vld [vmem:[%s19544_s8 + $0x678] sm:$0xf0]  ;;  %v12810_v2 = vor.u32 %v14056_v26, %v12809_v7  ;;  %v12770_v57 = vor.u32 %v14047_v20, %v12769_v56  ;;  %v14083_v7 = vld [vmem:[%s19545_s9 + $0x330] sm:$0xff] }
0x2d8d   :  { %v12830_v60 = vor.u32 %v14058_v62, %v12827_v24  ;;  %v14091_v26 = vld [vmem:[%s19545_s9 + $0x370] sm:$0xff] }
0x2d8e   :  { %8252 = vmatpush.bf16.msra.mxu0 %v12810_v2  ;;  %v14090_v2 = vld [vmem:[%s19545_s9 + $0x368] sm:$0xff] }
0x2d8f   :  { %8234 = vmatpush.bf16.msrb.mxu3 %v12870_v19  ;;  %8222 = vmatpush.bf16.msrb.mxu2 %v12834_v40  ;;  %v14052_v19 = vld [vmem:[%s19544_s8 + $0x634] sm:$0xf0]  ;;  %v12782_v40 = vor.u32 %v14046_v3, %v12779_v16 }
0x2d90   :  { %8265 = vmatpush.bf16.msra.mxu1 %v12830_v60  ;;  %v12794_v31 = vor.u32 %v14052_v19, %v12793_v14  ;;  %v14079_v14 = vld [vmem:[%s19545_s9 + $0x310] sm:$0xff] }
0x2d91   :  { %v14087_v19 = vld [vmem:[%s19545_s9 + $0x350] sm:$0xff] }
0x2d92   :  { %8253 = vmatpush.bf16.msra.mxu0 %v12794_v31  ;;  %v14086_v31 = vld [vmem:[%s19545_s9 + $0x348] sm:$0xff] }
0x2d93   :  { %8235 = vmatpush.bf16.msrb.mxu3 %v12854_v58  ;;  %8223 = vmatpush.bf16.msrb.mxu2 %v12818_v10  ;;  %v12771_v58 = vld [vmem:[%s19544_s8 + $0x610] sm:$0xf0] }
0x2d94   :  { %8266 = vmatpush.bf16.msra.mxu1 %v12814_v27  ;;  %v12774_v33 = vor.u32 %v14045_v1, %v12771_v58  ;;  %v14080_v27 = vld [vmem:[%s19545_s9 + $0x318] sm:$0xff]  ;;  %v14077_v1 = vld [vmem:[%s19545_s9 + $0x300] sm:$0xff] }
0x2d96   :  { %8254 = vmatpush.bf16.msra.mxu0 %v12778_v53 }
0x2d97   :  { %8236 = vmatpush.bf16.msrb.mxu3 %v12838_v0  ;;  %8224 = vmatpush.bf16.msrb.mxu2 %v12802_v22  ;;  %v14084_v22 = vld [vmem:[%s19545_s9 + $0x338] sm:$0xff] }
0x2d98   :  { %8267 = vmatpush.bf16.msra.mxu1 %v12798_v46 }
0x2d9b   :  { %8237 = vmatpush.bf16.msrb.mxu3 %v12822_v35  ;;  %8225 = vmatpush.bf16.msrb.mxu2 %v12786_v37 }
0x2d9c   :  { %8268 = vmatpush.bf16.msra.mxu1 %v12782_v40 }
0x2d9f   :  { %8238 = vmatpush.bf16.msrb.mxu3 %v12806_v34  ;;  %8226 = vmatpush.bf16.msrb.mxu2 %v12770_v57  ;;  %v14082_v34 = vld [vmem:[%s19545_s9 + $0x328] sm:$0xff]  ;;  %v14085_v57 = vld [vmem:[%s19545_s9 + $0x340] sm:$0xff] }
0x2da3   :  { %8239 = vmatpush.bf16.msrb.mxu3 %v12790_v44  ;;  %8490 = vmatpush.bf16.msra.mxu2 %v14084_v22  ;;  %v14078_v44 = vld [vmem:[%s19545_s9 + $0x308] sm:$0xff] }
0x2da7   :  { %8240 = vmatpush.bf16.msrb.mxu3 %v12774_v33  ;;  %8491 = vmatpush.bf16.msra.mxu2 %v14083_v7 }
0x2dab   :  { %8504 = vmatpush.bf16.msra.mxu3 %v14092_v42  ;;  %8492 = vmatpush.bf16.msra.mxu2 %v14082_v34 }
0x2daf   :  { %8505 = vmatpush.bf16.msra.mxu3 %v14091_v26  ;;  %8493 = vmatpush.bf16.msra.mxu2 %v14081_v29 }
0x2db3   :  { %8506 = vmatpush.bf16.msra.mxu3 %v14090_v2  ;;  %8494 = vmatpush.bf16.msra.mxu2 %v14080_v27 }
0x2db7   :  { %8507 = vmatpush.bf16.msra.mxu3 %v14089_v6  ;;  %8495 = vmatpush.bf16.msra.mxu2 %v14079_v14 }
0x2dbb   :  { %8508 = vmatpush.bf16.msra.mxu3 %v14088_v54  ;;  %8496 = vmatpush.bf16.msra.mxu2 %v14078_v44 }
0x2dbf   :  { %8509 = vmatpush.bf16.msra.mxu3 %v14087_v19  ;;  %8497 = vmatpush.bf16.msra.mxu2 %v14077_v1 }
0x2dc3   :  { %8510 = vmatpush.bf16.msra.mxu3 %v14086_v31 }
0x2dc7   :  { %8511 = vmatpush.bf16.msra.mxu3 %v14085_v57 }
0x2df7   :  { %v7991_v9 = vpop.xlane.xlu2 %7990 }
0x2df8   :  { %v7994_v30 = vmul.f32 %v7991_v9, %v14995_v32 }
0x2dfa   :  { %v7996_v55 = vadd.f32 1e-05, %v7994_v30 }
0x2dfc   :  { %14616 = vrsqrt.f32 %v7996_v55  ;;  %vm8004_vm10 = vweird.f32 %v7996_v55 }
0x2dff   :  { %v7993_v4 = vpop.xlane.xlu1 %7992 }
0x2e00   :  { %v7995_v8 = vmul.f32 %v7993_v4, %v14995_v32 }
0x2e02   :  { %v14617_v49 = vpop.eup %14616  ;;  %v7997_v0 = vadd.f32 1e-05, %v7995_v8 }
0x2e03   :  { %v7999_v50 = vmul.f32 %v14617_v49, %v7996_v55  ;;  %vm8005_vm9 = vweird.f32 %v14617_v49 }
0x2e04   :  { %14618 = vrsqrt.f32 %v7997_v0  ;;  %vm8006_vm11 = vmor %vm8004_vm10, %vm8005_vm9  ;;  %vm8014_vm13 = vweird.f32 %v7997_v0 }
0x2e05   :  { %v8000_v59 = vmul.f32 %v14617_v49, %v7999_v50 }
0x2e07   :  { %v8001_v38 = vmul.f32 0.5, %v8000_v59 }
0x2e09   :  { %v8002_v11 = vsub.f32 1.5, %v8001_v38 }
0x2e0a   :  { %v14619_v47 = vpop.eup %14618 }
0x2e0b   :  { %v8009_v17 = vmul.f32 %v14619_v47, %v7997_v0  ;;  %v8003_v52 = vmul.f32 %v14617_v49, %v8002_v11  ;;  %vm8015_vm12 = vweird.f32 %v14619_v47 }
0x2e0c   :  { %vm8016_vm14 = vmor %vm8014_vm13, %vm8015_vm12 }
0x2e0d   :  { %v8010_v10 = vmul.f32 %v14619_v47, %v8009_v17  ;;  %v8007_v5 = vsel %vm8006_vm11, %v14617_v49, %v8003_v52  ;;  %v14122_v52 = vld [vmem:[%s19538_s5 + $0x7ec] sm:$0xf] }
0x2e0e   :  { %v8018_v62 = vmul.f32 %v8007_v5, %v18659_v48 }
0x2e0f   :  { %v8011_v18 = vmul.f32 0.5, %v8010_v10 }
0x2e10   :  { %v8023_v15 = vmul.f32 %v14239_v21, %v8018_v62 }
0x2e11   :  { %v8012_v45 = vsub.f32 1.5, %v8011_v18 }
0x2e13   :  { %v8013_v35 = vmul.f32 %v14619_v47, %v8012_v45 }
0x2e15   :  { %v8017_v24 = vsel %vm8016_vm14, %v14619_v47, %v8013_v35 }
0x2e16   :  { %v8019_v60 = vmul.f32 %v8017_v24, %v18664_v23 }
0x2e18   :  { %v8024_v25 = vmul.f32 %v14239_v21, %v8019_v60 }
0x2e1a   :  { %v8025_v51 = vpack.c.bf16 %v8024_v25, %v8023_v15 }
0x2e1c   :  { %8227 = vmatmul.bf16.vlgmr.msrb.gmra.mxu2 %v8025_v51  ;;  %8241 = vmatmul.bf16.vlgmr.msrb.gmra.mxu3 %v8025_v51 }
0x2e1d   :  { %8255 = vmatmul.bf16.vlgmr.msra.gmra.mxu0 %v8025_v51  ;;  %8269 = vmatmul.bf16.vlgmr.msra.gmra.mxu1 %v8025_v51 }
0x2e9a   :  { %v8256_v17 = vpop.f32.mrf.mxu0  ;;  %v8270_v15 = vpop.f32.mrf.mxu1 }
0x2e9f   :  { %v18897_v12 = vpop.f32.mrf.mxu2  ;;  %v18899_v39 = vpop.f32.mrf.mxu3 }
0x2ea0   :  { %v12895_v37 = vmul.f32 -1.442695, %v18897_v12  ;;  %v12896_v43 = vmul.f32 -1.442695, %v18899_v39 }
0x2ea2   :  { %14620 = vpow2.f32 %v12895_v37 }
0x2ea3   :  { %14622 = vpow2.f32 %v12896_v43 }
0x2ea7   :  { %v18915_v41 = vpop.f32.mrf.mxu2  ;;  %v18917_v63 = vpop.f32.mrf.mxu3 }
0x2ea8   :  { %v14621_v9 = vpop.eup %14620  ;;  %v12897_v46 = vmul.f32 -1.442695, %v18915_v41  ;;  %v12898_v20 = vmul.f32 -1.442695, %v18917_v63 }
0x2ea9   :  { %v14623_v30 = vpop.eup %14622  ;;  %v8287_v56 = vadd.f32 1.0, %v14621_v9 }
0x2eaa   :  { %v8288_v58 = vadd.f32 1.0, %v14623_v30  ;;  %14624 = vpow2.f32 %v12897_v46  ;;  %v8258_v30 = vpop.f32.mrf.mxu0 }
0x2eab   :  { %14626 = vrcp.f32 %v8287_v56  ;;  %v8302_v38 = vand.u32 2147483648, %v8287_v56  ;;  %vm8296_vm0 = vweird.f32 %v8287_v56  ;;  %v8300_v11 = vand.u32 2147483647, %v8287_v56 }
0x2eac   :  { %14628 = vrcp.f32 %v8288_v58  ;;  %v8315_v18 = vand.u32 2147483647, %v8288_v58  ;;  %v8317_v35 = vand.u32 2147483648, %v8288_v58  ;;  %vm8311_vm3 = vweird.f32 %v8288_v58 }
0x2ead   :  { %14630 = vpow2.f32 %v12898_v20  ;;  %v8303_v62 = vor.u32 1.1754944e-38, %v8302_v38  ;;  %vm8301_vm4 = vcmp.eq.f32.partialorder %v8300_v11, 8.507059e+37  ;;  %v13150_v38 = vld [vmem:[%s19538_s5 + $0x7e8] sm:$0xf]  ;;  %v14124_v11 = vld [vmem:[%s19538_s5 + $0x7f4] sm:$0xf0] }
0x2eae   :  { %vm8316_vm9 = vcmp.eq.f32.partialorder %v8315_v18, 8.507059e+37  ;;  %v8318_v34 = vor.u32 1.1754944e-38, %v8317_v35  ;;  %v14117_v35 = vld [vmem:[%s19538_s5 + $0x7c4] sm:$0xf] }
0x2eb0   :  { %v14625_v61 = vpop.eup %14624 }
0x2eb1   :  { %v14627_v36 = vpop.eup %14626  ;;  %v8289_v55 = vadd.f32 1.0, %v14625_v61 }
0x2eb2   :  { %v14629_v33 = vpop.eup %14628  ;;  %v8292_v53 = vmul.f32 %v14627_v36, %v8287_v56  ;;  %vm8297_vm15 = vweird.f32 %v14627_v36 }
0x2eb3   :  { %v14631_v3 = vpop.eup %14630  ;;  %v8307_v16 = vmul.f32 %v14629_v33, %v8288_v58  ;;  %14632 = vrcp.f32 %v8289_v55  ;;  %vm18927_vm1 = vmor %vm8296_vm0, %vm8297_vm15  ;;  %vm8312_vm2 = vweird.f32 %v14629_v33  ;;  %v8332_v24 = vand.u32 2147483648, %v8289_v55  ;;  %v8272_v58 = vpop.f32.mrf.mxu1 }
0x2eb4   :  { %v8293_v40 = vsub.f32 1.0, %v8292_v53  ;;  %v8290_v4 = vadd.f32 1.0, %v14631_v3  ;;  %vm18933_vm5 = vmor %vm8311_vm3, %vm8312_vm2  ;;  %v8330_v22 = vand.u32 2147483647, %v8289_v55  ;;  %vm8326_vm10 = vweird.f32 %v8289_v55 }
0x2eb5   :  { %v8308_v8 = vsub.f32 1.0, %v8307_v16  ;;  %v8333_v6 = vor.u32 1.1754944e-38, %v8332_v24  ;;  %v13134_v24 = vld [vmem:[%s19538_s5 + $0x7c8] sm:$0xf] }
0x2eb6   :  { %v8294_v49 = vmul.f32 %v14627_v36, %v8293_v40  ;;  %14634 = vrcp.f32 %v8290_v4  ;;  %v8347_v29 = vand.u32 2147483648, %v8290_v4  ;;  %v8345_v54 = vand.u32 2147483647, %v8290_v4 }
0x2eb7   :  { %v8309_v0 = vmul.f32 %v14629_v33, %v8308_v8  ;;  %vm8331_vm13 = vcmp.eq.f32.partialorder %v8330_v22, 8.507059e+37  ;;  %vm8341_vm14 = vweird.f32 %v8290_v4  ;;  %v13136_v22 = vld [vmem:[%s19538_s5 + $0x7d8] sm:$0xf0] }
0x2eb8   :  { %v8295_v50 = vadd.f32 %v14627_v36, %v8294_v49  ;;  %v8348_v9 = vor.u32 1.1754944e-38, %v8347_v29  ;;  %vm8346_vm0 = vcmp.eq.f32.partialorder %v8345_v54, 8.507059e+37  ;;  %v13112_v29 = vld [vmem:[%s19538_s5 + $0x7b0] sm:$0xf0] }
0x2eb9   :  { %v14633_v59 = vpop.eup %14632  ;;  %v8310_v10 = vadd.f32 %v14629_v33, %v8309_v0  ;;  %v13142_v0 = vld [vmem:[%s19538_s5 + $0x7e0] sm:$0xf] }
0x2eba   :  { %v8322_v47 = vmul.f32 %v14633_v59, %v8289_v55  ;;  %v8299_v45 = vsel %vm18927_vm1, %v14627_v36, %v8295_v50  ;;  %vm8327_vm6 = vweird.f32 %v14633_v59  ;;  %v14121_v50 = vld [vmem:[%s19538_s5 + $0x7e4] sm:$0xf] }
0x2ebb   :  { %v8304_v42 = vsel %vm8301_vm4, %v8303_v62, %v8299_v45  ;;  %v8314_v7 = vsel %vm18933_vm5, %v14629_v33, %v8310_v10  ;;  %vm8328_vm11 = vmor %vm8326_vm10, %vm8327_vm6  ;;  %v13152_v10 = vld [vmem:[%s19538_s5 + $0x7f8] sm:$0xf0]  ;;  %v14119_v45 = vld [vmem:[%s19538_s5 + $0x7cc] sm:$0xf0] }
0x2ebc   :  { %v14635_v5 = vpop.eup %14634  ;;  %v8323_v21 = vsub.f32 1.0, %v8322_v47  ;;  %v8351_v37 = vmul.f32 %v8304_v42, %v18897_v12  ;;  %v8319_v43 = vsel %vm8316_vm9, %v8318_v34, %v8314_v7  ;;  %v13155_v18 = vor.u32 %v14122_v52, %v13152_v10  ;;  %v13128_v62 = vld [vmem:[%s19538_s5 + $0x7d0] sm:$0xf0]  ;;  %v13110_v7 = vld [vmem:[%s19538_s5 + $0x7a0] sm:$0xf] }
0x2ebd   :  { %v8337_v60 = vmul.f32 %v14635_v5, %v8290_v4  ;;  %vm8342_vm12 = vweird.f32 %v14635_v5  ;;  %v8352_v46 = vmul.f32 %v8319_v43, %v18899_v39  ;;  %v14113_v34 = vld [vmem:[%s19538_s5 + $0x7a4] sm:$0xf]  ;;  %v14114_v43 = vld [vmem:[%s19538_s5 + $0x7ac] sm:$0xf] }
0x2ebe   :  { %v8324_v51 = vmul.f32 %v14633_v59, %v8323_v21  ;;  %vm8343_vm15 = vmor %vm8341_vm14, %vm8342_vm12  ;;  %v8355_v20 = vmul.f32 %v8351_v37, %v8256_v17  ;;  %v13151_v17 = vor.u32 %v14124_v11, %v13150_v38  ;;  %8795 = vmatpush.bf16.msrb.mxu3 %v13155_v18  ;;  %v13115_v54 = vor.u32 %v14113_v34, %v13112_v29  ;;  %v13064_v38 = vld [vmem:[%s19538_s5 + $0x750] sm:$0xf0]  ;;  %v13070_v11 = vld [vmem:[%s19538_s5 + $0x748] sm:$0xf] }
0x2ebf   :  { %v8338_v26 = vsub.f32 1.0, %v8337_v60  ;;  %v8356_v36 = vmul.f32 %v8352_v46, %v8270_v15  ;;  %v14120_v60 = vld [vmem:[%s19538_s5 + $0x7d4] sm:$0xf0]  ;;  %v13131_v15 = vor.u32 %v14117_v35, %v13128_v62  ;;  %v14102_v10 = vld [vmem:[%s19538_s5 + $0x74c] sm:$0xf] }
0x2ec0   :  { %v8325_v2 = vadd.f32 %v14633_v59, %v8324_v51  ;;  %8781 = vmatpush.bf16.msrb.mxu2 %v13151_v17  ;;  %v13135_v25 = vor.u32 %v14120_v60, %v13134_v24  ;;  %v14118_v51 = vld [vmem:[%s19538_s5 + $0x7cc] sm:$0xf]  ;;  %v13072_v18 = vld [vmem:[%s19538_s5 + $0x758] sm:$0xf0]  ;;  %v14099_v35 = vld [vmem:[%s19538_s5 + $0x72c] sm:$0xf0] }
0x2ec1   :  { %v8339_v27 = vmul.f32 %v14635_v5, %v8338_v26  ;;  %v13139_v42 = vor.u32 %v14118_v51, %v13136_v22  ;;  %v14115_v26 = vld [vmem:[%s19538_s5 + $0x7ac] sm:$0xf0]  ;;  %v13048_v24 = vld [vmem:[%s19538_s5 + $0x730] sm:$0xf0]  ;;  %v13054_v60 = vld [vmem:[%s19538_s5 + $0x728] sm:$0xf] }
0x2ec2   :  { %v8329_v14 = vsel %vm8328_vm11, %v14633_v59, %v8325_v2  ;;  %v13111_v2 = vor.u32 %v14115_v26, %v13110_v7  ;;  %v14098_v22 = vld [vmem:[%s19538_s5 + $0x72c] sm:$0xf]  ;;  %v13030_v34 = vld [vmem:[%s19538_s5 + $0x700] sm:$0xf]  ;;  %v14093_v29 = vld [vmem:[%s19538_s5 + $0x704] sm:$0xf] }
0x2ec3   :  { %v8334_v19 = vsel %vm8331_vm13, %v8333_v6, %v8329_v14  ;;  %v8340_v44 = vadd.f32 %v14635_v5, %v8339_v27  ;;  %8796 = vmatpush.bf16.msrb.mxu3 %v13139_v42  ;;  %v13118_v6 = vld [vmem:[%s19538_s5 + $0x7a8] sm:$0xf]  ;;  %v14116_v27 = vld [vmem:[%s19538_s5 + $0x7b4] sm:$0xf0]  ;;  %v13120_v14 = vld [vmem:[%s19538_s5 + $0x7b8] sm:$0xf0] }
0x2ec4   :  { %v8353_v31 = vmul.f32 %v8334_v19, %v18915_v41  ;;  %8782 = vmatpush.bf16.msrb.mxu2 %v13135_v25  ;;  %v13119_v37 = vor.u32 %v14116_v27, %v13118_v6  ;;  %v13123_v19 = vor.u32 %v14114_v43, %v13120_v14  ;;  %v13056_v42 = vld [vmem:[%s19538_s5 + $0x738] sm:$0xf0]  ;;  %v14096_v43 = vld [vmem:[%s19538_s5 + $0x714] sm:$0xf0] }
0x2ec5   :  { %v8344_v56 = vsel %vm8343_vm15, %v14635_v5, %v8340_v44  ;;  %v13126_v5 = vld [vmem:[%s19538_s5 + $0x7c0] sm:$0xf]  ;;  %v13059_v7 = vor.u32 %v14098_v22, %v13056_v42 }
0x2ec6   :  { %v8357_v1 = vmul.f32 %v8353_v31, %v8258_v30  ;;  %v8349_v57 = vsel %vm8346_vm0, %v8348_v9, %v8344_v56  ;;  %v13127_v21 = vor.u32 %v14119_v45, %v13126_v5  ;;  %v13094_v44 = vld [vmem:[%s19538_s5 + $0x780] sm:$0xf]  ;;  %v14111_v31 = vld [vmem:[%s19538_s5 + $0x78c] sm:$0xf0]  ;;  %v14109_v9 = vld [vmem:[%s19538_s5 + $0x784] sm:$0xf]  ;;  %v13075_v5 = vor.u32 %v14102_v10, %v13072_v18 }
0x2ec7   :  { %v8354_v12 = vmul.f32 %v8349_v57, %v18917_v63  ;;  %8797 = vmatpush.bf16.msrb.mxu3 %v13123_v19  ;;  %v13095_v46 = vor.u32 %v14111_v31, %v13094_v44  ;;  %v13096_v30 = vld [vmem:[%s19538_s5 + $0x790] sm:$0xf0]  ;;  %v13102_v56 = vld [vmem:[%s19538_s5 + $0x788] sm:$0xf]  ;;  %v13046_v45 = vld [vmem:[%s19538_s5 + $0x720] sm:$0xf] }
0x2ec8   :  { %v8359_v61 = vpack.c.bf16 %v8357_v1, %v8355_v20  ;;  %8783 = vmatpush.bf16.msrb.mxu2 %v13119_v37  ;;  %v14112_v20 = vld [vmem:[%s19538_s5 + $0x794] sm:$0xf0]  ;;  %v13099_v1 = vor.u32 %v14109_v9, %v13096_v30  ;;  %v13047_v62 = vor.u32 %v14099_v35, %v13046_v45  ;;  %v13038_v37 = vld [vmem:[%s19538_s5 + $0x708] sm:$0xf]  ;;  %v14094_v44 = vld [vmem:[%s19538_s5 + $0x70c] sm:$0xf] }
0x2ec9   :  { %v8358_v55 = vmul.f32 %v8354_v12, %v8272_v58  ;;  %v13103_v57 = vor.u32 %v14112_v20, %v13102_v56  ;;  %v14110_v12 = vld [vmem:[%s19538_s5 + $0x78c] sm:$0xf]  ;;  %v13104_v58 = vld [vmem:[%s19538_s5 + $0x798] sm:$0xf0]  ;;  %v13039_v19 = vor.u32 %v14096_v43, %v13038_v37 }
0x2eca   :  { %8498 = vmatmul.bf16.vlgmr.msra.gmra.mxu2 %v8359_v61  ;;  %v13107_v61 = vor.u32 %v14110_v12, %v13104_v58  ;;  %v13040_v31 = vld [vmem:[%s19538_s5 + $0x718] sm:$0xf0]  ;;  %v14740_v18 = vld [vmem:[%s19540_s1 + $0x8] sm:$0xff] }
0x2ecb   :  { %v8360_v33 = vpack.c.bf16 %v8358_v55, %v8356_v36  ;;  %v13078_v36 = vld [vmem:[%s19538_s5 + $0x760] sm:$0xf]  ;;  %v14107_v55 = vld [vmem:[%s19538_s5 + $0x76c] sm:$0xf0]  ;;  %v14741_v45 = vld [vmem:[%s19539_s2 + $0x8] sm:$0xff] }
0x2ecc   :  { %8784 = vmatpush.bf16.msrb.mxu2 %v13103_v57  ;;  %8798 = vmatpush.bf16.msrb.mxu3 %v13107_v61 }
0x2ecd   :  { %8512 = vmatmul.bf16.vlgmr.msra.gmra.mxu3 %v8360_v33  ;;  %v14105_v33 = vld [vmem:[%s19538_s5 + $0x764] sm:$0xf] }
0x2f4d   :  { %v8499_v41 = vpop.f32.mrf.mxu2 }
0x2f50   :  { %v8513_v53 = vpop.f32.mrf.mxu3 }
0x2f51   :  { %v8514_v3 = vadd.f32 %v8513_v53, %v8499_v41  ;;  %v13079_v41 = vor.u32 %v14107_v55, %v13078_v36  ;;  %v13080_v53 = vld [vmem:[%s19538_s5 + $0x770] sm:$0xf0] }
0x2f53   :  { %v18944_v39 = vadd.f32 %v8514_v3, %v18659_v48  ;;  %v14123_v48 = vld [vmem:[%s19538_s5 + $0x7ec] sm:$0xf0]  ;;  %v13086_v3 = vld [vmem:[%s19538_s5 + $0x768] sm:$0xf] }
0x2f54   :  { %v13143_v59 = vor.u32 %v14123_v48, %v13142_v0  ;;  %v13062_v48 = vld [vmem:[%s19538_s5 + $0x740] sm:$0xf] }
0x2f55   :  { %v8522_v16 = vmul.f32 %v18944_v39, %v18944_v39  ;;  %v8501_v40 = vpop.f32.mrf.mxu2 }
0x2f56   :  { %8753 = vmatpush.bf16.msrb.mxu0 %v13143_v59  ;;  %v14101_v59 = vld [vmem:[%s19538_s5 + $0x744] sm:$0xf] }
0x2f57   :  { %8524 = vadd.xlane.f32.xlu2 %v8522_v16  ;;  %v14108_v16 = vld [vmem:[%s19538_s5 + $0x774] sm:$0xf0]  ;;  %v13067_v17 = vor.u32 %v14101_v59, %v13064_v38 }
0x2f58   :  { %v8515_v4 = vpop.f32.mrf.mxu3 }
0x2f59   :  { %v8516_v63 = vadd.f32 %v8515_v4, %v8501_v40  ;;  %v13083_v40 = vor.u32 %v14105_v33, %v13080_v53  ;;  %v13087_v4 = vor.u32 %v14108_v16, %v13086_v3 }
0x2f5a   :  { %8754 = vmatpush.bf16.msrb.mxu0 %v13127_v21  ;;  %v14097_v21 = vld [vmem:[%s19538_s5 + $0x724] sm:$0xf] }
0x2f5b   :  { %v18949_v8 = vadd.f32 %v8516_v63, %v18664_v23  ;;  %v13144_v23 = vld [vmem:[%s19538_s5 + $0x7f0] sm:$0xf0]  ;;  %v14106_v63 = vld [vmem:[%s19538_s5 + $0x76c] sm:$0xf]  ;;  %8785 = vmatpush.bf16.msrb.mxu2 %v13087_v4  ;;  %v13051_v25 = vor.u32 %v14097_v21, %v13048_v24  ;;  %v14240_v4 = vld [vmem:[%s19537_s4 + $0x7] ss:$0 sm:$0xff] }
0x2f5c   :  { %v13147_v47 = vor.u32 %v14121_v50, %v13144_v23  ;;  %v14103_v50 = vld [vmem:[%s19538_s5 + $0x74c] sm:$0xf0]  ;;  %v14742_v21 = vld [vmem:[%s19540_s1] sm:$0xff] }
0x2f5d   :  { %v8523_v49 = vmul.f32 %v18949_v8, %v18949_v8  ;;  %v13063_v23 = vor.u32 %v14103_v50, %v13062_v48 }
0x2f5e   :  { %8767 = vmatpush.bf16.msrb.mxu1 %v13147_v47  ;;  %8755 = vmatpush.bf16.msrb.mxu0 %v13111_v2  ;;  %v14104_v47 = vld [vmem:[%s19538_s5 + $0x754] sm:$0xf0]  ;;  %v14095_v2 = vld [vmem:[%s19538_s5 + $0x70c] sm:$0xf0] }
0x2f5f   :  { %8526 = vadd.xlane.f32.xlu0 %v8523_v49  ;;  %v13088_v49 = vld [vmem:[%s19538_s5 + $0x778] sm:$0xf0]  ;;  %v13071_v52 = vor.u32 %v14104_v47, %v13070_v11  ;;  %v13031_v27 = vor.u32 %v14095_v2, %v13030_v34 }
0x2f60   :  { %v13091_v0 = vor.u32 %v14106_v63, %v13088_v49 }
0x2f61   :  { %8786 = vmatpush.bf16.msrb.mxu2 %v13071_v52 }
0x2f62   :  { %8768 = vmatpush.bf16.msrb.mxu1 %v13131_v15  ;;  %8756 = vmatpush.bf16.msrb.mxu0 %v13095_v46  ;;  %v14100_v15 = vld [vmem:[%s19538_s5 + $0x734] sm:$0xf0]  ;;  %v13043_v46 = vor.u32 %v14094_v44, %v13040_v31 }
0x2f63   :  { %8799 = vmatpush.bf16.msrb.mxu3 %v13091_v0  ;;  %v13055_v51 = vor.u32 %v14100_v15, %v13054_v60 }
0x2f65   :  { %8787 = vmatpush.bf16.msrb.mxu2 %v13055_v51 }
0x2f66   :  { %8769 = vmatpush.bf16.msrb.mxu1 %v13115_v54  ;;  %8757 = vmatpush.bf16.msrb.mxu0 %v13079_v41  ;;  %v13032_v54 = vld [vmem:[%s19538_s5 + $0x710] sm:$0xf0] }
0x2f67   :  { %8800 = vmatpush.bf16.msrb.mxu3 %v13075_v5  ;;  %v13035_v14 = vor.u32 %v14093_v29, %v13032_v54 }
0x2f69   :  { %8788 = vmatpush.bf16.msrb.mxu2 %v13039_v19 }
0x2f6a   :  { %8770 = vmatpush.bf16.msrb.mxu1 %v13099_v1  ;;  %8758 = vmatpush.bf16.msrb.mxu0 %v13063_v23 }
0x2f6b   :  { %8801 = vmatpush.bf16.msrb.mxu3 %v13059_v7 }
0x2f6e   :  { %8771 = vmatpush.bf16.msrb.mxu1 %v13083_v40  ;;  %8759 = vmatpush.bf16.msrb.mxu0 %v13047_v62 }
0x2f6f   :  { %8802 = vmatpush.bf16.msrb.mxu3 %v13043_v46 }
0x2f72   :  { %8772 = vmatpush.bf16.msrb.mxu1 %v13067_v17  ;;  %8760 = vmatpush.bf16.msrb.mxu0 %v13031_v27 }
0x2f76   :  { %8773 = vmatpush.bf16.msrb.mxu1 %v13051_v25 }
0x2f7a   :  { %8774 = vmatpush.bf16.msrb.mxu1 %v13035_v14 }
0x2fca   :  { %v8525_v26 = vpop.xlane.xlu2 %8524 }
0x2fcb   :  { %v8528_v6 = vmul.f32 %v8525_v26, %v14995_v32 }
0x2fcd   :  { %v8530_v9 = vadd.f32 1e-05, %v8528_v6 }
0x2fcf   :  { %14636 = vrsqrt.f32 %v8530_v9  ;;  %vm8538_vm2 = vweird.f32 %v8530_v9 }
0x2fd2   :  { %v8527_v30 = vpop.xlane.xlu0 %8526 }
0x2fd3   :  { %v8529_v56 = vmul.f32 %v8527_v30, %v14995_v32 }
0x2fd5   :  { %v14637_v20 = vpop.eup %14636  ;;  %v8531_v1 = vadd.f32 1e-05, %v8529_v56 }
0x2fd6   :  { %v8533_v57 = vmul.f32 %v14637_v20, %v8530_v9  ;;  %vm8539_vm1 = vweird.f32 %v14637_v20 }
0x2fd7   :  { %14638 = vrsqrt.f32 %v8531_v1  ;;  %vm8540_vm3 = vmor %vm8538_vm2, %vm8539_vm1  ;;  %vm8548_vm5 = vweird.f32 %v8531_v1 }
0x2fd8   :  { %v8534_v12 = vmul.f32 %v14637_v20, %v8533_v57 }
0x2fda   :  { %v8535_v58 = vmul.f32 0.5, %v8534_v12 }
0x2fdc   :  { %v8536_v61 = vsub.f32 1.5, %v8535_v58  ;;  %v14745_v58 = vld [vmem:[%s19541_s3 + $0x8] sm:$0xff] }
0x2fdd   :  { %v14639_v36 = vpop.eup %14638 }
0x2fde   :  { %v8543_v55 = vmul.f32 %v14639_v36, %v8531_v1  ;;  %v8537_v33 = vmul.f32 %v14637_v20, %v8536_v61  ;;  %vm8549_vm4 = vweird.f32 %v14639_v36 }
0x2fdf   :  { %vm8550_vm6 = vmor %vm8548_vm5, %vm8549_vm4 }
0x2fe0   :  { %v8544_v41 = vmul.f32 %v14639_v36, %v8543_v55  ;;  %v8541_v3 = vsel %vm8540_vm3, %v14637_v20, %v8537_v33  ;;  %v14744_v20 = vld [vmem:[%s19541_s3] sm:$0xff]  ;;  %v14746_v33 = vld [vmem:[%s19541_s3 + $0x10] sm:$0xff] }
0x2fe1   :  { %v8552_v63 = vmul.f32 %v8541_v3, %v18944_v39 }
0x2fe2   :  { %v8545_v53 = vmul.f32 0.5, %v8544_v41 }
0x2fe3   :  { %v8557_v48 = vmul.f32 %v14240_v4, %v8552_v63 }
0x2fe4   :  { %v8546_v16 = vsub.f32 1.5, %v8545_v53 }
0x2fe6   :  { %v8547_v40 = vmul.f32 %v14639_v36, %v8546_v16  ;;  %v14747_v16 = vld [vmem:[%s19541_s3 + $0x18] sm:$0xff] }
0x2fe8   :  { %v8551_v49 = vsel %vm8550_vm6, %v14639_v36, %v8547_v40 }
0x2fe9   :  { %v8553_v0 = vmul.f32 %v8551_v49, %v18949_v8 }
0x2feb   :  { %v8558_v50 = vmul.f32 %v14240_v4, %v8553_v0 }
0x2fed   :  { %v8559_v59 = vpack.c.bf16 %v8558_v50, %v8557_v48 }
0x2fef   :  { %8761 = vmatmul.bf16.vlgmr.msrb.gmra.mxu0 %v8559_v59  ;;  %8775 = vmatmul.bf16.vlgmr.msrb.gmra.mxu1 %v8559_v59 }
0x2ff0   :  { %8789 = vmatmul.bf16.vlgmr.msrb.gmra.mxu2 %v8559_v59  ;;  %8803 = vmatmul.bf16.vlgmr.msrb.gmra.mxu3 %v8559_v59 }
0x306c   :  { %v8762_v23 = vpop.f32.mrf.mxu0  ;;  %v8776_v38 = vpop.f32.mrf.mxu1 }
0x306d   :  { %v8809_v62 = vmul.f32 %v14742_v21, %v8762_v23 }
0x3073   :  { %v8790_v11 = vpop.f32.mrf.mxu2  ;;  %v8804_v47 = vpop.f32.mrf.mxu3 }
0x3074   :  { %v8817_v17 = vmul.f32 %v8790_v11, %v15036_v13  ;;  %v8764_v52 = vpop.f32.mrf.mxu0  ;;  %v8778_v10 = vpop.f32.mrf.mxu1  ;;  %v14743_v13 = vld [vmem:[%s19539_s2] sm:$0xff]  ;;  %v8815_v2 = vmul.f32 %v14742_v21, %v8790_v11 }
0x3075   :  { %v8810_v5 = vmul.f32 %v14740_v18, %v8764_v52  ;;  %v8812_v35 = vmul.f32 %v14741_v45, %v8778_v10  ;;  %v8811_v24 = vmul.f32 %v14743_v13, %v8776_v38 }
0x3076   :  { %8821 = vrot.lane.b32.xlu1 %v8817_v17, %s14749_s21 }
0x3077   :  { %v8814_v60 = vadd.f32 %v8812_v35, %v8810_v5  ;;  %v8813_v15 = vadd.f32 %v8811_v24, %v8809_v62 }
0x3079   :  { %v14221_v7 = vpack.i.bf16 %v8814_v60, %v8813_v15  ;;  %v8837_v26 = vpack.c.bf16 %v8814_v60, %v8813_v15 }
0x307b   :  { %v8792_v25 = vpop.f32.mrf.mxu2  ;;  %v8806_v51 = vpop.f32.mrf.mxu3 }
0x307c   :  { %v8818_v22 = vmul.f32 %v8792_v25, %v15048_v28  ;;  %v19167_v42 = vpack.c.bf16 %v8806_v51, %v8804_v47  ;;  %v8816_v29 = vmul.f32 %v14740_v18, %v8792_v25 }
0x307e   :  { %8928 = vmatpush.bf16.msra.mxu1 %v19167_v42  ;;  %8823 = vrot.lane.b32.xlu2 %v8818_v22, %s14749_s21 }
0x307f   :  { %14222 = vrot.lane.b32.xlu1 %v14221_v7, %s14750_s29 }
0x3087   :  { %9011 = vrot.lane.b32.xlu1 %v8837_v26, %s14749_s21 }
0x30d8   :  { %v8824_v34 = vpop.permute.xlu2 %8823 }
0x30d9   :  { %v8828_v27 = vadd.f32 %v8824_v34, %v8816_v29 }
0x30e8   :  { %v8822_v6 = vpop.permute.xlu1 %8821 }
0x30e9   :  { %v8827_v54 = vadd.f32 %v8822_v6, %v8815_v2 }
0x30eb   :  { %v8839_v37 = vpack.c.bf16 %v8828_v27, %v8827_v54 }
0x30ed   :  { %9016 = vrot.lane.b32.xlu2 %v8839_v37, %s14750_s29  ;;  %v8847_v28 = vsel %vm379_vm7, %v8839_v37, 0 }
0x30ee   :  { %8856 = vmatpush.bf16.xpose.msra.mxu0 %v8847_v28 }
0x30f1   :  { %v14223_v43 = vpop.permute.xlu1 %14222 }
0x30f2   :  { %v14225_v14 = vunpack.i.h.bf16 %v14223_v43  ;;  %v14224_v19 = vunpack.i.l.bf16 %v14223_v43 }
0x30f4   :  { %v8838_v44 = vpack.c.bf16 %v14225_v14, %v14224_v19 }
0x30f5   :  { %13156 = vmatmul.msk.bf16.vlgmr.msra.gmra.mxu0 %vm379_vm7, %v8837_v26 }
0x30f6   :  { %9013 = vrot.lane.b32.xlu2 %v8838_v44, %s14749_s21 }
0x30f9   :  { %v9012_v46 = vpop.permute.xlu1 %9011 }
0x3105   :  { %13157 = vmatmul.msk.bf16.gmra.mxu0 %vm379_vm7, %v8838_v44 }
0x3147   :  { %v9017_v31 = vpop.permute.xlu2 %9016 }
0x3148   :  { %v9025_v9 = vsel %vm379_vm7, %v9017_v31, 0 }
0x3149   :  { %9034 = vmatpush.bf16.xpose.msrb.mxu0 %v9025_v9 }
0x3150   :  { %13186 = vmatmul.msk.bf16.vlgmr.msrb.gmra.mxu0 %vm379_vm7, %v9012_v46  ;;  %v9014_v30 = vpop.permute.xlu2 %9013 }
0x3160   :  { %13187 = vmatmul.msk.bf16.gmra.mxu0 %vm379_vm7, %v9014_v30 }
0x3172   :  { %v8858_v56 = vpop.f32.mrf.mxu0 }
0x3173   :  { %v8859_v1 = vadd.f32 %v14744_v20, %v8858_v56 }
0x3175   :  { %v8868_v57 = vsel %vm408_vm8, %v8859_v1, -inf }
0x3176   :  { %8869 = vmax.xlane.f32.xlu0 %v8868_v57 }
0x317a   :  { %v8860_v12 = vpop.f32.mrf.mxu0 }
0x317b   :  { %v8861_v61 = vadd.f32 %v14745_v58, %v8860_v12 }
0x317d   :  { %v8871_v36 = vsel %vm408_vm8, %v8861_v61, -inf }
0x317e   :  { %8872 = vmax.xlane.f32.xlu1 %v8871_v36 }
0x3182   :  { %v8863_v55 = vpop.f32.mrf.mxu0 }
0x3183   :  { %v8864_v41 = vadd.f32 %v14746_v33, %v8863_v55 }
0x3185   :  { %v8874_v53 = vsel %vm408_vm8, %v8864_v41, -inf }
0x3186   :  { %8875 = vmax.xlane.f32.xlu2 %v8874_v53 }
0x318a   :  { %v8865_v3 = vpop.f32.mrf.mxu0 }
0x318b   :  { %v8866_v40 = vadd.f32 %v14747_v16, %v8865_v3 }
0x318d   :  { %v8877_v4 = vsel %vm408_vm8, %v8866_v40, -inf }
0x318e   :  { %8878 = vmax.xlane.f32.xlu0 %v8877_v4 }
0x31cd   :  { %v9036_v63 = vpop.f32.mrf.mxu0 }
0x31ce   :  { %v9037_v49 = vadd.f32 %v14744_v20, %v9036_v63 }
0x31d0   :  { %v9046_v0 = vsel %vm408_vm8, %v9037_v49, -inf }
0x31d1   :  { %9047 = vmax.xlane.f32.xlu0 %v9046_v0 }
0x31d5   :  { %v9038_v48 = vpop.f32.mrf.mxu0 }
0x31d6   :  { %v9039_v50 = vadd.f32 %v14745_v58, %v9038_v48 }
0x31d8   :  { %v9049_v59 = vsel %vm408_vm8, %v9039_v50, -inf }
0x31d9   :  { %9050 = vmax.xlane.f32.xlu0 %v9049_v59 }
0x31dd   :  { %v9041_v23 = vpop.f32.mrf.mxu0 }
0x31de   :  { %v9042_v38 = vadd.f32 %v14746_v33, %v9041_v23 }
0x31e0   :  { %v9052_v11 = vsel %vm408_vm8, %v9042_v38, -inf }
0x31e1   :  { %9053 = vmax.xlane.f32.xlu0 %v9052_v11 }
0x31e5   :  { %v9043_v47 = vpop.f32.mrf.mxu0 }
0x31e6   :  { %v9044_v17 = vadd.f32 %v14747_v16, %v9043_v47 }
0x31e8   :  { %v9055_v52 = vsel %vm408_vm8, %v9044_v17, -inf }
0x31e9   :  { %9056 = vmax.xlane.f32.xlu0 %v9055_v52  ;;  %v8870_v10 = vpop.xlane.xlu0 %8869 }
0x31ea   :  { %v8880_v18 = vsub.f32 %v8859_v1, %v8870_v10 }
0x31ec   :  { %v8884_v5 = vmul.f32 1.442695, %v8880_v18 }
0x31ee   :  { %14640 = vpow2.f32 %v8884_v5  ;;  %v14126_v5 = vld [vmem:[%s19542_s6 + $0x1c8] sm:$0xff] }
0x31ef   :  { %9001 = vmatpush.bf16.msra.mxu3 %v14126_v5 }
0x31f1   :  { %v8873_v45 = vpop.xlane.xlu1 %8872 }
0x31f2   :  { %v8881_v35 = vsub.f32 %v8861_v61, %v8873_v45 }
0x31f4   :  { %v14641_v21 = vpop.eup %14640  ;;  %v8886_v62 = vmul.f32 1.442695, %v8881_v35 }
0x31f5   :  { %v8892_v13 = vsel %vm408_vm8, %v14641_v21, 0.0 }
0x31f6   :  { %14642 = vpow2.f32 %v8886_v62  ;;  %8893 = vadd.xlane.f32.xlu2 %v8892_v13 }
0x31f9   :  { %v8876_v24 = vpop.xlane.xlu2 %8875 }
0x31fa   :  { %v8882_v60 = vsub.f32 %v8864_v41, %v8876_v24 }
0x31fc   :  { %v14643_v15 = vpop.eup %14642  ;;  %v8888_v25 = vmul.f32 1.442695, %v8882_v60 }
0x31fd   :  { %v8895_v51 = vsel %vm408_vm8, %v14643_v15, 0.0 }
0x31fe   :  { %14644 = vpow2.f32 %v8888_v25  ;;  %8896 = vadd.xlane.f32.xlu1 %v8895_v51  ;;  %v14127_v25 = vld [vmem:[%s19542_s6 + $0x1d0] sm:$0xff] }
0x3201   :  { %v8879_v22 = vpop.xlane.xlu0 %8878 }
0x3202   :  { %v8883_v7 = vsub.f32 %v8866_v40, %v8879_v22 }
0x3204   :  { %v14645_v26 = vpop.eup %14644  ;;  %v8890_v34 = vmul.f32 1.442695, %v8883_v7 }
0x3205   :  { %v8898_v2 = vsel %vm408_vm8, %v14645_v26, 0.0 }
0x3206   :  { %14646 = vpow2.f32 %v8890_v34  ;;  %8899 = vadd.xlane.f32.xlu0 %v8898_v2 }
0x320c   :  { %v14647_v29 = vpop.eup %14646 }
0x320d   :  { %v8901_v6 = vsel %vm408_vm8, %v14647_v29, 0.0 }
0x320e   :  { %8902 = vadd.xlane.f32.xlu2 %v8901_v6  ;;  %v14129_v6 = vld [vmem:[%s19542_s6 + $0x1e0] sm:$0xff] }
0x3226   :  { %9093 = vrot.lane.b32.xlu2 %v19167_v42, %s14750_s29 }
0x3244   :  { %v9048_v27 = vpop.xlane.xlu0 %9047 }
0x3245   :  { %v9058_v54 = vsub.f32 %v9037_v49, %v9048_v27  ;;  %v14132_v27 = vld [vmem:[%s19542_s6 + $0x1f8] sm:$0xff] }
0x3247   :  { %v9062_v37 = vmul.f32 1.442695, %v9058_v54  ;;  %v14131_v54 = vld [vmem:[%s19542_s6 + $0x1f0] sm:$0xff] }
0x3249   :  { %14648 = vpow2.f32 %v9062_v37 }
0x324c   :  { %v9051_v28 = vpop.xlane.xlu0 %9050 }
0x324d   :  { %v9059_v43 = vsub.f32 %v9039_v50, %v9051_v28 }
0x324f   :  { %v14649_v14 = vpop.eup %14648  ;;  %v9064_v19 = vmul.f32 1.442695, %v9059_v43 }
0x3250   :  { %v9070_v44 = vsel %vm408_vm8, %v14649_v14, 0.0 }
0x3251   :  { %14650 = vpow2.f32 %v9064_v19  ;;  %9071 = vadd.xlane.f32.xlu1 %v9070_v44 }
0x3254   :  { %v9054_v31 = vpop.xlane.xlu0 %9053 }
0x3255   :  { %v9060_v9 = vsub.f32 %v9042_v38, %v9054_v31 }
0x3257   :  { %v14651_v46 = vpop.eup %14650  ;;  %v9066_v30 = vmul.f32 1.442695, %v9060_v9 }
0x3258   :  { %v9073_v56 = vsel %vm408_vm8, %v14651_v46, 0.0 }
0x3259   :  { %14652 = vpow2.f32 %v9066_v30  ;;  %9074 = vadd.xlane.f32.xlu0 %v9073_v56 }
0x325c   :  { %v9057_v42 = vpop.xlane.xlu0 %9056 }
0x325d   :  { %v9061_v20 = vsub.f32 %v9044_v17, %v9057_v42 }
0x325f   :  { %v14653_v1 = vpop.eup %14652  ;;  %v9068_v57 = vmul.f32 1.442695, %v9061_v20 }
0x3260   :  { %v9076_v12 = vsel %vm408_vm8, %v14653_v1, 0.0 }
0x3261   :  { %14654 = vpow2.f32 %v9068_v57  ;;  %9077 = vadd.xlane.f32.xlu1 %v9076_v12 }
0x3267   :  { %v14655_v58 = vpop.eup %14654 }
0x3268   :  { %v9079_v61 = vsel %vm408_vm8, %v14655_v58, 0.0 }
0x3269   :  { %9080 = vadd.xlane.f32.xlu0 %v9079_v61  ;;  %v8894_v36 = vpop.xlane.xlu2 %8893 }
0x326a   :  { %14656 = vrcp.f32 %v8894_v36 }
0x3270   :  { %v14657_v33 = vpop.eup %14656 }
0x3271   :  { %v8897_v55 = vpop.xlane.xlu1 %8896  ;;  %v8908_v53 = vmul.f32 %v14657_v33, %v14641_v21  ;;  %v14125_v21 = vld [vmem:[%s19542_s6 + $0x1c0] sm:$0xff] }
0x3272   :  { %14658 = vrcp.f32 %v8897_v55  ;;  %9002 = vmatpush.bf16.msra.mxu3 %v14125_v21  ;;  %v13357_v21 = vld [vmem:[%s19544_s8 + $0x7d8] sm:$0xf0] }
0x3276   :  { %9183 = vmatpush.bf16.msrb.mxu3 %v14132_v27  ;;  %v14151_v27 = vld [vmem:[%s19544_s8 + $0x78c] sm:$0xf0] }
0x3278   :  { %v14659_v41 = vpop.eup %14658 }
0x3279   :  { %v8909_v3 = vmul.f32 %v14659_v41, %v14643_v15  ;;  %v8900_v40 = vpop.xlane.xlu0 %8899  ;;  %v14128_v15 = vld [vmem:[%s19542_s6 + $0x1d8] sm:$0xff] }
0x327a   :  { %14660 = vrcp.f32 %v8900_v40  ;;  %8972 = vmatpush.bf16.msra.mxu2 %v14128_v15  ;;  %9184 = vmatpush.bf16.msrb.mxu3 %v14131_v54  ;;  %v14161_v40 = vld [vmem:[%s19544_s8 + $0x7e4] sm:$0xf] }
0x327b   :  { %v8912_v16 = vpack.c.bf16 %v8909_v3, %v8908_v53  ;;  %v14149_v54 = vld [vmem:[%s19544_s8 + $0x784] sm:$0xf] }
0x327d   :  { %13158 = vmatmul.msk.bf16.vlgmr.msra.gmra.mxu1 %vm408_vm8, %v8912_v16  ;;  %v14163_v16 = vld [vmem:[%s19544_s8 + $0x7ec] sm:$0xf0] }
0x327e   :  { %8973 = vmatpush.bf16.msra.mxu2 %v14127_v25  ;;  %v13333_v25 = vld [vmem:[%s19544_s8 + $0x7b0] sm:$0xf0] }
0x3280   :  { %v14661_v63 = vpop.eup %14660 }
0x3281   :  { %v8903_v4 = vpop.xlane.xlu2 %8902  ;;  %v8910_v0 = vmul.f32 %v14661_v63, %v14645_v26  ;;  %v13371_v63 = vld [vmem:[%s19544_s8 + $0x7e8] sm:$0xf] }
0x3282   :  { %14662 = vrcp.f32 %v8903_v4 }
0x3288   :  { %v14663_v49 = vpop.eup %14662 }
0x3289   :  { %v8911_v48 = vmul.f32 %v14663_v49, %v14647_v29  ;;  %v9094_v50 = vpop.permute.xlu2 %9093  ;;  %v14130_v29 = vld [vmem:[%s19542_s6 + $0x1e8] sm:$0xff]  ;;  %v14164_v49 = vld [vmem:[%s19544_s8 + $0x7f4] sm:$0xf0] }
0x328a   :  { %9109 = vmatpush.bf16.msrb.mxu1 %v9094_v50  ;;  %9147 = vmatpush.bf16.msrb.mxu2 %v14130_v29  ;;  %v14162_v50 = vld [vmem:[%s19544_s8 + $0x7ec] sm:$0xf] }
0x328b   :  { %v8913_v59 = vpack.c.bf16 %v8911_v48, %v8910_v0  ;;  %v13372_v48 = vor.u32 %v14164_v49, %v13371_v63  ;;  %v14144_v63 = vld [vmem:[%s19544_s8 + $0x754] sm:$0xf0] }
0x328d   :  { %13159 = vmatmul.msk.bf16.gmra.mxu1 %vm408_vm8, %v8913_v59  ;;  %v13373_v59 = vld [vmem:[%s19544_s8 + $0x7f8] sm:$0xf0] }
0x328e   :  { %9148 = vmatpush.bf16.msrb.mxu2 %v14129_v6  ;;  %v13315_v6 = vld [vmem:[%s19544_s8 + $0x780] sm:$0xf] }
0x32c4   :  { %v9072_v23 = vpop.xlane.xlu1 %9071 }
0x32c5   :  { %14664 = vrcp.f32 %v9072_v23  ;;  %v13376_v23 = vor.u32 %v14162_v50, %v13373_v59  ;;  %v13293_v50 = vld [vmem:[%s19544_s8 + $0x758] sm:$0xf0] }
0x32cb   :  { %v14665_v11 = vpop.eup %14664 }
0x32cc   :  { %v9075_v38 = vpop.xlane.xlu0 %9074  ;;  %v9086_v17 = vmul.f32 %v14665_v11, %v14649_v14  ;;  %v14159_v11 = vld [vmem:[%s19544_s8 + $0x7cc] sm:$0xf0] }
0x32cd   :  { %14666 = vrcp.f32 %v9075_v38  ;;  %v13347_v38 = vld [vmem:[%s19544_s8 + $0x7c0] sm:$0xf] }
0x32d3   :  { %v14667_v47 = vpop.eup %14666 }
0x32d4   :  { %v9087_v52 = vmul.f32 %v14667_v47, %v14651_v46  ;;  %v9078_v18 = vpop.xlane.xlu1 %9077  ;;  %v14157_v47 = vld [vmem:[%s19544_s8 + $0x7c4] sm:$0xf] }
0x32d5   :  { %14668 = vrcp.f32 %v9078_v18  ;;  %v14160_v18 = vld [vmem:[%s19544_s8 + $0x7d4] sm:$0xf0] }
0x32d6   :  { %v9090_v10 = vpack.c.bf16 %v9087_v52, %v9086_v17  ;;  %v13348_v17 = vor.u32 %v14159_v11, %v13347_v38  ;;  %v13349_v52 = vld [vmem:[%s19544_s8 + $0x7d0] sm:$0xf0]  ;;  %v14139_v38 = vld [vmem:[%s19544_s8 + $0x72c] sm:$0xf0]  ;;  %v14137_v11 = vld [vmem:[%s19544_s8 + $0x724] sm:$0xf] }
0x32d7   :  { %v13352_v5 = vor.u32 %v14157_v47, %v13349_v52  ;;  %v13275_v52 = vld [vmem:[%s19544_s8 + $0x728] sm:$0xf] }
0x32d8   :  { %13188 = vmatmul.msk.bf16.vlgmr.msrb.gmra.mxu1 %vm408_vm8, %v9090_v10  ;;  %v13355_v10 = vld [vmem:[%s19544_s8 + $0x7c8] sm:$0xf] }
0x32db   :  { %v14669_v35 = vpop.eup %14668 }
0x32dc   :  { %v9081_v45 = vpop.xlane.xlu0 %9080  ;;  %v9088_v13 = vmul.f32 %v14669_v35, %v14653_v1  ;;  %v14158_v35 = vld [vmem:[%s19544_s8 + $0x7cc] sm:$0xf] }
0x32dd   :  { %14670 = vrcp.f32 %v9081_v45  ;;  %v13356_v45 = vor.u32 %v14160_v18, %v13355_v10  ;;  %v14140_v10 = vld [vmem:[%s19544_s8 + $0x734] sm:$0xf0] }
0x32e3   :  { %v14671_v62 = vpop.eup %14670 }
0x32e4   :  { %v9089_v24 = vmul.f32 %v14671_v62, %v14655_v58  ;;  %v13360_v62 = vor.u32 %v14158_v35, %v13357_v21  ;;  %v13277_v35 = vld [vmem:[%s19544_s8 + $0x738] sm:$0xf0] }
0x32e6   :  { %v9091_v60 = vpack.c.bf16 %v9089_v24, %v9088_v13  ;;  %v13331_v13 = vld [vmem:[%s19544_s8 + $0x7a0] sm:$0xf]  ;;  %v14155_v24 = vld [vmem:[%s19544_s8 + $0x7ac] sm:$0xf0] }
0x32e7   :  { %v13332_v15 = vor.u32 %v14155_v24, %v13331_v13  ;;  %v13251_v13 = vld [vmem:[%s19544_s8 + $0x700] sm:$0xf]  ;;  %v14135_v24 = vld [vmem:[%s19544_s8 + $0x70c] sm:$0xf0] }
0x32e8   :  { %13189 = vmatmul.msk.bf16.gmra.mxu1 %vm408_vm8, %v9091_v60  ;;  %v14153_v60 = vld [vmem:[%s19544_s8 + $0x7a4] sm:$0xf] }
0x32fa   :  { %v8930_v51 = vpop.f32.mrf.mxu1 }
0x3302   :  { %v8932_v22 = vpop.f32.mrf.mxu1 }
0x3303   :  { %v8940_v7 = vpack.c.bf16 %v8932_v22, %v8930_v51  ;;  %v13339_v51 = vld [vmem:[%s19544_s8 + $0x7a8] sm:$0xf]  ;;  %v14156_v22 = vld [vmem:[%s19544_s8 + $0x7b4] sm:$0xf0] }
0x3305   :  { %13185 = vmatmul.msk.bf16.vlgmr.msra.gmra.mxu3 %vm379_vm7, %v8940_v7  ;;  %v13336_v7 = vor.u32 %v14153_v60, %v13333_v25  ;;  %v14133_v60 = vld [vmem:[%s19544_s8 + $0x704] sm:$0xf]  ;;  %v13252_v25 = vor.u32 %v14135_v24, %v13251_v13 }
0x3306   :  { %9470 = vmatpush.bf16.msra.mxu3 %v13376_v23  ;;  %v13267_v23 = vld [vmem:[%s19544_s8 + $0x720] sm:$0xf] }
0x3307   :  { %v13268_v47 = vor.u32 %v14139_v38, %v13267_v23  ;;  %v14165_v13 = vld [vmem:[%s19545_s9 + $0x380] sm:$0xff] }
0x3308   :  { %v14173_v24 = vld [vmem:[%s19545_s9 + $0x3c0] sm:$0xff] }
0x330a   :  { %v8935_v26 = vpop.f32.mrf.mxu1  ;;  %9471 = vmatpush.bf16.msra.mxu3 %v13360_v62 }
0x3312   :  { %v8937_v34 = vpop.f32.mrf.mxu1 }
0x3313   :  { %v8946_v2 = vpack.c.bf16 %v8937_v34, %v8935_v26  ;;  %v13340_v26 = vor.u32 %v14156_v22, %v13339_v51  ;;  %v14154_v34 = vld [vmem:[%s19544_s8 + $0x7ac] sm:$0xf]  ;;  %v13253_v51 = vld [vmem:[%s19544_s8 + $0x710] sm:$0xf0]  ;;  %v13259_v22 = vld [vmem:[%s19544_s8 + $0x708] sm:$0xf] }
0x3315   :  { %13176 = vmatmul.msk.bf16.vlgmr.msra.gmra.mxu2 %vm379_vm7, %v8946_v2  ;;  %v13341_v2 = vld [vmem:[%s19544_s8 + $0x7b8] sm:$0xf0] }
0x3316   :  { %9456 = vmatpush.bf16.msra.mxu2 %v13372_v48  ;;  %v13344_v29 = vor.u32 %v14154_v34, %v13341_v2  ;;  %v14142_v48 = vld [vmem:[%s19544_s8 + $0x74c] sm:$0xf] }
0x3317   :  { %v13296_v59 = vor.u32 %v14142_v48, %v13293_v50  ;;  %v14134_v2 = vld [vmem:[%s19544_s8 + $0x70c] sm:$0xf]  ;;  %v14176_v48 = vld [vmem:[%s19545_s9 + $0x3d8] sm:$0xff] }
0x3318   :  { %9472 = vmatpush.bf16.msra.mxu3 %v13344_v29  ;;  %v13261_v29 = vld [vmem:[%s19544_s8 + $0x718] sm:$0xf0] }
0x331a   :  { %9457 = vmatpush.bf16.msra.mxu2 %v13356_v45  ;;  %v14138_v45 = vld [vmem:[%s19544_s8 + $0x72c] sm:$0xf] }
0x331b   :  { %v13280_v21 = vor.u32 %v14138_v45, %v13277_v35 }
0x331e   :  { %9458 = vmatpush.bf16.msra.mxu2 %v13340_v26  ;;  %v13256_v26 = vor.u32 %v14133_v60, %v13253_v51 }
0x3355   :  { %v9111_v37 = vpop.f32.mrf.mxu1 }
0x335d   :  { %v9113_v28 = vpop.f32.mrf.mxu1 }
0x335e   :  { %v9121_v43 = vpack.c.bf16 %v9113_v28, %v9111_v37  ;;  %v13316_v37 = vor.u32 %v14151_v27, %v13315_v6  ;;  %v13317_v28 = vld [vmem:[%s19544_s8 + $0x790] sm:$0xf0]  ;;  %v13264_v27 = vor.u32 %v14134_v2, %v13261_v29 }
0x3360   :  { %13202 = vmatmul.msk.bf16.vlgmr.msrb.gmra.mxu2 %vm379_vm7, %v9121_v43  ;;  %v13323_v43 = vld [vmem:[%s19544_s8 + $0x788] sm:$0xf] }
0x3365   :  { %v9116_v14 = vpop.f32.mrf.mxu1 }
0x336d   :  { %v9118_v19 = vpop.f32.mrf.mxu1 }
0x336e   :  { %v9157_v44 = vpack.c.bf16 %v9118_v19, %v9116_v14  ;;  %v14152_v14 = vld [vmem:[%s19544_s8 + $0x794] sm:$0xf0]  ;;  %v13320_v19 = vor.u32 %v14149_v54, %v13317_v28 }
0x3370   :  { %13215 = vmatmul.msk.bf16.vlgmr.msrb.gmra.mxu3 %vm379_vm7, %v9157_v44  ;;  %v13324_v44 = vor.u32 %v14152_v14, %v13323_v43 }
0x3372   :  { %9459 = vmatpush.bf16.msra.mxu2 %v13324_v44 }
0x3388   :  { %v9004_v9 = vpop.f32.mrf.mxu3 }
0x3390   :  { %v9006_v30 = vpop.f32.mrf.mxu3 }
0x3398   :  { %v8975_v31 = vpop.f32.mrf.mxu2 }
0x3399   :  { %v9005_v42 = vadd.f32 %v9004_v9, %v8975_v31  ;;  %v14150_v31 = vld [vmem:[%s19544_s8 + $0x78c] sm:$0xf]  ;;  %v13325_v9 = vld [vmem:[%s19544_s8 + $0x798] sm:$0xf0] }
0x33a0   :  { %v8977_v46 = vpop.f32.mrf.mxu2 }
0x33a1   :  { %v9007_v61 = vadd.f32 %v9006_v30, %v8977_v46  ;;  %v13328_v46 = vor.u32 %v14150_v31, %v13325_v9  ;;  %v13299_v30 = vld [vmem:[%s19544_s8 + $0x760] sm:$0xf] }
0x33a3   :  { %9473 = vmatpush.bf16.msra.mxu3 %v13328_v46 }
0x33e3   :  { %v9150_v56 = vpop.f32.mrf.mxu2 }
0x33e4   :  { %v9155_v20 = vadd.f32 %v9150_v56, %v9005_v42  ;;  %v14147_v56 = vld [vmem:[%s19544_s8 + $0x76c] sm:$0xf0]  ;;  %v14145_v42 = vld [vmem:[%s19544_s8 + $0x764] sm:$0xf] }
0x33eb   :  { %v9152_v58 = vpop.f32.mrf.mxu2 }
0x33ec   :  { %v9156_v55 = vadd.f32 %v9152_v58, %v9007_v61  ;;  %v14148_v58 = vld [vmem:[%s19544_s8 + $0x774] sm:$0xf0] }
0x33f3   :  { %v9186_v1 = vpop.f32.mrf.mxu3 }
0x33f4   :  { %v9191_v57 = vadd.f32 %v9186_v1, %v9155_v20  ;;  %v13300_v20 = vor.u32 %v14147_v56, %v13299_v30  ;;  %v13301_v1 = vld [vmem:[%s19544_s8 + $0x770] sm:$0xf0] }
0x33f5   :  { %v13304_v61 = vor.u32 %v14145_v42, %v13301_v1 }
0x33f6   :  { %v19244_v12 = vadd.f32 %v9191_v57, %v18944_v39  ;;  %v13363_v39 = vld [vmem:[%s19544_s8 + $0x7e0] sm:$0xf]  ;;  %v13307_v57 = vld [vmem:[%s19544_s8 + $0x768] sm:$0xf] }
0x33f7   :  { %v13364_v4 = vor.u32 %v14163_v16, %v13363_v39  ;;  %v14143_v39 = vld [vmem:[%s19544_s8 + $0x74c] sm:$0xf0]  ;;  %v14141_v16 = vld [vmem:[%s19544_s8 + $0x744] sm:$0xf] }
0x33f8   :  { %v9197_v36 = vmul.f32 %v19244_v12, %v19244_v12 }
0x33f9   :  { %9428 = vmatpush.bf16.msra.mxu0 %v13364_v4  ;;  %v13285_v4 = vld [vmem:[%s19544_s8 + $0x750] sm:$0xf0] }
0x33fa   :  { %9199 = vadd.xlane.f32.xlu1 %v9197_v36  ;;  %v13308_v36 = vor.u32 %v14148_v58, %v13307_v57  ;;  %v13288_v49 = vor.u32 %v14141_v16, %v13285_v4  ;;  %v14171_v16 = vld [vmem:[%s19545_s9 + $0x3b0] sm:$0xff]  ;;  %v14170_v4 = vld [vmem:[%s19545_s9 + $0x3a8] sm:$0xff] }
0x33fb   :  { %v9188_v33 = vpop.f32.mrf.mxu3 }
0x33fc   :  { %v9192_v41 = vadd.f32 %v9188_v33, %v9156_v55  ;;  %v14146_v55 = vld [vmem:[%s19544_s8 + $0x76c] sm:$0xf]  ;;  %v13309_v33 = vld [vmem:[%s19544_s8 + $0x778] sm:$0xf0]  ;;  %9460 = vmatpush.bf16.msra.mxu2 %v13308_v36 }
0x33fd   :  { %9429 = vmatpush.bf16.msra.mxu0 %v13348_v17  ;;  %v13269_v17 = vld [vmem:[%s19544_s8 + $0x730] sm:$0xf0] }
0x33fe   :  { %v19249_v53 = vadd.f32 %v9192_v41, %v18949_v8  ;;  %v13365_v8 = vld [vmem:[%s19544_s8 + $0x7f0] sm:$0xf0]  ;;  %v13312_v41 = vor.u32 %v14146_v55, %v13309_v33  ;;  %v13272_v18 = vor.u32 %v14137_v11, %v13269_v17  ;;  %v14166_v17 = vld [vmem:[%s19545_s9 + $0x388] sm:$0xff] }
0x33ff   :  { %v13368_v0 = vor.u32 %v14161_v40, %v13365_v8  ;;  %v13291_v8 = vld [vmem:[%s19544_s8 + $0x748] sm:$0xf]  ;;  %v14167_v11 = vld [vmem:[%s19545_s9 + $0x390] sm:$0xff] }
0x3400   :  { %v9198_v3 = vmul.f32 %v19249_v53, %v19249_v53  ;;  %9474 = vmatpush.bf16.msra.mxu3 %v13312_v41 }
0x3401   :  { %9442 = vmatpush.bf16.msra.mxu1 %v13368_v0  ;;  %9430 = vmatpush.bf16.msra.mxu0 %v13332_v15  ;;  %v13292_v0 = vor.u32 %v14144_v63, %v13291_v8  ;;  %v14178_v8 = vld [vmem:[%s19545_s9 + $0x3e8] sm:$0xff]  ;;  %v14169_v63 = vld [vmem:[%s19545_s9 + $0x3a0] sm:$0xff] }
0x3402   :  { %9201 = vadd.xlane.f32.xlu0 %v9198_v3  ;;  %v13283_v3 = vld [vmem:[%s19544_s8 + $0x740] sm:$0xf] }
0x3403   :  { %v13284_v40 = vor.u32 %v14143_v39, %v13283_v3  ;;  %9461 = vmatpush.bf16.msra.mxu2 %v13292_v0  ;;  %v14172_v3 = vld [vmem:[%s19545_s9 + $0x3b8] sm:$0xff] }
0x3404   :  { %9475 = vmatpush.bf16.msra.mxu3 %v13296_v59  ;;  %v14180_v39 = vld [vmem:[%s19545_s9 + $0x3f8] sm:$0xff] }
0x3405   :  { %9443 = vmatpush.bf16.msra.mxu1 %v13352_v5  ;;  %9431 = vmatpush.bf16.msra.mxu0 %v13316_v37  ;;  %v13276_v5 = vor.u32 %v14140_v10, %v13275_v52  ;;  %v14168_v0 = vld [vmem:[%s19545_s9 + $0x398] sm:$0xff]  ;;  %v14174_v52 = vld [vmem:[%s19545_s9 + $0x3c8] sm:$0xff] }
0x3407   :  { %9462 = vmatpush.bf16.msra.mxu2 %v13276_v5 }
0x3408   :  { %9476 = vmatpush.bf16.msra.mxu3 %v13280_v21 }
0x3409   :  { %9444 = vmatpush.bf16.msra.mxu1 %v13336_v7  ;;  %9432 = vmatpush.bf16.msra.mxu0 %v13300_v20  ;;  %v14136_v7 = vld [vmem:[%s19544_s8 + $0x714] sm:$0xf0] }
0x340a   :  { %v13260_v34 = vor.u32 %v14136_v7, %v13259_v22 }
0x340c   :  { %9463 = vmatpush.bf16.msra.mxu2 %v13260_v34  ;;  %9477 = vmatpush.bf16.msra.mxu3 %v13264_v27 }
0x340d   :  { %9445 = vmatpush.bf16.msra.mxu1 %v13320_v19  ;;  %9433 = vmatpush.bf16.msra.mxu0 %v13284_v40  ;;  %v14179_v40 = vld [vmem:[%s19545_s9 + $0x3f0] sm:$0xff] }
0x3411   :  { %9446 = vmatpush.bf16.msra.mxu1 %v13304_v61  ;;  %9434 = vmatpush.bf16.msra.mxu0 %v13268_v47  ;;  %v14175_v47 = vld [vmem:[%s19545_s9 + $0x3d0] sm:$0xff] }
0x3415   :  { %9447 = vmatpush.bf16.msra.mxu1 %v13288_v49  ;;  %9435 = vmatpush.bf16.msra.mxu0 %v13252_v25  ;;  %v14177_v49 = vld [vmem:[%s19545_s9 + $0x3e0] sm:$0xff] }
0x3419   :  { %9448 = vmatpush.bf16.msra.mxu1 %v13272_v18  ;;  %9699 = vmatpush.bf16.msrb.mxu0 %v14172_v3 }
0x341d   :  { %9449 = vmatpush.bf16.msra.mxu1 %v13256_v26  ;;  %9700 = vmatpush.bf16.msrb.mxu0 %v14171_v16 }
0x3421   :  { %9713 = vmatpush.bf16.msrb.mxu1 %v14180_v39  ;;  %9701 = vmatpush.bf16.msrb.mxu0 %v14170_v4 }
0x3425   :  { %9714 = vmatpush.bf16.msrb.mxu1 %v14179_v40  ;;  %9702 = vmatpush.bf16.msrb.mxu0 %v14169_v63 }
0x3429   :  { %9715 = vmatpush.bf16.msrb.mxu1 %v14178_v8  ;;  %9703 = vmatpush.bf16.msrb.mxu0 %v14168_v0 }
0x342d   :  { %9716 = vmatpush.bf16.msrb.mxu1 %v14177_v49  ;;  %9704 = vmatpush.bf16.msrb.mxu0 %v14167_v11 }
0x3431   :  { %9717 = vmatpush.bf16.msrb.mxu1 %v14176_v48  ;;  %9705 = vmatpush.bf16.msrb.mxu0 %v14166_v17 }
0x3435   :  { %9718 = vmatpush.bf16.msrb.mxu1 %v14175_v47  ;;  %9706 = vmatpush.bf16.msrb.mxu0 %v14165_v13 }
0x3439   :  { %9719 = vmatpush.bf16.msrb.mxu1 %v14174_v52 }
0x343d   :  { %9720 = vmatpush.bf16.msrb.mxu1 %v14173_v24 }
0x346d   :  { %v9200_v62 = vpop.xlane.xlu1 %9199 }
0x346e   :  { %v9203_v15 = vmul.f32 %v9200_v62, %v14995_v32 }
0x3470   :  { %v9205_v6 = vadd.f32 1e-05, %v9203_v15 }
0x3472   :  { %14672 = vrsqrt.f32 %v9205_v6  ;;  %vm9213_vm8 = vweird.f32 %v9205_v6 }
0x3475   :  { %v9202_v54 = vpop.xlane.xlu0 %9201 }
0x3476   :  { %v9204_v37 = vmul.f32 %v9202_v54, %v14995_v32  ;;  %v14241_v32 = vld [vmem:[%s19543_s7 + $0x7] ss:$0 sm:$0xff] }
0x3478   :  { %v14673_v28 = vpop.eup %14672  ;;  %v9206_v43 = vadd.f32 1e-05, %v9204_v37 }
0x3479   :  { %v9208_v14 = vmul.f32 %v14673_v28, %v9205_v6  ;;  %vm9214_vm7 = vweird.f32 %v14673_v28 }
0x347a   :  { %14674 = vrsqrt.f32 %v9206_v43  ;;  %vm9215_vm9 = vmor %vm9213_vm8, %vm9214_vm7  ;;  %vm9223_vm11 = vweird.f32 %v9206_v43 }
0x347b   :  { %v9209_v19 = vmul.f32 %v14673_v28, %v9208_v14 }
0x347d   :  { %v9210_v44 = vmul.f32 0.5, %v9209_v19 }
0x347f   :  { %v9211_v31 = vsub.f32 1.5, %v9210_v44 }
0x3480   :  { %v14675_v9 = vpop.eup %14674 }
0x3481   :  { %v9218_v46 = vmul.f32 %v14675_v9, %v9206_v43  ;;  %v9212_v30 = vmul.f32 %v14673_v28, %v9211_v31  ;;  %vm9224_vm10 = vweird.f32 %v14675_v9 }
0x3482   :  { %vm9225_vm12 = vmor %vm9223_vm11, %vm9224_vm10 }
0x3483   :  { %v9219_v56 = vmul.f32 %v14675_v9, %v9218_v46  ;;  %v9216_v20 = vsel %vm9215_vm9, %v14673_v28, %v9212_v30 }
0x3484   :  { %v9227_v58 = vmul.f32 %v9216_v20, %v19244_v12 }
0x3485   :  { %v9220_v42 = vmul.f32 0.5, %v9219_v56 }
0x3486   :  { %v9232_v55 = vmul.f32 %v14241_v32, %v9227_v58 }
0x3487   :  { %v9221_v1 = vsub.f32 1.5, %v9220_v42 }
0x3489   :  { %v9222_v57 = vmul.f32 %v14675_v9, %v9221_v1 }
0x348b   :  { %v9226_v61 = vsel %vm9225_vm12, %v14675_v9, %v9222_v57 }
0x348c   :  { %v9228_v36 = vmul.f32 %v9226_v61, %v19249_v53 }
0x348e   :  { %v9233_v33 = vmul.f32 %v14241_v32, %v9228_v36 }
0x3490   :  { %v9234_v41 = vpack.c.bf16 %v9233_v33, %v9232_v55 }
0x3492   :  { %9436 = vmatmul.bf16.vlgmr.msra.gmra.mxu0 %v9234_v41  ;;  %9450 = vmatmul.bf16.vlgmr.msra.gmra.mxu1 %v9234_v41 }
0x3493   :  { %9464 = vmatmul.bf16.vlgmr.msra.gmra.mxu2 %v9234_v41  ;;  %9478 = vmatmul.bf16.vlgmr.msra.gmra.mxu3 %v9234_v41 }
0x350f   :  { %v19482_v50 = vpop.f32.mrf.mxu0  ;;  %v19484_v59 = vpop.f32.mrf.mxu1 }
0x3510   :  { %v13377_v23 = vmul.f32 -1.442695, %v19482_v50  ;;  %v13378_v38 = vmul.f32 -1.442695, %v19484_v59 }
0x3512   :  { %14676 = vpow2.f32 %v13377_v23 }
0x3513   :  { %14678 = vpow2.f32 %v13378_v38 }
0x3516   :  { %v9465_v46 = vpop.f32.mrf.mxu2  ;;  %v9479_v61 = vpop.f32.mrf.mxu3 }
0x3517   :  { %v19500_v10 = vpop.f32.mrf.mxu0  ;;  %v19502_v18 = vpop.f32.mrf.mxu1 }
0x3518   :  { %v14677_v5 = vpop.eup %14676  ;;  %v13379_v45 = vmul.f32 -1.442695, %v19500_v10  ;;  %v13380_v62 = vmul.f32 -1.442695, %v19502_v18 }
0x3519   :  { %v14679_v35 = vpop.eup %14678  ;;  %v9496_v21 = vadd.f32 1.0, %v14677_v5 }
0x351a   :  { %v9497_v60 = vadd.f32 1.0, %v14679_v35  ;;  %14680 = vpow2.f32 %v13379_v45 }
0x351b   :  { %14682 = vrcp.f32 %v9496_v21  ;;  %v9511_v43 = vand.u32 2147483648, %v9496_v21  ;;  %vm9505_vm14 = vweird.f32 %v9496_v21  ;;  %v9509_v14 = vand.u32 2147483647, %v9496_v21 }
0x351c   :  { %14684 = vrcp.f32 %v9497_v60  ;;  %v9524_v9 = vand.u32 2147483647, %v9497_v60  ;;  %v9526_v42 = vand.u32 2147483648, %v9497_v60  ;;  %vm9520_vm1 = vweird.f32 %v9497_v60 }
0x351d   :  { %14686 = vpow2.f32 %v13380_v62  ;;  %v9512_v1 = vor.u32 1.1754944e-38, %v9511_v43  ;;  %vm9510_vm2 = vcmp.eq.f32.partialorder %v9509_v14, 8.507059e+37 }
0x351e   :  { %vm9525_vm5 = vcmp.eq.f32.partialorder %v9524_v9, 8.507059e+37  ;;  %v9527_v39 = vor.u32 1.1754944e-38, %v9526_v42  ;;  %v9467_v5 = vpop.f32.mrf.mxu2  ;;  %v9481_v13 = vpop.f32.mrf.mxu3 }
0x3520   :  { %v14681_v15 = vpop.eup %14680 }
0x3521   :  { %v14683_v25 = vpop.eup %14682  ;;  %v9498_v51 = vadd.f32 1.0, %v14681_v15 }
0x3522   :  { %v14685_v22 = vpop.eup %14684  ;;  %v9501_v7 = vmul.f32 %v14683_v25, %v9496_v21  ;;  %vm9506_vm13 = vweird.f32 %v14683_v25 }
0x3523   :  { %v14687_v26 = vpop.eup %14686  ;;  %v9516_v34 = vmul.f32 %v14685_v22, %v9497_v60  ;;  %14688 = vrcp.f32 %v9498_v51  ;;  %vm19512_vm15 = vmor %vm9505_vm14, %vm9506_vm13  ;;  %vm9521_vm0 = vweird.f32 %v14685_v22  ;;  %v9541_v57 = vand.u32 2147483648, %v9498_v51 }
0x3524   :  { %v9502_v2 = vsub.f32 1.0, %v9501_v7  ;;  %v9499_v29 = vadd.f32 1.0, %v14687_v26  ;;  %vm19518_vm3 = vmor %vm9520_vm1, %vm9521_vm0  ;;  %v9539_v55 = vand.u32 2147483647, %v9498_v51  ;;  %vm9535_vm6 = vweird.f32 %v9498_v51 }
0x3525   :  { %v9517_v6 = vsub.f32 1.0, %v9516_v34  ;;  %v9542_v4 = vor.u32 1.1754944e-38, %v9541_v57 }
0x3526   :  { %v9503_v27 = vmul.f32 %v14683_v25, %v9502_v2  ;;  %14690 = vrcp.f32 %v9499_v29  ;;  %v9556_v40 = vand.u32 2147483648, %v9499_v29  ;;  %v9554_v63 = vand.u32 2147483647, %v9499_v29 }
0x3527   :  { %v9518_v54 = vmul.f32 %v14685_v22, %v9517_v6  ;;  %vm9540_vm9 = vcmp.eq.f32.partialorder %v9539_v55, 8.507059e+37  ;;  %vm9550_vm10 = vweird.f32 %v9499_v29 }
0x3528   :  { %v9504_v37 = vadd.f32 %v14683_v25, %v9503_v27  ;;  %v9557_v47 = vor.u32 1.1754944e-38, %v9556_v40  ;;  %vm9555_vm12 = vcmp.eq.f32.partialorder %v9554_v63, 8.507059e+37 }
0x3529   :  { %v14689_v28 = vpop.eup %14688  ;;  %v9519_v31 = vadd.f32 %v14685_v22, %v9518_v54 }
0x352a   :  { %v9531_v19 = vmul.f32 %v14689_v28, %v9498_v51  ;;  %v9508_v56 = vsel %vm19512_vm15, %v14683_v25, %v9504_v37  ;;  %vm9536_vm4 = vweird.f32 %v14689_v28 }
0x352b   :  { %v9513_v33 = vsel %vm9510_vm2, %v9512_v1, %v9508_v56  ;;  %v9523_v41 = vsel %vm19518_vm3, %v14685_v22, %v9519_v31  ;;  %vm9537_vm7 = vmor %vm9535_vm6, %vm9536_vm4 }
0x352c   :  { %v14691_v30 = vpop.eup %14690  ;;  %v9532_v20 = vsub.f32 1.0, %v9531_v19  ;;  %v9560_v49 = vmul.f32 %v9513_v33, %v19482_v50  ;;  %v9528_v0 = vsel %vm9525_vm5, %v9527_v39, %v9523_v41 }
0x352d   :  { %v9546_v32 = vmul.f32 %v14691_v30, %v9499_v29  ;;  %vm9551_vm8 = vweird.f32 %v14691_v30  ;;  %v9561_v17 = vmul.f32 %v9528_v0, %v19484_v59 }
0x352e   :  { %v9533_v36 = vmul.f32 %v14689_v28, %v9532_v20  ;;  %vm9552_vm11 = vmor %vm9550_vm10, %vm9551_vm8  ;;  %v9564_v45 = vmul.f32 %v9560_v49, %v9465_v46 }
0x352f   :  { %v9547_v3 = vsub.f32 1.0, %v9546_v32  ;;  %v9565_v24 = vmul.f32 %v9561_v17, %v9479_v61 }
0x3530   :  { %v9534_v16 = vadd.f32 %v14689_v28, %v9533_v36 }
0x3531   :  { %v9548_v8 = vmul.f32 %v14691_v30, %v9547_v3 }
0x3532   :  { %v9538_v48 = vsel %vm9537_vm7, %v14689_v28, %v9534_v16 }
0x3533   :  { %v9543_v23 = vsel %vm9540_vm9, %v9542_v4, %v9538_v48  ;;  %v9549_v38 = vadd.f32 %v14691_v30, %v9548_v8 }
0x3534   :  { %v9562_v11 = vmul.f32 %v9543_v23, %v19500_v10 }
0x3535   :  { %v9553_v52 = vsel %vm9552_vm11, %v14691_v30, %v9549_v38 }
0x3536   :  { %v9558_v35 = vsel %vm9555_vm12, %v9557_v47, %v9553_v52  ;;  %v9566_v21 = vmul.f32 %v9562_v11, %v9467_v5 }
0x3537   :  { %v9563_v50 = vmul.f32 %v9558_v35, %v19502_v18 }
0x3538   :  { %v9568_v62 = vpack.c.bf16 %v9566_v21, %v9564_v45 }
0x3539   :  { %v9567_v60 = vmul.f32 %v9563_v50, %v9481_v13 }
0x353a   :  { %9707 = vmatmul.bf16.vlgmr.msrb.gmra.mxu0 %v9568_v62 }
0x353b   :  { %v9569_v15 = vpack.c.bf16 %v9567_v60, %v9565_v24 }
0x353d   :  { %9721 = vmatmul.bf16.vlgmr.msrb.gmra.mxu1 %v9569_v15 }
0x35b7   :  { %v9708_v10 = vpop.f32.mrf.mxu0 }
0x35ba   :  { %v9722_v25 = vpop.f32.mrf.mxu1 }
0x35bb   :  { %v9723_v51 = vadd.f32 %v9722_v25, %v9708_v10 }
0x35bd   :  { %v9727_v59 = vadd.f32 %v9723_v51, %v19244_v12 }
0x35bf   :  { %9729 = vst [vmem:[%s19546_s10] sm:$0xff] %v9727_v59  ;;  %v9710_v22 = vpop.f32.mrf.mxu0 }
0x35c2   :  { %v9724_v7 = vpop.f32.mrf.mxu1 }
0x35c3   :  { %v9725_v26 = vadd.f32 %v9724_v7, %v9710_v22 }
0x35c5   :  { %v9728_v18 = vadd.f32 %v9725_v26, %v19249_v53 }
0x35c7   :  { %9730 = vst [vmem:[%s19546_s10 + $0x8] sm:$0xff] %v9728_v18 }

</bundles_post_ra>
